<compile_context>
chip_gen: v5e
topology: v5e:2x2
jax: 0.10.0
libtpu: 0.0.40
codegen_flags: <defaults>
</compile_context>

<pallas_src>
import functools

import jax
import jax.numpy as jnp
from jax.experimental import pallas as pl
from jax.experimental.pallas import tpu as pltpu


# -----------------------------------------------------------------------------
# Fused LePE-attention kernel (one grid step = `block_b` full (H, W, C) images)
# -----------------------------------------------------------------------------

def _lepe_attn_kernel(qkv_ref, w_ref, b_ref, out_ref, *,
                      H, W, H_sp, W_sp, heads, scale, mm_dtype):
    """qkv_ref : (3, block_b, H, W, C)  q/k/v token images, channels last
       w_ref   : (9, C)                 depthwise 3x3 taps, w[ki*3+kj, c]
       b_ref   : (1, C)                 conv bias
       out_ref : (block_b, H, W, C)
    """
    f32 = jnp.float32
    BB = out_ref.shape[0]
    C = out_ref.shape[3]
    hd = C // heads
    nWh, nWw = H // H_sp, W // W_sp
    L = H_sp * W_sp

    q_img = qkv_ref[0].astype(f32)            # (BB, H, W, C)
    k_img = qkv_ref[1].astype(f32)
    v_img = qkv_ref[2].astype(f32)

    zrow = jnp.zeros((BB, 1, W_sp, C), f32)
    zcol = jnp.zeros((BB, H_sp + 2, 1, C), f32)
    bias = b_ref[0, :][None, None, None, :]

    rows = []
    for hb in range(nWh):                     # static: windows are thin strips
        cols = []
        for wb in range(nWw):
            hs, ws = hb * H_sp, wb * W_sp
            q_w = q_img[:, hs:hs + H_sp, ws:ws + W_sp, :]   # (BB, H_sp, W_sp, C)
            k_w = k_img[:, hs:hs + H_sp, ws:ws + W_sp, :]
            v_w = v_img[:, hs:hs + H_sp, ws:ws + W_sp, :]

            # ---- LePE: depthwise 3x3 conv, zero padded inside the window ----
            vpad = jnp.concatenate([zrow, v_w, zrow], axis=1)
            vpad = jnp.concatenate([zcol, vpad, zcol], axis=2)
            lepe = jnp.zeros((BB, H_sp, W_sp, C), f32)
            for di in range(3):
                for dj in range(3):
                    tap = w_ref[di * 3 + dj, :][None, None, None, :]
                    lepe = lepe + vpad[:, di:di + H_sp, dj:dj + W_sp, :] * tap
            lepe = lepe + bias

            # ---- per-window multi-head softmax attention over L tokens ----
            q_t = q_w.reshape(BB, L, C) * scale
            k_t = k_w.reshape(BB, L, C)
            v_t = v_w.reshape(BB, L, C)

            head_outs = []
            for h in range(heads):            # static lane slices per head
                c0 = h * hd
                qh = q_t[:, :, c0:c0 + hd].astype(mm_dtype)
                kh = k_t[:, :, c0:c0 + hd].astype(mm_dtype)
                vh = v_t[:, :, c0:c0 + hd]
                s = jnp.einsum("bld,bmd->blm", qh, kh,
                               preferred_element_type=f32)
                s = s - jnp.max(s, axis=-1, keepdims=True)
                p = jnp.exp(s)
                p = p * pl.reciprocal(jnp.sum(p, axis=-1, keepdims=True),
                                      approx=True)
                head_outs.append(
                    jnp.einsum("blm,bmd->bld", p.astype(mm_dtype),
                               vh.astype(mm_dtype),
                               preferred_element_type=f32))
            o_win = jnp.concatenate(head_outs, axis=-1)       # (BB, L, C) dense
            o_win = o_win.reshape(BB, H_sp, W_sp, C) + lepe
            cols.append(o_win)
        rows.append(cols[0] if nWw == 1 else jnp.concatenate(cols, axis=2))
    full = rows[0] if nWh == 1 else jnp.concatenate(rows, axis=1)
    out_ref[...] = full.astype(out_ref.dtype)                 # one dense store


# -----------------------------------------------------------------------------
# Wrapper
# -----------------------------------------------------------------------------

def lepe_attention_forward(qkv, conv_w, conv_b, *, resolution, idx,
                           split_size=7, num_heads=8, qk_scale=None,
                           block_b=None, mm_dtype=jnp.float32):
    """Pallas forward of LePEAttention.

    qkv    : (3, B, N, C) with N = resolution**2
    conv_w : (C, 1, 3, 3) depthwise conv weight (PyTorch layout)
    conv_b : (C,)         conv bias
    """
    three, B, N, C = qkv.shape
    assert three == 3
    H = W = resolution
    assert N == H * W, "token count must equal resolution**2 (square images)"
    assert C % num_heads == 0
    if idx == 0:
        H_sp, W_sp = H, split_size
    elif idx == 1:
        H_sp, W_sp = split_size, W
    else:
        raise ValueError("idx must be 0 or 1")
    assert H % H_sp == 0 and W % W_sp == 0
    hd = C // num_heads
    scale = qk_scale if qk_scale is not None else hd ** (-0.5)

    if block_b is None:                        # images per grid step; keep >= 4
        block_b = 1                            # steps so the DMA pipeline and
        for cand in range(min(B, 8), 0, -1):   # megacore sharding have work
            if B % cand == 0 and (B // cand) >= 4:
                block_b = cand
                break
    assert B % block_b == 0

    qkv_img = qkv.reshape(3, B, H, W, C)       # free reshape, channels stay last
    w9c = conv_w.reshape(C, 9).T               # (9, C): w9c[ki*3+kj, c]
    b1c = conv_b.reshape(1, C)

    kernel = functools.partial(
        _lepe_attn_kernel, H=H, W=W, H_sp=H_sp, W_sp=W_sp,
        heads=num_heads, scale=scale, mm_dtype=mm_dtype)

    out_img = pl.pallas_call(
        kernel,
        out_shape=jax.ShapeDtypeStruct((B, H, W, C), qkv.dtype),
        grid=(B // block_b,),
        in_specs=[
            pl.BlockSpec((3, block_b, H, W, C), lambda b: (0, b, 0, 0, 0)),
            pl.BlockSpec((9, C), lambda b: (0, 0)),   # resident across steps
            pl.BlockSpec((1, C), lambda b: (0, 0)),
        ],
        out_specs=pl.BlockSpec((block_b, H, W, C), lambda b: (b, 0, 0, 0)),
        compiler_params=pltpu.CompilerParams(
            dimension_semantics=("parallel",),        # shard steps across TCs
            vmem_limit_bytes=32 * 1024 * 1024,        # fits v5e/v6e/v7x budgets
        ),
    )(qkv_img, w9c, b1c)

    return out_img.reshape(B, N, C)


# -----------------------------------------------------------------------------
# Pure-XLA reference (mirrors the PyTorch module) for validation
# -----------------------------------------------------------------------------

def _lepe_attention_reference(qkv, conv_w, conv_b, *, resolution, idx,
                              split_size=7, num_heads=8, qk_scale=None):
    q, k, v = qkv[0], qkv[1], qkv[2]
    B, N, C = q.shape
    H = W = resolution
    if idx == 0:
        H_sp, W_sp = H, split_size
    else:
        H_sp, W_sp = split_size, W
    heads = num_heads
    hd = C // heads
    scale = qk_scale if qk_scale is not None else hd ** (-0.5)
    L = H_sp * W_sp
    nW = (H // H_sp) * (W // W_sp)

    def im2cswin(x):
        t = jnp.transpose(x, (0, 2, 1)).reshape(B, C, H, W)
        t = t.reshape(B, C, H // H_sp, H_sp, W // W_sp, W_sp)
        t = jnp.transpose(t, (0, 2, 4, 3, 5, 1)).reshape(B * nW, L, C)
        t = t.reshape(B * nW, L, heads, hd)
        return jnp.transpose(t, (0, 2, 1, 3))                  # (B', heads, L, hd)

    qw, kw = im2cswin(q), im2cswin(k)

    vimg = jnp.transpose(v, (0, 2, 1)).reshape(B, C, H, W)
    vimg = vimg.reshape(B, C, H // H_sp, H_sp, W // W_sp, W_sp)
    vwin = jnp.transpose(vimg, (0, 2, 4, 1, 3, 5)).reshape(B * nW, C, H_sp, W_sp)
    lepe = jax.lax.conv_general_dilated(
        vwin, conv_w, window_strides=(1, 1), padding="SAME",
        dimension_numbers=("NCHW", "OIHW", "NCHW"),
        feature_group_count=C) + conv_b[None, :, None, None]
    lepe = jnp.transpose(lepe.reshape(B * nW, heads, hd, L), (0, 1, 3, 2))
    vw = jnp.transpose(vwin.reshape(B * nW, heads, hd, L), (0, 1, 3, 2))

    attn = jnp.einsum("bhld,bhmd->bhlm", qw * scale, kw)
    attn = jax.nn.softmax(attn, axis=-1)
    x = jnp.einsum("bhlm,bhmd->bhld", attn, vw) + lepe
    x = jnp.transpose(x, (0, 2, 1, 3)).reshape(B * nW, L, C)
    img = x.reshape(B, H // H_sp, W // W_sp, H_sp, W_sp, C)
    img = jnp.transpose(img, (0, 1, 3, 2, 4, 5)).reshape(B, H * W, C)
    return img


# -----------------------------------------------------------------------------
# Main
# -----------------------------------------------------------------------------

if __name__ == "__main__":
    # Small config consistent with the module (SERT uses 8x8 window images).
    B = 4              # batch of window-images (num_windows * batch upstream)
    resolution = 8     # -> N = 64 tokens
    split_size = 2
    C = 128            # dim; keeps the channel/lane axis fully dense
    num_heads = 8      # head_dim = 16
    N = resolution * resolution

    key = jax.random.PRNGKey(0)
    k_qkv, k_w0, k_b0, k_w1, k_b1 = jax.random.split(key, 5)
    qkv = jax.random.normal(k_qkv, (3, B, N, C), jnp.float32)
    conv_w = {0: 0.05 * jax.random.normal(k_w0, (C, 1, 3, 3), jnp.float32),
              1: 0.05 * jax.random.normal(k_w1, (C, 1, 3, 3), jnp.float32)}
    conv_b = {0: 0.05 * jax.random.normal(k_b0, (C,), jnp.float32),
              1: 0.05 * jax.random.normal(k_b1, (C,), jnp.float32)}

    for idx in (0, 1):        # exercise both orientations of the module
        out = lepe_attention_forward(
            qkv, conv_w[idx], conv_b[idx], resolution=resolution, idx=idx,
            split_size=split_size, num_heads=num_heads)
        out = jax.block_until_ready(out)
        assert out.shape == (B, N, C)
        assert bool(jnp.all(jnp.isfinite(out)))

        ref = _lepe_attention_reference(
            qkv, conv_w[idx], conv_b[idx], resolution=resolution, idx=idx,
            split_size=split_size, num_heads=num_heads)
        assert bool(jnp.allclose(out, ref, atol=5e-2, rtol=5e-2)), (
            "mismatch", idx, float(jnp.max(jnp.abs(out - ref))))

    # bf16 MXU-operand variant (f32 accumulate / f32 softmax), recommended for
    # v6e / v7x; only sanity-checked since numerics are intentionally looser.
    out_bf16 = lepe_attention_forward(
        qkv, conv_w[0], conv_b[0], resolution=resolution, idx=0,
        split_size=split_size, num_heads=num_heads, mm_dtype=jnp.bfloat16)
    out_bf16 = jax.block_until_ready(out_bf16)
    assert out_bf16.shape == (B, N, C)
    assert bool(jnp.all(jnp.isfinite(out_bf16)))

    print("KERNEL_OK")
</pallas_src>

<mosaic_0001>
module attributes {stable_mosaic.version = 11 : i64} {
  func.func @_lepe_attn_kernel(%arg0: i32, %arg1: memref<3x1x8x8x128xf32, #tpu.memory_space<vmem>>, %arg2: memref<9x128xf32, #tpu.memory_space<vmem>>, %arg3: memref<1x128xf32, #tpu.memory_space<vmem>>, %arg4: memref<1x8x8x128xf32, #tpu.memory_space<vmem>>) attributes {dimension_semantics = [#tpu.dimension_semantics<parallel>], iteration_bounds = array<i64: 4>, scalar_prefetch = 0 : i64, scratch_operands = 0 : i64, tpu.core_type = #tpu.core_type<tc>, window_params = [{transform_indices = @transform_0, window_bounds = array<i64: 3, 1, 8, 8, 128>}, {pipeline_mode = #tpu.pipeline_mode<synchronous>, transform_indices = @transform_1, window_bounds = array<i64: 9, 128>}, {pipeline_mode = #tpu.pipeline_mode<synchronous>, transform_indices = @transform_2, window_bounds = array<i64: 1, 128>}, {transform_indices = @transform_3, window_bounds = array<i64: 1, 8, 8, 128>}]} {
    %c0 = arith.constant 0 : index
    %c0_0 = arith.constant 0 : index
    %c0_1 = arith.constant 0 : index
    %c0_2 = arith.constant 0 : index
    %c0_3 = arith.constant 0 : index
    %0 = vector.load %arg1[%c0, %c0_0, %c0_1, %c0_2, %c0_3] : memref<3x1x8x8x128xf32, #tpu.memory_space<vmem>>, vector<1x1x8x8x128xf32>
    %1 = vector.shape_cast %0 : vector<1x1x8x8x128xf32> to vector<1x8x8x128xf32>
    %c1 = arith.constant 1 : index
    %c0_4 = arith.constant 0 : index
    %c0_5 = arith.constant 0 : index
    %c0_6 = arith.constant 0 : index
    %c0_7 = arith.constant 0 : index
    %2 = vector.load %arg1[%c1, %c0_4, %c0_5, %c0_6, %c0_7] : memref<3x1x8x8x128xf32, #tpu.memory_space<vmem>>, vector<1x1x8x8x128xf32>
    %3 = vector.shape_cast %2 : vector<1x1x8x8x128xf32> to vector<1x8x8x128xf32>
    %c2 = arith.constant 2 : index
    %c0_8 = arith.constant 0 : index
    %c0_9 = arith.constant 0 : index
    %c0_10 = arith.constant 0 : index
    %c0_11 = arith.constant 0 : index
    %4 = vector.load %arg1[%c2, %c0_8, %c0_9, %c0_10, %c0_11] : memref<3x1x8x8x128xf32, #tpu.memory_space<vmem>>, vector<1x1x8x8x128xf32>
    %5 = vector.shape_cast %4 : vector<1x1x8x8x128xf32> to vector<1x8x8x128xf32>
    %cst = arith.constant 0.000000e+00 : f32
    %6 = vector.broadcast %cst : f32 to vector<1x1x2x128xf32>
    %cst_12 = arith.constant 0.000000e+00 : f32
    %7 = vector.broadcast %cst_12 : f32 to vector<1x10x1x128xf32>
    %c0_13 = arith.constant 0 : index
    %c0_14 = arith.constant 0 : index
    %8 = vector.load %arg3[%c0_13, %c0_14] : memref<1x128xf32, #tpu.memory_space<vmem>>, vector<1x128xf32>
    %9 = vector.shape_cast %8 : vector<1x128xf32> to vector<128xf32>
    %10 = vector.shape_cast %9 : vector<128xf32> to vector<1x1x1x128xf32>
    %11 = vector.extract_strided_slice %1 {offsets = [0, 0, 0, 0], sizes = [1, 8, 2, 128], strides = [1, 1, 1, 1]} : vector<1x8x8x128xf32> to vector<1x8x2x128xf32>
    %12 = vector.extract_strided_slice %3 {offsets = [0, 0, 0, 0], sizes = [1, 8, 2, 128], strides = [1, 1, 1, 1]} : vector<1x8x8x128xf32> to vector<1x8x2x128xf32>
    %13 = vector.extract_strided_slice %5 {offsets = [0, 0, 0, 0], sizes = [1, 8, 2, 128], strides = [1, 1, 1, 1]} : vector<1x8x8x128xf32> to vector<1x8x2x128xf32>
    %14 = tpu.concatenate %6, %13, %6 in 1 : vector<1x1x2x128xf32>, vector<1x8x2x128xf32>, vector<1x1x2x128xf32> -> vector<1x10x2x128xf32>
    %15 = tpu.concatenate %7, %14, %7 in 2 : vector<1x10x1x128xf32>, vector<1x10x2x128xf32>, vector<1x10x1x128xf32> -> vector<1x10x4x128xf32>
    %cst_15 = arith.constant 0.000000e+00 : f32
    %16 = vector.broadcast %cst_15 : f32 to vector<1x8x2x128xf32>
    %c0_16 = arith.constant 0 : index
    %c0_17 = arith.constant 0 : index
    %17 = vector.load %arg2[%c0_16, %c0_17] : memref<9x128xf32, #tpu.memory_space<vmem>>, vector<1x128xf32>
    %18 = vector.shape_cast %17 : vector<1x128xf32> to vector<128xf32>
    %19 = vector.shape_cast %18 : vector<128xf32> to vector<1x1x1x128xf32>
    %20 = vector.extract_strided_slice %15 {offsets = [0, 0, 0, 0], sizes = [1, 8, 2, 128], strides = [1, 1, 1, 1]} : vector<1x10x4x128xf32> to vector<1x8x2x128xf32>
    %21 = vector.broadcast %19 : vector<1x1x1x128xf32> to vector<1x8x2x128xf32>
    %22 = arith.mulf %20, %21 : vector<1x8x2x128xf32>
    %23 = arith.addf %16, %22 : vector<1x8x2x128xf32>
    %c1_18 = arith.constant 1 : index
    %c0_19 = arith.constant 0 : index
    %24 = vector.load %arg2[%c1_18, %c0_19] : memref<9x128xf32, #tpu.memory_space<vmem>>, vector<1x128xf32>
    %25 = vector.shape_cast %24 : vector<1x128xf32> to vector<128xf32>
    %26 = vector.shape_cast %25 : vector<128xf32> to vector<1x1x1x128xf32>
    %27 = vector.extract_strided_slice %15 {offsets = [0, 0, 1, 0], sizes = [1, 8, 2, 128], strides = [1, 1, 1, 1]} : vector<1x10x4x128xf32> to vector<1x8x2x128xf32>
    %28 = vector.broadcast %26 : vector<1x1x1x128xf32> to vector<1x8x2x128xf32>
    %29 = arith.mulf %27, %28 : vector<1x8x2x128xf32>
    %30 = arith.addf %23, %29 : vector<1x8x2x128xf32>
    %c2_20 = arith.constant 2 : index
    %c0_21 = arith.constant 0 : index
    %31 = vector.load %arg2[%c2_20, %c0_21] : memref<9x128xf32, #tpu.memory_space<vmem>>, vector<1x128xf32>
    %32 = vector.shape_cast %31 : vector<1x128xf32> to vector<128xf32>
    %33 = vector.shape_cast %32 : vector<128xf32> to vector<1x1x1x128xf32>
    %34 = vector.extract_strided_slice %15 {offsets = [0, 0, 2, 0], sizes = [1, 8, 2, 128], strides = [1, 1, 1, 1]} : vector<1x10x4x128xf32> to vector<1x8x2x128xf32>
    %35 = vector.broadcast %33 : vector<1x1x1x128xf32> to vector<1x8x2x128xf32>
    %36 = arith.mulf %34, %35 : vector<1x8x2x128xf32>
    %37 = arith.addf %30, %36 : vector<1x8x2x128xf32>
    %c3 = arith.constant 3 : index
    %c0_22 = arith.constant 0 : index
    %38 = vector.load %arg2[%c3, %c0_22] : memref<9x128xf32, #tpu.memory_space<vmem>>, vector<1x128xf32>
    %39 = vector.shape_cast %38 : vector<1x128xf32> to vector<128xf32>
    %40 = vector.shape_cast %39 : vector<128xf32> to vector<1x1x1x128xf32>
    %41 = vector.extract_strided_slice %15 {offsets = [0, 1, 0, 0], sizes = [1, 8, 2, 128], strides = [1, 1, 1, 1]} : vector<1x10x4x128xf32> to vector<1x8x2x128xf32>
    %42 = vector.broadcast %40 : vector<1x1x1x128xf32> to vector<1x8x2x128xf32>
    %43 = arith.mulf %41, %42 : vector<1x8x2x128xf32>
    %44 = arith.addf %37, %43 : vector<1x8x2x128xf32>
    %c4 = arith.constant 4 : index
    %c0_23 = arith.constant 0 : index
    %45 = vector.load %arg2[%c4, %c0_23] : memref<9x128xf32, #tpu.memory_space<vmem>>, vector<1x128xf32>
    %46 = vector.shape_cast %45 : vector<1x128xf32> to vector<128xf32>
    %47 = vector.shape_cast %46 : vector<128xf32> to vector<1x1x1x128xf32>
    %48 = vector.extract_strided_slice %15 {offsets = [0, 1, 1, 0], sizes = [1, 8, 2, 128], strides = [1, 1, 1, 1]} : vector<1x10x4x128xf32> to vector<1x8x2x128xf32>
    %49 = vector.broadcast %47 : vector<1x1x1x128xf32> to vector<1x8x2x128xf32>
    %50 = arith.mulf %48, %49 : vector<1x8x2x128xf32>
    %51 = arith.addf %44, %50 : vector<1x8x2x128xf32>
    %c5 = arith.constant 5 : index
    %c0_24 = arith.constant 0 : index
    %52 = vector.load %arg2[%c5, %c0_24] : memref<9x128xf32, #tpu.memory_space<vmem>>, vector<1x128xf32>
    %53 = vector.shape_cast %52 : vector<1x128xf32> to vector<128xf32>
    %54 = vector.shape_cast %53 : vector<128xf32> to vector<1x1x1x128xf32>
    %55 = vector.extract_strided_slice %15 {offsets = [0, 1, 2, 0], sizes = [1, 8, 2, 128], strides = [1, 1, 1, 1]} : vector<1x10x4x128xf32> to vector<1x8x2x128xf32>
    %56 = vector.broadcast %54 : vector<1x1x1x128xf32> to vector<1x8x2x128xf32>
    %57 = arith.mulf %55, %56 : vector<1x8x2x128xf32>
    %58 = arith.addf %51, %57 : vector<1x8x2x128xf32>
    %c6 = arith.constant 6 : index
    %c0_25 = arith.constant 0 : index
    %59 = vector.load %arg2[%c6, %c0_25] : memref<9x128xf32, #tpu.memory_space<vmem>>, vector<1x128xf32>
    %60 = vector.shape_cast %59 : vector<1x128xf32> to vector<128xf32>
    %61 = vector.shape_cast %60 : vector<128xf32> to vector<1x1x1x128xf32>
    %62 = vector.extract_strided_slice %15 {offsets = [0, 2, 0, 0], sizes = [1, 8, 2, 128], strides = [1, 1, 1, 1]} : vector<1x10x4x128xf32> to vector<1x8x2x128xf32>
    %63 = vector.broadcast %61 : vector<1x1x1x128xf32> to vector<1x8x2x128xf32>
    %64 = arith.mulf %62, %63 : vector<1x8x2x128xf32>
    %65 = arith.addf %58, %64 : vector<1x8x2x128xf32>
    %c7 = arith.constant 7 : index
    %c0_26 = arith.constant 0 : index
    %66 = vector.load %arg2[%c7, %c0_26] : memref<9x128xf32, #tpu.memory_space<vmem>>, vector<1x128xf32>
    %67 = vector.shape_cast %66 : vector<1x128xf32> to vector<128xf32>
    %68 = vector.shape_cast %67 : vector<128xf32> to vector<1x1x1x128xf32>
    %69 = vector.extract_strided_slice %15 {offsets = [0, 2, 1, 0], sizes = [1, 8, 2, 128], strides = [1, 1, 1, 1]} : vector<1x10x4x128xf32> to vector<1x8x2x128xf32>
    %70 = vector.broadcast %68 : vector<1x1x1x128xf32> to vector<1x8x2x128xf32>
    %71 = arith.mulf %69, %70 : vector<1x8x2x128xf32>
    %72 = arith.addf %65, %71 : vector<1x8x2x128xf32>
    %c8 = arith.constant 8 : index
    %c0_27 = arith.constant 0 : index
    %73 = vector.load %arg2[%c8, %c0_27] : memref<9x128xf32, #tpu.memory_space<vmem>>, vector<1x128xf32>
    %74 = vector.shape_cast %73 : vector<1x128xf32> to vector<128xf32>
    %75 = vector.shape_cast %74 : vector<128xf32> to vector<1x1x1x128xf32>
    %76 = vector.extract_strided_slice %15 {offsets = [0, 2, 2, 0], sizes = [1, 8, 2, 128], strides = [1, 1, 1, 1]} : vector<1x10x4x128xf32> to vector<1x8x2x128xf32>
    %77 = vector.broadcast %75 : vector<1x1x1x128xf32> to vector<1x8x2x128xf32>
    %78 = arith.mulf %76, %77 : vector<1x8x2x128xf32>
    %79 = arith.addf %72, %78 : vector<1x8x2x128xf32>
    %80 = vector.broadcast %10 : vector<1x1x1x128xf32> to vector<1x8x2x128xf32>
    %81 = arith.addf %79, %80 : vector<1x8x2x128xf32>
    %82 = vector.shape_cast %11 : vector<1x8x2x128xf32> to vector<1x16x128xf32>
    %cst_28 = arith.constant 2.500000e-01 : f32
    %83 = vector.broadcast %cst_28 : f32 to vector<1x16x128xf32>
    %84 = arith.mulf %82, %83 : vector<1x16x128xf32>
    %85 = vector.shape_cast %12 : vector<1x8x2x128xf32> to vector<1x16x128xf32>
    %86 = vector.shape_cast %13 : vector<1x8x2x128xf32> to vector<1x16x128xf32>
    %87 = vector.extract_strided_slice %84 {offsets = [0, 0, 0], sizes = [1, 16, 16], strides = [1, 1, 1]} : vector<1x16x128xf32> to vector<1x16x16xf32>
    %88 = vector.extract_strided_slice %85 {offsets = [0, 0, 0], sizes = [1, 16, 16], strides = [1, 1, 1]} : vector<1x16x128xf32> to vector<1x16x16xf32>
    %89 = vector.extract_strided_slice %86 {offsets = [0, 0, 0], sizes = [1, 16, 16], strides = [1, 1, 1]} : vector<1x16x128xf32> to vector<1x16x16xf32>
    "tpu.trace_start"() <{level = 10 : i32, message = "bld,bmd->blm"}> : () -> ()
    %cst_29 = arith.constant dense<0.000000e+00> : vector<1x16x16xf32>
    %90 = tpu.matmul %87, %88, %cst_29 {dimension_numbers = #tpu.dot_dimension_numbers<[2], [2], [1], [1], [0, 0, 0, 1, 1, 1], [0], [0]>} : vector<1x16x16xf32>, vector<1x16x16xf32>, vector<1x16x16xf32> -> vector<1x16x16xf32>
    "tpu.trace_stop"() : () -> ()
    %cst_30 = arith.constant dense<0xFF800000> : vector<1x16xf32>
    %91 = vector.multi_reduction <maximumf>, %90, %cst_30 [2] : vector<1x16x16xf32> to vector<1x16xf32>
    %92 = vector.shape_cast %91 : vector<1x16xf32> to vector<1x16x1xf32>
    %93 = vector.broadcast %92 : vector<1x16x1xf32> to vector<1x16x16xf32>
    %94 = arith.subf %90, %93 : vector<1x16x16xf32>
    %95 = math.exp %94 : vector<1x16x16xf32>
    %cst_31 = arith.constant dense<0.000000e+00> : vector<1x16xf32>
    %96 = vector.multi_reduction <add>, %95, %cst_31 [2] : vector<1x16x16xf32> to vector<1x16xf32>
    %97 = vector.shape_cast %96 : vector<1x16xf32> to vector<1x16x1xf32>
    %98 = tpu.reciprocal %97 {approx = true} : vector<1x16x1xf32> -> vector<1x16x1xf32>
    %99 = vector.broadcast %98 : vector<1x16x1xf32> to vector<1x16x16xf32>
    %100 = arith.mulf %95, %99 : vector<1x16x16xf32>
    "tpu.trace_start"() <{level = 10 : i32, message = "blm,bmd->bld"}> : () -> ()
    %cst_32 = arith.constant dense<0.000000e+00> : vector<1x16x16xf32>
    %101 = tpu.matmul %100, %89, %cst_32 {dimension_numbers = #tpu.dot_dimension_numbers<[2], [1], [1], [2], [0, 0, 0, 1, 1, 2], [0], [0]>} : vector<1x16x16xf32>, vector<1x16x16xf32>, vector<1x16x16xf32> -> vector<1x16x16xf32>
    "tpu.trace_stop"() : () -> ()
    %102 = vector.extract_strided_slice %84 {offsets = [0, 0, 16], sizes = [1, 16, 16], strides = [1, 1, 1]} : vector<1x16x128xf32> to vector<1x16x16xf32>
    %103 = vector.extract_strided_slice %85 {offsets = [0, 0, 16], sizes = [1, 16, 16], strides = [1, 1, 1]} : vector<1x16x128xf32> to vector<1x16x16xf32>
    %104 = vector.extract_strided_slice %86 {offsets = [0, 0, 16], sizes = [1, 16, 16], strides = [1, 1, 1]} : vector<1x16x128xf32> to vector<1x16x16xf32>
    "tpu.trace_start"() <{level = 10 : i32, message = "bld,bmd->blm"}> : () -> ()
    %cst_33 = arith.constant dense<0.000000e+00> : vector<1x16x16xf32>
    %105 = tpu.matmul %102, %103, %cst_33 {dimension_numbers = #tpu.dot_dimension_numbers<[2], [2], [1], [1], [0, 0, 0, 1, 1, 1], [0], [0]>} : vector<1x16x16xf32>, vector<1x16x16xf32>, vector<1x16x16xf32> -> vector<1x16x16xf32>
    "tpu.trace_stop"() : () -> ()
    %cst_34 = arith.constant dense<0xFF800000> : vector<1x16xf32>
    %106 = vector.multi_reduction <maximumf>, %105, %cst_34 [2] : vector<1x16x16xf32> to vector<1x16xf32>
    %107 = vector.shape_cast %106 : vector<1x16xf32> to vector<1x16x1xf32>
    %108 = vector.broadcast %107 : vector<1x16x1xf32> to vector<1x16x16xf32>
    %109 = arith.subf %105, %108 : vector<1x16x16xf32>
    %110 = math.exp %109 : vector<1x16x16xf32>
    %cst_35 = arith.constant dense<0.000000e+00> : vector<1x16xf32>
    %111 = vector.multi_reduction <add>, %110, %cst_35 [2] : vector<1x16x16xf32> to vector<1x16xf32>
    %112 = vector.shape_cast %111 : vector<1x16xf32> to vector<1x16x1xf32>
    %113 = tpu.reciprocal %112 {approx = true} : vector<1x16x1xf32> -> vector<1x16x1xf32>
    %114 = vector.broadcast %113 : vector<1x16x1xf32> to vector<1x16x16xf32>
    %115 = arith.mulf %110, %114 : vector<1x16x16xf32>
    "tpu.trace_start"() <{level = 10 : i32, message = "blm,bmd->bld"}> : () -> ()
    %cst_36 = arith.constant dense<0.000000e+00> : vector<1x16x16xf32>
    %116 = tpu.matmul %115, %104, %cst_36 {dimension_numbers = #tpu.dot_dimension_numbers<[2], [1], [1], [2], [0, 0, 0, 1, 1, 2], [0], [0]>} : vector<1x16x16xf32>, vector<1x16x16xf32>, vector<1x16x16xf32> -> vector<1x16x16xf32>
    "tpu.trace_stop"() : () -> ()
    %117 = vector.extract_strided_slice %84 {offsets = [0, 0, 32], sizes = [1, 16, 16], strides = [1, 1, 1]} : vector<1x16x128xf32> to vector<1x16x16xf32>
    %118 = vector.extract_strided_slice %85 {offsets = [0, 0, 32], sizes = [1, 16, 16], strides = [1, 1, 1]} : vector<1x16x128xf32> to vector<1x16x16xf32>
    %119 = vector.extract_strided_slice %86 {offsets = [0, 0, 32], sizes = [1, 16, 16], strides = [1, 1, 1]} : vector<1x16x128xf32> to vector<1x16x16xf32>
    "tpu.trace_start"() <{level = 10 : i32, message = "bld,bmd->blm"}> : () -> ()
    %cst_37 = arith.constant dense<0.000000e+00> : vector<1x16x16xf32>
    %120 = tpu.matmul %117, %118, %cst_37 {dimension_numbers = #tpu.dot_dimension_numbers<[2], [2], [1], [1], [0, 0, 0, 1, 1, 1], [0], [0]>} : vector<1x16x16xf32>, vector<1x16x16xf32>, vector<1x16x16xf32> -> vector<1x16x16xf32>
    "tpu.trace_stop"() : () -> ()
    %cst_38 = arith.constant dense<0xFF800000> : vector<1x16xf32>
    %121 = vector.multi_reduction <maximumf>, %120, %cst_38 [2] : vector<1x16x16xf32> to vector<1x16xf32>
    %122 = vector.shape_cast %121 : vector<1x16xf32> to vector<1x16x1xf32>
    %123 = vector.broadcast %122 : vector<1x16x1xf32> to vector<1x16x16xf32>
    %124 = arith.subf %120, %123 : vector<1x16x16xf32>
    %125 = math.exp %124 : vector<1x16x16xf32>
    %cst_39 = arith.constant dense<0.000000e+00> : vector<1x16xf32>
    %126 = vector.multi_reduction <add>, %125, %cst_39 [2] : vector<1x16x16xf32> to vector<1x16xf32>
    %127 = vector.shape_cast %126 : vector<1x16xf32> to vector<1x16x1xf32>
    %128 = tpu.reciprocal %127 {approx = true} : vector<1x16x1xf32> -> vector<1x16x1xf32>
    %129 = vector.broadcast %128 : vector<1x16x1xf32> to vector<1x16x16xf32>
    %130 = arith.mulf %125, %129 : vector<1x16x16xf32>
    "tpu.trace_start"() <{level = 10 : i32, message = "blm,bmd->bld"}> : () -> ()
    %cst_40 = arith.constant dense<0.000000e+00> : vector<1x16x16xf32>
    %131 = tpu.matmul %130, %119, %cst_40 {dimension_numbers = #tpu.dot_dimension_numbers<[2], [1], [1], [2], [0, 0, 0, 1, 1, 2], [0], [0]>} : vector<1x16x16xf32>, vector<1x16x16xf32>, vector<1x16x16xf32> -> vector<1x16x16xf32>
    "tpu.trace_stop"() : () -> ()
    %132 = vector.extract_strided_slice %84 {offsets = [0, 0, 48], sizes = [1, 16, 16], strides = [1, 1, 1]} : vector<1x16x128xf32> to vector<1x16x16xf32>
    %133 = vector.extract_strided_slice %85 {offsets = [0, 0, 48], sizes = [1, 16, 16], strides = [1, 1, 1]} : vector<1x16x128xf32> to vector<1x16x16xf32>
    %134 = vector.extract_strided_slice %86 {offsets = [0, 0, 48], sizes = [1, 16, 16], strides = [1, 1, 1]} : vector<1x16x128xf32> to vector<1x16x16xf32>
    "tpu.trace_start"() <{level = 10 : i32, message = "bld,bmd->blm"}> : () -> ()
    %cst_41 = arith.constant dense<0.000000e+00> : vector<1x16x16xf32>
    %135 = tpu.matmul %132, %133, %cst_41 {dimension_numbers = #tpu.dot_dimension_numbers<[2], [2], [1], [1], [0, 0, 0, 1, 1, 1], [0], [0]>} : vector<1x16x16xf32>, vector<1x16x16xf32>, vector<1x16x16xf32> -> vector<1x16x16xf32>
    "tpu.trace_stop"() : () -> ()
    %cst_42 = arith.constant dense<0xFF800000> : vector<1x16xf32>
    %136 = vector.multi_reduction <maximumf>, %135, %cst_42 [2] : vector<1x16x16xf32> to vector<1x16xf32>
    %137 = vector.shape_cast %136 : vector<1x16xf32> to vector<1x16x1xf32>
    %138 = vector.broadcast %137 : vector<1x16x1xf32> to vector<1x16x16xf32>
    %139 = arith.subf %135, %138 : vector<1x16x16xf32>
    %140 = math.exp %139 : vector<1x16x16xf32>
    %cst_43 = arith.constant dense<0.000000e+00> : vector<1x16xf32>
    %141 = vector.multi_reduction <add>, %140, %cst_43 [2] : vector<1x16x16xf32> to vector<1x16xf32>
    %142 = vector.shape_cast %141 : vector<1x16xf32> to vector<1x16x1xf32>
    %143 = tpu.reciprocal %142 {approx = true} : vector<1x16x1xf32> -> vector<1x16x1xf32>
    %144 = vector.broadcast %143 : vector<1x16x1xf32> to vector<1x16x16xf32>
    %145 = arith.mulf %140, %144 : vector<1x16x16xf32>
    "tpu.trace_start"() <{level = 10 : i32, message = "blm,bmd->bld"}> : () -> ()
    %cst_44 = arith.constant dense<0.000000e+00> : vector<1x16x16xf32>
    %146 = tpu.matmul %145, %134, %cst_44 {dimension_numbers = #tpu.dot_dimension_numbers<[2], [1], [1], [2], [0, 0, 0, 1, 1, 2], [0], [0]>} : vector<1x16x16xf32>, vector<1x16x16xf32>, vector<1x16x16xf32> -> vector<1x16x16xf32>
    "tpu.trace_stop"() : () -> ()
    %147 = vector.extract_strided_slice %84 {offsets = [0, 0, 64], sizes = [1, 16, 16], strides = [1, 1, 1]} : vector<1x16x128xf32> to vector<1x16x16xf32>
    %148 = vector.extract_strided_slice %85 {offsets = [0, 0, 64], sizes = [1, 16, 16], strides = [1, 1, 1]} : vector<1x16x128xf32> to vector<1x16x16xf32>
    %149 = vector.extract_strided_slice %86 {offsets = [0, 0, 64], sizes = [1, 16, 16], strides = [1, 1, 1]} : vector<1x16x128xf32> to vector<1x16x16xf32>
    "tpu.trace_start"() <{level = 10 : i32, message = "bld,bmd->blm"}> : () -> ()
    %cst_45 = arith.constant dense<0.000000e+00> : vector<1x16x16xf32>
    %150 = tpu.matmul %147, %148, %cst_45 {dimension_numbers = #tpu.dot_dimension_numbers<[2], [2], [1], [1], [0, 0, 0, 1, 1, 1], [0], [0]>} : vector<1x16x16xf32>, vector<1x16x16xf32>, vector<1x16x16xf32> -> vector<1x16x16xf32>
    "tpu.trace_stop"() : () -> ()
    %cst_46 = arith.constant dense<0xFF800000> : vector<1x16xf32>
    %151 = vector.multi_reduction <maximumf>, %150, %cst_46 [2] : vector<1x16x16xf32> to vector<1x16xf32>
    %152 = vector.shape_cast %151 : vector<1x16xf32> to vector<1x16x1xf32>
    %153 = vector.broadcast %152 : vector<1x16x1xf32> to vector<1x16x16xf32>
    %154 = arith.subf %150, %153 : vector<1x16x16xf32>
    %155 = math.exp %154 : vector<1x16x16xf32>
    %cst_47 = arith.constant dense<0.000000e+00> : vector<1x16xf32>
    %156 = vector.multi_reduction <add>, %155, %cst_47 [2] : vector<1x16x16xf32> to vector<1x16xf32>
    %157 = vector.shape_cast %156 : vector<1x16xf32> to vector<1x16x1xf32>
    %158 = tpu.reciprocal %157 {approx = true} : vector<1x16x1xf32> -> vector<1x16x1xf32>
    %159 = vector.broadcast %158 : vector<1x16x1xf32> to vector<1x16x16xf32>
    %160 = arith.mulf %155, %159 : vector<1x16x16xf32>
    "tpu.trace_start"() <{level = 10 : i32, message = "blm,bmd->bld"}> : () -> ()
    %cst_48 = arith.constant dense<0.000000e+00> : vector<1x16x16xf32>
    %161 = tpu.matmul %160, %149, %cst_48 {dimension_numbers = #tpu.dot_dimension_numbers<[2], [1], [1], [2], [0, 0, 0, 1, 1, 2], [0], [0]>} : vector<1x16x16xf32>, vector<1x16x16xf32>, vector<1x16x16xf32> -> vector<1x16x16xf32>
    "tpu.trace_stop"() : () -> ()
    %162 = vector.extract_strided_slice %84 {offsets = [0, 0, 80], sizes = [1, 16, 16], strides = [1, 1, 1]} : vector<1x16x128xf32> to vector<1x16x16xf32>
    %163 = vector.extract_strided_slice %85 {offsets = [0, 0, 80], sizes = [1, 16, 16], strides = [1, 1, 1]} : vector<1x16x128xf32> to vector<1x16x16xf32>
    %164 = vector.extract_strided_slice %86 {offsets = [0, 0, 80], sizes = [1, 16, 16], strides = [1, 1, 1]} : vector<1x16x128xf32> to vector<1x16x16xf32>
    "tpu.trace_start"() <{level = 10 : i32, message = "bld,bmd->blm"}> : () -> ()
    %cst_49 = arith.constant dense<0.000000e+00> : vector<1x16x16xf32>
    %165 = tpu.matmul %162, %163, %cst_49 {dimension_numbers = #tpu.dot_dimension_numbers<[2], [2], [1], [1], [0, 0, 0, 1, 1, 1], [0], [0]>} : vector<1x16x16xf32>, vector<1x16x16xf32>, vector<1x16x16xf32> -> vector<1x16x16xf32>
    "tpu.trace_stop"() : () -> ()
    %cst_50 = arith.constant dense<0xFF800000> : vector<1x16xf32>
    %166 = vector.multi_reduction <maximumf>, %165, %cst_50 [2] : vector<1x16x16xf32> to vector<1x16xf32>
    %167 = vector.shape_cast %166 : vector<1x16xf32> to vector<1x16x1xf32>
    %168 = vector.broadcast %167 : vector<1x16x1xf32> to vector<1x16x16xf32>
    %169 = arith.subf %165, %168 : vector<1x16x16xf32>
    %170 = math.exp %169 : vector<1x16x16xf32>
    %cst_51 = arith.constant dense<0.000000e+00> : vector<1x16xf32>
    %171 = vector.multi_reduction <add>, %170, %cst_51 [2] : vector<1x16x16xf32> to vector<1x16xf32>
    %172 = vector.shape_cast %171 : vector<1x16xf32> to vector<1x16x1xf32>
    %173 = tpu.reciprocal %172 {approx = true} : vector<1x16x1xf32> -> vector<1x16x1xf32>
    %174 = vector.broadcast %173 : vector<1x16x1xf32> to vector<1x16x16xf32>
    %175 = arith.mulf %170, %174 : vector<1x16x16xf32>
    "tpu.trace_start"() <{level = 10 : i32, message = "blm,bmd->bld"}> : () -> ()
    %cst_52 = arith.constant dense<0.000000e+00> : vector<1x16x16xf32>
    %176 = tpu.matmul %175, %164, %cst_52 {dimension_numbers = #tpu.dot_dimension_numbers<[2], [1], [1], [2], [0, 0, 0, 1, 1, 2], [0], [0]>} : vector<1x16x16xf32>, vector<1x16x16xf32>, vector<1x16x16xf32> -> vector<1x16x16xf32>
    "tpu.trace_stop"() : () -> ()
    %177 = vector.extract_strided_slice %84 {offsets = [0, 0, 96], sizes = [1, 16, 16], strides = [1, 1, 1]} : vector<1x16x128xf32> to vector<1x16x16xf32>
    %178 = vector.extract_strided_slice %85 {offsets = [0, 0, 96], sizes = [1, 16, 16], strides = [1, 1, 1]} : vector<1x16x128xf32> to vector<1x16x16xf32>
    %179 = vector.extract_strided_slice %86 {offsets = [0, 0, 96], sizes = [1, 16, 16], strides = [1, 1, 1]} : vector<1x16x128xf32> to vector<1x16x16xf32>
    "tpu.trace_start"() <{level = 10 : i32, message = "bld,bmd->blm"}> : () -> ()
    %cst_53 = arith.constant dense<0.000000e+00> : vector<1x16x16xf32>
    %180 = tpu.matmul %177, %178, %cst_53 {dimension_numbers = #tpu.dot_dimension_numbers<[2], [2], [1], [1], [0, 0, 0, 1, 1, 1], [0], [0]>} : vector<1x16x16xf32>, vector<1x16x16xf32>, vector<1x16x16xf32> -> vector<1x16x16xf32>
    "tpu.trace_stop"() : () -> ()
    %cst_54 = arith.constant dense<0xFF800000> : vector<1x16xf32>
    %181 = vector.multi_reduction <maximumf>, %180, %cst_54 [2] : vector<1x16x16xf32> to vector<1x16xf32>
    %182 = vector.shape_cast %181 : vector<1x16xf32> to vector<1x16x1xf32>
    %183 = vector.broadcast %182 : vector<1x16x1xf32> to vector<1x16x16xf32>
    %184 = arith.subf %180, %183 : vector<1x16x16xf32>
    %185 = math.exp %184 : vector<1x16x16xf32>
    %cst_55 = arith.constant dense<0.000000e+00> : vector<1x16xf32>
    %186 = vector.multi_reduction <add>, %185, %cst_55 [2] : vector<1x16x16xf32> to vector<1x16xf32>
    %187 = vector.shape_cast %186 : vector<1x16xf32> to vector<1x16x1xf32>
    %188 = tpu.reciprocal %187 {approx = true} : vector<1x16x1xf32> -> vector<1x16x1xf32>
    %189 = vector.broadcast %188 : vector<1x16x1xf32> to vector<1x16x16xf32>
    %190 = arith.mulf %185, %189 : vector<1x16x16xf32>
    "tpu.trace_start"() <{level = 10 : i32, message = "blm,bmd->bld"}> : () -> ()
    %cst_56 = arith.constant dense<0.000000e+00> : vector<1x16x16xf32>
    %191 = tpu.matmul %190, %179, %cst_56 {dimension_numbers = #tpu.dot_dimension_numbers<[2], [1], [1], [2], [0, 0, 0, 1, 1, 2], [0], [0]>} : vector<1x16x16xf32>, vector<1x16x16xf32>, vector<1x16x16xf32> -> vector<1x16x16xf32>
    "tpu.trace_stop"() : () -> ()
    %192 = vector.extract_strided_slice %84 {offsets = [0, 0, 112], sizes = [1, 16, 16], strides = [1, 1, 1]} : vector<1x16x128xf32> to vector<1x16x16xf32>
    %193 = vector.extract_strided_slice %85 {offsets = [0, 0, 112], sizes = [1, 16, 16], strides = [1, 1, 1]} : vector<1x16x128xf32> to vector<1x16x16xf32>
    %194 = vector.extract_strided_slice %86 {offsets = [0, 0, 112], sizes = [1, 16, 16], strides = [1, 1, 1]} : vector<1x16x128xf32> to vector<1x16x16xf32>
    "tpu.trace_start"() <{level = 10 : i32, message = "bld,bmd->blm"}> : () -> ()
    %cst_57 = arith.constant dense<0.000000e+00> : vector<1x16x16xf32>
    %195 = tpu.matmul %192, %193, %cst_57 {dimension_numbers = #tpu.dot_dimension_numbers<[2], [2], [1], [1], [0, 0, 0, 1, 1, 1], [0], [0]>} : vector<1x16x16xf32>, vector<1x16x16xf32>, vector<1x16x16xf32> -> vector<1x16x16xf32>
    "tpu.trace_stop"() : () -> ()
    %cst_58 = arith.constant dense<0xFF800000> : vector<1x16xf32>
    %196 = vector.multi_reduction <maximumf>, %195, %cst_58 [2] : vector<1x16x16xf32> to vector<1x16xf32>
    %197 = vector.shape_cast %196 : vector<1x16xf32> to vector<1x16x1xf32>
    %198 = vector.broadcast %197 : vector<1x16x1xf32> to vector<1x16x16xf32>
    %199 = arith.subf %195, %198 : vector<1x16x16xf32>
    %200 = math.exp %199 : vector<1x16x16xf32>
    %cst_59 = arith.constant dense<0.000000e+00> : vector<1x16xf32>
    %201 = vector.multi_reduction <add>, %200, %cst_59 [2] : vector<1x16x16xf32> to vector<1x16xf32>
    %202 = vector.shape_cast %201 : vector<1x16xf32> to vector<1x16x1xf32>
    %203 = tpu.reciprocal %202 {approx = true} : vector<1x16x1xf32> -> vector<1x16x1xf32>
    %204 = vector.broadcast %203 : vector<1x16x1xf32> to vector<1x16x16xf32>
    %205 = arith.mulf %200, %204 : vector<1x16x16xf32>
    "tpu.trace_start"() <{level = 10 : i32, message = "blm,bmd->bld"}> : () -> ()
    %cst_60 = arith.constant dense<0.000000e+00> : vector<1x16x16xf32>
    %206 = tpu.matmul %205, %194, %cst_60 {dimension_numbers = #tpu.dot_dimension_numbers<[2], [1], [1], [2], [0, 0, 0, 1, 1, 2], [0], [0]>} : vector<1x16x16xf32>, vector<1x16x16xf32>, vector<1x16x16xf32> -> vector<1x16x16xf32>
    "tpu.trace_stop"() : () -> ()
    %207 = tpu.concatenate %101, %116, %131, %146, %161, %176, %191, %206 in 2 : vector<1x16x16xf32>, vector<1x16x16xf32>, vector<1x16x16xf32>, vector<1x16x16xf32>, vector<1x16x16xf32>, vector<1x16x16xf32>, vector<1x16x16xf32>, vector<1x16x16xf32> -> vector<1x16x128xf32>
    %208 = vector.shape_cast %207 : vector<1x16x128xf32> to vector<1x8x2x128xf32>
    %209 = arith.addf %208, %81 : vector<1x8x2x128xf32>
    %210 = vector.extract_strided_slice %1 {offsets = [0, 0, 2, 0], sizes = [1, 8, 2, 128], strides = [1, 1, 1, 1]} : vector<1x8x8x128xf32> to vector<1x8x2x128xf32>
    %211 = vector.extract_strided_slice %3 {offsets = [0, 0, 2, 0], sizes = [1, 8, 2, 128], strides = [1, 1, 1, 1]} : vector<1x8x8x128xf32> to vector<1x8x2x128xf32>
    %212 = vector.extract_strided_slice %5 {offsets = [0, 0, 2, 0], sizes = [1, 8, 2, 128], strides = [1, 1, 1, 1]} : vector<1x8x8x128xf32> to vector<1x8x2x128xf32>
    %213 = tpu.concatenate %6, %212, %6 in 1 : vector<1x1x2x128xf32>, vector<1x8x2x128xf32>, vector<1x1x2x128xf32> -> vector<1x10x2x128xf32>
    %214 = tpu.concatenate %7, %213, %7 in 2 : vector<1x10x1x128xf32>, vector<1x10x2x128xf32>, vector<1x10x1x128xf32> -> vector<1x10x4x128xf32>
    %cst_61 = arith.constant 0.000000e+00 : f32
    %215 = vector.broadcast %cst_61 : f32 to vector<1x8x2x128xf32>
    %c0_62 = arith.constant 0 : index
    %c0_63 = arith.constant 0 : index
    %216 = vector.load %arg2[%c0_62, %c0_63] : memref<9x128xf32, #tpu.memory_space<vmem>>, vector<1x128xf32>
    %217 = vector.shape_cast %216 : vector<1x128xf32> to vector<128xf32>
    %218 = vector.shape_cast %217 : vector<128xf32> to vector<1x1x1x128xf32>
    %219 = vector.extract_strided_slice %214 {offsets = [0, 0, 0, 0], sizes = [1, 8, 2, 128], strides = [1, 1, 1, 1]} : vector<1x10x4x128xf32> to vector<1x8x2x128xf32>
    %220 = vector.broadcast %218 : vector<1x1x1x128xf32> to vector<1x8x2x128xf32>
    %221 = arith.mulf %219, %220 : vector<1x8x2x128xf32>
    %222 = arith.addf %215, %221 : vector<1x8x2x128xf32>
    %c1_64 = arith.constant 1 : index
    %c0_65 = arith.constant 0 : index
    %223 = vector.load %arg2[%c1_64, %c0_65] : memref<9x128xf32, #tpu.memory_space<vmem>>, vector<1x128xf32>
    %224 = vector.shape_cast %223 : vector<1x128xf32> to vector<128xf32>
    %225 = vector.shape_cast %224 : vector<128xf32> to vector<1x1x1x128xf32>
    %226 = vector.extract_strided_slice %214 {offsets = [0, 0, 1, 0], sizes = [1, 8, 2, 128], strides = [1, 1, 1, 1]} : vector<1x10x4x128xf32> to vector<1x8x2x128xf32>
    %227 = vector.broadcast %225 : vector<1x1x1x128xf32> to vector<1x8x2x128xf32>
    %228 = arith.mulf %226, %227 : vector<1x8x2x128xf32>
    %229 = arith.addf %222, %228 : vector<1x8x2x128xf32>
    %c2_66 = arith.constant 2 : index
    %c0_67 = arith.constant 0 : index
    %230 = vector.load %arg2[%c2_66, %c0_67] : memref<9x128xf32, #tpu.memory_space<vmem>>, vector<1x128xf32>
    %231 = vector.shape_cast %230 : vector<1x128xf32> to vector<128xf32>
    %232 = vector.shape_cast %231 : vector<128xf32> to vector<1x1x1x128xf32>
    %233 = vector.extract_strided_slice %214 {offsets = [0, 0, 2, 0], sizes = [1, 8, 2, 128], strides = [1, 1, 1, 1]} : vector<1x10x4x128xf32> to vector<1x8x2x128xf32>
    %234 = vector.broadcast %232 : vector<1x1x1x128xf32> to vector<1x8x2x128xf32>
    %235 = arith.mulf %233, %234 : vector<1x8x2x128xf32>
    %236 = arith.addf %229, %235 : vector<1x8x2x128xf32>
    %c3_68 = arith.constant 3 : index
    %c0_69 = arith.constant 0 : index
    %237 = vector.load %arg2[%c3_68, %c0_69] : memref<9x128xf32, #tpu.memory_space<vmem>>, vector<1x128xf32>
    %238 = vector.shape_cast %237 : vector<1x128xf32> to vector<128xf32>
    %239 = vector.shape_cast %238 : vector<128xf32> to vector<1x1x1x128xf32>
    %240 = vector.extract_strided_slice %214 {offsets = [0, 1, 0, 0], sizes = [1, 8, 2, 128], strides = [1, 1, 1, 1]} : vector<1x10x4x128xf32> to vector<1x8x2x128xf32>
    %241 = vector.broadcast %239 : vector<1x1x1x128xf32> to vector<1x8x2x128xf32>
    %242 = arith.mulf %240, %241 : vector<1x8x2x128xf32>
    %243 = arith.addf %236, %242 : vector<1x8x2x128xf32>
    %c4_70 = arith.constant 4 : index
    %c0_71 = arith.constant 0 : index
    %244 = vector.load %arg2[%c4_70, %c0_71] : memref<9x128xf32, #tpu.memory_space<vmem>>, vector<1x128xf32>
    %245 = vector.shape_cast %244 : vector<1x128xf32> to vector<128xf32>
    %246 = vector.shape_cast %245 : vector<128xf32> to vector<1x1x1x128xf32>
    %247 = vector.extract_strided_slice %214 {offsets = [0, 1, 1, 0], sizes = [1, 8, 2, 128], strides = [1, 1, 1, 1]} : vector<1x10x4x128xf32> to vector<1x8x2x128xf32>
    %248 = vector.broadcast %246 : vector<1x1x1x128xf32> to vector<1x8x2x128xf32>
    %249 = arith.mulf %247, %248 : vector<1x8x2x128xf32>
    %250 = arith.addf %243, %249 : vector<1x8x2x128xf32>
    %c5_72 = arith.constant 5 : index
    %c0_73 = arith.constant 0 : index
    %251 = vector.load %arg2[%c5_72, %c0_73] : memref<9x128xf32, #tpu.memory_space<vmem>>, vector<1x128xf32>
    %252 = vector.shape_cast %251 : vector<1x128xf32> to vector<128xf32>
    %253 = vector.shape_cast %252 : vector<128xf32> to vector<1x1x1x128xf32>
    %254 = vector.extract_strided_slice %214 {offsets = [0, 1, 2, 0], sizes = [1, 8, 2, 128], strides = [1, 1, 1, 1]} : vector<1x10x4x128xf32> to vector<1x8x2x128xf32>
    %255 = vector.broadcast %253 : vector<1x1x1x128xf32> to vector<1x8x2x128xf32>
    %256 = arith.mulf %254, %255 : vector<1x8x2x128xf32>
    %257 = arith.addf %250, %256 : vector<1x8x2x128xf32>
    %c6_74 = arith.constant 6 : index
    %c0_75 = arith.constant 0 : index
    %258 = vector.load %arg2[%c6_74, %c0_75] : memref<9x128xf32, #tpu.memory_space<vmem>>, vector<1x128xf32>
    %259 = vector.shape_cast %258 : vector<1x128xf32> to vector<128xf32>
    %260 = vector.shape_cast %259 : vector<128xf32> to vector<1x1x1x128xf32>
    %261 = vector.extract_strided_slice %214 {offsets = [0, 2, 0, 0], sizes = [1, 8, 2, 128], strides = [1, 1, 1, 1]} : vector<1x10x4x128xf32> to vector<1x8x2x128xf32>
    %262 = vector.broadcast %260 : vector<1x1x1x128xf32> to vector<1x8x2x128xf32>
    %263 = arith.mulf %261, %262 : vector<1x8x2x128xf32>
    %264 = arith.addf %257, %263 : vector<1x8x2x128xf32>
    %c7_76 = arith.constant 7 : index
    %c0_77 = arith.constant 0 : index
    %265 = vector.load %arg2[%c7_76, %c0_77] : memref<9x128xf32, #tpu.memory_space<vmem>>, vector<1x128xf32>
    %266 = vector.shape_cast %265 : vector<1x128xf32> to vector<128xf32>
    %267 = vector.shape_cast %266 : vector<128xf32> to vector<1x1x1x128xf32>
    %268 = vector.extract_strided_slice %214 {offsets = [0, 2, 1, 0], sizes = [1, 8, 2, 128], strides = [1, 1, 1, 1]} : vector<1x10x4x128xf32> to vector<1x8x2x128xf32>
    %269 = vector.broadcast %267 : vector<1x1x1x128xf32> to vector<1x8x2x128xf32>
    %270 = arith.mulf %268, %269 : vector<1x8x2x128xf32>
    %271 = arith.addf %264, %270 : vector<1x8x2x128xf32>
    %c8_78 = arith.constant 8 : index
    %c0_79 = arith.constant 0 : index
    %272 = vector.load %arg2[%c8_78, %c0_79] : memref<9x128xf32, #tpu.memory_space<vmem>>, vector<1x128xf32>
    %273 = vector.shape_cast %272 : vector<1x128xf32> to vector<128xf32>
    %274 = vector.shape_cast %273 : vector<128xf32> to vector<1x1x1x128xf32>
    %275 = vector.extract_strided_slice %214 {offsets = [0, 2, 2, 0], sizes = [1, 8, 2, 128], strides = [1, 1, 1, 1]} : vector<1x10x4x128xf32> to vector<1x8x2x128xf32>
    %276 = vector.broadcast %274 : vector<1x1x1x128xf32> to vector<1x8x2x128xf32>
    %277 = arith.mulf %275, %276 : vector<1x8x2x128xf32>
    %278 = arith.addf %271, %277 : vector<1x8x2x128xf32>
    %279 = vector.broadcast %10 : vector<1x1x1x128xf32> to vector<1x8x2x128xf32>
    %280 = arith.addf %278, %279 : vector<1x8x2x128xf32>
    %281 = vector.shape_cast %210 : vector<1x8x2x128xf32> to vector<1x16x128xf32>
    %cst_80 = arith.constant 2.500000e-01 : f32
    %282 = vector.broadcast %cst_80 : f32 to vector<1x16x128xf32>
    %283 = arith.mulf %281, %282 : vector<1x16x128xf32>
    %284 = vector.shape_cast %211 : vector<1x8x2x128xf32> to vector<1x16x128xf32>
    %285 = vector.shape_cast %212 : vector<1x8x2x128xf32> to vector<1x16x128xf32>
    %286 = vector.extract_strided_slice %283 {offsets = [0, 0, 0], sizes = [1, 16, 16], strides = [1, 1, 1]} : vector<1x16x128xf32> to vector<1x16x16xf32>
    %287 = vector.extract_strided_slice %284 {offsets = [0, 0, 0], sizes = [1, 16, 16], strides = [1, 1, 1]} : vector<1x16x128xf32> to vector<1x16x16xf32>
    %288 = vector.extract_strided_slice %285 {offsets = [0, 0, 0], sizes = [1, 16, 16], strides = [1, 1, 1]} : vector<1x16x128xf32> to vector<1x16x16xf32>
    "tpu.trace_start"() <{level = 10 : i32, message = "bld,bmd->blm"}> : () -> ()
    %cst_81 = arith.constant dense<0.000000e+00> : vector<1x16x16xf32>
    %289 = tpu.matmul %286, %287, %cst_81 {dimension_numbers = #tpu.dot_dimension_numbers<[2], [2], [1], [1], [0, 0, 0, 1, 1, 1], [0], [0]>} : vector<1x16x16xf32>, vector<1x16x16xf32>, vector<1x16x16xf32> -> vector<1x16x16xf32>
    "tpu.trace_stop"() : () -> ()
    %cst_82 = arith.constant dense<0xFF800000> : vector<1x16xf32>
    %290 = vector.multi_reduction <maximumf>, %289, %cst_82 [2] : vector<1x16x16xf32> to vector<1x16xf32>
    %291 = vector.shape_cast %290 : vector<1x16xf32> to vector<1x16x1xf32>
    %292 = vector.broadcast %291 : vector<1x16x1xf32> to vector<1x16x16xf32>
    %293 = arith.subf %289, %292 : vector<1x16x16xf32>
    %294 = math.exp %293 : vector<1x16x16xf32>
    %cst_83 = arith.constant dense<0.000000e+00> : vector<1x16xf32>
    %295 = vector.multi_reduction <add>, %294, %cst_83 [2] : vector<1x16x16xf32> to vector<1x16xf32>
    %296 = vector.shape_cast %295 : vector<1x16xf32> to vector<1x16x1xf32>
    %297 = tpu.reciprocal %296 {approx = true} : vector<1x16x1xf32> -> vector<1x16x1xf32>
    %298 = vector.broadcast %297 : vector<1x16x1xf32> to vector<1x16x16xf32>
    %299 = arith.mulf %294, %298 : vector<1x16x16xf32>
    "tpu.trace_start"() <{level = 10 : i32, message = "blm,bmd->bld"}> : () -> ()
    %cst_84 = arith.constant dense<0.000000e+00> : vector<1x16x16xf32>
    %300 = tpu.matmul %299, %288, %cst_84 {dimension_numbers = #tpu.dot_dimension_numbers<[2], [1], [1], [2], [0, 0, 0, 1, 1, 2], [0], [0]>} : vector<1x16x16xf32>, vector<1x16x16xf32>, vector<1x16x16xf32> -> vector<1x16x16xf32>
    "tpu.trace_stop"() : () -> ()
    %301 = vector.extract_strided_slice %283 {offsets = [0, 0, 16], sizes = [1, 16, 16], strides = [1, 1, 1]} : vector<1x16x128xf32> to vector<1x16x16xf32>
    %302 = vector.extract_strided_slice %284 {offsets = [0, 0, 16], sizes = [1, 16, 16], strides = [1, 1, 1]} : vector<1x16x128xf32> to vector<1x16x16xf32>
    %303 = vector.extract_strided_slice %285 {offsets = [0, 0, 16], sizes = [1, 16, 16], strides = [1, 1, 1]} : vector<1x16x128xf32> to vector<1x16x16xf32>
    "tpu.trace_start"() <{level = 10 : i32, message = "bld,bmd->blm"}> : () -> ()
    %cst_85 = arith.constant dense<0.000000e+00> : vector<1x16x16xf32>
    %304 = tpu.matmul %301, %302, %cst_85 {dimension_numbers = #tpu.dot_dimension_numbers<[2], [2], [1], [1], [0, 0, 0, 1, 1, 1], [0], [0]>} : vector<1x16x16xf32>, vector<1x16x16xf32>, vector<1x16x16xf32> -> vector<1x16x16xf32>
    "tpu.trace_stop"() : () -> ()
    %cst_86 = arith.constant dense<0xFF800000> : vector<1x16xf32>
    %305 = vector.multi_reduction <maximumf>, %304, %cst_86 [2] : vector<1x16x16xf32> to vector<1x16xf32>
    %306 = vector.shape_cast %305 : vector<1x16xf32> to vector<1x16x1xf32>
    %307 = vector.broadcast %306 : vector<1x16x1xf32> to vector<1x16x16xf32>
    %308 = arith.subf %304, %307 : vector<1x16x16xf32>
    %309 = math.exp %308 : vector<1x16x16xf32>
    %cst_87 = arith.constant dense<0.000000e+00> : vector<1x16xf32>
    %310 = vector.multi_reduction <add>, %309, %cst_87 [2] : vector<1x16x16xf32> to vector<1x16xf32>
    %311 = vector.shape_cast %310 : vector<1x16xf32> to vector<1x16x1xf32>
    %312 = tpu.reciprocal %311 {approx = true} : vector<1x16x1xf32> -> vector<1x16x1xf32>
    %313 = vector.broadcast %312 : vector<1x16x1xf32> to vector<1x16x16xf32>
    %314 = arith.mulf %309, %313 : vector<1x16x16xf32>
    "tpu.trace_start"() <{level = 10 : i32, message = "blm,bmd->bld"}> : () -> ()
    %cst_88 = arith.constant dense<0.000000e+00> : vector<1x16x16xf32>
    %315 = tpu.matmul %314, %303, %cst_88 {dimension_numbers = #tpu.dot_dimension_numbers<[2], [1], [1], [2], [0, 0, 0, 1, 1, 2], [0], [0]>} : vector<1x16x16xf32>, vector<1x16x16xf32>, vector<1x16x16xf32> -> vector<1x16x16xf32>
    "tpu.trace_stop"() : () -> ()
    %316 = vector.extract_strided_slice %283 {offsets = [0, 0, 32], sizes = [1, 16, 16], strides = [1, 1, 1]} : vector<1x16x128xf32> to vector<1x16x16xf32>
    %317 = vector.extract_strided_slice %284 {offsets = [0, 0, 32], sizes = [1, 16, 16], strides = [1, 1, 1]} : vector<1x16x128xf32> to vector<1x16x16xf32>
    %318 = vector.extract_strided_slice %285 {offsets = [0, 0, 32], sizes = [1, 16, 16], strides = [1, 1, 1]} : vector<1x16x128xf32> to vector<1x16x16xf32>
    "tpu.trace_start"() <{level = 10 : i32, message = "bld,bmd->blm"}> : () -> ()
    %cst_89 = arith.constant dense<0.000000e+00> : vector<1x16x16xf32>
    %319 = tpu.matmul %316, %317, %cst_89 {dimension_numbers = #tpu.dot_dimension_numbers<[2], [2], [1], [1], [0, 0, 0, 1, 1, 1], [0], [0]>} : vector<1x16x16xf32>, vector<1x16x16xf32>, vector<1x16x16xf32> -> vector<1x16x16xf32>
    "tpu.trace_stop"() : () -> ()
    %cst_90 = arith.constant dense<0xFF800000> : vector<1x16xf32>
    %320 = vector.multi_reduction <maximumf>, %319, %cst_90 [2] : vector<1x16x16xf32> to vector<1x16xf32>
    %321 = vector.shape_cast %320 : vector<1x16xf32> to vector<1x16x1xf32>
    %322 = vector.broadcast %321 : vector<1x16x1xf32> to vector<1x16x16xf32>
    %323 = arith.subf %319, %322 : vector<1x16x16xf32>
    %324 = math.exp %323 : vector<1x16x16xf32>
    %cst_91 = arith.constant dense<0.000000e+00> : vector<1x16xf32>
    %325 = vector.multi_reduction <add>, %324, %cst_91 [2] : vector<1x16x16xf32> to vector<1x16xf32>
    %326 = vector.shape_cast %325 : vector<1x16xf32> to vector<1x16x1xf32>
    %327 = tpu.reciprocal %326 {approx = true} : vector<1x16x1xf32> -> vector<1x16x1xf32>
    %328 = vector.broadcast %327 : vector<1x16x1xf32> to vector<1x16x16xf32>
    %329 = arith.mulf %324, %328 : vector<1x16x16xf32>
    "tpu.trace_start"() <{level = 10 : i32, message = "blm,bmd->bld"}> : () -> ()
    %cst_92 = arith.constant dense<0.000000e+00> : vector<1x16x16xf32>
    %330 = tpu.matmul %329, %318, %cst_92 {dimension_numbers = #tpu.dot_dimension_numbers<[2], [1], [1], [2], [0, 0, 0, 1, 1, 2], [0], [0]>} : vector<1x16x16xf32>, vector<1x16x16xf32>, vector<1x16x16xf32> -> vector<1x16x16xf32>
    "tpu.trace_stop"() : () -> ()
    %331 = vector.extract_strided_slice %283 {offsets = [0, 0, 48], sizes = [1, 16, 16], strides = [1, 1, 1]} : vector<1x16x128xf32> to vector<1x16x16xf32>
    %332 = vector.extract_strided_slice %284 {offsets = [0, 0, 48], sizes = [1, 16, 16], strides = [1, 1, 1]} : vector<1x16x128xf32> to vector<1x16x16xf32>
    %333 = vector.extract_strided_slice %285 {offsets = [0, 0, 48], sizes = [1, 16, 16], strides = [1, 1, 1]} : vector<1x16x128xf32> to vector<1x16x16xf32>
    "tpu.trace_start"() <{level = 10 : i32, message = "bld,bmd->blm"}> : () -> ()
    %cst_93 = arith.constant dense<0.000000e+00> : vector<1x16x16xf32>
    %334 = tpu.matmul %331, %332, %cst_93 {dimension_numbers = #tpu.dot_dimension_numbers<[2], [2], [1], [1], [0, 0, 0, 1, 1, 1], [0], [0]>} : vector<1x16x16xf32>, vector<1x16x16xf32>, vector<1x16x16xf32> -> vector<1x16x16xf32>
    "tpu.trace_stop"() : () -> ()
    %cst_94 = arith.constant dense<0xFF800000> : vector<1x16xf32>
    %335 = vector.multi_reduction <maximumf>, %334, %cst_94 [2] : vector<1x16x16xf32> to vector<1x16xf32>
    %336 = vector.shape_cast %335 : vector<1x16xf32> to vector<1x16x1xf32>
    %337 = vector.broadcast %336 : vector<1x16x1xf32> to vector<1x16x16xf32>
    %338 = arith.subf %334, %337 : vector<1x16x16xf32>
    %339 = math.exp %338 : vector<1x16x16xf32>
    %cst_95 = arith.constant dense<0.000000e+00> : vector<1x16xf32>
    %340 = vector.multi_reduction <add>, %339, %cst_95 [2] : vector<1x16x16xf32> to vector<1x16xf32>
    %341 = vector.shape_cast %340 : vector<1x16xf32> to vector<1x16x1xf32>
    %342 = tpu.reciprocal %341 {approx = true} : vector<1x16x1xf32> -> vector<1x16x1xf32>
    %343 = vector.broadcast %342 : vector<1x16x1xf32> to vector<1x16x16xf32>
    %344 = arith.mulf %339, %343 : vector<1x16x16xf32>
    "tpu.trace_start"() <{level = 10 : i32, message = "blm,bmd->bld"}> : () -> ()
    %cst_96 = arith.constant dense<0.000000e+00> : vector<1x16x16xf32>
    %345 = tpu.matmul %344, %333, %cst_96 {dimension_numbers = #tpu.dot_dimension_numbers<[2], [1], [1], [2], [0, 0, 0, 1, 1, 2], [0], [0]>} : vector<1x16x16xf32>, vector<1x16x16xf32>, vector<1x16x16xf32> -> vector<1x16x16xf32>
    "tpu.trace_stop"() : () -> ()
    %346 = vector.extract_strided_slice %283 {offsets = [0, 0, 64], sizes = [1, 16, 16], strides = [1, 1, 1]} : vector<1x16x128xf32> to vector<1x16x16xf32>
    %347 = vector.extract_strided_slice %284 {offsets = [0, 0, 64], sizes = [1, 16, 16], strides = [1, 1, 1]} : vector<1x16x128xf32> to vector<1x16x16xf32>
    %348 = vector.extract_strided_slice %285 {offsets = [0, 0, 64], sizes = [1, 16, 16], strides = [1, 1, 1]} : vector<1x16x128xf32> to vector<1x16x16xf32>
    "tpu.trace_start"() <{level = 10 : i32, message = "bld,bmd->blm"}> : () -> ()
    %cst_97 = arith.constant dense<0.000000e+00> : vector<1x16x16xf32>
    %349 = tpu.matmul %346, %347, %cst_97 {dimension_numbers = #tpu.dot_dimension_numbers<[2], [2], [1], [1], [0, 0, 0, 1, 1, 1], [0], [0]>} : vector<1x16x16xf32>, vector<1x16x16xf32>, vector<1x16x16xf32> -> vector<1x16x16xf32>
    "tpu.trace_stop"() : () -> ()
    %cst_98 = arith.constant dense<0xFF800000> : vector<1x16xf32>
    %350 = vector.multi_reduction <maximumf>, %349, %cst_98 [2] : vector<1x16x16xf32> to vector<1x16xf32>
    %351 = vector.shape_cast %350 : vector<1x16xf32> to vector<1x16x1xf32>
    %352 = vector.broadcast %351 : vector<1x16x1xf32> to vector<1x16x16xf32>
    %353 = arith.subf %349, %352 : vector<1x16x16xf32>
    %354 = math.exp %353 : vector<1x16x16xf32>
    %cst_99 = arith.constant dense<0.000000e+00> : vector<1x16xf32>
    %355 = vector.multi_reduction <add>, %354, %cst_99 [2] : vector<1x16x16xf32> to vector<1x16xf32>
    %356 = vector.shape_cast %355 : vector<1x16xf32> to vector<1x16x1xf32>
    %357 = tpu.reciprocal %356 {approx = true} : vector<1x16x1xf32> -> vector<1x16x1xf32>
    %358 = vector.broadcast %357 : vector<1x16x1xf32> to vector<1x16x16xf32>
    %359 = arith.mulf %354, %358 : vector<1x16x16xf32>
    "tpu.trace_start"() <{level = 10 : i32, message = "blm,bmd->bld"}> : () -> ()
    %cst_100 = arith.constant dense<0.000000e+00> : vector<1x16x16xf32>
    %360 = tpu.matmul %359, %348, %cst_100 {dimension_numbers = #tpu.dot_dimension_numbers<[2], [1], [1], [2], [0, 0, 0, 1, 1, 2], [0], [0]>} : vector<1x16x16xf32>, vector<1x16x16xf32>, vector<1x16x16xf32> -> vector<1x16x16xf32>
    "tpu.trace_stop"() : () -> ()
    %361 = vector.extract_strided_slice %283 {offsets = [0, 0, 80], sizes = [1, 16, 16], strides = [1, 1, 1]} : vector<1x16x128xf32> to vector<1x16x16xf32>
    %362 = vector.extract_strided_slice %284 {offsets = [0, 0, 80], sizes = [1, 16, 16], strides = [1, 1, 1]} : vector<1x16x128xf32> to vector<1x16x16xf32>
    %363 = vector.extract_strided_slice %285 {offsets = [0, 0, 80], sizes = [1, 16, 16], strides = [1, 1, 1]} : vector<1x16x128xf32> to vector<1x16x16xf32>
    "tpu.trace_start"() <{level = 10 : i32, message = "bld,bmd->blm"}> : () -> ()
    %cst_101 = arith.constant dense<0.000000e+00> : vector<1x16x16xf32>
    %364 = tpu.matmul %361, %362, %cst_101 {dimension_numbers = #tpu.dot_dimension_numbers<[2], [2], [1], [1], [0, 0, 0, 1, 1, 1], [0], [0]>} : vector<1x16x16xf32>, vector<1x16x16xf32>, vector<1x16x16xf32> -> vector<1x16x16xf32>
    "tpu.trace_stop"() : () -> ()
    %cst_102 = arith.constant dense<0xFF800000> : vector<1x16xf32>
    %365 = vector.multi_reduction <maximumf>, %364, %cst_102 [2] : vector<1x16x16xf32> to vector<1x16xf32>
    %366 = vector.shape_cast %365 : vector<1x16xf32> to vector<1x16x1xf32>
    %367 = vector.broadcast %366 : vector<1x16x1xf32> to vector<1x16x16xf32>
    %368 = arith.subf %364, %367 : vector<1x16x16xf32>
    %369 = math.exp %368 : vector<1x16x16xf32>
    %cst_103 = arith.constant dense<0.000000e+00> : vector<1x16xf32>
    %370 = vector.multi_reduction <add>, %369, %cst_103 [2] : vector<1x16x16xf32> to vector<1x16xf32>
    %371 = vector.shape_cast %370 : vector<1x16xf32> to vector<1x16x1xf32>
    %372 = tpu.reciprocal %371 {approx = true} : vector<1x16x1xf32> -> vector<1x16x1xf32>
    %373 = vector.broadcast %372 : vector<1x16x1xf32> to vector<1x16x16xf32>
    %374 = arith.mulf %369, %373 : vector<1x16x16xf32>
    "tpu.trace_start"() <{level = 10 : i32, message = "blm,bmd->bld"}> : () -> ()
    %cst_104 = arith.constant dense<0.000000e+00> : vector<1x16x16xf32>
    %375 = tpu.matmul %374, %363, %cst_104 {dimension_numbers = #tpu.dot_dimension_numbers<[2], [1], [1], [2], [0, 0, 0, 1, 1, 2], [0], [0]>} : vector<1x16x16xf32>, vector<1x16x16xf32>, vector<1x16x16xf32> -> vector<1x16x16xf32>
    "tpu.trace_stop"() : () -> ()
    %376 = vector.extract_strided_slice %283 {offsets = [0, 0, 96], sizes = [1, 16, 16], strides = [1, 1, 1]} : vector<1x16x128xf32> to vector<1x16x16xf32>
    %377 = vector.extract_strided_slice %284 {offsets = [0, 0, 96], sizes = [1, 16, 16], strides = [1, 1, 1]} : vector<1x16x128xf32> to vector<1x16x16xf32>
    %378 = vector.extract_strided_slice %285 {offsets = [0, 0, 96], sizes = [1, 16, 16], strides = [1, 1, 1]} : vector<1x16x128xf32> to vector<1x16x16xf32>
    "tpu.trace_start"() <{level = 10 : i32, message = "bld,bmd->blm"}> : () -> ()
    %cst_105 = arith.constant dense<0.000000e+00> : vector<1x16x16xf32>
    %379 = tpu.matmul %376, %377, %cst_105 {dimension_numbers = #tpu.dot_dimension_numbers<[2], [2], [1], [1], [0, 0, 0, 1, 1, 1], [0], [0]>} : vector<1x16x16xf32>, vector<1x16x16xf32>, vector<1x16x16xf32> -> vector<1x16x16xf32>
    "tpu.trace_stop"() : () -> ()
    %cst_106 = arith.constant dense<0xFF800000> : vector<1x16xf32>
    %380 = vector.multi_reduction <maximumf>, %379, %cst_106 [2] : vector<1x16x16xf32> to vector<1x16xf32>
    %381 = vector.shape_cast %380 : vector<1x16xf32> to vector<1x16x1xf32>
    %382 = vector.broadcast %381 : vector<1x16x1xf32> to vector<1x16x16xf32>
    %383 = arith.subf %379, %382 : vector<1x16x16xf32>
    %384 = math.exp %383 : vector<1x16x16xf32>
    %cst_107 = arith.constant dense<0.000000e+00> : vector<1x16xf32>
    %385 = vector.multi_reduction <add>, %384, %cst_107 [2] : vector<1x16x16xf32> to vector<1x16xf32>
    %386 = vector.shape_cast %385 : vector<1x16xf32> to vector<1x16x1xf32>
    %387 = tpu.reciprocal %386 {approx = true} : vector<1x16x1xf32> -> vector<1x16x1xf32>
    %388 = vector.broadcast %387 : vector<1x16x1xf32> to vector<1x16x16xf32>
    %389 = arith.mulf %384, %388 : vector<1x16x16xf32>
    "tpu.trace_start"() <{level = 10 : i32, message = "blm,bmd->bld"}> : () -> ()
    %cst_108 = arith.constant dense<0.000000e+00> : vector<1x16x16xf32>
    %390 = tpu.matmul %389, %378, %cst_108 {dimension_numbers = #tpu.dot_dimension_numbers<[2], [1], [1], [2], [0, 0, 0, 1, 1, 2], [0], [0]>} : vector<1x16x16xf32>, vector<1x16x16xf32>, vector<1x16x16xf32> -> vector<1x16x16xf32>
    "tpu.trace_stop"() : () -> ()
    %391 = vector.extract_strided_slice %283 {offsets = [0, 0, 112], sizes = [1, 16, 16], strides = [1, 1, 1]} : vector<1x16x128xf32> to vector<1x16x16xf32>
    %392 = vector.extract_strided_slice %284 {offsets = [0, 0, 112], sizes = [1, 16, 16], strides = [1, 1, 1]} : vector<1x16x128xf32> to vector<1x16x16xf32>
    %393 = vector.extract_strided_slice %285 {offsets = [0, 0, 112], sizes = [1, 16, 16], strides = [1, 1, 1]} : vector<1x16x128xf32> to vector<1x16x16xf32>
    "tpu.trace_start"() <{level = 10 : i32, message = "bld,bmd->blm"}> : () -> ()
    %cst_109 = arith.constant dense<0.000000e+00> : vector<1x16x16xf32>
    %394 = tpu.matmul %391, %392, %cst_109 {dimension_numbers = #tpu.dot_dimension_numbers<[2], [2], [1], [1], [0, 0, 0, 1, 1, 1], [0], [0]>} : vector<1x16x16xf32>, vector<1x16x16xf32>, vector<1x16x16xf32> -> vector<1x16x16xf32>
    "tpu.trace_stop"() : () -> ()
    %cst_110 = arith.constant dense<0xFF800000> : vector<1x16xf32>
    %395 = vector.multi_reduction <maximumf>, %394, %cst_110 [2] : vector<1x16x16xf32> to vector<1x16xf32>
    %396 = vector.shape_cast %395 : vector<1x16xf32> to vector<1x16x1xf32>
    %397 = vector.broadcast %396 : vector<1x16x1xf32> to vector<1x16x16xf32>
    %398 = arith.subf %394, %397 : vector<1x16x16xf32>
    %399 = math.exp %398 : vector<1x16x16xf32>
    %cst_111 = arith.constant dense<0.000000e+00> : vector<1x16xf32>
    %400 = vector.multi_reduction <add>, %399, %cst_111 [2] : vector<1x16x16xf32> to vector<1x16xf32>
    %401 = vector.shape_cast %400 : vector<1x16xf32> to vector<1x16x1xf32>
    %402 = tpu.reciprocal %401 {approx = true} : vector<1x16x1xf32> -> vector<1x16x1xf32>
    %403 = vector.broadcast %402 : vector<1x16x1xf32> to vector<1x16x16xf32>
    %404 = arith.mulf %399, %403 : vector<1x16x16xf32>
    "tpu.trace_start"() <{level = 10 : i32, message = "blm,bmd->bld"}> : () -> ()
    %cst_112 = arith.constant dense<0.000000e+00> : vector<1x16x16xf32>
    %405 = tpu.matmul %404, %393, %cst_112 {dimension_numbers = #tpu.dot_dimension_numbers<[2], [1], [1], [2], [0, 0, 0, 1, 1, 2], [0], [0]>} : vector<1x16x16xf32>, vector<1x16x16xf32>, vector<1x16x16xf32> -> vector<1x16x16xf32>
    "tpu.trace_stop"() : () -> ()
    %406 = tpu.concatenate %300, %315, %330, %345, %360, %375, %390, %405 in 2 : vector<1x16x16xf32>, vector<1x16x16xf32>, vector<1x16x16xf32>, vector<1x16x16xf32>, vector<1x16x16xf32>, vector<1x16x16xf32>, vector<1x16x16xf32>, vector<1x16x16xf32> -> vector<1x16x128xf32>
    %407 = vector.shape_cast %406 : vector<1x16x128xf32> to vector<1x8x2x128xf32>
    %408 = arith.addf %407, %280 : vector<1x8x2x128xf32>
    %409 = vector.extract_strided_slice %1 {offsets = [0, 0, 4, 0], sizes = [1, 8, 2, 128], strides = [1, 1, 1, 1]} : vector<1x8x8x128xf32> to vector<1x8x2x128xf32>
    %410 = vector.extract_strided_slice %3 {offsets = [0, 0, 4, 0], sizes = [1, 8, 2, 128], strides = [1, 1, 1, 1]} : vector<1x8x8x128xf32> to vector<1x8x2x128xf32>
    %411 = vector.extract_strided_slice %5 {offsets = [0, 0, 4, 0], sizes = [1, 8, 2, 128], strides = [1, 1, 1, 1]} : vector<1x8x8x128xf32> to vector<1x8x2x128xf32>
    %412 = tpu.concatenate %6, %411, %6 in 1 : vector<1x1x2x128xf32>, vector<1x8x2x128xf32>, vector<1x1x2x128xf32> -> vector<1x10x2x128xf32>
    %413 = tpu.concatenate %7, %412, %7 in 2 : vector<1x10x1x128xf32>, vector<1x10x2x128xf32>, vector<1x10x1x128xf32> -> vector<1x10x4x128xf32>
    %cst_113 = arith.constant 0.000000e+00 : f32
    %414 = vector.broadcast %cst_113 : f32 to vector<1x8x2x128xf32>
    %c0_114 = arith.constant 0 : index
    %c0_115 = arith.constant 0 : index
    %415 = vector.load %arg2[%c0_114, %c0_115] : memref<9x128xf32, #tpu.memory_space<vmem>>, vector<1x128xf32>
    %416 = vector.shape_cast %415 : vector<1x128xf32> to vector<128xf32>
    %417 = vector.shape_cast %416 : vector<128xf32> to vector<1x1x1x128xf32>
    %418 = vector.extract_strided_slice %413 {offsets = [0, 0, 0, 0], sizes = [1, 8, 2, 128], strides = [1, 1, 1, 1]} : vector<1x10x4x128xf32> to vector<1x8x2x128xf32>
    %419 = vector.broadcast %417 : vector<1x1x1x128xf32> to vector<1x8x2x128xf32>
    %420 = arith.mulf %418, %419 : vector<1x8x2x128xf32>
    %421 = arith.addf %414, %420 : vector<1x8x2x128xf32>
    %c1_116 = arith.constant 1 : index
    %c0_117 = arith.constant 0 : index
    %422 = vector.load %arg2[%c1_116, %c0_117] : memref<9x128xf32, #tpu.memory_space<vmem>>, vector<1x128xf32>
    %423 = vector.shape_cast %422 : vector<1x128xf32> to vector<128xf32>
    %424 = vector.shape_cast %423 : vector<128xf32> to vector<1x1x1x128xf32>
    %425 = vector.extract_strided_slice %413 {offsets = [0, 0, 1, 0], sizes = [1, 8, 2, 128], strides = [1, 1, 1, 1]} : vector<1x10x4x128xf32> to vector<1x8x2x128xf32>
    %426 = vector.broadcast %424 : vector<1x1x1x128xf32> to vector<1x8x2x128xf32>
    %427 = arith.mulf %425, %426 : vector<1x8x2x128xf32>
    %428 = arith.addf %421, %427 : vector<1x8x2x128xf32>
    %c2_118 = arith.constant 2 : index
    %c0_119 = arith.constant 0 : index
    %429 = vector.load %arg2[%c2_118, %c0_119] : memref<9x128xf32, #tpu.memory_space<vmem>>, vector<1x128xf32>
    %430 = vector.shape_cast %429 : vector<1x128xf32> to vector<128xf32>
    %431 = vector.shape_cast %430 : vector<128xf32> to vector<1x1x1x128xf32>
    %432 = vector.extract_strided_slice %413 {offsets = [0, 0, 2, 0], sizes = [1, 8, 2, 128], strides = [1, 1, 1, 1]} : vector<1x10x4x128xf32> to vector<1x8x2x128xf32>
    %433 = vector.broadcast %431 : vector<1x1x1x128xf32> to vector<1x8x2x128xf32>
    %434 = arith.mulf %432, %433 : vector<1x8x2x128xf32>
    %435 = arith.addf %428, %434 : vector<1x8x2x128xf32>
    %c3_120 = arith.constant 3 : index
    %c0_121 = arith.constant 0 : index
    %436 = vector.load %arg2[%c3_120, %c0_121] : memref<9x128xf32, #tpu.memory_space<vmem>>, vector<1x128xf32>
    %437 = vector.shape_cast %436 : vector<1x128xf32> to vector<128xf32>
    %438 = vector.shape_cast %437 : vector<128xf32> to vector<1x1x1x128xf32>
    %439 = vector.extract_strided_slice %413 {offsets = [0, 1, 0, 0], sizes = [1, 8, 2, 128], strides = [1, 1, 1, 1]} : vector<1x10x4x128xf32> to vector<1x8x2x128xf32>
    %440 = vector.broadcast %438 : vector<1x1x1x128xf32> to vector<1x8x2x128xf32>
    %441 = arith.mulf %439, %440 : vector<1x8x2x128xf32>
    %442 = arith.addf %435, %441 : vector<1x8x2x128xf32>
    %c4_122 = arith.constant 4 : index
    %c0_123 = arith.constant 0 : index
    %443 = vector.load %arg2[%c4_122, %c0_123] : memref<9x128xf32, #tpu.memory_space<vmem>>, vector<1x128xf32>
    %444 = vector.shape_cast %443 : vector<1x128xf32> to vector<128xf32>
    %445 = vector.shape_cast %444 : vector<128xf32> to vector<1x1x1x128xf32>
    %446 = vector.extract_strided_slice %413 {offsets = [0, 1, 1, 0], sizes = [1, 8, 2, 128], strides = [1, 1, 1, 1]} : vector<1x10x4x128xf32> to vector<1x8x2x128xf32>
    %447 = vector.broadcast %445 : vector<1x1x1x128xf32> to vector<1x8x2x128xf32>
    %448 = arith.mulf %446, %447 : vector<1x8x2x128xf32>
    %449 = arith.addf %442, %448 : vector<1x8x2x128xf32>
    %c5_124 = arith.constant 5 : index
    %c0_125 = arith.constant 0 : index
    %450 = vector.load %arg2[%c5_124, %c0_125] : memref<9x128xf32, #tpu.memory_space<vmem>>, vector<1x128xf32>
    %451 = vector.shape_cast %450 : vector<1x128xf32> to vector<128xf32>
    %452 = vector.shape_cast %451 : vector<128xf32> to vector<1x1x1x128xf32>
    %453 = vector.extract_strided_slice %413 {offsets = [0, 1, 2, 0], sizes = [1, 8, 2, 128], strides = [1, 1, 1, 1]} : vector<1x10x4x128xf32> to vector<1x8x2x128xf32>
    %454 = vector.broadcast %452 : vector<1x1x1x128xf32> to vector<1x8x2x128xf32>
    %455 = arith.mulf %453, %454 : vector<1x8x2x128xf32>
    %456 = arith.addf %449, %455 : vector<1x8x2x128xf32>
    %c6_126 = arith.constant 6 : index
    %c0_127 = arith.constant 0 : index
    %457 = vector.load %arg2[%c6_126, %c0_127] : memref<9x128xf32, #tpu.memory_space<vmem>>, vector<1x128xf32>
    %458 = vector.shape_cast %457 : vector<1x128xf32> to vector<128xf32>
    %459 = vector.shape_cast %458 : vector<128xf32> to vector<1x1x1x128xf32>
    %460 = vector.extract_strided_slice %413 {offsets = [0, 2, 0, 0], sizes = [1, 8, 2, 128], strides = [1, 1, 1, 1]} : vector<1x10x4x128xf32> to vector<1x8x2x128xf32>
    %461 = vector.broadcast %459 : vector<1x1x1x128xf32> to vector<1x8x2x128xf32>
    %462 = arith.mulf %460, %461 : vector<1x8x2x128xf32>
    %463 = arith.addf %456, %462 : vector<1x8x2x128xf32>
    %c7_128 = arith.constant 7 : index
    %c0_129 = arith.constant 0 : index
    %464 = vector.load %arg2[%c7_128, %c0_129] : memref<9x128xf32, #tpu.memory_space<vmem>>, vector<1x128xf32>
    %465 = vector.shape_cast %464 : vector<1x128xf32> to vector<128xf32>
    %466 = vector.shape_cast %465 : vector<128xf32> to vector<1x1x1x128xf32>
    %467 = vector.extract_strided_slice %413 {offsets = [0, 2, 1, 0], sizes = [1, 8, 2, 128], strides = [1, 1, 1, 1]} : vector<1x10x4x128xf32> to vector<1x8x2x128xf32>
    %468 = vector.broadcast %466 : vector<1x1x1x128xf32> to vector<1x8x2x128xf32>
    %469 = arith.mulf %467, %468 : vector<1x8x2x128xf32>
    %470 = arith.addf %463, %469 : vector<1x8x2x128xf32>
    %c8_130 = arith.constant 8 : index
    %c0_131 = arith.constant 0 : index
    %471 = vector.load %arg2[%c8_130, %c0_131] : memref<9x128xf32, #tpu.memory_space<vmem>>, vector<1x128xf32>
    %472 = vector.shape_cast %471 : vector<1x128xf32> to vector<128xf32>
    %473 = vector.shape_cast %472 : vector<128xf32> to vector<1x1x1x128xf32>
    %474 = vector.extract_strided_slice %413 {offsets = [0, 2, 2, 0], sizes = [1, 8, 2, 128], strides = [1, 1, 1, 1]} : vector<1x10x4x128xf32> to vector<1x8x2x128xf32>
    %475 = vector.broadcast %473 : vector<1x1x1x128xf32> to vector<1x8x2x128xf32>
    %476 = arith.mulf %474, %475 : vector<1x8x2x128xf32>
    %477 = arith.addf %470, %476 : vector<1x8x2x128xf32>
    %478 = vector.broadcast %10 : vector<1x1x1x128xf32> to vector<1x8x2x128xf32>
    %479 = arith.addf %477, %478 : vector<1x8x2x128xf32>
    %480 = vector.shape_cast %409 : vector<1x8x2x128xf32> to vector<1x16x128xf32>
    %cst_132 = arith.constant 2.500000e-01 : f32
    %481 = vector.broadcast %cst_132 : f32 to vector<1x16x128xf32>
    %482 = arith.mulf %480, %481 : vector<1x16x128xf32>
    %483 = vector.shape_cast %410 : vector<1x8x2x128xf32> to vector<1x16x128xf32>
    %484 = vector.shape_cast %411 : vector<1x8x2x128xf32> to vector<1x16x128xf32>
    %485 = vector.extract_strided_slice %482 {offsets = [0, 0, 0], sizes = [1, 16, 16], strides = [1, 1, 1]} : vector<1x16x128xf32> to vector<1x16x16xf32>
    %486 = vector.extract_strided_slice %483 {offsets = [0, 0, 0], sizes = [1, 16, 16], strides = [1, 1, 1]} : vector<1x16x128xf32> to vector<1x16x16xf32>
    %487 = vector.extract_strided_slice %484 {offsets = [0, 0, 0], sizes = [1, 16, 16], strides = [1, 1, 1]} : vector<1x16x128xf32> to vector<1x16x16xf32>
    "tpu.trace_start"() <{level = 10 : i32, message = "bld,bmd->blm"}> : () -> ()
    %cst_133 = arith.constant dense<0.000000e+00> : vector<1x16x16xf32>
    %488 = tpu.matmul %485, %486, %cst_133 {dimension_numbers = #tpu.dot_dimension_numbers<[2], [2], [1], [1], [0, 0, 0, 1, 1, 1], [0], [0]>} : vector<1x16x16xf32>, vector<1x16x16xf32>, vector<1x16x16xf32> -> vector<1x16x16xf32>
    "tpu.trace_stop"() : () -> ()
    %cst_134 = arith.constant dense<0xFF800000> : vector<1x16xf32>
    %489 = vector.multi_reduction <maximumf>, %488, %cst_134 [2] : vector<1x16x16xf32> to vector<1x16xf32>
    %490 = vector.shape_cast %489 : vector<1x16xf32> to vector<1x16x1xf32>
    %491 = vector.broadcast %490 : vector<1x16x1xf32> to vector<1x16x16xf32>
    %492 = arith.subf %488, %491 : vector<1x16x16xf32>
    %493 = math.exp %492 : vector<1x16x16xf32>
    %cst_135 = arith.constant dense<0.000000e+00> : vector<1x16xf32>
    %494 = vector.multi_reduction <add>, %493, %cst_135 [2] : vector<1x16x16xf32> to vector<1x16xf32>
    %495 = vector.shape_cast %494 : vector<1x16xf32> to vector<1x16x1xf32>
    %496 = tpu.reciprocal %495 {approx = true} : vector<1x16x1xf32> -> vector<1x16x1xf32>
    %497 = vector.broadcast %496 : vector<1x16x1xf32> to vector<1x16x16xf32>
    %498 = arith.mulf %493, %497 : vector<1x16x16xf32>
    "tpu.trace_start"() <{level = 10 : i32, message = "blm,bmd->bld"}> : () -> ()
    %cst_136 = arith.constant dense<0.000000e+00> : vector<1x16x16xf32>
    %499 = tpu.matmul %498, %487, %cst_136 {dimension_numbers = #tpu.dot_dimension_numbers<[2], [1], [1], [2], [0, 0, 0, 1, 1, 2], [0], [0]>} : vector<1x16x16xf32>, vector<1x16x16xf32>, vector<1x16x16xf32> -> vector<1x16x16xf32>
    "tpu.trace_stop"() : () -> ()
    %500 = vector.extract_strided_slice %482 {offsets = [0, 0, 16], sizes = [1, 16, 16], strides = [1, 1, 1]} : vector<1x16x128xf32> to vector<1x16x16xf32>
    %501 = vector.extract_strided_slice %483 {offsets = [0, 0, 16], sizes = [1, 16, 16], strides = [1, 1, 1]} : vector<1x16x128xf32> to vector<1x16x16xf32>
    %502 = vector.extract_strided_slice %484 {offsets = [0, 0, 16], sizes = [1, 16, 16], strides = [1, 1, 1]} : vector<1x16x128xf32> to vector<1x16x16xf32>
    "tpu.trace_start"() <{level = 10 : i32, message = "bld,bmd->blm"}> : () -> ()
    %cst_137 = arith.constant dense<0.000000e+00> : vector<1x16x16xf32>
    %503 = tpu.matmul %500, %501, %cst_137 {dimension_numbers = #tpu.dot_dimension_numbers<[2], [2], [1], [1], [0, 0, 0, 1, 1, 1], [0], [0]>} : vector<1x16x16xf32>, vector<1x16x16xf32>, vector<1x16x16xf32> -> vector<1x16x16xf32>
    "tpu.trace_stop"() : () -> ()
    %cst_138 = arith.constant dense<0xFF800000> : vector<1x16xf32>
    %504 = vector.multi_reduction <maximumf>, %503, %cst_138 [2] : vector<1x16x16xf32> to vector<1x16xf32>
    %505 = vector.shape_cast %504 : vector<1x16xf32> to vector<1x16x1xf32>
    %506 = vector.broadcast %505 : vector<1x16x1xf32> to vector<1x16x16xf32>
    %507 = arith.subf %503, %506 : vector<1x16x16xf32>
    %508 = math.exp %507 : vector<1x16x16xf32>
    %cst_139 = arith.constant dense<0.000000e+00> : vector<1x16xf32>
    %509 = vector.multi_reduction <add>, %508, %cst_139 [2] : vector<1x16x16xf32> to vector<1x16xf32>
    %510 = vector.shape_cast %509 : vector<1x16xf32> to vector<1x16x1xf32>
    %511 = tpu.reciprocal %510 {approx = true} : vector<1x16x1xf32> -> vector<1x16x1xf32>
    %512 = vector.broadcast %511 : vector<1x16x1xf32> to vector<1x16x16xf32>
    %513 = arith.mulf %508, %512 : vector<1x16x16xf32>
    "tpu.trace_start"() <{level = 10 : i32, message = "blm,bmd->bld"}> : () -> ()
    %cst_140 = arith.constant dense<0.000000e+00> : vector<1x16x16xf32>
    %514 = tpu.matmul %513, %502, %cst_140 {dimension_numbers = #tpu.dot_dimension_numbers<[2], [1], [1], [2], [0, 0, 0, 1, 1, 2], [0], [0]>} : vector<1x16x16xf32>, vector<1x16x16xf32>, vector<1x16x16xf32> -> vector<1x16x16xf32>
    "tpu.trace_stop"() : () -> ()
    %515 = vector.extract_strided_slice %482 {offsets = [0, 0, 32], sizes = [1, 16, 16], strides = [1, 1, 1]} : vector<1x16x128xf32> to vector<1x16x16xf32>
    %516 = vector.extract_strided_slice %483 {offsets = [0, 0, 32], sizes = [1, 16, 16], strides = [1, 1, 1]} : vector<1x16x128xf32> to vector<1x16x16xf32>
    %517 = vector.extract_strided_slice %484 {offsets = [0, 0, 32], sizes = [1, 16, 16], strides = [1, 1, 1]} : vector<1x16x128xf32> to vector<1x16x16xf32>
    "tpu.trace_start"() <{level = 10 : i32, message = "bld,bmd->blm"}> : () -> ()
    %cst_141 = arith.constant dense<0.000000e+00> : vector<1x16x16xf32>
    %518 = tpu.matmul %515, %516, %cst_141 {dimension_numbers = #tpu.dot_dimension_numbers<[2], [2], [1], [1], [0, 0, 0, 1, 1, 1], [0], [0]>} : vector<1x16x16xf32>, vector<1x16x16xf32>, vector<1x16x16xf32> -> vector<1x16x16xf32>
    "tpu.trace_stop"() : () -> ()
    %cst_142 = arith.constant dense<0xFF800000> : vector<1x16xf32>
    %519 = vector.multi_reduction <maximumf>, %518, %cst_142 [2] : vector<1x16x16xf32> to vector<1x16xf32>
    %520 = vector.shape_cast %519 : vector<1x16xf32> to vector<1x16x1xf32>
    %521 = vector.broadcast %520 : vector<1x16x1xf32> to vector<1x16x16xf32>
    %522 = arith.subf %518, %521 : vector<1x16x16xf32>
    %523 = math.exp %522 : vector<1x16x16xf32>
    %cst_143 = arith.constant dense<0.000000e+00> : vector<1x16xf32>
    %524 = vector.multi_reduction <add>, %523, %cst_143 [2] : vector<1x16x16xf32> to vector<1x16xf32>
    %525 = vector.shape_cast %524 : vector<1x16xf32> to vector<1x16x1xf32>
    %526 = tpu.reciprocal %525 {approx = true} : vector<1x16x1xf32> -> vector<1x16x1xf32>
    %527 = vector.broadcast %526 : vector<1x16x1xf32> to vector<1x16x16xf32>
    %528 = arith.mulf %523, %527 : vector<1x16x16xf32>
    "tpu.trace_start"() <{level = 10 : i32, message = "blm,bmd->bld"}> : () -> ()
    %cst_144 = arith.constant dense<0.000000e+00> : vector<1x16x16xf32>
    %529 = tpu.matmul %528, %517, %cst_144 {dimension_numbers = #tpu.dot_dimension_numbers<[2], [1], [1], [2], [0, 0, 0, 1, 1, 2], [0], [0]>} : vector<1x16x16xf32>, vector<1x16x16xf32>, vector<1x16x16xf32> -> vector<1x16x16xf32>
    "tpu.trace_stop"() : () -> ()
    %530 = vector.extract_strided_slice %482 {offsets = [0, 0, 48], sizes = [1, 16, 16], strides = [1, 1, 1]} : vector<1x16x128xf32> to vector<1x16x16xf32>
    %531 = vector.extract_strided_slice %483 {offsets = [0, 0, 48], sizes = [1, 16, 16], strides = [1, 1, 1]} : vector<1x16x128xf32> to vector<1x16x16xf32>
    %532 = vector.extract_strided_slice %484 {offsets = [0, 0, 48], sizes = [1, 16, 16], strides = [1, 1, 1]} : vector<1x16x128xf32> to vector<1x16x16xf32>
    "tpu.trace_start"() <{level = 10 : i32, message = "bld,bmd->blm"}> : () -> ()
    %cst_145 = arith.constant dense<0.000000e+00> : vector<1x16x16xf32>
    %533 = tpu.matmul %530, %531, %cst_145 {dimension_numbers = #tpu.dot_dimension_numbers<[2], [2], [1], [1], [0, 0, 0, 1, 1, 1], [0], [0]>} : vector<1x16x16xf32>, vector<1x16x16xf32>, vector<1x16x16xf32> -> vector<1x16x16xf32>
    "tpu.trace_stop"() : () -> ()
    %cst_146 = arith.constant dense<0xFF800000> : vector<1x16xf32>
    %534 = vector.multi_reduction <maximumf>, %533, %cst_146 [2] : vector<1x16x16xf32> to vector<1x16xf32>
    %535 = vector.shape_cast %534 : vector<1x16xf32> to vector<1x16x1xf32>
    %536 = vector.broadcast %535 : vector<1x16x1xf32> to vector<1x16x16xf32>
    %537 = arith.subf %533, %536 : vector<1x16x16xf32>
    %538 = math.exp %537 : vector<1x16x16xf32>
    %cst_147 = arith.constant dense<0.000000e+00> : vector<1x16xf32>
    %539 = vector.multi_reduction <add>, %538, %cst_147 [2] : vector<1x16x16xf32> to vector<1x16xf32>
    %540 = vector.shape_cast %539 : vector<1x16xf32> to vector<1x16x1xf32>
    %541 = tpu.reciprocal %540 {approx = true} : vector<1x16x1xf32> -> vector<1x16x1xf32>
    %542 = vector.broadcast %541 : vector<1x16x1xf32> to vector<1x16x16xf32>
    %543 = arith.mulf %538, %542 : vector<1x16x16xf32>
    "tpu.trace_start"() <{level = 10 : i32, message = "blm,bmd->bld"}> : () -> ()
    %cst_148 = arith.constant dense<0.000000e+00> : vector<1x16x16xf32>
    %544 = tpu.matmul %543, %532, %cst_148 {dimension_numbers = #tpu.dot_dimension_numbers<[2], [1], [1], [2], [0, 0, 0, 1, 1, 2], [0], [0]>} : vector<1x16x16xf32>, vector<1x16x16xf32>, vector<1x16x16xf32> -> vector<1x16x16xf32>
    "tpu.trace_stop"() : () -> ()
    %545 = vector.extract_strided_slice %482 {offsets = [0, 0, 64], sizes = [1, 16, 16], strides = [1, 1, 1]} : vector<1x16x128xf32> to vector<1x16x16xf32>
    %546 = vector.extract_strided_slice %483 {offsets = [0, 0, 64], sizes = [1, 16, 16], strides = [1, 1, 1]} : vector<1x16x128xf32> to vector<1x16x16xf32>
    %547 = vector.extract_strided_slice %484 {offsets = [0, 0, 64], sizes = [1, 16, 16], strides = [1, 1, 1]} : vector<1x16x128xf32> to vector<1x16x16xf32>
    "tpu.trace_start"() <{level = 10 : i32, message = "bld,bmd->blm"}> : () -> ()
    %cst_149 = arith.constant dense<0.000000e+00> : vector<1x16x16xf32>
    %548 = tpu.matmul %545, %546, %cst_149 {dimension_numbers = #tpu.dot_dimension_numbers<[2], [2], [1], [1], [0, 0, 0, 1, 1, 1], [0], [0]>} : vector<1x16x16xf32>, vector<1x16x16xf32>, vector<1x16x16xf32> -> vector<1x16x16xf32>
    "tpu.trace_stop"() : () -> ()
    %cst_150 = arith.constant dense<0xFF800000> : vector<1x16xf32>
    %549 = vector.multi_reduction <maximumf>, %548, %cst_150 [2] : vector<1x16x16xf32> to vector<1x16xf32>
    %550 = vector.shape_cast %549 : vector<1x16xf32> to vector<1x16x1xf32>
    %551 = vector.broadcast %550 : vector<1x16x1xf32> to vector<1x16x16xf32>
    %552 = arith.subf %548, %551 : vector<1x16x16xf32>
    %553 = math.exp %552 : vector<1x16x16xf32>
    %cst_151 = arith.constant dense<0.000000e+00> : vector<1x16xf32>
    %554 = vector.multi_reduction <add>, %553, %cst_151 [2] : vector<1x16x16xf32> to vector<1x16xf32>
    %555 = vector.shape_cast %554 : vector<1x16xf32> to vector<1x16x1xf32>
    %556 = tpu.reciprocal %555 {approx = true} : vector<1x16x1xf32> -> vector<1x16x1xf32>
    %557 = vector.broadcast %556 : vector<1x16x1xf32> to vector<1x16x16xf32>
    %558 = arith.mulf %553, %557 : vector<1x16x16xf32>
    "tpu.trace_start"() <{level = 10 : i32, message = "blm,bmd->bld"}> : () -> ()
    %cst_152 = arith.constant dense<0.000000e+00> : vector<1x16x16xf32>
    %559 = tpu.matmul %558, %547, %cst_152 {dimension_numbers = #tpu.dot_dimension_numbers<[2], [1], [1], [2], [0, 0, 0, 1, 1, 2], [0], [0]>} : vector<1x16x16xf32>, vector<1x16x16xf32>, vector<1x16x16xf32> -> vector<1x16x16xf32>
    "tpu.trace_stop"() : () -> ()
    %560 = vector.extract_strided_slice %482 {offsets = [0, 0, 80], sizes = [1, 16, 16], strides = [1, 1, 1]} : vector<1x16x128xf32> to vector<1x16x16xf32>
    %561 = vector.extract_strided_slice %483 {offsets = [0, 0, 80], sizes = [1, 16, 16], strides = [1, 1, 1]} : vector<1x16x128xf32> to vector<1x16x16xf32>
    %562 = vector.extract_strided_slice %484 {offsets = [0, 0, 80], sizes = [1, 16, 16], strides = [1, 1, 1]} : vector<1x16x128xf32> to vector<1x16x16xf32>
    "tpu.trace_start"() <{level = 10 : i32, message = "bld,bmd->blm"}> : () -> ()
    %cst_153 = arith.constant dense<0.000000e+00> : vector<1x16x16xf32>
    %563 = tpu.matmul %560, %561, %cst_153 {dimension_numbers = #tpu.dot_dimension_numbers<[2], [2], [1], [1], [0, 0, 0, 1, 1, 1], [0], [0]>} : vector<1x16x16xf32>, vector<1x16x16xf32>, vector<1x16x16xf32> -> vector<1x16x16xf32>
    "tpu.trace_stop"() : () -> ()
    %cst_154 = arith.constant dense<0xFF800000> : vector<1x16xf32>
    %564 = vector.multi_reduction <maximumf>, %563, %cst_154 [2] : vector<1x16x16xf32> to vector<1x16xf32>
    %565 = vector.shape_cast %564 : vector<1x16xf32> to vector<1x16x1xf32>
    %566 = vector.broadcast %565 : vector<1x16x1xf32> to vector<1x16x16xf32>
    %567 = arith.subf %563, %566 : vector<1x16x16xf32>
    %568 = math.exp %567 : vector<1x16x16xf32>
    %cst_155 = arith.constant dense<0.000000e+00> : vector<1x16xf32>
    %569 = vector.multi_reduction <add>, %568, %cst_155 [2] : vector<1x16x16xf32> to vector<1x16xf32>
    %570 = vector.shape_cast %569 : vector<1x16xf32> to vector<1x16x1xf32>
    %571 = tpu.reciprocal %570 {approx = true} : vector<1x16x1xf32> -> vector<1x16x1xf32>
    %572 = vector.broadcast %571 : vector<1x16x1xf32> to vector<1x16x16xf32>
    %573 = arith.mulf %568, %572 : vector<1x16x16xf32>
    "tpu.trace_start"() <{level = 10 : i32, message = "blm,bmd->bld"}> : () -> ()
    %cst_156 = arith.constant dense<0.000000e+00> : vector<1x16x16xf32>
    %574 = tpu.matmul %573, %562, %cst_156 {dimension_numbers = #tpu.dot_dimension_numbers<[2], [1], [1], [2], [0, 0, 0, 1, 1, 2], [0], [0]>} : vector<1x16x16xf32>, vector<1x16x16xf32>, vector<1x16x16xf32> -> vector<1x16x16xf32>
    "tpu.trace_stop"() : () -> ()
    %575 = vector.extract_strided_slice %482 {offsets = [0, 0, 96], sizes = [1, 16, 16], strides = [1, 1, 1]} : vector<1x16x128xf32> to vector<1x16x16xf32>
    %576 = vector.extract_strided_slice %483 {offsets = [0, 0, 96], sizes = [1, 16, 16], strides = [1, 1, 1]} : vector<1x16x128xf32> to vector<1x16x16xf32>
    %577 = vector.extract_strided_slice %484 {offsets = [0, 0, 96], sizes = [1, 16, 16], strides = [1, 1, 1]} : vector<1x16x128xf32> to vector<1x16x16xf32>
    "tpu.trace_start"() <{level = 10 : i32, message = "bld,bmd->blm"}> : () -> ()
    %cst_157 = arith.constant dense<0.000000e+00> : vector<1x16x16xf32>
    %578 = tpu.matmul %575, %576, %cst_157 {dimension_numbers = #tpu.dot_dimension_numbers<[2], [2], [1], [1], [0, 0, 0, 1, 1, 1], [0], [0]>} : vector<1x16x16xf32>, vector<1x16x16xf32>, vector<1x16x16xf32> -> vector<1x16x16xf32>
    "tpu.trace_stop"() : () -> ()
    %cst_158 = arith.constant dense<0xFF800000> : vector<1x16xf32>
    %579 = vector.multi_reduction <maximumf>, %578, %cst_158 [2] : vector<1x16x16xf32> to vector<1x16xf32>
    %580 = vector.shape_cast %579 : vector<1x16xf32> to vector<1x16x1xf32>
    %581 = vector.broadcast %580 : vector<1x16x1xf32> to vector<1x16x16xf32>
    %582 = arith.subf %578, %581 : vector<1x16x16xf32>
    %583 = math.exp %582 : vector<1x16x16xf32>
    %cst_159 = arith.constant dense<0.000000e+00> : vector<1x16xf32>
    %584 = vector.multi_reduction <add>, %583, %cst_159 [2] : vector<1x16x16xf32> to vector<1x16xf32>
    %585 = vector.shape_cast %584 : vector<1x16xf32> to vector<1x16x1xf32>
    %586 = tpu.reciprocal %585 {approx = true} : vector<1x16x1xf32> -> vector<1x16x1xf32>
    %587 = vector.broadcast %586 : vector<1x16x1xf32> to vector<1x16x16xf32>
    %588 = arith.mulf %583, %587 : vector<1x16x16xf32>
    "tpu.trace_start"() <{level = 10 : i32, message = "blm,bmd->bld"}> : () -> ()
    %cst_160 = arith.constant dense<0.000000e+00> : vector<1x16x16xf32>
    %589 = tpu.matmul %588, %577, %cst_160 {dimension_numbers = #tpu.dot_dimension_numbers<[2], [1], [1], [2], [0, 0, 0, 1, 1, 2], [0], [0]>} : vector<1x16x16xf32>, vector<1x16x16xf32>, vector<1x16x16xf32> -> vector<1x16x16xf32>
    "tpu.trace_stop"() : () -> ()
    %590 = vector.extract_strided_slice %482 {offsets = [0, 0, 112], sizes = [1, 16, 16], strides = [1, 1, 1]} : vector<1x16x128xf32> to vector<1x16x16xf32>
    %591 = vector.extract_strided_slice %483 {offsets = [0, 0, 112], sizes = [1, 16, 16], strides = [1, 1, 1]} : vector<1x16x128xf32> to vector<1x16x16xf32>
    %592 = vector.extract_strided_slice %484 {offsets = [0, 0, 112], sizes = [1, 16, 16], strides = [1, 1, 1]} : vector<1x16x128xf32> to vector<1x16x16xf32>
    "tpu.trace_start"() <{level = 10 : i32, message = "bld,bmd->blm"}> : () -> ()
    %cst_161 = arith.constant dense<0.000000e+00> : vector<1x16x16xf32>
    %593 = tpu.matmul %590, %591, %cst_161 {dimension_numbers = #tpu.dot_dimension_numbers<[2], [2], [1], [1], [0, 0, 0, 1, 1, 1], [0], [0]>} : vector<1x16x16xf32>, vector<1x16x16xf32>, vector<1x16x16xf32> -> vector<1x16x16xf32>
    "tpu.trace_stop"() : () -> ()
    %cst_162 = arith.constant dense<0xFF800000> : vector<1x16xf32>
    %594 = vector.multi_reduction <maximumf>, %593, %cst_162 [2] : vector<1x16x16xf32> to vector<1x16xf32>
    %595 = vector.shape_cast %594 : vector<1x16xf32> to vector<1x16x1xf32>
    %596 = vector.broadcast %595 : vector<1x16x1xf32> to vector<1x16x16xf32>
    %597 = arith.subf %593, %596 : vector<1x16x16xf32>
    %598 = math.exp %597 : vector<1x16x16xf32>
    %cst_163 = arith.constant dense<0.000000e+00> : vector<1x16xf32>
    %599 = vector.multi_reduction <add>, %598, %cst_163 [2] : vector<1x16x16xf32> to vector<1x16xf32>
    %600 = vector.shape_cast %599 : vector<1x16xf32> to vector<1x16x1xf32>
    %601 = tpu.reciprocal %600 {approx = true} : vector<1x16x1xf32> -> vector<1x16x1xf32>
    %602 = vector.broadcast %601 : vector<1x16x1xf32> to vector<1x16x16xf32>
    %603 = arith.mulf %598, %602 : vector<1x16x16xf32>
    "tpu.trace_start"() <{level = 10 : i32, message = "blm,bmd->bld"}> : () -> ()
    %cst_164 = arith.constant dense<0.000000e+00> : vector<1x16x16xf32>
    %604 = tpu.matmul %603, %592, %cst_164 {dimension_numbers = #tpu.dot_dimension_numbers<[2], [1], [1], [2], [0, 0, 0, 1, 1, 2], [0], [0]>} : vector<1x16x16xf32>, vector<1x16x16xf32>, vector<1x16x16xf32> -> vector<1x16x16xf32>
    "tpu.trace_stop"() : () -> ()
    %605 = tpu.concatenate %499, %514, %529, %544, %559, %574, %589, %604 in 2 : vector<1x16x16xf32>, vector<1x16x16xf32>, vector<1x16x16xf32>, vector<1x16x16xf32>, vector<1x16x16xf32>, vector<1x16x16xf32>, vector<1x16x16xf32>, vector<1x16x16xf32> -> vector<1x16x128xf32>
    %606 = vector.shape_cast %605 : vector<1x16x128xf32> to vector<1x8x2x128xf32>
    %607 = arith.addf %606, %479 : vector<1x8x2x128xf32>
    %608 = vector.extract_strided_slice %1 {offsets = [0, 0, 6, 0], sizes = [1, 8, 2, 128], strides = [1, 1, 1, 1]} : vector<1x8x8x128xf32> to vector<1x8x2x128xf32>
    %609 = vector.extract_strided_slice %3 {offsets = [0, 0, 6, 0], sizes = [1, 8, 2, 128], strides = [1, 1, 1, 1]} : vector<1x8x8x128xf32> to vector<1x8x2x128xf32>
    %610 = vector.extract_strided_slice %5 {offsets = [0, 0, 6, 0], sizes = [1, 8, 2, 128], strides = [1, 1, 1, 1]} : vector<1x8x8x128xf32> to vector<1x8x2x128xf32>
    %611 = tpu.concatenate %6, %610, %6 in 1 : vector<1x1x2x128xf32>, vector<1x8x2x128xf32>, vector<1x1x2x128xf32> -> vector<1x10x2x128xf32>
    %612 = tpu.concatenate %7, %611, %7 in 2 : vector<1x10x1x128xf32>, vector<1x10x2x128xf32>, vector<1x10x1x128xf32> -> vector<1x10x4x128xf32>
    %cst_165 = arith.constant 0.000000e+00 : f32
    %613 = vector.broadcast %cst_165 : f32 to vector<1x8x2x128xf32>
    %c0_166 = arith.constant 0 : index
    %c0_167 = arith.constant 0 : index
    %614 = vector.load %arg2[%c0_166, %c0_167] : memref<9x128xf32, #tpu.memory_space<vmem>>, vector<1x128xf32>
    %615 = vector.shape_cast %614 : vector<1x128xf32> to vector<128xf32>
    %616 = vector.shape_cast %615 : vector<128xf32> to vector<1x1x1x128xf32>
    %617 = vector.extract_strided_slice %612 {offsets = [0, 0, 0, 0], sizes = [1, 8, 2, 128], strides = [1, 1, 1, 1]} : vector<1x10x4x128xf32> to vector<1x8x2x128xf32>
    %618 = vector.broadcast %616 : vector<1x1x1x128xf32> to vector<1x8x2x128xf32>
    %619 = arith.mulf %617, %618 : vector<1x8x2x128xf32>
    %620 = arith.addf %613, %619 : vector<1x8x2x128xf32>
    %c1_168 = arith.constant 1 : index
    %c0_169 = arith.constant 0 : index
    %621 = vector.load %arg2[%c1_168, %c0_169] : memref<9x128xf32, #tpu.memory_space<vmem>>, vector<1x128xf32>
    %622 = vector.shape_cast %621 : vector<1x128xf32> to vector<128xf32>
    %623 = vector.shape_cast %622 : vector<128xf32> to vector<1x1x1x128xf32>
    %624 = vector.extract_strided_slice %612 {offsets = [0, 0, 1, 0], sizes = [1, 8, 2, 128], strides = [1, 1, 1, 1]} : vector<1x10x4x128xf32> to vector<1x8x2x128xf32>
    %625 = vector.broadcast %623 : vector<1x1x1x128xf32> to vector<1x8x2x128xf32>
    %626 = arith.mulf %624, %625 : vector<1x8x2x128xf32>
    %627 = arith.addf %620, %626 : vector<1x8x2x128xf32>
    %c2_170 = arith.constant 2 : index
    %c0_171 = arith.constant 0 : index
    %628 = vector.load %arg2[%c2_170, %c0_171] : memref<9x128xf32, #tpu.memory_space<vmem>>, vector<1x128xf32>
    %629 = vector.shape_cast %628 : vector<1x128xf32> to vector<128xf32>
    %630 = vector.shape_cast %629 : vector<128xf32> to vector<1x1x1x128xf32>
    %631 = vector.extract_strided_slice %612 {offsets = [0, 0, 2, 0], sizes = [1, 8, 2, 128], strides = [1, 1, 1, 1]} : vector<1x10x4x128xf32> to vector<1x8x2x128xf32>
    %632 = vector.broadcast %630 : vector<1x1x1x128xf32> to vector<1x8x2x128xf32>
    %633 = arith.mulf %631, %632 : vector<1x8x2x128xf32>
    %634 = arith.addf %627, %633 : vector<1x8x2x128xf32>
    %c3_172 = arith.constant 3 : index
    %c0_173 = arith.constant 0 : index
    %635 = vector.load %arg2[%c3_172, %c0_173] : memref<9x128xf32, #tpu.memory_space<vmem>>, vector<1x128xf32>
    %636 = vector.shape_cast %635 : vector<1x128xf32> to vector<128xf32>
    %637 = vector.shape_cast %636 : vector<128xf32> to vector<1x1x1x128xf32>
    %638 = vector.extract_strided_slice %612 {offsets = [0, 1, 0, 0], sizes = [1, 8, 2, 128], strides = [1, 1, 1, 1]} : vector<1x10x4x128xf32> to vector<1x8x2x128xf32>
    %639 = vector.broadcast %637 : vector<1x1x1x128xf32> to vector<1x8x2x128xf32>
    %640 = arith.mulf %638, %639 : vector<1x8x2x128xf32>
    %641 = arith.addf %634, %640 : vector<1x8x2x128xf32>
    %c4_174 = arith.constant 4 : index
    %c0_175 = arith.constant 0 : index
    %642 = vector.load %arg2[%c4_174, %c0_175] : memref<9x128xf32, #tpu.memory_space<vmem>>, vector<1x128xf32>
    %643 = vector.shape_cast %642 : vector<1x128xf32> to vector<128xf32>
    %644 = vector.shape_cast %643 : vector<128xf32> to vector<1x1x1x128xf32>
    %645 = vector.extract_strided_slice %612 {offsets = [0, 1, 1, 0], sizes = [1, 8, 2, 128], strides = [1, 1, 1, 1]} : vector<1x10x4x128xf32> to vector<1x8x2x128xf32>
    %646 = vector.broadcast %644 : vector<1x1x1x128xf32> to vector<1x8x2x128xf32>
    %647 = arith.mulf %645, %646 : vector<1x8x2x128xf32>
    %648 = arith.addf %641, %647 : vector<1x8x2x128xf32>
    %c5_176 = arith.constant 5 : index
    %c0_177 = arith.constant 0 : index
    %649 = vector.load %arg2[%c5_176, %c0_177] : memref<9x128xf32, #tpu.memory_space<vmem>>, vector<1x128xf32>
    %650 = vector.shape_cast %649 : vector<1x128xf32> to vector<128xf32>
    %651 = vector.shape_cast %650 : vector<128xf32> to vector<1x1x1x128xf32>
    %652 = vector.extract_strided_slice %612 {offsets = [0, 1, 2, 0], sizes = [1, 8, 2, 128], strides = [1, 1, 1, 1]} : vector<1x10x4x128xf32> to vector<1x8x2x128xf32>
    %653 = vector.broadcast %651 : vector<1x1x1x128xf32> to vector<1x8x2x128xf32>
    %654 = arith.mulf %652, %653 : vector<1x8x2x128xf32>
    %655 = arith.addf %648, %654 : vector<1x8x2x128xf32>
    %c6_178 = arith.constant 6 : index
    %c0_179 = arith.constant 0 : index
    %656 = vector.load %arg2[%c6_178, %c0_179] : memref<9x128xf32, #tpu.memory_space<vmem>>, vector<1x128xf32>
    %657 = vector.shape_cast %656 : vector<1x128xf32> to vector<128xf32>
    %658 = vector.shape_cast %657 : vector<128xf32> to vector<1x1x1x128xf32>
    %659 = vector.extract_strided_slice %612 {offsets = [0, 2, 0, 0], sizes = [1, 8, 2, 128], strides = [1, 1, 1, 1]} : vector<1x10x4x128xf32> to vector<1x8x2x128xf32>
    %660 = vector.broadcast %658 : vector<1x1x1x128xf32> to vector<1x8x2x128xf32>
    %661 = arith.mulf %659, %660 : vector<1x8x2x128xf32>
    %662 = arith.addf %655, %661 : vector<1x8x2x128xf32>
    %c7_180 = arith.constant 7 : index
    %c0_181 = arith.constant 0 : index
    %663 = vector.load %arg2[%c7_180, %c0_181] : memref<9x128xf32, #tpu.memory_space<vmem>>, vector<1x128xf32>
    %664 = vector.shape_cast %663 : vector<1x128xf32> to vector<128xf32>
    %665 = vector.shape_cast %664 : vector<128xf32> to vector<1x1x1x128xf32>
    %666 = vector.extract_strided_slice %612 {offsets = [0, 2, 1, 0], sizes = [1, 8, 2, 128], strides = [1, 1, 1, 1]} : vector<1x10x4x128xf32> to vector<1x8x2x128xf32>
    %667 = vector.broadcast %665 : vector<1x1x1x128xf32> to vector<1x8x2x128xf32>
    %668 = arith.mulf %666, %667 : vector<1x8x2x128xf32>
    %669 = arith.addf %662, %668 : vector<1x8x2x128xf32>
    %c8_182 = arith.constant 8 : index
    %c0_183 = arith.constant 0 : index
    %670 = vector.load %arg2[%c8_182, %c0_183] : memref<9x128xf32, #tpu.memory_space<vmem>>, vector<1x128xf32>
    %671 = vector.shape_cast %670 : vector<1x128xf32> to vector<128xf32>
    %672 = vector.shape_cast %671 : vector<128xf32> to vector<1x1x1x128xf32>
    %673 = vector.extract_strided_slice %612 {offsets = [0, 2, 2, 0], sizes = [1, 8, 2, 128], strides = [1, 1, 1, 1]} : vector<1x10x4x128xf32> to vector<1x8x2x128xf32>
    %674 = vector.broadcast %672 : vector<1x1x1x128xf32> to vector<1x8x2x128xf32>
    %675 = arith.mulf %673, %674 : vector<1x8x2x128xf32>
    %676 = arith.addf %669, %675 : vector<1x8x2x128xf32>
    %677 = vector.broadcast %10 : vector<1x1x1x128xf32> to vector<1x8x2x128xf32>
    %678 = arith.addf %676, %677 : vector<1x8x2x128xf32>
    %679 = vector.shape_cast %608 : vector<1x8x2x128xf32> to vector<1x16x128xf32>
    %cst_184 = arith.constant 2.500000e-01 : f32
    %680 = vector.broadcast %cst_184 : f32 to vector<1x16x128xf32>
    %681 = arith.mulf %679, %680 : vector<1x16x128xf32>
    %682 = vector.shape_cast %609 : vector<1x8x2x128xf32> to vector<1x16x128xf32>
    %683 = vector.shape_cast %610 : vector<1x8x2x128xf32> to vector<1x16x128xf32>
    %684 = vector.extract_strided_slice %681 {offsets = [0, 0, 0], sizes = [1, 16, 16], strides = [1, 1, 1]} : vector<1x16x128xf32> to vector<1x16x16xf32>
    %685 = vector.extract_strided_slice %682 {offsets = [0, 0, 0], sizes = [1, 16, 16], strides = [1, 1, 1]} : vector<1x16x128xf32> to vector<1x16x16xf32>
    %686 = vector.extract_strided_slice %683 {offsets = [0, 0, 0], sizes = [1, 16, 16], strides = [1, 1, 1]} : vector<1x16x128xf32> to vector<1x16x16xf32>
    "tpu.trace_start"() <{level = 10 : i32, message = "bld,bmd->blm"}> : () -> ()
    %cst_185 = arith.constant dense<0.000000e+00> : vector<1x16x16xf32>
    %687 = tpu.matmul %684, %685, %cst_185 {dimension_numbers = #tpu.dot_dimension_numbers<[2], [2], [1], [1], [0, 0, 0, 1, 1, 1], [0], [0]>} : vector<1x16x16xf32>, vector<1x16x16xf32>, vector<1x16x16xf32> -> vector<1x16x16xf32>
    "tpu.trace_stop"() : () -> ()
    %cst_186 = arith.constant dense<0xFF800000> : vector<1x16xf32>
    %688 = vector.multi_reduction <maximumf>, %687, %cst_186 [2] : vector<1x16x16xf32> to vector<1x16xf32>
    %689 = vector.shape_cast %688 : vector<1x16xf32> to vector<1x16x1xf32>
    %690 = vector.broadcast %689 : vector<1x16x1xf32> to vector<1x16x16xf32>
    %691 = arith.subf %687, %690 : vector<1x16x16xf32>
    %692 = math.exp %691 : vector<1x16x16xf32>
    %cst_187 = arith.constant dense<0.000000e+00> : vector<1x16xf32>
    %693 = vector.multi_reduction <add>, %692, %cst_187 [2] : vector<1x16x16xf32> to vector<1x16xf32>
    %694 = vector.shape_cast %693 : vector<1x16xf32> to vector<1x16x1xf32>
    %695 = tpu.reciprocal %694 {approx = true} : vector<1x16x1xf32> -> vector<1x16x1xf32>
    %696 = vector.broadcast %695 : vector<1x16x1xf32> to vector<1x16x16xf32>
    %697 = arith.mulf %692, %696 : vector<1x16x16xf32>
    "tpu.trace_start"() <{level = 10 : i32, message = "blm,bmd->bld"}> : () -> ()
    %cst_188 = arith.constant dense<0.000000e+00> : vector<1x16x16xf32>
    %698 = tpu.matmul %697, %686, %cst_188 {dimension_numbers = #tpu.dot_dimension_numbers<[2], [1], [1], [2], [0, 0, 0, 1, 1, 2], [0], [0]>} : vector<1x16x16xf32>, vector<1x16x16xf32>, vector<1x16x16xf32> -> vector<1x16x16xf32>
    "tpu.trace_stop"() : () -> ()
    %699 = vector.extract_strided_slice %681 {offsets = [0, 0, 16], sizes = [1, 16, 16], strides = [1, 1, 1]} : vector<1x16x128xf32> to vector<1x16x16xf32>
    %700 = vector.extract_strided_slice %682 {offsets = [0, 0, 16], sizes = [1, 16, 16], strides = [1, 1, 1]} : vector<1x16x128xf32> to vector<1x16x16xf32>
    %701 = vector.extract_strided_slice %683 {offsets = [0, 0, 16], sizes = [1, 16, 16], strides = [1, 1, 1]} : vector<1x16x128xf32> to vector<1x16x16xf32>
    "tpu.trace_start"() <{level = 10 : i32, message = "bld,bmd->blm"}> : () -> ()
    %cst_189 = arith.constant dense<0.000000e+00> : vector<1x16x16xf32>
    %702 = tpu.matmul %699, %700, %cst_189 {dimension_numbers = #tpu.dot_dimension_numbers<[2], [2], [1], [1], [0, 0, 0, 1, 1, 1], [0], [0]>} : vector<1x16x16xf32>, vector<1x16x16xf32>, vector<1x16x16xf32> -> vector<1x16x16xf32>
    "tpu.trace_stop"() : () -> ()
    %cst_190 = arith.constant dense<0xFF800000> : vector<1x16xf32>
    %703 = vector.multi_reduction <maximumf>, %702, %cst_190 [2] : vector<1x16x16xf32> to vector<1x16xf32>
    %704 = vector.shape_cast %703 : vector<1x16xf32> to vector<1x16x1xf32>
    %705 = vector.broadcast %704 : vector<1x16x1xf32> to vector<1x16x16xf32>
    %706 = arith.subf %702, %705 : vector<1x16x16xf32>
    %707 = math.exp %706 : vector<1x16x16xf32>
    %cst_191 = arith.constant dense<0.000000e+00> : vector<1x16xf32>
    %708 = vector.multi_reduction <add>, %707, %cst_191 [2] : vector<1x16x16xf32> to vector<1x16xf32>
    %709 = vector.shape_cast %708 : vector<1x16xf32> to vector<1x16x1xf32>
    %710 = tpu.reciprocal %709 {approx = true} : vector<1x16x1xf32> -> vector<1x16x1xf32>
    %711 = vector.broadcast %710 : vector<1x16x1xf32> to vector<1x16x16xf32>
    %712 = arith.mulf %707, %711 : vector<1x16x16xf32>
    "tpu.trace_start"() <{level = 10 : i32, message = "blm,bmd->bld"}> : () -> ()
    %cst_192 = arith.constant dense<0.000000e+00> : vector<1x16x16xf32>
    %713 = tpu.matmul %712, %701, %cst_192 {dimension_numbers = #tpu.dot_dimension_numbers<[2], [1], [1], [2], [0, 0, 0, 1, 1, 2], [0], [0]>} : vector<1x16x16xf32>, vector<1x16x16xf32>, vector<1x16x16xf32> -> vector<1x16x16xf32>
    "tpu.trace_stop"() : () -> ()
    %714 = vector.extract_strided_slice %681 {offsets = [0, 0, 32], sizes = [1, 16, 16], strides = [1, 1, 1]} : vector<1x16x128xf32> to vector<1x16x16xf32>
    %715 = vector.extract_strided_slice %682 {offsets = [0, 0, 32], sizes = [1, 16, 16], strides = [1, 1, 1]} : vector<1x16x128xf32> to vector<1x16x16xf32>
    %716 = vector.extract_strided_slice %683 {offsets = [0, 0, 32], sizes = [1, 16, 16], strides = [1, 1, 1]} : vector<1x16x128xf32> to vector<1x16x16xf32>
    "tpu.trace_start"() <{level = 10 : i32, message = "bld,bmd->blm"}> : () -> ()
    %cst_193 = arith.constant dense<0.000000e+00> : vector<1x16x16xf32>
    %717 = tpu.matmul %714, %715, %cst_193 {dimension_numbers = #tpu.dot_dimension_numbers<[2], [2], [1], [1], [0, 0, 0, 1, 1, 1], [0], [0]>} : vector<1x16x16xf32>, vector<1x16x16xf32>, vector<1x16x16xf32> -> vector<1x16x16xf32>
    "tpu.trace_stop"() : () -> ()
    %cst_194 = arith.constant dense<0xFF800000> : vector<1x16xf32>
    %718 = vector.multi_reduction <maximumf>, %717, %cst_194 [2] : vector<1x16x16xf32> to vector<1x16xf32>
    %719 = vector.shape_cast %718 : vector<1x16xf32> to vector<1x16x1xf32>
    %720 = vector.broadcast %719 : vector<1x16x1xf32> to vector<1x16x16xf32>
    %721 = arith.subf %717, %720 : vector<1x16x16xf32>
    %722 = math.exp %721 : vector<1x16x16xf32>
    %cst_195 = arith.constant dense<0.000000e+00> : vector<1x16xf32>
    %723 = vector.multi_reduction <add>, %722, %cst_195 [2] : vector<1x16x16xf32> to vector<1x16xf32>
    %724 = vector.shape_cast %723 : vector<1x16xf32> to vector<1x16x1xf32>
    %725 = tpu.reciprocal %724 {approx = true} : vector<1x16x1xf32> -> vector<1x16x1xf32>
    %726 = vector.broadcast %725 : vector<1x16x1xf32> to vector<1x16x16xf32>
    %727 = arith.mulf %722, %726 : vector<1x16x16xf32>
    "tpu.trace_start"() <{level = 10 : i32, message = "blm,bmd->bld"}> : () -> ()
    %cst_196 = arith.constant dense<0.000000e+00> : vector<1x16x16xf32>
    %728 = tpu.matmul %727, %716, %cst_196 {dimension_numbers = #tpu.dot_dimension_numbers<[2], [1], [1], [2], [0, 0, 0, 1, 1, 2], [0], [0]>} : vector<1x16x16xf32>, vector<1x16x16xf32>, vector<1x16x16xf32> -> vector<1x16x16xf32>
    "tpu.trace_stop"() : () -> ()
    %729 = vector.extract_strided_slice %681 {offsets = [0, 0, 48], sizes = [1, 16, 16], strides = [1, 1, 1]} : vector<1x16x128xf32> to vector<1x16x16xf32>
    %730 = vector.extract_strided_slice %682 {offsets = [0, 0, 48], sizes = [1, 16, 16], strides = [1, 1, 1]} : vector<1x16x128xf32> to vector<1x16x16xf32>
    %731 = vector.extract_strided_slice %683 {offsets = [0, 0, 48], sizes = [1, 16, 16], strides = [1, 1, 1]} : vector<1x16x128xf32> to vector<1x16x16xf32>
    "tpu.trace_start"() <{level = 10 : i32, message = "bld,bmd->blm"}> : () -> ()
    %cst_197 = arith.constant dense<0.000000e+00> : vector<1x16x16xf32>
    %732 = tpu.matmul %729, %730, %cst_197 {dimension_numbers = #tpu.dot_dimension_numbers<[2], [2], [1], [1], [0, 0, 0, 1, 1, 1], [0], [0]>} : vector<1x16x16xf32>, vector<1x16x16xf32>, vector<1x16x16xf32> -> vector<1x16x16xf32>
    "tpu.trace_stop"() : () -> ()
    %cst_198 = arith.constant dense<0xFF800000> : vector<1x16xf32>
    %733 = vector.multi_reduction <maximumf>, %732, %cst_198 [2] : vector<1x16x16xf32> to vector<1x16xf32>
    %734 = vector.shape_cast %733 : vector<1x16xf32> to vector<1x16x1xf32>
    %735 = vector.broadcast %734 : vector<1x16x1xf32> to vector<1x16x16xf32>
    %736 = arith.subf %732, %735 : vector<1x16x16xf32>
    %737 = math.exp %736 : vector<1x16x16xf32>
    %cst_199 = arith.constant dense<0.000000e+00> : vector<1x16xf32>
    %738 = vector.multi_reduction <add>, %737, %cst_199 [2] : vector<1x16x16xf32> to vector<1x16xf32>
    %739 = vector.shape_cast %738 : vector<1x16xf32> to vector<1x16x1xf32>
    %740 = tpu.reciprocal %739 {approx = true} : vector<1x16x1xf32> -> vector<1x16x1xf32>
    %741 = vector.broadcast %740 : vector<1x16x1xf32> to vector<1x16x16xf32>
    %742 = arith.mulf %737, %741 : vector<1x16x16xf32>
    "tpu.trace_start"() <{level = 10 : i32, message = "blm,bmd->bld"}> : () -> ()
    %cst_200 = arith.constant dense<0.000000e+00> : vector<1x16x16xf32>
    %743 = tpu.matmul %742, %731, %cst_200 {dimension_numbers = #tpu.dot_dimension_numbers<[2], [1], [1], [2], [0, 0, 0, 1, 1, 2], [0], [0]>} : vector<1x16x16xf32>, vector<1x16x16xf32>, vector<1x16x16xf32> -> vector<1x16x16xf32>
    "tpu.trace_stop"() : () -> ()
    %744 = vector.extract_strided_slice %681 {offsets = [0, 0, 64], sizes = [1, 16, 16], strides = [1, 1, 1]} : vector<1x16x128xf32> to vector<1x16x16xf32>
    %745 = vector.extract_strided_slice %682 {offsets = [0, 0, 64], sizes = [1, 16, 16], strides = [1, 1, 1]} : vector<1x16x128xf32> to vector<1x16x16xf32>
    %746 = vector.extract_strided_slice %683 {offsets = [0, 0, 64], sizes = [1, 16, 16], strides = [1, 1, 1]} : vector<1x16x128xf32> to vector<1x16x16xf32>
    "tpu.trace_start"() <{level = 10 : i32, message = "bld,bmd->blm"}> : () -> ()
    %cst_201 = arith.constant dense<0.000000e+00> : vector<1x16x16xf32>
    %747 = tpu.matmul %744, %745, %cst_201 {dimension_numbers = #tpu.dot_dimension_numbers<[2], [2], [1], [1], [0, 0, 0, 1, 1, 1], [0], [0]>} : vector<1x16x16xf32>, vector<1x16x16xf32>, vector<1x16x16xf32> -> vector<1x16x16xf32>
    "tpu.trace_stop"() : () -> ()
    %cst_202 = arith.constant dense<0xFF800000> : vector<1x16xf32>
    %748 = vector.multi_reduction <maximumf>, %747, %cst_202 [2] : vector<1x16x16xf32> to vector<1x16xf32>
    %749 = vector.shape_cast %748 : vector<1x16xf32> to vector<1x16x1xf32>
    %750 = vector.broadcast %749 : vector<1x16x1xf32> to vector<1x16x16xf32>
    %751 = arith.subf %747, %750 : vector<1x16x16xf32>
    %752 = math.exp %751 : vector<1x16x16xf32>
    %cst_203 = arith.constant dense<0.000000e+00> : vector<1x16xf32>
    %753 = vector.multi_reduction <add>, %752, %cst_203 [2] : vector<1x16x16xf32> to vector<1x16xf32>
    %754 = vector.shape_cast %753 : vector<1x16xf32> to vector<1x16x1xf32>
    %755 = tpu.reciprocal %754 {approx = true} : vector<1x16x1xf32> -> vector<1x16x1xf32>
    %756 = vector.broadcast %755 : vector<1x16x1xf32> to vector<1x16x16xf32>
    %757 = arith.mulf %752, %756 : vector<1x16x16xf32>
    "tpu.trace_start"() <{level = 10 : i32, message = "blm,bmd->bld"}> : () -> ()
    %cst_204 = arith.constant dense<0.000000e+00> : vector<1x16x16xf32>
    %758 = tpu.matmul %757, %746, %cst_204 {dimension_numbers = #tpu.dot_dimension_numbers<[2], [1], [1], [2], [0, 0, 0, 1, 1, 2], [0], [0]>} : vector<1x16x16xf32>, vector<1x16x16xf32>, vector<1x16x16xf32> -> vector<1x16x16xf32>
    "tpu.trace_stop"() : () -> ()
    %759 = vector.extract_strided_slice %681 {offsets = [0, 0, 80], sizes = [1, 16, 16], strides = [1, 1, 1]} : vector<1x16x128xf32> to vector<1x16x16xf32>
    %760 = vector.extract_strided_slice %682 {offsets = [0, 0, 80], sizes = [1, 16, 16], strides = [1, 1, 1]} : vector<1x16x128xf32> to vector<1x16x16xf32>
    %761 = vector.extract_strided_slice %683 {offsets = [0, 0, 80], sizes = [1, 16, 16], strides = [1, 1, 1]} : vector<1x16x128xf32> to vector<1x16x16xf32>
    "tpu.trace_start"() <{level = 10 : i32, message = "bld,bmd->blm"}> : () -> ()
    %cst_205 = arith.constant dense<0.000000e+00> : vector<1x16x16xf32>
    %762 = tpu.matmul %759, %760, %cst_205 {dimension_numbers = #tpu.dot_dimension_numbers<[2], [2], [1], [1], [0, 0, 0, 1, 1, 1], [0], [0]>} : vector<1x16x16xf32>, vector<1x16x16xf32>, vector<1x16x16xf32> -> vector<1x16x16xf32>
    "tpu.trace_stop"() : () -> ()
    %cst_206 = arith.constant dense<0xFF800000> : vector<1x16xf32>
    %763 = vector.multi_reduction <maximumf>, %762, %cst_206 [2] : vector<1x16x16xf32> to vector<1x16xf32>
    %764 = vector.shape_cast %763 : vector<1x16xf32> to vector<1x16x1xf32>
    %765 = vector.broadcast %764 : vector<1x16x1xf32> to vector<1x16x16xf32>
    %766 = arith.subf %762, %765 : vector<1x16x16xf32>
    %767 = math.exp %766 : vector<1x16x16xf32>
    %cst_207 = arith.constant dense<0.000000e+00> : vector<1x16xf32>
    %768 = vector.multi_reduction <add>, %767, %cst_207 [2] : vector<1x16x16xf32> to vector<1x16xf32>
    %769 = vector.shape_cast %768 : vector<1x16xf32> to vector<1x16x1xf32>
    %770 = tpu.reciprocal %769 {approx = true} : vector<1x16x1xf32> -> vector<1x16x1xf32>
    %771 = vector.broadcast %770 : vector<1x16x1xf32> to vector<1x16x16xf32>
    %772 = arith.mulf %767, %771 : vector<1x16x16xf32>
    "tpu.trace_start"() <{level = 10 : i32, message = "blm,bmd->bld"}> : () -> ()
    %cst_208 = arith.constant dense<0.000000e+00> : vector<1x16x16xf32>
    %773 = tpu.matmul %772, %761, %cst_208 {dimension_numbers = #tpu.dot_dimension_numbers<[2], [1], [1], [2], [0, 0, 0, 1, 1, 2], [0], [0]>} : vector<1x16x16xf32>, vector<1x16x16xf32>, vector<1x16x16xf32> -> vector<1x16x16xf32>
    "tpu.trace_stop"() : () -> ()
    %774 = vector.extract_strided_slice %681 {offsets = [0, 0, 96], sizes = [1, 16, 16], strides = [1, 1, 1]} : vector<1x16x128xf32> to vector<1x16x16xf32>
    %775 = vector.extract_strided_slice %682 {offsets = [0, 0, 96], sizes = [1, 16, 16], strides = [1, 1, 1]} : vector<1x16x128xf32> to vector<1x16x16xf32>
    %776 = vector.extract_strided_slice %683 {offsets = [0, 0, 96], sizes = [1, 16, 16], strides = [1, 1, 1]} : vector<1x16x128xf32> to vector<1x16x16xf32>
    "tpu.trace_start"() <{level = 10 : i32, message = "bld,bmd->blm"}> : () -> ()
    %cst_209 = arith.constant dense<0.000000e+00> : vector<1x16x16xf32>
    %777 = tpu.matmul %774, %775, %cst_209 {dimension_numbers = #tpu.dot_dimension_numbers<[2], [2], [1], [1], [0, 0, 0, 1, 1, 1], [0], [0]>} : vector<1x16x16xf32>, vector<1x16x16xf32>, vector<1x16x16xf32> -> vector<1x16x16xf32>
    "tpu.trace_stop"() : () -> ()
    %cst_210 = arith.constant dense<0xFF800000> : vector<1x16xf32>
    %778 = vector.multi_reduction <maximumf>, %777, %cst_210 [2] : vector<1x16x16xf32> to vector<1x16xf32>
    %779 = vector.shape_cast %778 : vector<1x16xf32> to vector<1x16x1xf32>
    %780 = vector.broadcast %779 : vector<1x16x1xf32> to vector<1x16x16xf32>
    %781 = arith.subf %777, %780 : vector<1x16x16xf32>
    %782 = math.exp %781 : vector<1x16x16xf32>
    %cst_211 = arith.constant dense<0.000000e+00> : vector<1x16xf32>
    %783 = vector.multi_reduction <add>, %782, %cst_211 [2] : vector<1x16x16xf32> to vector<1x16xf32>
    %784 = vector.shape_cast %783 : vector<1x16xf32> to vector<1x16x1xf32>
    %785 = tpu.reciprocal %784 {approx = true} : vector<1x16x1xf32> -> vector<1x16x1xf32>
    %786 = vector.broadcast %785 : vector<1x16x1xf32> to vector<1x16x16xf32>
    %787 = arith.mulf %782, %786 : vector<1x16x16xf32>
    "tpu.trace_start"() <{level = 10 : i32, message = "blm,bmd->bld"}> : () -> ()
    %cst_212 = arith.constant dense<0.000000e+00> : vector<1x16x16xf32>
    %788 = tpu.matmul %787, %776, %cst_212 {dimension_numbers = #tpu.dot_dimension_numbers<[2], [1], [1], [2], [0, 0, 0, 1, 1, 2], [0], [0]>} : vector<1x16x16xf32>, vector<1x16x16xf32>, vector<1x16x16xf32> -> vector<1x16x16xf32>
    "tpu.trace_stop"() : () -> ()
    %789 = vector.extract_strided_slice %681 {offsets = [0, 0, 112], sizes = [1, 16, 16], strides = [1, 1, 1]} : vector<1x16x128xf32> to vector<1x16x16xf32>
    %790 = vector.extract_strided_slice %682 {offsets = [0, 0, 112], sizes = [1, 16, 16], strides = [1, 1, 1]} : vector<1x16x128xf32> to vector<1x16x16xf32>
    %791 = vector.extract_strided_slice %683 {offsets = [0, 0, 112], sizes = [1, 16, 16], strides = [1, 1, 1]} : vector<1x16x128xf32> to vector<1x16x16xf32>
    "tpu.trace_start"() <{level = 10 : i32, message = "bld,bmd->blm"}> : () -> ()
    %cst_213 = arith.constant dense<0.000000e+00> : vector<1x16x16xf32>
    %792 = tpu.matmul %789, %790, %cst_213 {dimension_numbers = #tpu.dot_dimension_numbers<[2], [2], [1], [1], [0, 0, 0, 1, 1, 1], [0], [0]>} : vector<1x16x16xf32>, vector<1x16x16xf32>, vector<1x16x16xf32> -> vector<1x16x16xf32>
    "tpu.trace_stop"() : () -> ()
    %cst_214 = arith.constant dense<0xFF800000> : vector<1x16xf32>
    %793 = vector.multi_reduction <maximumf>, %792, %cst_214 [2] : vector<1x16x16xf32> to vector<1x16xf32>
    %794 = vector.shape_cast %793 : vector<1x16xf32> to vector<1x16x1xf32>
    %795 = vector.broadcast %794 : vector<1x16x1xf32> to vector<1x16x16xf32>
    %796 = arith.subf %792, %795 : vector<1x16x16xf32>
    %797 = math.exp %796 : vector<1x16x16xf32>
    %cst_215 = arith.constant dense<0.000000e+00> : vector<1x16xf32>
    %798 = vector.multi_reduction <add>, %797, %cst_215 [2] : vector<1x16x16xf32> to vector<1x16xf32>
    %799 = vector.shape_cast %798 : vector<1x16xf32> to vector<1x16x1xf32>
    %800 = tpu.reciprocal %799 {approx = true} : vector<1x16x1xf32> -> vector<1x16x1xf32>
    %801 = vector.broadcast %800 : vector<1x16x1xf32> to vector<1x16x16xf32>
    %802 = arith.mulf %797, %801 : vector<1x16x16xf32>
    "tpu.trace_start"() <{level = 10 : i32, message = "blm,bmd->bld"}> : () -> ()
    %cst_216 = arith.constant dense<0.000000e+00> : vector<1x16x16xf32>
    %803 = tpu.matmul %802, %791, %cst_216 {dimension_numbers = #tpu.dot_dimension_numbers<[2], [1], [1], [2], [0, 0, 0, 1, 1, 2], [0], [0]>} : vector<1x16x16xf32>, vector<1x16x16xf32>, vector<1x16x16xf32> -> vector<1x16x16xf32>
    "tpu.trace_stop"() : () -> ()
    %804 = tpu.concatenate %698, %713, %728, %743, %758, %773, %788, %803 in 2 : vector<1x16x16xf32>, vector<1x16x16xf32>, vector<1x16x16xf32>, vector<1x16x16xf32>, vector<1x16x16xf32>, vector<1x16x16xf32>, vector<1x16x16xf32>, vector<1x16x16xf32> -> vector<1x16x128xf32>
    %805 = vector.shape_cast %804 : vector<1x16x128xf32> to vector<1x8x2x128xf32>
    %806 = arith.addf %805, %678 : vector<1x8x2x128xf32>
    %807 = tpu.concatenate %209, %408, %607, %806 in 2 : vector<1x8x2x128xf32>, vector<1x8x2x128xf32>, vector<1x8x2x128xf32>, vector<1x8x2x128xf32> -> vector<1x8x8x128xf32>
    %c0_217 = arith.constant 0 : index
    %c0_218 = arith.constant 0 : index
    %c0_219 = arith.constant 0 : index
    %c0_220 = arith.constant 0 : index
    %808 = vector.load %arg4[%c0_217, %c0_218, %c0_219, %c0_220] : memref<1x8x8x128xf32, #tpu.memory_space<vmem>>, vector<1x8x8x128xf32>
    tpu.vector_store %arg4[%c0_217, %c0_218, %c0_219, %c0_220], %807 {strides = array<i32>} : memref<1x8x8x128xf32, #tpu.memory_space<vmem>>, vector<1x8x8x128xf32>,
    return
  }
  func.func @transform_0(%arg0: i32) -> (i32, i32, i32, i32, i32) {
    %c0_i32 = arith.constant 0 : i32
    %c0_i32_0 = arith.constant 0 : i32
    %c0_i32_1 = arith.constant 0 : i32
    %c0_i32_2 = arith.constant 0 : i32
    %c0_i32_3 = arith.constant 0 : i32
    return %c0_i32, %arg0, %c0_i32_0, %c0_i32_1, %c0_i32_2 : i32, i32, i32, i32, i32
  }
  func.func @transform_1(%arg0: i32) -> (i32, i32) {
    %c0_i32 = arith.constant 0 : i32
    %c0_i32_0 = arith.constant 0 : i32
    %c0_i32_1 = arith.constant 0 : i32
    return %c0_i32, %c0_i32_0 : i32, i32
  }
  func.func @transform_2(%arg0: i32) -> (i32, i32) {
    %c0_i32 = arith.constant 0 : i32
    %c0_i32_0 = arith.constant 0 : i32
    %c0_i32_1 = arith.constant 0 : i32
    return %c0_i32, %c0_i32_0 : i32, i32
  }
  func.func @transform_3(%arg0: i32) -> (i32, i32, i32, i32) {
    %c0_i32 = arith.constant 0 : i32
    %c0_i32_0 = arith.constant 0 : i32
    %c0_i32_1 = arith.constant 0 : i32
    %c0_i32_2 = arith.constant 0 : i32
    return %arg0, %c0_i32, %c0_i32_0, %c0_i32_1 : i32, i32, i32, i32
  }
}

</mosaic_0001>

<bundles_post_ra>
// kernel: tpu_custom_call.1
= control target key start
LH: loop header
LB: loop body
LE: loop exit
PB: predicated region body
PF: predicated region fallthrough
CT: control target
= control target key end

     0   :  { %8 = vsyncpa [#allocation3], 0  ;;  %s11927_s0 = inlined_call_operand.hbm [shape: f32[3,4,8,8,128], index: 0, kind: input, shape index: {}]   ;;  %s11928_s1 = inlined_call_operand.hbm [shape: f32[9,128], index: 1, kind: input, shape index: {}]   ;;  %s11929_s2 = inlined_call_operand.vmem [shape: f32[1,128], index: 2, kind: input, shape index: {}]   ;;  %s11930_s3 = inlined_call_operand.hbm [shape: f32[4,8,8,128], index: 3, kind: output, shape index: {}]  }
   0x1   :  { %10 = vsyncpa [#allocation3 + $0x1], 0 }
   0x2   :  { %11 = vsyncpa [#allocation6], 0 }
   0x3   :  { %12 = vsyncpa [#allocation4], 0 }
   0x4   :  { %14 = vsyncpa [#allocation4 + $0x1], 0  ;;  %s8122_s12 = smov 0   ;;  %s8124_s13 = smov 0  }
   0x5   :  { %s8126_s14 = smov 0   ;;  %s8128_s15 = smov 0  }
   0x6 LB: > { %s8143_s16 = sadd.s32 4294967295, %s8082_s15   ;;  %s7219_s17 = sadd.s32 4294967294, %s8082_s15   ;;  %s8082_s15 = sphi %s8128_s15, %s12377_s15   ;;  %s8078_s14 = sphi %s8126_s14, %s12376_s14   ;;  %s8074_s13 = sphi %s8124_s13, %s12375_s13   ;;  %s8070_s12 = sphi %s8122_s12, %s12374_s12  }
   0x7   : > { %s8147_s18 = sadd.s32 1, %s8082_s15   ;;  %s27_s19 = sadd.s32 1, %s8078_s14 }
   0x8   : > { %s24_s20 = ssub.s32 %s8082_s15, %s8147_s18  ;;  %p34_p0 = scmp.ne.s32.totalorder %s8078_s14, %s8074_s13 }
   0x9   : > { %p25_p1 = scmp.eq.s32.totalorder %s24_s20, 0  ;;  %p35_p2 = scmp.eq.s32.totalorder %s8082_s15, 0 }
   0xa   : > { %p40_p3 = scmp.ne.s32.totalorder %s8074_s13, %s8070_s12  ;;  %p41_p4 = scmp.eq.s32.totalorder %s8143_s16, 0 }
   0xb   : > { %s8159_s21 = scalar_select %p25_p1, %s8078_s14, %s27_s19  }
   0xc   : > { %p8161_p5 = por %p35_p2, %p34_p0  ;;  %p8167_p6 = por %p41_p4, %p40_p3 }
   0xd   : > { %p106_p7 = scmp.eq.s32.totalorder %s8143_s16, 3  ;;  %p112_p8 = scmp.eq.s32.totalorder %s7219_s17, 3 }
   0xe   : > { %p7220_p9 = scmp.ge.s32.totalorder %s8082_s15, 1  ;;  %p119_p10 = scmp.lt.s32.totalorder %s8082_s15, 5 }
   0xf   : > { %p8174_p11 = por %p106_p7, %p34_p0  ;;  %p8178_p12 = por %p112_p8, %p40_p3 }
  0x10   : > { %p8182_p13 = pnand %p7220_p9, %p119_p10  ;;  %s130_s29 = sshll.u32 %s11928_s1, 4  ;;  %s131_s29 = int_to_ptr.hbm [resolvable:$true] %s130_s29 }
  0x11   : > { %s8084_s30 = smov [#allocation5]   ;;  %s8085_s5 = smov 128  }
  0x12   : > { %p7486_p1 = pneg %p8182_p13  ;;  %s132_s4 = sshll.u32 %s8084_s30, 4  ;;  %s133_s4 = int_to_ptr.vmem [resolvable:$true] %s132_s4 }
  0x13   : > { %s8086_s6 = smov 8   ;;  %p7222_p2 = scmp.ge.s32.totalorder %s8082_s15, 4 }
  0x14   : > { %p7487_p0 = pnand %p7486_p1, %p41_p4 }
  0x15   : > { %145 = sbr.rel (%p7222_p2) target bundleno = 40 (0x28), region = 24 }
  0x16   : > { %7489 = dma.hbm_to_vmem [thread:$0]  (!%p7487_p0), %s131_s29, 256, %s133_s4, [#allocation6], %s8085_s5, %s8085_s5, %s8086_s6  }
  0x1a   : > { %s149_s7 = sand.u32 1, %s8078_s14   ;;  %s7467_s8 = sshll.u32 %s8082_s15, 6 }
  0x1b   : > { %s7469_s9 = smul.u32 192, %s149_s7  ;;  %s158_s17 = scalar_lea.hbm %s11927_s0, %s7467_s8 }
  0x1c   : > { %s171_s19 = sshll.u32 %s158_s17, 4  ;;  %s8087_s30 = smov 4096   ;;  %s172_s19 = int_to_ptr.hbm [resolvable:$true] %s171_s19 }
  0x1d   : > { %s7473_s20 = scalar_select %p8161_p5, [#allocation0], [#allocation10] }
  0x1e   : > { %s153_s28 = scalar_lea.vmem [#allocation2], %s7469_s9  ;;  %7474 = sst [smem:[#allocation9]] (%p8161_p5), %s8087_s30 }
  0x1f   : > { %s163_s27 = sld [smem:[%s7473_s20]]   ;;  %s173_s29 = sshll.u32 %s153_s28, 4  ;;  %s174_s29 = int_to_ptr.vmem [resolvable:$true] %s173_s29 }
  0x20   : > { %s8088_s4 = smov 1024   ;;  %s8089_s5 = smov 8  }
  0x21   : > { %7475 = sst [smem:[#allocation9 + $0x1]] (%p8161_p5), %s8088_s4  ;;  %s8090_s6 = smov 128  }
  0x22   : > { %7476 = sst [smem:[#allocation9 + $0x2]] (%p8161_p5), %s8089_s5  ;;  %s150_s10 = scalar_lea.sflag [#allocation3], %s149_s7 }
  0x23   : > { %7477 = sst [smem:[#allocation9 + $0x3]] (%p8161_p5), %s8090_s6  ;;  %s8091_s11 = smov [#allocation8]  }
  0x24   : > { %7478 = sst [smem:[#allocation9 + $0x4]] (%p8161_p5), %s8090_s6 }
  0x25   : > { %s7225_s8 = sshll.u32 %s163_s27, 26  ;;  %7479 = sst [smem:[#allocation9 + $0x5]] (%p8161_p5), %s8089_s5 }
  0x26   : > { %s7226_s9 = sadd.s32 134217728, %s7225_s8 }
  0x27   : > { %7480 = dma.general (%p8161_p5), %s172_s19, 3072, %s174_s29, %s150_s10, %s8091_s11, [#allocation9], %s7226_s9, 0  }
  0x28 PF: > { %198 = sbr.rel (%p8182_p13) target bundleno = 6675 (0x1a13), region = 32 }
  0x2d   : > { %s8218_s17 = sand.u32 1, %s8074_s13  }
  0x2e   : > { %s7470_s20 = smul.u32 192, %s8218_s17  ;;  %s201_s28 = scalar_lea.sflag [#allocation3], %s8218_s17 }
  0x30   : > { %s8222_s27 = scalar_lea.vmem [#allocation2], %s7470_s20 }
  0x31   : > { %8057 = dma.done.wait (%p8167_p6), %s201_s28, 3072  }
  0x32   : > { %8059 = vsyncadd (%p8167_p6), %s201_s28, 4294964224 }
  0x33   : > { %8061 = dma.done.wait (%p41_p4), [#allocation6], 256  }
  0x34   : > { %8063 = vsyncadd (%p41_p4), [#allocation6], 4294967040  ;;  %v8233_v0 = vld [vmem:[%s8222_s27 + $0x20] sm:$0xff]  ;;  %v8236_v1 = vld [vmem:[%s8222_s27 + $0x28] sm:$0xff]  ;;  %vm682_vm0 = vcmask 130048   ;;  %s8092_s22 = smov 112  }
  0x35   : > { %12018 = vst [vmem:[#allocation14_spill] sm:$0xff] %v8233_v0  ;;  %v8239_v2 = vld [vmem:[%s8222_s27 + $0x30] sm:$0xff]  ;;  %v8242_v3 = vld [vmem:[%s8222_s27 + $0x38] sm:$0xff]  ;;  %v8245_v4 = vmul.f32 0.25, %v8233_v0  ;;  %v8248_v5 = vmul.f32 0.25, %v8236_v1  ;;  %v8259_v8 = vld [vmem:[%s8222_s27] sm:$0xff] }
  0x36   : > { %12019 = vst [vmem:[#allocation15_spill] sm:$0xff] %v8236_v1  ;;  %v8251_v6 = vmul.f32 0.25, %v8239_v2  ;;  %v8254_v7 = vmul.f32 0.25, %v8242_v3  ;;  %v8262_v9 = vld [vmem:[%s8222_s27 + $0x8] sm:$0xff]  ;;  %v8265_v10 = vld [vmem:[%s8222_s27 + $0x10] sm:$0xff]  ;;  %v8269_v11 = vld [vmem:[%s8222_s27 + $0x18] sm:$0xff] }
  0x37   : > { %12020 = vst [vmem:[#allocation16_spill] sm:$0xff] %v8239_v2  ;;  %v8272_v12 = vmul.f32 0.25, %v8259_v8  ;;  %v8276_v13 = vmul.f32 0.25, %v8262_v9  ;;  %v8279_v14 = vmul.f32 0.25, %v8265_v10  ;;  %v8282_v15 = vmul.f32 0.25, %v8269_v11  ;;  %v8286_v16 = vld [vmem:[%s8222_s27 + $0x60] sm:$0xff] }
  0x38   : > { %12021 = vst [vmem:[#allocation17_spill] sm:$0xff] %v8242_v3  ;;  %v8290_v17 = vld [vmem:[%s8222_s27 + $0x68] sm:$0xff]  ;;  %v8294_v18 = vld [vmem:[%s8222_s27 + $0x70] sm:$0xff]  ;;  %v8298_v19 = vld [vmem:[%s8222_s27 + $0x78] sm:$0xff]  ;;  %s8093_s23 = smov 96   ;;  %s8094_s26 = smov 80  }
  0x39   : > { %648 = vst [vmem:[#allocation1 + $0x20] ss:$4 sm:$0xff] %v8245_v4  ;;  %v8302_v21 = vld [vmem:[%s8222_s27 + $0x40] sm:$0xff]  ;;  %v8306_v22 = vld [vmem:[%s8222_s27 + $0x48] sm:$0xff]  ;;  %v8310_v23 = vld [vmem:[%s8222_s27 + $0x50] sm:$0xff]  ;;  %s8095_s7 = smov 64  }
  0x3a   : > { %650 = vst [vmem:[#allocation1 + $0x21] ss:$4 sm:$0xff] %v8248_v5  ;;  %v8314_v24 = vld [vmem:[%s8222_s27 + $0x58] sm:$0xff]  ;;  %v8318_v26 = vld [vmem:[%s8222_s27 + $0xa0] sm:$0xff]  ;;  %v8323_v27 = vld [vmem:[%s8222_s27 + $0xa8] sm:$0xff]  ;;  %s8096_s19 = smov 48  }
  0x3b   : > { %12022 = vst [vmem:[#allocation18_spill] sm:$0xff] %v8259_v8  ;;  %v8326_v28 = vld [vmem:[%s8222_s27 + $0xb0] sm:$0xff]  ;;  %v8330_v29 = vld [vmem:[%s8222_s27 + $0xb8] sm:$0xff]  ;;  %v8336_v31 = vld [vmem:[%s8222_s27 + $0x80] sm:$0xff]  ;;  %s8097_s29 = smov 32   ;;  %s8098_s30 = smov 16  }
  0x3c   : > { %12023 = vst [vmem:[#allocation19_spill] sm:$0xff] %v8262_v9  ;;  %v8340_v32 = vld [vmem:[%s8222_s27 + $0x88] sm:$0xff]  ;;  %v8343_v33 = vld [vmem:[%s8222_s27 + $0x90] sm:$0xff]  ;;  %v8347_v35 = vld [vmem:[%s8222_s27 + $0x98] sm:$0xff]  ;;  %vm287_vm1 = vcmask 1040384   ;;  %vm297_vm2 = vcmask 1042432  }
  0x3d   : > { %12024 = vst [vmem:[#allocation20_spill] sm:$0xff] %v8265_v10  ;;  %vm1871_vm3 = vcmask 261120   ;;  %vm1874_vm4 = vcmask 392192   ;;  %vm1877_vm5 = vcmask 523264   ;;  %vm1880_vm6 = vcmask 654336   ;;  %s7229_s11 = sshll.u32 %s8218_s17, 6 }
  0x3e   : > { %652 = vst [vmem:[#allocation1 + $0x22] ss:$4 sm:$0xff] %v8251_v6  ;;  %vm1883_vm7 = vcmask 785408   ;;  %vm1886_vm8 = vcmask 916480   ;;  %vm7085_vm9 = vcmask 1041408   ;;  %vm7094_vm10 = vcmask 1043456  }
  0x3f   : > { %12025 = vst [vmem:[#allocation21_spill] sm:$0xff] %v8269_v11  ;;  %vm7103_vm11 = vcmask 1045504   ;;  %s11819_s20 = scalar_lea.vmem [#allocation7], %s7229_s11  ;;  %s7468_s28 = sshll.u32 %s8143_s16, 6 }
  0x40   : > { %654 = vst [vmem:[#allocation1 + $0x23] ss:$4 sm:$0xff] %v8254_v7  ;;  %s8032_s5 = scalar_lea.hbm %s11930_s3, 256 }
  0x41   : > { %640 = vst [vmem:[#allocation1] ss:$4 sm:$0xff] %v8272_v12 }
  0x42   : > { %12026 = vst [vmem:[#allocation22_spill] sm:$0xff] %v8286_v16 }
  0x43   : > { %642 = vst [vmem:[#allocation1 + $0x1] ss:$4 sm:$0xff] %v8276_v13 }
  0x44   : > { %12027 = vst [vmem:[#allocation23_spill] sm:$0xff] %v8290_v17 }
  0x45   : > { %644 = vst [vmem:[#allocation1 + $0x2] ss:$4 sm:$0xff] %v8279_v14 }
  0x46   : > { %12028 = vst [vmem:[#allocation24_spill] sm:$0xff] %v8294_v18 }
  0x47   : > { %646 = vst [vmem:[#allocation1 + $0x3] ss:$4 sm:$0xff] %v8282_v15  ;;  %v656_v20 = vld.sshfl [vmem:[#allocation1 + $0x20] sm:$0xff pattern:$0x73625140] }
  0x48   : > { %12029 = vst [vmem:[#allocation25_spill] sm:$0xff] %v8298_v19 }
  0x49   : > { %673 = vst [vmem:[#allocation1 + $0x20] ss:$4 sm:$0xff] %v8286_v16 }
  0x4a   : > { %12030 = vst [vmem:[#allocation26_spill] sm:$0xff] %v8302_v21 }
  0x4b   : > { %675 = vst [vmem:[#allocation1 + $0x21] ss:$4 sm:$0xff] %v8290_v17 }
  0x4c   : > { %12031 = vst [vmem:[#allocation27_spill] sm:$0xff] %v8306_v22 }
  0x4d   : > { %677 = vst [vmem:[#allocation1 + $0x22] ss:$4 sm:$0xff] %v8294_v18 }
  0x4e   : > { %12032 = vst [vmem:[#allocation28_spill] sm:$0xff] %v8310_v23  ;;  %v655_v25 = vld.sshfl [vmem:[#allocation1] sm:$0xff pattern:$0x73625140] }
  0x4f   : > { %679 = vst [vmem:[#allocation1 + $0x23] ss:$4 sm:$0xff] %v8298_v19 }
  0x50   : > { %12033 = vst [vmem:[#allocation29_spill] sm:$0xff] %v8314_v24 }
  0x51   : > { %665 = vst [vmem:[#allocation1] ss:$4 sm:$0xff] %v8302_v21 }
  0x52   : > { %12034 = vst [vmem:[#allocation30_spill] sm:$0xff] %v8318_v26 }
  0x53   : > { %667 = vst [vmem:[#allocation1 + $0x1] ss:$4 sm:$0xff] %v8306_v22 }
  0x54   : > { %669 = vst [vmem:[#allocation1 + $0x2] ss:$4 sm:$0xff] %v8310_v23 }
  0x55   : > { %12035 = vst [vmem:[#allocation31_spill] sm:$0xff] %v8323_v27 }
  0x56   : > { %12036 = vst [vmem:[#allocation32_spill] sm:$0xff] %v8326_v28  ;;  %v681_v30 = vld.sshfl [vmem:[#allocation1 + $0x20] sm:$0xff pattern:$0x73625140] }
  0x57   : > { %671 = vst [vmem:[#allocation1 + $0x3] ss:$4 sm:$0xff] %v8314_v24  ;;  %7246 = vmatpush.xpose.msk.msra.mxu0 %vm682_vm0, %v681_v30 }
  0x58   : > { %12037 = vst [vmem:[#allocation33_spill] sm:$0xff] %v8330_v29 }
  0x59   : > { %744 = vst [vmem:[#allocation1 + $0x20] ss:$4 sm:$0xff] %v8318_v26 }
  0x5a   : > { %746 = vst [vmem:[#allocation1 + $0x21] ss:$4 sm:$0xff] %v8323_v27 }
  0x5b   : > { %748 = vst [vmem:[#allocation1 + $0x22] ss:$4 sm:$0xff] %v8326_v28 }
  0x5c   : > { %12038 = vst [vmem:[#allocation34_spill] sm:$0xff] %v8336_v31 }
  0x5d   : > { %750 = vst [vmem:[#allocation1 + $0x23] ss:$4 sm:$0xff] %v8330_v29 }
  0x5e   : > { %12039 = vst [vmem:[#allocation35_spill] sm:$0xff] %v8340_v32  ;;  %v680_v34 = vld.sshfl [vmem:[#allocation1] sm:$0xff pattern:$0x73625140] }
  0x5f   : > { %12040 = vst [vmem:[#allocation36_spill] sm:$0xff] %v8343_v33  ;;  %7247 = vmatpush.xpose.msk.msra.mxu0 %vm682_vm0, %v680_v34 }
  0x60   : > { %12041 = vst [vmem:[#allocation37_spill] sm:$0xff] %v8347_v35 }
  0x61   : > { %736 = vst [vmem:[#allocation1] ss:$4 sm:$0xff] %v8336_v31 }
  0x62   : > { %738 = vst [vmem:[#allocation1 + $0x1] ss:$4 sm:$0xff] %v8340_v32  ;;  %7248 = vmatmul.msk.f32.vlgmr.msra.gmra.mxu0 %vm682_vm0, %v655_v25 }
  0x63   : > { %740 = vst [vmem:[#allocation1 + $0x2] ss:$4 sm:$0xff] %v8343_v33 }
  0x64   : > { %742 = vst [vmem:[#allocation1 + $0x3] ss:$4 sm:$0xff] %v8347_v35  ;;  %v752_v36 = vld.sshfl [vmem:[#allocation1 + $0x20] sm:$0xff pattern:$0x73625140] }
  0x65   : > { %792 = vst [vmem:[#allocation1 + $0x20] ss:$4 sm:$0xff] %v8245_v4  ;;  %775 = vmatpush.msra.mxu1 %v752_v36 }
  0x66   : > { %794 = vst [vmem:[#allocation1 + $0x21] ss:$4 sm:$0xff] %v8248_v5 }
  0x67   : > { %796 = vst [vmem:[#allocation1 + $0x22] ss:$4 sm:$0xff] %v8251_v6 }
  0x68   : > { %798 = vst [vmem:[#allocation1 + $0x23] ss:$4 sm:$0xff] %v8254_v7 }
  0x6a   : > { %7249 = vmatmul.msk.f32.gmra.mxu0 %vm682_vm0, %v656_v20 }
  0x6b   : > { %v751_v37 = vld.sshfl [vmem:[#allocation1] sm:$0xff pattern:$0x73625140] }
  0x6c   : > { %784 = vst [vmem:[#allocation1] ss:$4 sm:$0xff] %v8272_v12  ;;  %776 = vmatpush.msra.mxu1 %v751_v37 }
  0x6d   : > { %786 = vst [vmem:[#allocation1 + $0x1] ss:$4 sm:$0xff] %v8276_v13 }
  0x6e   : > { %788 = vst [vmem:[#allocation1 + $0x2] ss:$4 sm:$0xff] %v8279_v14 }
  0x6f   : > { %790 = vst [vmem:[#allocation1 + $0x3] ss:$4 sm:$0xff] %v8282_v15  ;;  %v800_v38 = vld.sshfl [vmem:[#allocation1 + $0x20] sm:$0xff pattern:$0x73625140] }
  0x70   : > { %813 = vst [vmem:[#allocation1 + $0x20] ss:$4 sm:$0xff] %v8286_v16 }
  0x71   : > { %815 = vst [vmem:[#allocation1 + $0x21] ss:$4 sm:$0xff] %v8290_v17 }
  0x72   : > { %817 = vst [vmem:[#allocation1 + $0x22] ss:$4 sm:$0xff] %v8294_v18 }
  0x73   : > { %819 = vst [vmem:[#allocation1 + $0x23] ss:$4 sm:$0xff] %v8298_v19 }
  0x76   : > { %v799_v39 = vld.sshfl [vmem:[#allocation1] sm:$0xff pattern:$0x73625140] }
  0x77   : > { %805 = vst [vmem:[#allocation1] ss:$4 sm:$0xff] %v8302_v21  ;;  %801 = vrot.lane.b32.xlu2 %v799_v39, %s8092_s22 }
  0x78   : > { %807 = vst [vmem:[#allocation1 + $0x1] ss:$4 sm:$0xff] %v8306_v22 }
  0x79   : > { %809 = vst [vmem:[#allocation1 + $0x2] ss:$4 sm:$0xff] %v8310_v23 }
  0x7a   : > { %811 = vst [vmem:[#allocation1 + $0x3] ss:$4 sm:$0xff] %v8314_v24  ;;  %v821_v40 = vld.sshfl [vmem:[#allocation1 + $0x20] sm:$0xff pattern:$0x73625140] }
  0x7b   : > { %824 = vrot.lane.b32.xlu1 %v821_v40, %s8092_s22  ;;  %887 = vst [vmem:[#allocation1 + $0x20] ss:$4 sm:$0xff] %v8318_v26 }
  0x7c   : > { %889 = vst [vmem:[#allocation1 + $0x21] ss:$4 sm:$0xff] %v8323_v27 }
  0x7d   : > { %891 = vst [vmem:[#allocation1 + $0x22] ss:$4 sm:$0xff] %v8326_v28 }
  0x7e   : > { %893 = vst [vmem:[#allocation1 + $0x23] ss:$4 sm:$0xff] %v8330_v29 }
  0x7f   : > { %803 = vrot.lane.b32.xlu2 %v800_v38, %s8092_s22 }
  0x81   : > { %v820_v41 = vld.sshfl [vmem:[#allocation1] sm:$0xff pattern:$0x73625140] }
  0x82   : > { %822 = vrot.lane.b32.xlu0 %v820_v41, %s8092_s22  ;;  %879 = vst [vmem:[#allocation1] ss:$4 sm:$0xff] %v8336_v31 }
  0x83   : > { %881 = vst [vmem:[#allocation1 + $0x1] ss:$4 sm:$0xff] %v8340_v32 }
  0x84   : > { %883 = vst [vmem:[#allocation1 + $0x2] ss:$4 sm:$0xff] %v8343_v33 }
  0x85   : > { %885 = vst [vmem:[#allocation1 + $0x3] ss:$4 sm:$0xff] %v8347_v35  ;;  %v895_v42 = vld.sshfl [vmem:[#allocation1 + $0x20] sm:$0xff pattern:$0x73625140] }
  0x86   : > { %939 = vst [vmem:[#allocation1 + $0x20] ss:$4 sm:$0xff] %v8245_v4 }
  0x87   : > { %941 = vst [vmem:[#allocation1 + $0x21] ss:$4 sm:$0xff] %v8248_v5 }
  0x88   : > { %943 = vst [vmem:[#allocation1 + $0x22] ss:$4 sm:$0xff] %v8251_v6 }
  0x89   : > { %945 = vst [vmem:[#allocation1 + $0x23] ss:$4 sm:$0xff] %v8254_v7 }
  0x8c   : > { %v894_v43 = vld.sshfl [vmem:[#allocation1] sm:$0xff pattern:$0x73625140] }
  0x8d   : > { %931 = vst [vmem:[#allocation1] ss:$4 sm:$0xff] %v8272_v12  ;;  %v7547_v44 = vpack.i.bf16 %v895_v42, %v894_v43 }
  0x8e   : > { %933 = vst [vmem:[#allocation1 + $0x1] ss:$4 sm:$0xff] %v8276_v13 }
  0x8f   : > { %935 = vst [vmem:[#allocation1 + $0x2] ss:$4 sm:$0xff] %v8279_v14  ;;  %7548 = vrot.lane.b32.xlu2 %v7547_v44, %s8092_s22 }
  0x90   : > { %937 = vst [vmem:[#allocation1 + $0x3] ss:$4 sm:$0xff] %v8282_v15  ;;  %v947_v45 = vld.sshfl [vmem:[#allocation1 + $0x20] sm:$0xff pattern:$0x73625140] }
  0x91   : > { %960 = vst [vmem:[#allocation1 + $0x20] ss:$4 sm:$0xff] %v8286_v16  ;;  %950 = vrot.lane.b32.xlu1 %v947_v45, %s8093_s23 }
  0x92   : > { %962 = vst [vmem:[#allocation1 + $0x21] ss:$4 sm:$0xff] %v8290_v17 }
  0x93   : > { %964 = vst [vmem:[#allocation1 + $0x22] ss:$4 sm:$0xff] %v8294_v18 }
  0x94   : > { %966 = vst [vmem:[#allocation1 + $0x23] ss:$4 sm:$0xff] %v8298_v19 }
  0x97   : > { %v946_v46 = vld.sshfl [vmem:[#allocation1] sm:$0xff pattern:$0x73625140] }
  0x98   : > { %948 = vrot.lane.b32.xlu0 %v946_v46, %s8093_s23  ;;  %952 = vst [vmem:[#allocation1] ss:$4 sm:$0xff] %v8302_v21 }
  0x99   : > { %954 = vst [vmem:[#allocation1 + $0x1] ss:$4 sm:$0xff] %v8306_v22 }
  0x9a   : > { %956 = vst [vmem:[#allocation1 + $0x2] ss:$4 sm:$0xff] %v8310_v23 }
  0x9b   : > { %958 = vst [vmem:[#allocation1 + $0x3] ss:$4 sm:$0xff] %v8314_v24  ;;  %v968_v47 = vld.sshfl [vmem:[#allocation1 + $0x20] sm:$0xff pattern:$0x73625140] }
  0x9c   : > { %1034 = vst [vmem:[#allocation1 + $0x20] ss:$4 sm:$0xff] %v8318_v26 }
  0x9d   : > { %1036 = vst [vmem:[#allocation1 + $0x21] ss:$4 sm:$0xff] %v8323_v27 }
  0x9e   : > { %1038 = vst [vmem:[#allocation1 + $0x22] ss:$4 sm:$0xff] %v8326_v28 }
  0x9f   : > { %1040 = vst [vmem:[#allocation1 + $0x23] ss:$4 sm:$0xff] %v8330_v29 }
  0xa2   : > { %v967_v48 = vld.sshfl [vmem:[#allocation1] sm:$0xff pattern:$0x73625140] }
  0xa3   : > { %1026 = vst [vmem:[#allocation1] ss:$4 sm:$0xff] %v8336_v31  ;;  %969 = vrot.lane.b32.xlu2 %v967_v48, %s8093_s23 }
  0xa4   : > { %1028 = vst [vmem:[#allocation1 + $0x1] ss:$4 sm:$0xff] %v8340_v32 }
  0xa5   : > { %1030 = vst [vmem:[#allocation1 + $0x2] ss:$4 sm:$0xff] %v8343_v33 }
  0xa6   : > { %1032 = vst [vmem:[#allocation1 + $0x3] ss:$4 sm:$0xff] %v8347_v35  ;;  %v1042_v49 = vld.sshfl [vmem:[#allocation1 + $0x20] sm:$0xff pattern:$0x73625140] }
  0xa7   : > { %1086 = vst [vmem:[#allocation1 + $0x20] ss:$4 sm:$0xff] %v8245_v4 }
  0xa8   : > { %1088 = vst [vmem:[#allocation1 + $0x21] ss:$4 sm:$0xff] %v8248_v5 }
  0xa9   : > { %1090 = vst [vmem:[#allocation1 + $0x22] ss:$4 sm:$0xff] %v8251_v6 }
  0xaa   : > { %1092 = vst [vmem:[#allocation1 + $0x23] ss:$4 sm:$0xff] %v8254_v7 }
  0xab   : > { %971 = vrot.lane.b32.xlu2 %v968_v47, %s8093_s23 }
  0xad   : > { %v1041_v50 = vld.sshfl [vmem:[#allocation1] sm:$0xff pattern:$0x73625140] }
  0xae   : > { %1078 = vst [vmem:[#allocation1] ss:$4 sm:$0xff] %v8272_v12  ;;  %v7552_v51 = vpack.i.bf16 %v1042_v49, %v1041_v50 }
  0xaf   : > { %1080 = vst [vmem:[#allocation1 + $0x1] ss:$4 sm:$0xff] %v8276_v13 }
  0xb0   : > { %1082 = vst [vmem:[#allocation1 + $0x2] ss:$4 sm:$0xff] %v8279_v14 }
  0xb1   : > { %1084 = vst [vmem:[#allocation1 + $0x3] ss:$4 sm:$0xff] %v8282_v15  ;;  %v1094_v52 = vld.sshfl [vmem:[#allocation1 + $0x20] sm:$0xff pattern:$0x73625140] }
  0xb2   : > { %1107 = vst [vmem:[#allocation1 + $0x20] ss:$4 sm:$0xff] %v8286_v16  ;;  %1097 = vrot.lane.b32.xlu1 %v1094_v52, %s8094_s26 }
  0xb3   : > { %7553 = vrot.lane.b32.xlu2 %v7552_v51, %s8093_s23  ;;  %1109 = vst [vmem:[#allocation1 + $0x21] ss:$4 sm:$0xff] %v8290_v17 }
  0xb4   : > { %1111 = vst [vmem:[#allocation1 + $0x22] ss:$4 sm:$0xff] %v8294_v18 }
  0xb5   : > { %1113 = vst [vmem:[#allocation1 + $0x23] ss:$4 sm:$0xff] %v8298_v19 }
  0xb8   : > { %v1093_v53 = vld.sshfl [vmem:[#allocation1] sm:$0xff pattern:$0x73625140] }
  0xb9   : > { %1095 = vrot.lane.b32.xlu0 %v1093_v53, %s8094_s26  ;;  %1099 = vst [vmem:[#allocation1] ss:$4 sm:$0xff] %v8302_v21 }
  0xba   : > { %1101 = vst [vmem:[#allocation1 + $0x1] ss:$4 sm:$0xff] %v8306_v22 }
  0xbb   : > { %1103 = vst [vmem:[#allocation1 + $0x2] ss:$4 sm:$0xff] %v8310_v23 }
  0xbc   : > { %1105 = vst [vmem:[#allocation1 + $0x3] ss:$4 sm:$0xff] %v8314_v24  ;;  %v1115_v54 = vld.sshfl [vmem:[#allocation1 + $0x20] sm:$0xff pattern:$0x73625140] }
  0xbd   : > { %1181 = vst [vmem:[#allocation1 + $0x20] ss:$4 sm:$0xff] %v8318_v26  ;;  %1118 = vrot.lane.b32.xlu2 %v1115_v54, %s8094_s26 }
  0xbe   : > { %1183 = vst [vmem:[#allocation1 + $0x21] ss:$4 sm:$0xff] %v8323_v27 }
  0xbf   : > { %1185 = vst [vmem:[#allocation1 + $0x22] ss:$4 sm:$0xff] %v8326_v28 }
  0xc0   : > { %1187 = vst [vmem:[#allocation1 + $0x23] ss:$4 sm:$0xff] %v8330_v29 }
  0xc3   : > { %v1114_v55 = vld.sshfl [vmem:[#allocation1] sm:$0xff pattern:$0x73625140] }
  0xc4   : > { %1116 = vrot.lane.b32.xlu0 %v1114_v55, %s8094_s26  ;;  %1173 = vst [vmem:[#allocation1] ss:$4 sm:$0xff] %v8336_v31 }
  0xc5   : > { %1175 = vst [vmem:[#allocation1 + $0x1] ss:$4 sm:$0xff] %v8340_v32 }
  0xc6   : > { %1177 = vst [vmem:[#allocation1 + $0x2] ss:$4 sm:$0xff] %v8343_v33 }
  0xc7   : > { %1179 = vst [vmem:[#allocation1 + $0x3] ss:$4 sm:$0xff] %v8347_v35  ;;  %v1189_v56 = vld.sshfl [vmem:[#allocation1 + $0x20] sm:$0xff pattern:$0x73625140] }
  0xc8   : > { %1233 = vst [vmem:[#allocation1 + $0x20] ss:$4 sm:$0xff] %v8245_v4 }
  0xc9   : > { %1235 = vst [vmem:[#allocation1 + $0x21] ss:$4 sm:$0xff] %v8248_v5 }
  0xca   : > { %1237 = vst [vmem:[#allocation1 + $0x22] ss:$4 sm:$0xff] %v8251_v6 }
  0xcb   : > { %1239 = vst [vmem:[#allocation1 + $0x23] ss:$4 sm:$0xff] %v8254_v7 }
  0xce   : > { %v1188_v57 = vld.sshfl [vmem:[#allocation1] sm:$0xff pattern:$0x73625140] }
  0xcf   : > { %v7557_v58 = vpack.i.bf16 %v1189_v56, %v1188_v57  ;;  %1225 = vst [vmem:[#allocation1] ss:$4 sm:$0xff] %v8272_v12 }
  0xd0   : > { %1227 = vst [vmem:[#allocation1 + $0x1] ss:$4 sm:$0xff] %v8276_v13 }
  0xd1   : > { %7558 = vrot.lane.b32.xlu0 %v7557_v58, %s8094_s26  ;;  %1229 = vst [vmem:[#allocation1 + $0x2] ss:$4 sm:$0xff] %v8279_v14  ;;  %v802_v30 = vpop.permute.xlu2 %801 }
  0xd2   : > { %1231 = vst [vmem:[#allocation1 + $0x3] ss:$4 sm:$0xff] %v8282_v15  ;;  %v1241_v59 = vld.sshfl [vmem:[#allocation1 + $0x20] sm:$0xff pattern:$0x73625140] }
  0xd3   : > { %1254 = vst [vmem:[#allocation1 + $0x20] ss:$4 sm:$0xff] %v8286_v16  ;;  %1244 = vrot.lane.b32.xlu1 %v1241_v59, %s8095_s7 }
  0xd4   : > { %1256 = vst [vmem:[#allocation1 + $0x21] ss:$4 sm:$0xff] %v8290_v17 }
  0xd5   : > { %1258 = vst [vmem:[#allocation1 + $0x22] ss:$4 sm:$0xff] %v8294_v18 }
  0xd6   : > { %1260 = vst [vmem:[#allocation1 + $0x23] ss:$4 sm:$0xff] %v8298_v19 }
  0xd9   : > { %v1240_v60 = vld.sshfl [vmem:[#allocation1] sm:$0xff pattern:$0x73625140]  ;;  %v804_v38 = vpop.permute.xlu2 %803 }
  0xda   : > { %1246 = vst [vmem:[#allocation1] ss:$4 sm:$0xff] %v8302_v21  ;;  %1242 = vrot.lane.b32.xlu2 %v1240_v60, %s8095_s7 }
  0xdb   : > { %1248 = vst [vmem:[#allocation1 + $0x1] ss:$4 sm:$0xff] %v8306_v22 }
  0xdc   : > { %1250 = vst [vmem:[#allocation1 + $0x2] ss:$4 sm:$0xff] %v8310_v23 }
  0xdd   : > { %1252 = vst [vmem:[#allocation1 + $0x3] ss:$4 sm:$0xff] %v8314_v24  ;;  %v1262_v61 = vld.sshfl [vmem:[#allocation1 + $0x20] sm:$0xff pattern:$0x73625140] }
  0xde   : > { %1328 = vst [vmem:[#allocation1 + $0x20] ss:$4 sm:$0xff] %v8318_v26 }
  0xdf   : > { %1330 = vst [vmem:[#allocation1 + $0x21] ss:$4 sm:$0xff] %v8323_v27  ;;  %v8537_v53 = vpop.f32.mrf.mxu0 }
  0xe0   : > { %1332 = vst [vmem:[#allocation1 + $0x22] ss:$4 sm:$0xff] %v8326_v28  ;;  %v714_v55 = vsel %vm682_vm0, %v8537_v53, -inf }
  0xe1   : > { %1334 = vst [vmem:[#allocation1 + $0x23] ss:$4 sm:$0xff] %v8330_v29 }
  0xe2   : > { %1265 = vrot.lane.b32.xlu2 %v1262_v61, %s8095_s7 }
  0xe4   : > { %v1261_v62 = vld.sshfl [vmem:[#allocation1] sm:$0xff pattern:$0x73625140] }
  0xe5   : > { %1263 = vrot.lane.b32.xlu0 %v1261_v62, %s8095_s7  ;;  %1320 = vst [vmem:[#allocation1] ss:$4 sm:$0xff] %v8336_v31 }
  0xe6   : > { %1322 = vst [vmem:[#allocation1 + $0x1] ss:$4 sm:$0xff] %v8340_v32 }
  0xe7   : > { %1324 = vst [vmem:[#allocation1 + $0x2] ss:$4 sm:$0xff] %v8343_v33 }
  0xe8   : > { %1326 = vst [vmem:[#allocation1 + $0x3] ss:$4 sm:$0xff] %v8347_v35  ;;  %v8471_v63 = vld.sshfl [vmem:[#allocation1 + $0x20] sm:$0xff pattern:$0x73625140] }
  0xe9   : > { %1380 = vst [vmem:[#allocation1 + $0x20] ss:$4 sm:$0xff] %v8245_v4  ;;  %v8504_v41 = vpop.permute.xlu2 %7548 }
  0xea   : > { %1382 = vst [vmem:[#allocation1 + $0x21] ss:$4 sm:$0xff] %v8248_v5 }
  0xeb   : > { %1384 = vst [vmem:[#allocation1 + $0x22] ss:$4 sm:$0xff] %v8251_v6 }
  0xec   : > { %1386 = vst [vmem:[#allocation1 + $0x23] ss:$4 sm:$0xff] %v8254_v7 }
  0xed   : > { %v825_v25 = vpop.permute.xlu1 %824 }
  0xee   : > { %7252 = vmatpush.xpose.msk.msra.mxu2 %vm682_vm0, %v825_v25 }
  0xef   : > { %v8477_v20 = vld.sshfl [vmem:[#allocation1] sm:$0xff pattern:$0x73625140] }
  0xf0   : > { %1372 = vst [vmem:[#allocation1] ss:$4 sm:$0xff] %v8272_v12  ;;  %v7562_v59 = vpack.i.bf16 %v8471_v63, %v8477_v20 }
  0xf1   : > { %1374 = vst [vmem:[#allocation1 + $0x1] ss:$4 sm:$0xff] %v8276_v13 }
  0xf2   : > { %1376 = vst [vmem:[#allocation1 + $0x2] ss:$4 sm:$0xff] %v8279_v14  ;;  %7563 = vrot.lane.b32.xlu1 %v7562_v59, %s8095_s7 }
  0xf3   : > { %1378 = vst [vmem:[#allocation1 + $0x3] ss:$4 sm:$0xff] %v8282_v15  ;;  %v1388_v36 = vld.sshfl [vmem:[#allocation1 + $0x20] sm:$0xff pattern:$0x73625140] }
  0xf4   : > { %v823_v34 = vpop.permute.xlu0 %822  ;;  %1391 = vrot.lane.b32.xlu0 %v1388_v36, %s8096_s19  ;;  %1401 = vst [vmem:[#allocation1 + $0x20] ss:$4 sm:$0xff] %v8286_v16 }
  0xf5   : > { %7253 = vmatpush.xpose.msk.msra.mxu2 %vm682_vm0, %v823_v34  ;;  %1403 = vst [vmem:[#allocation1 + $0x21] ss:$4 sm:$0xff] %v8290_v17 }
  0xf6   : > { %1405 = vst [vmem:[#allocation1 + $0x22] ss:$4 sm:$0xff] %v8294_v18 }
  0xf7   : > { %1407 = vst [vmem:[#allocation1 + $0x23] ss:$4 sm:$0xff] %v8298_v19 }
  0xf8   : > { %7254 = vmatmul.msk.f32.vlgmr.msra.gmra.mxu2 %vm682_vm0, %v802_v30 }
  0xfa   : > { %v1387_v37 = vld.sshfl [vmem:[#allocation1] sm:$0xff pattern:$0x73625140] }
  0xfb   : > { %1393 = vst [vmem:[#allocation1] ss:$4 sm:$0xff] %v8302_v21  ;;  %1389 = vrot.lane.b32.xlu2 %v1387_v37, %s8096_s19 }
  0xfc   : > { %1395 = vst [vmem:[#allocation1 + $0x1] ss:$4 sm:$0xff] %v8306_v22 }
  0xfd   : > { %1397 = vst [vmem:[#allocation1 + $0x2] ss:$4 sm:$0xff] %v8310_v23  ;;  %v970_v42 = vpop.permute.xlu2 %969 }
  0xfe   : > { %1399 = vst [vmem:[#allocation1 + $0x3] ss:$4 sm:$0xff] %v8314_v24  ;;  %v1409_v39 = vld.sshfl [vmem:[#allocation1 + $0x20] sm:$0xff pattern:$0x73625140] }
  0xff   : > { %1475 = vst [vmem:[#allocation1 + $0x20] ss:$4 sm:$0xff] %v8318_v26 }
 0x100   : > { %7255 = vmatmul.msk.f32.gmra.mxu2 %vm682_vm0, %v804_v38  ;;  %1477 = vst [vmem:[#allocation1 + $0x21] ss:$4 sm:$0xff] %v8323_v27 }
 0x101   : > { %1479 = vst [vmem:[#allocation1 + $0x22] ss:$4 sm:$0xff] %v8326_v28 }
 0x102   : > { %1481 = vst [vmem:[#allocation1 + $0x23] ss:$4 sm:$0xff] %v8330_v29 }
 0x103   : > { %1412 = vrot.lane.b32.xlu2 %v1409_v39, %s8096_s19 }
 0x105   : > { %v1408_v40 = vld.sshfl [vmem:[#allocation1] sm:$0xff pattern:$0x73625140]  ;;  %v972_v45 = vpop.permute.xlu2 %971 }
 0x106   : > { %1410 = vrot.lane.b32.xlu0 %v1408_v40, %s8096_s19  ;;  %1467 = vst [vmem:[#allocation1] ss:$4 sm:$0xff] %v8336_v31  ;;  %7258 = vmatpush.xpose.msk.msrb.mxu1 %vm682_vm0, %v972_v45  ;;  %v8607_v40 = vpop.f32.mrf.mxu0 }
 0x107   : > { %1469 = vst [vmem:[#allocation1 + $0x1] ss:$4 sm:$0xff] %v8340_v32 }
 0x108   : > { %1471 = vst [vmem:[#allocation1 + $0x2] ss:$4 sm:$0xff] %v8343_v33 }
 0x109   : > { %1473 = vst [vmem:[#allocation1 + $0x3] ss:$4 sm:$0xff] %v8347_v35  ;;  %v1483_v44 = vld.sshfl [vmem:[#allocation1 + $0x20] sm:$0xff pattern:$0x73625140] }
 0x10a   : > { %1527 = vst [vmem:[#allocation1 + $0x20] ss:$4 sm:$0xff] %v8245_v4  ;;  %7259 = vmatpush.xpose.msk.msrb.mxu1 %vm682_vm0, %v970_v42  ;;  %v8525_v48 = vpop.permute.xlu0 %948 }
 0x10b   : > { %1529 = vst [vmem:[#allocation1 + $0x21] ss:$4 sm:$0xff] %v8248_v5 }
 0x10c   : > { %1531 = vst [vmem:[#allocation1 + $0x22] ss:$4 sm:$0xff] %v8251_v6 }
 0x10d   : > { %1533 = vst [vmem:[#allocation1 + $0x23] ss:$4 sm:$0xff] %v8254_v7  ;;  %v8523_v47 = vpop.permute.xlu2 %7553 }
 0x110   : > { %v1482_v43 = vld.sshfl [vmem:[#allocation1] sm:$0xff pattern:$0x73625140] }
 0x111   : > { %1519 = vst [vmem:[#allocation1] ss:$4 sm:$0xff] %v8272_v12  ;;  %v7567_v52 = vpack.i.bf16 %v1483_v44, %v1482_v43  ;;  %v717_v44 = vsel %vm682_vm0, %v8607_v40, -inf }
 0x112   : > { %1521 = vst [vmem:[#allocation1 + $0x1] ss:$4 sm:$0xff] %v8276_v13 }
 0x113   : > { %1523 = vst [vmem:[#allocation1 + $0x2] ss:$4 sm:$0xff] %v8279_v14  ;;  %7568 = vrot.lane.b32.xlu2 %v7567_v52, %s8096_s19 }
 0x114   : > { %1525 = vst [vmem:[#allocation1 + $0x3] ss:$4 sm:$0xff] %v8282_v15  ;;  %v1535_v49 = vld.sshfl [vmem:[#allocation1 + $0x20] sm:$0xff pattern:$0x73625140] }
 0x115   : > { %1548 = vst [vmem:[#allocation1 + $0x20] ss:$4 sm:$0xff] %v8286_v16  ;;  %1538 = vrot.lane.b32.xlu1 %v1535_v49, %s8097_s29 }
 0x116   : > { %1550 = vst [vmem:[#allocation1 + $0x21] ss:$4 sm:$0xff] %v8290_v17 }
 0x117   : > { %1552 = vst [vmem:[#allocation1 + $0x22] ss:$4 sm:$0xff] %v8294_v18  ;;  %v1119_v51 = vpop.permute.xlu2 %1118 }
 0x118   : > { %1554 = vst [vmem:[#allocation1 + $0x23] ss:$4 sm:$0xff] %v8298_v19  ;;  %7264 = vmatpush.xpose.msk.msrb.mxu0 %vm682_vm0, %v1119_v51 }
 0x11b   : > { %v1534_v46 = vld.sshfl [vmem:[#allocation1] sm:$0xff pattern:$0x73625140] }
 0x11c   : > { %1540 = vst [vmem:[#allocation1] ss:$4 sm:$0xff] %v8302_v21 }
 0x11d   : > { %1542 = vst [vmem:[#allocation1 + $0x1] ss:$4 sm:$0xff] %v8306_v22 }
 0x11e   : > { %1544 = vst [vmem:[#allocation1 + $0x2] ss:$4 sm:$0xff] %v8310_v23 }
 0x11f   : > { %1546 = vst [vmem:[#allocation1 + $0x3] ss:$4 sm:$0xff] %v8314_v24  ;;  %v1556_v56 = vld.sshfl [vmem:[#allocation1 + $0x20] sm:$0xff pattern:$0x73625140] }
 0x120   : > { %1622 = vst [vmem:[#allocation1 + $0x20] ss:$4 sm:$0xff] %v8318_v26  ;;  %1559 = vrot.lane.b32.xlu2 %v1556_v56, %s8097_s29 }
 0x121   : > { %1624 = vst [vmem:[#allocation1 + $0x21] ss:$4 sm:$0xff] %v8323_v27 }
 0x122   : > { %1626 = vst [vmem:[#allocation1 + $0x22] ss:$4 sm:$0xff] %v8326_v28 }
 0x123   : > { %1628 = vst [vmem:[#allocation1 + $0x23] ss:$4 sm:$0xff] %v8330_v29 }
 0x126   : > { %v8531_v50 = vld.sshfl [vmem:[#allocation1] sm:$0xff pattern:$0x73625140] }
 0x127   : > { %1614 = vst [vmem:[#allocation1] ss:$4 sm:$0xff] %v8336_v31 }
 0x128   : > { %1616 = vst [vmem:[#allocation1 + $0x1] ss:$4 sm:$0xff] %v8340_v32 }
 0x129   : > { %1618 = vst [vmem:[#allocation1 + $0x2] ss:$4 sm:$0xff] %v8343_v33 }
 0x12a   : > { %1620 = vst [vmem:[#allocation1 + $0x3] ss:$4 sm:$0xff] %v8347_v35  ;;  %v8557_v60 = vld.sshfl [vmem:[#allocation1 + $0x20] sm:$0xff pattern:$0x73625140] }
 0x12b   : > { %v1096_v54 = vpop.permute.xlu0 %1095  ;;  %1674 = vst [vmem:[#allocation1 + $0x20] ss:$4 sm:$0xff] %v8245_v4 }
 0x12c   : > { %1676 = vst [vmem:[#allocation1 + $0x21] ss:$4 sm:$0xff] %v8248_v5 }
 0x12d   : > { %1678 = vst [vmem:[#allocation1 + $0x22] ss:$4 sm:$0xff] %v8251_v6 }
 0x12e   : > { %1680 = vst [vmem:[#allocation1 + $0x23] ss:$4 sm:$0xff] %v8254_v7 }
 0x130   : > { %715 = vmax.xlane.f32.xlu0 %v714_v55 }
 0x131   : > { %v8547_v57 = vld.sshfl [vmem:[#allocation1] sm:$0xff pattern:$0x73625140] }
 0x132   : > { %1666 = vst [vmem:[#allocation1] ss:$4 sm:$0xff] %v8272_v12  ;;  %v7572_v59 = vpack.i.bf16 %v8557_v60, %v8547_v57  ;;  %v7551_v57 = vunpack.i.h.bf16 %v8504_v41 }
 0x133   : > { %1668 = vst [vmem:[#allocation1 + $0x1] ss:$4 sm:$0xff] %v8276_v13 }
 0x134   : > { %1670 = vst [vmem:[#allocation1 + $0x2] ss:$4 sm:$0xff] %v8279_v14  ;;  %v8570_v4 = vpop.permute.xlu2 %1242  ;;  %v8574_v14 = vpop.permute.xlu1 %950  ;;  %922 = vmatpush.msra.mxu3 %v7551_v57 }
 0x135   : > { %1672 = vst [vmem:[#allocation1 + $0x3] ss:$4 sm:$0xff] %v8282_v15  ;;  %v1682_v6 = vld.sshfl [vmem:[#allocation1 + $0x20] sm:$0xff pattern:$0x73625140] }
 0x136   : > { %v1117_v58 = vpop.permute.xlu0 %1116  ;;  %1695 = vst [vmem:[#allocation1 + $0x20] ss:$4 sm:$0xff] %v8286_v16  ;;  %1685 = vrot.lane.b32.xlu1 %v1682_v6, %s8098_s30 }
 0x137   : > { %7265 = vmatpush.xpose.msk.msrb.mxu0 %vm682_vm0, %v1117_v58  ;;  %1697 = vst [vmem:[#allocation1 + $0x21] ss:$4 sm:$0xff] %v8290_v17 }
 0x138   : > { %1699 = vst [vmem:[#allocation1 + $0x22] ss:$4 sm:$0xff] %v8294_v18 }
 0x139   : > { %1701 = vst [vmem:[#allocation1 + $0x23] ss:$4 sm:$0xff] %v8298_v19 }
 0x13a   : > { %7266 = vmatmul.msk.f32.vlgmr.msrb.gmra.mxu0 %vm682_vm0, %v1096_v54 }
 0x13c   : > { %v1681_v12 = vld.sshfl [vmem:[#allocation1] sm:$0xff pattern:$0x73625140]  ;;  %v8586_v61 = vpop.permute.xlu2 %1265  ;;  %v1098_v62 = vpop.permute.xlu1 %1097 }
 0x13d   : > { %1683 = vrot.lane.b32.xlu2 %v1681_v12, %s8098_s30  ;;  %1687 = vst [vmem:[#allocation1] ss:$4 sm:$0xff] %v8302_v21 }
 0x13e   : > { %1689 = vst [vmem:[#allocation1 + $0x1] ss:$4 sm:$0xff] %v8306_v22 }
 0x13f   : > { %1691 = vst [vmem:[#allocation1 + $0x2] ss:$4 sm:$0xff] %v8310_v23 }
 0x140   : > { %1693 = vst [vmem:[#allocation1 + $0x3] ss:$4 sm:$0xff] %v8314_v24  ;;  %v1703_v63 = vld.sshfl [vmem:[#allocation1 + $0x20] sm:$0xff pattern:$0x73625140] }
 0x141   : > { %1769 = vst [vmem:[#allocation1 + $0x20] ss:$4 sm:$0xff] %v8318_v26 }
 0x142   : > { %7267 = vmatmul.msk.f32.gmra.mxu0 %vm682_vm0, %v1098_v62  ;;  %1771 = vst [vmem:[#allocation1 + $0x21] ss:$4 sm:$0xff] %v8323_v27 }
 0x143   : > { %v7559_v5 = vpop.permute.xlu0 %7558  ;;  %1773 = vst [vmem:[#allocation1 + $0x22] ss:$4 sm:$0xff] %v8326_v28 }
 0x144   : > { %1536 = vrot.lane.b32.xlu0 %v1534_v46, %s8097_s29  ;;  %v7561_v7 = vunpack.i.h.bf16 %v7559_v5  ;;  %v7560_v13 = vunpack.i.l.bf16 %v7559_v5  ;;  %1775 = vst [vmem:[#allocation1 + $0x23] ss:$4 sm:$0xff] %v8330_v29 }
 0x145   : > { %1706 = vrot.lane.b32.xlu2 %v1703_v63, %s8098_s30 }
 0x146   : > { %1216 = vmatpush.msrb.mxu2 %v7561_v7  ;;  %v7550_v7 = vunpack.i.l.bf16 %v8504_v41 }
 0x147   : > { %v8580_v15 = vld.sshfl [vmem:[#allocation1] sm:$0xff pattern:$0x73625140] }
 0x148   : > { %1217 = vmatpush.msrb.mxu2 %v7560_v13  ;;  %1761 = vst [vmem:[#allocation1] ss:$4 sm:$0xff] %v8336_v31  ;;  %923 = vmatpush.msra.mxu3 %v7550_v7 }
 0x149   : > { %1763 = vst [vmem:[#allocation1 + $0x1] ss:$4 sm:$0xff] %v8340_v32 }
 0x14a   : > { %1765 = vst [vmem:[#allocation1 + $0x2] ss:$4 sm:$0xff] %v8343_v33 }
 0x14b   : > { %1767 = vst [vmem:[#allocation1 + $0x3] ss:$4 sm:$0xff] %v8347_v35  ;;  %v1777_v30 = vld.sshfl [vmem:[#allocation1 + $0x20] sm:$0xff pattern:$0x73625140] }
 0x14c   : > { %2276 = vst.sshfl [vmem:[#allocation1 + $0x20] sm:$0xff pattern:$0x73625140] %v8262_v9 }
 0x152   : > { %v1776_v20 = vld.sshfl [vmem:[#allocation1] sm:$0xff pattern:$0x73625140] }
 0x153   : > { %2273 = vst.sshfl [vmem:[#allocation1] sm:$0xff pattern:$0x73625140] %v8259_v8  ;;  %v8601_v37 = vld [vmem:[#allocation1 + $0x21] ss:$4 sm:$0xff]  ;;  %v7577_v46 = vpack.i.bf16 %v1777_v30, %v1776_v20 }
 0x154   : > { %2281 = vst.sshfl [vmem:[#allocation1 + $0x20] sm:$0xff pattern:$0x73625140] %v8269_v11 }
 0x155   : > { %v1390_v25 = vpop.permute.xlu2 %1389  ;;  %7578 = vrot.lane.b32.xlu1 %v7577_v46, %s8098_s30 }
 0x157   : > { %v8605_v39 = vpop.permute.xlu0 %1263 }
 0x15a   : > { %v8597_v34 = vld [vmem:[#allocation1 + $0x1] ss:$4 sm:$0xff] }
 0x15b   : > { %2279 = vst.sshfl [vmem:[#allocation1] sm:$0xff pattern:$0x73625140] %v8265_v10  ;;  %v2282_v42 = vld [vmem:[#allocation1 + $0x21] ss:$4 sm:$0xff] }
 0x15c   : > { %2285 = vst.sshfl [vmem:[#allocation1 + $0x20] sm:$0xff pattern:$0x73625140] %v8236_v1  ;;  %v8681_v46 = vmul.f32 0.25, %v2282_v42  ;;  %v8697_v42 = vmul.f32 0.25, %v8601_v37 }
 0x15d   : > { %v1413_v36 = vpop.permute.xlu2 %1412 }
 0x15e   : > { %7276 = vmatpush.xpose.msk.msra.mxu0 %vm682_vm0, %v1413_v36  ;;  %12044 = vst [vmem:[#allocation40_spill] sm:$0xff] %v8697_v42 }
 0x162   : > { %v2280_v38 = vld [vmem:[#allocation1 + $0x1] ss:$4 sm:$0xff] }
 0x163   : > { %2283 = vst.sshfl [vmem:[#allocation1] sm:$0xff pattern:$0x73625140] %v8233_v0  ;;  %v8615_v49 = vld [vmem:[#allocation1 + $0x21] ss:$4 sm:$0xff] }
 0x164   : > { %2289 = vst.sshfl [vmem:[#allocation1 + $0x20] sm:$0xff pattern:$0x73625140] %v8242_v3  ;;  %v8715_v37 = vmul.f32 0.25, %v8615_v49 }
 0x166   : > { %v1392_v45 = vpop.permute.xlu0 %1391 }
 0x16a   : > { %v8610_v43 = vld [vmem:[#allocation1 + $0x1] ss:$4 sm:$0xff] }
 0x16b   : > { %2287 = vst.sshfl [vmem:[#allocation1] sm:$0xff pattern:$0x73625140] %v8239_v2  ;;  %v2290_v54 = vld [vmem:[#allocation1 + $0x21] ss:$4 sm:$0xff]  ;;  %v8702_v7 = vmul.f32 0.25, %v8610_v43 }
 0x16c   : > { %2310 = vst.sshfl [vmem:[#allocation1 + $0x20] sm:$0xff pattern:$0x73625140] %v8306_v22 }
 0x16d   : > { %12045 = vst [vmem:[#allocation41_spill] sm:$0xff] %v8702_v7 }
 0x16e   : > { %718 = vmax.xlane.f32.xlu0 %v717_v44  ;;  %v8676_v44 = vmul.f32 0.25, %v8597_v34 }
 0x172   : > { %v8619_v51 = vld [vmem:[#allocation1 + $0x1] ss:$4 sm:$0xff] }
 0x173   : > { %2307 = vst.sshfl [vmem:[#allocation1] sm:$0xff pattern:$0x73625140] %v8302_v21  ;;  %v8628_v56 = vld [vmem:[#allocation1 + $0x21] ss:$4 sm:$0xff] }
 0x174   : > { %2315 = vst.sshfl [vmem:[#allocation1 + $0x20] sm:$0xff pattern:$0x73625140] %v8314_v24 }
 0x178   : > { %v1411_v52 = vpop.permute.xlu0 %1410 }
 0x179   : > { %7277 = vmatpush.xpose.msk.msra.mxu0 %vm682_vm0, %v1411_v52 }
 0x17a   : > { %v8624_v55 = vld [vmem:[#allocation1 + $0x1] ss:$4 sm:$0xff] }
 0x17b   : > { %12042 = vst [vmem:[#allocation38_spill] sm:$0xff] %v8624_v55  ;;  %v8639_v12 = vld [vmem:[#allocation1 + $0x21] ss:$4 sm:$0xff]  ;;  %v8661_v62 = vpop.f32.mrf.mxu2 }
 0x17c   : > { %2313 = vst.sshfl [vmem:[#allocation1] sm:$0xff pattern:$0x73625140] %v8310_v23  ;;  %7278 = vmatmul.msk.f32.vlgmr.msra.gmra.mxu0 %vm682_vm0, %v1390_v25 }
 0x17d   : > { %2319 = vst.sshfl [vmem:[#allocation1 + $0x20] sm:$0xff pattern:$0x73625140] %v8290_v17 }
 0x182   : > { %1557 = vrot.lane.b32.xlu0 %v8531_v50, %s8097_s29 }
 0x183   : > { %v8633_v58 = vld [vmem:[#allocation1 + $0x1] ss:$4 sm:$0xff] }
 0x184   : > { %2317 = vst.sshfl [vmem:[#allocation1] sm:$0xff pattern:$0x73625140] %v8286_v16  ;;  %7279 = vmatmul.msk.f32.gmra.mxu0 %vm682_vm0, %v1392_v45  ;;  %v8646_v50 = vld [vmem:[#allocation1 + $0x21] ss:$4 sm:$0xff]  ;;  %v8679_v45 = vmul.f32 0.25, %v2280_v38  ;;  %v7556_v38 = vunpack.i.h.bf16 %v8523_v47 }
 0x185   : > { %2323 = vst.sshfl [vmem:[#allocation1 + $0x20] sm:$0xff pattern:$0x73625140] %v8298_v19 }
 0x186   : > { %1069 = vmatpush.msrb.mxu3 %v7556_v38 }
 0x18a   : > { %7573 = vrot.lane.b32.xlu0 %v7572_v59, %s8097_s29  ;;  %v8690_v59 = vmul.f32 0.25, %v2290_v54  ;;  %v7555_v54 = vunpack.i.l.bf16 %v8523_v47  ;;  %v8718_v47 = vpop.f32.mrf.mxu2 }
 0x18b   : > { %v8642_v5 = vld [vmem:[#allocation1 + $0x1] ss:$4 sm:$0xff] }
 0x18c   : > { %2321 = vst.sshfl [vmem:[#allocation1] sm:$0xff pattern:$0x73625140] %v8294_v18  ;;  %v8655_v60 = vld [vmem:[#allocation1 + $0x21] ss:$4 sm:$0xff]  ;;  %1070 = vmatpush.msrb.mxu3 %v7555_v54 }
 0x18d   : > { %2328 = vst.sshfl [vmem:[#allocation1 + $0x20] sm:$0xff pattern:$0x73625140] %v8340_v32 }
 0x18e   : > { %12043 = vst [vmem:[#allocation39_spill] sm:$0xff] %v8690_v59 }
 0x192   : > { %1704 = vrot.lane.b32.xlu0 %v8580_v15, %s8098_s30  ;;  %v857_v15 = vsel %vm682_vm0, %v8661_v62, -inf }
 0x193   : > { %v8649_v6 = vld [vmem:[#allocation1 + $0x1] ss:$4 sm:$0xff]  ;;  %858 = vmax.xlane.f32.xlu2 %v857_v15  ;;  %v8707_v15 = vmul.f32 0.25, %v8619_v51  ;;  %v860_v51 = vsel %vm682_vm0, %v8718_v47, -inf }
 0x194   : > { %2325 = vst.sshfl [vmem:[#allocation1] sm:$0xff pattern:$0x73625140] %v8336_v31  ;;  %v8666_v63 = vld [vmem:[#allocation1 + $0x21] ss:$4 sm:$0xff] }
 0x195   : > { %2333 = vst.sshfl [vmem:[#allocation1 + $0x20] sm:$0xff pattern:$0x73625140] %v8347_v35 }
 0x196   : > { %12046 = vst [vmem:[#allocation42_spill] sm:$0xff] %v8707_v15 }
 0x19b   : > { %v8659_v13 = vld [vmem:[#allocation1 + $0x1] ss:$4 sm:$0xff] }
 0x19c   : > { %2331 = vst.sshfl [vmem:[#allocation1] sm:$0xff pattern:$0x73625140] %v8343_v33  ;;  %v8673_v36 = vld [vmem:[#allocation1 + $0x21] ss:$4 sm:$0xff] }
 0x19d   : > { %2337 = vst.sshfl [vmem:[#allocation1 + $0x20] sm:$0xff pattern:$0x73625140] %v8323_v27 }
 0x1a3   : > { %v8669_v20 = vld [vmem:[#allocation1 + $0x1] ss:$4 sm:$0xff]  ;;  %v716_v41 = vpop.xlane.xlu0 %715 }
 0x1a4   : > { %2335 = vst.sshfl [vmem:[#allocation1] sm:$0xff pattern:$0x73625140] %v8318_v26  ;;  %v720_v25 = vsub.f32 %v8537_v53, %v716_v41  ;;  %v8699_v57 = vld [vmem:[#allocation1 + $0x21] ss:$4 sm:$0xff] }
 0x1a5   : > { %2341 = vst.sshfl [vmem:[#allocation1 + $0x20] sm:$0xff pattern:$0x73625140] %v8330_v29 }
 0x1a6   : > { %v722_v30 = vmul.f32 1.442695, %v720_v25  ;;  %2365 = vst [vmem:[#allocation1 + $0x23] ss:$4 sm:$0xff] %v8690_v59 }
 0x1a7   : > { %2359 = vst [vmem:[#allocation1 + $0x20] ss:$4 sm:$0xff] %v8702_v7 }
 0x1a8   : > { %7724 = vpow2.f32 %v722_v30  ;;  %2363 = vst [vmem:[#allocation1 + $0x22] ss:$4 sm:$0xff] %v8707_v15 }
 0x1ab   : > { %v8683_v52 = vld [vmem:[#allocation1 + $0x1] ss:$4 sm:$0xff] }
 0x1ac   : > { %2339 = vst.sshfl [vmem:[#allocation1] sm:$0xff pattern:$0x73625140] %v8326_v28  ;;  %v8720_v43 = vld [vmem:[#allocation1 + $0x21] ss:$4 sm:$0xff]  ;;  %v7569_v28 = vpop.permute.xlu2 %7568 }
 0x1ad   : > { %2351 = vst [vmem:[#allocation1] ss:$4 sm:$0xff] %v8676_v44  ;;  %v7571_v27 = vunpack.i.h.bf16 %v7569_v28  ;;  %v7570_v35 = vunpack.i.l.bf16 %v7569_v28 }
 0x1ae   : > { %v8687_v53 = vpop.eup %7724  ;;  %2355 = vst [vmem:[#allocation1 + $0x2] ss:$4 sm:$0xff] %v8679_v45 }
 0x1af   : > { %2357 = vst [vmem:[#allocation1 + $0x3] ss:$4 sm:$0xff] %v8681_v46  ;;  %v726_v34 = vsel %vm682_vm0, %v8687_v53, 0.0  ;;  %1510 = vmatpush.msra.mxu2 %v7571_v27 }
 0x1b0   : > { %727 = vadd.xlane.f32.xlu1 %v726_v34  ;;  %2361 = vst [vmem:[#allocation1 + $0x21] ss:$4 sm:$0xff] %v8715_v37 }
 0x1b1   : > { %1511 = vmatpush.msra.mxu2 %v7570_v35 }
 0x1b3   : > { %v8710_v41 = vld [vmem:[#allocation1 + $0x1] ss:$4 sm:$0xff] }
 0x1b4   : > { %2353 = vst [vmem:[#allocation1 + $0x1] ss:$4 sm:$0xff] %v8697_v42  ;;  %v8777_v27 = vpop.permute.xlu2 %1559 }
 0x1b7   : > { %v8731_v49 = vld.sshfl [vmem:[#allocation1 + $0x20] sm:$0xff pattern:$0x73625140] }
 0x1b8   : > { %2376 = vst [vmem:[#allocation1 + $0x20] ss:$4 sm:$0xff] %v8642_v5 }
 0x1b9   : > { %2378 = vst [vmem:[#allocation1 + $0x21] ss:$4 sm:$0xff] %v8646_v50 }
 0x1ba   : > { %2380 = vst [vmem:[#allocation1 + $0x22] ss:$4 sm:$0xff] %v8649_v6 }
 0x1bb   : > { %v8725_v25 = vld.sshfl [vmem:[#allocation1] sm:$0xff pattern:$0x73625140]  ;;  %2382 = vst [vmem:[#allocation1 + $0x23] ss:$4 sm:$0xff] %v8655_v60 }
 0x1bc   : > { %2368 = vst [vmem:[#allocation1] ss:$4 sm:$0xff] %v8624_v55  ;;  %861 = vmax.xlane.f32.xlu0 %v860_v51  ;;  %v8759_v51 = vpop.permute.xlu0 %1536 }
 0x1bd   : > { %2370 = vst [vmem:[#allocation1 + $0x1] ss:$4 sm:$0xff] %v8628_v56 }
 0x1be   : > { %2372 = vst [vmem:[#allocation1 + $0x2] ss:$4 sm:$0xff] %v8633_v58 }
 0x1bf   : > { %2374 = vst [vmem:[#allocation1 + $0x3] ss:$4 sm:$0xff] %v8639_v12 }
 0x1c2   : > { %v8743_v34 = vld.sshfl [vmem:[#allocation1 + $0x20] sm:$0xff pattern:$0x73625140] }
 0x1c3   : > { %2446 = vst [vmem:[#allocation1 + $0x20] ss:$4 sm:$0xff] %v8683_v52 }
 0x1c4   : > { %2448 = vst [vmem:[#allocation1 + $0x21] ss:$4 sm:$0xff] %v8699_v57 }
 0x1c5   : > { %2450 = vst [vmem:[#allocation1 + $0x22] ss:$4 sm:$0xff] %v8710_v41 }
 0x1c6   : > { %v8737_v30 = vld.sshfl [vmem:[#allocation1] sm:$0xff pattern:$0x73625140]  ;;  %2452 = vst [vmem:[#allocation1 + $0x23] ss:$4 sm:$0xff] %v8720_v43 }
 0x1c7   : > { %2438 = vst [vmem:[#allocation1] ss:$4 sm:$0xff] %v8659_v13 }
 0x1c8   : > { %2440 = vst [vmem:[#allocation1 + $0x1] ss:$4 sm:$0xff] %v8666_v63 }
 0x1c9   : > { %2442 = vst [vmem:[#allocation1 + $0x2] ss:$4 sm:$0xff] %v8669_v20 }
 0x1ca   : > { %2444 = vst [vmem:[#allocation1 + $0x3] ss:$4 sm:$0xff] %v8673_v36 }
 0x1cd   : > { %v8755_v54 = vld.sshfl [vmem:[#allocation1 + $0x20] sm:$0xff pattern:$0x73625140] }
 0x1ce   : > { %12048 = vst [vmem:[#allocation44_spill] sm:$0xff] %v8755_v54 }
 0x1cf   : > { %2494 = vst [vmem:[#allocation1 + $0x20] ss:$4 sm:$0xff] %v8702_v7 }
 0x1d0   : > { %2496 = vst [vmem:[#allocation1 + $0x21] ss:$4 sm:$0xff] %v8715_v37 }
 0x1d1   : > { %v8749_v38 = vld.sshfl [vmem:[#allocation1] sm:$0xff pattern:$0x73625140]  ;;  %2498 = vst [vmem:[#allocation1 + $0x22] ss:$4 sm:$0xff] %v8707_v15 }
 0x1d2   : > { %12047 = vst [vmem:[#allocation43_spill] sm:$0xff] %v8749_v38 }
 0x1d3   : > { %2486 = vst [vmem:[#allocation1] ss:$4 sm:$0xff] %v8676_v44 }
 0x1d4   : > { %2488 = vst [vmem:[#allocation1 + $0x1] ss:$4 sm:$0xff] %v8697_v42 }
 0x1d5   : > { %2490 = vst [vmem:[#allocation1 + $0x2] ss:$4 sm:$0xff] %v8679_v45 }
 0x1d6   : > { %2492 = vst [vmem:[#allocation1 + $0x3] ss:$4 sm:$0xff] %v8681_v46 }
 0x1d7   : > { %2500 = vst [vmem:[#allocation1 + $0x23] ss:$4 sm:$0xff] %v8690_v59 }
 0x1dd   : > { %v8763_v29 = vld.sshfl [vmem:[#allocation1] sm:$0xff pattern:$0x73625140] }
 0x1de   : > { %2507 = vst [vmem:[#allocation1] ss:$4 sm:$0xff] %v8624_v55  ;;  %v2502_v33 = vld.sshfl [vmem:[#allocation1 + $0x20] sm:$0xff pattern:$0x73625140] }
 0x1df   : > { %2509 = vst [vmem:[#allocation1 + $0x1] ss:$4 sm:$0xff] %v8628_v56  ;;  %2505 = vrot.lane.b32.xlu2 %v2502_v33, %s8092_s22 }
 0x1e0   : > { %2511 = vst [vmem:[#allocation1 + $0x2] ss:$4 sm:$0xff] %v8633_v58 }
 0x1e1   : > { %2513 = vst [vmem:[#allocation1 + $0x3] ss:$4 sm:$0xff] %v8639_v12  ;;  %v719_v26 = vpop.xlane.xlu0 %718 }
 0x1e2   : > { %v721_v32 = vsub.f32 %v8607_v40, %v719_v26  ;;  %2515 = vst [vmem:[#allocation1 + $0x20] ss:$4 sm:$0xff] %v8642_v5 }
 0x1e3   : > { %2517 = vst [vmem:[#allocation1 + $0x21] ss:$4 sm:$0xff] %v8646_v50 }
 0x1e4   : > { %v724_v31 = vmul.f32 1.442695, %v721_v32  ;;  %2519 = vst [vmem:[#allocation1 + $0x22] ss:$4 sm:$0xff] %v8649_v6 }
 0x1e5   : > { %2521 = vst [vmem:[#allocation1 + $0x23] ss:$4 sm:$0xff] %v8655_v60 }
 0x1e6   : > { %7726 = vpow2.f32 %v724_v31  ;;  %v1684_v31 = vpop.permute.xlu2 %1683 }
 0x1e8   : > { %v2522_v19 = vld.sshfl [vmem:[#allocation1] sm:$0xff pattern:$0x73625140] }
 0x1e9   : > { %2581 = vst [vmem:[#allocation1] ss:$4 sm:$0xff] %v8659_v13  ;;  %2524 = vrot.lane.b32.xlu0 %v2522_v19, %s8092_s22  ;;  %v8789_v19 = vpop.permute.xlu1 %1244 }
 0x1ea   : > { %2583 = vst [vmem:[#allocation1 + $0x1] ss:$4 sm:$0xff] %v8666_v63 }
 0x1eb   : > { %2585 = vst [vmem:[#allocation1 + $0x2] ss:$4 sm:$0xff] %v8669_v20 }
 0x1ec   : > { %2587 = vst [vmem:[#allocation1 + $0x3] ss:$4 sm:$0xff] %v8673_v36  ;;  %v8782_v26 = vpop.eup %7726  ;;  %v2523_v28 = vld.sshfl [vmem:[#allocation1 + $0x20] sm:$0xff pattern:$0x73625140] }
 0x1ed   : > { %v729_v32 = vsel %vm682_vm0, %v8782_v26, 0.0  ;;  %2589 = vst [vmem:[#allocation1 + $0x20] ss:$4 sm:$0xff] %v8683_v52  ;;  %2526 = vrot.lane.b32.xlu2 %v2523_v28, %s8092_s22  ;;  %v8803_v28 = vpop.f32.mrf.mxu0 }
 0x1ee   : > { %730 = vadd.xlane.f32.xlu1 %v729_v32  ;;  %2591 = vst [vmem:[#allocation1 + $0x21] ss:$4 sm:$0xff] %v8699_v57  ;;  %v1707_v32 = vpop.permute.xlu2 %1706 }
 0x1ef   : > { %2593 = vst [vmem:[#allocation1 + $0x22] ss:$4 sm:$0xff] %v8710_v41  ;;  %7288 = vmatpush.xpose.msk.msrb.mxu0 %vm682_vm0, %v1707_v32 }
 0x1f0   : > { %2595 = vst [vmem:[#allocation1 + $0x23] ss:$4 sm:$0xff] %v8720_v43 }
 0x1f1   : > { %v8806_v18 = vpop.permute.xlu1 %7563 }
 0x1f3   : > { %v8793_v33 = vld.sshfl [vmem:[#allocation1] sm:$0xff pattern:$0x73625140] }
 0x1f4   : > { %2633 = vst [vmem:[#allocation1] ss:$4 sm:$0xff] %v8676_v44  ;;  %v8797_v35 = vpop.permute.xlu0 %1557 }
 0x1f5   : > { %2635 = vst [vmem:[#allocation1 + $0x1] ss:$4 sm:$0xff] %v8697_v42  ;;  %v8819_v24 = vpop.f32.mrf.mxu0 }
 0x1f6   : > { %2637 = vst [vmem:[#allocation1 + $0x2] ss:$4 sm:$0xff] %v8679_v45 }
 0x1f7   : > { %2639 = vst [vmem:[#allocation1 + $0x3] ss:$4 sm:$0xff] %v8681_v46  ;;  %v8801_v40 = vld.sshfl [vmem:[#allocation1 + $0x20] sm:$0xff pattern:$0x73625140] }
 0x1f8   : > { %2641 = vst [vmem:[#allocation1 + $0x20] ss:$4 sm:$0xff] %v8702_v7 }
 0x1f9   : > { %2643 = vst [vmem:[#allocation1 + $0x21] ss:$4 sm:$0xff] %v8715_v37  ;;  %v8824_v23 = vpop.permute.xlu1 %1538 }
 0x1fa   : > { %2645 = vst [vmem:[#allocation1 + $0x22] ss:$4 sm:$0xff] %v8707_v15 }
 0x1fb   : > { %2647 = vst [vmem:[#allocation1 + $0x23] ss:$4 sm:$0xff] %v8690_v59 }
 0x1fc   : > { %v8812_v17 = vpop.permute.xlu0 %7573 }
 0x1fd   : > { %v8838_v3 = vpop.f32.mrf.mxu0 }
 0x1fe   : > { %v8814_v16 = vld.sshfl [vmem:[#allocation1] sm:$0xff pattern:$0x73625140] }
 0x1ff   : > { %2654 = vst [vmem:[#allocation1] ss:$4 sm:$0xff] %v8624_v55 }
 0x200   : > { %2656 = vst [vmem:[#allocation1 + $0x1] ss:$4 sm:$0xff] %v8628_v56 }
 0x201   : > { %2658 = vst [vmem:[#allocation1 + $0x2] ss:$4 sm:$0xff] %v8633_v58 }
 0x202   : > { %2660 = vst [vmem:[#allocation1 + $0x3] ss:$4 sm:$0xff] %v8639_v12  ;;  %v8822_v32 = vld.sshfl [vmem:[#allocation1 + $0x20] sm:$0xff pattern:$0x73625140] }
 0x203   : > { %2662 = vst [vmem:[#allocation1 + $0x20] ss:$4 sm:$0xff] %v8642_v5 }
 0x204   : > { %v1705_v22 = vpop.permute.xlu0 %1704  ;;  %2664 = vst [vmem:[#allocation1 + $0x21] ss:$4 sm:$0xff] %v8646_v50 }
 0x205   : > { %7289 = vmatpush.xpose.msk.msrb.mxu0 %vm682_vm0, %v1705_v22  ;;  %2666 = vst [vmem:[#allocation1 + $0x22] ss:$4 sm:$0xff] %v8649_v6  ;;  %v1686_v22 = vpop.permute.xlu1 %1685  ;;  %v8854_v1 = vpop.f32.mrf.mxu0 }
 0x206   : > { %2668 = vst [vmem:[#allocation1 + $0x23] ss:$4 sm:$0xff] %v8655_v60 }
 0x207   : > { %2503 = vrot.lane.b32.xlu1 %v8763_v29, %s8092_s22  ;;  %v1154_v29 = vsel %vm682_vm0, %v8819_v24, -inf }
 0x208   : > { %7290 = vmatmul.msk.f32.vlgmr.msrb.gmra.mxu0 %vm682_vm0, %v1684_v31 }
 0x209   : > { %v8833_v21 = vld.sshfl [vmem:[#allocation1] sm:$0xff pattern:$0x73625140] }
 0x20a   : > { %2728 = vst [vmem:[#allocation1] ss:$4 sm:$0xff] %v8659_v13 }
 0x20b   : > { %2730 = vst [vmem:[#allocation1 + $0x1] ss:$4 sm:$0xff] %v8666_v63 }
 0x20c   : > { %2732 = vst [vmem:[#allocation1 + $0x2] ss:$4 sm:$0xff] %v8669_v20 }
 0x20d   : > { %2734 = vst [vmem:[#allocation1 + $0x3] ss:$4 sm:$0xff] %v8673_v36  ;;  %v8842_v2 = vld.sshfl [vmem:[#allocation1 + $0x20] sm:$0xff pattern:$0x73625140]  ;;  %v8863_v11 = vpop.permute.xlu1 %7578 }
 0x20e   : > { %2736 = vst [vmem:[#allocation1 + $0x20] ss:$4 sm:$0xff] %v8683_v52 }
 0x20f   : > { %2738 = vst [vmem:[#allocation1 + $0x21] ss:$4 sm:$0xff] %v8699_v57 }
 0x210   : > { %7291 = vmatmul.msk.f32.gmra.mxu0 %vm682_vm0, %v1686_v22  ;;  %2740 = vst [vmem:[#allocation1 + $0x22] ss:$4 sm:$0xff] %v8710_v41  ;;  %v1448_v22 = vsel %vm682_vm0, %v8854_v1, -inf }
 0x211   : > { %2742 = vst [vmem:[#allocation1 + $0x23] ss:$4 sm:$0xff] %v8720_v43 }
 0x213   : > { %1155 = vmax.xlane.f32.xlu0 %v1154_v29 }
 0x214   : > { %v8851_v31 = vld.sshfl [vmem:[#allocation1] sm:$0xff pattern:$0x73625140] }
 0x215   : > { %2780 = vst [vmem:[#allocation1] ss:$4 sm:$0xff] %v8676_v44 }
 0x216   : > { %2782 = vst [vmem:[#allocation1 + $0x1] ss:$4 sm:$0xff] %v8697_v42 }
 0x217   : > { %2784 = vst [vmem:[#allocation1 + $0x2] ss:$4 sm:$0xff] %v8679_v45 }
 0x218   : > { %2786 = vst [vmem:[#allocation1 + $0x3] ss:$4 sm:$0xff] %v8681_v46  ;;  %v8861_v0 = vld.sshfl [vmem:[#allocation1 + $0x20] sm:$0xff pattern:$0x73625140] }
 0x219   : > { %12049 = vst [vmem:[#allocation45_spill] sm:$0xff] %v8861_v0 }
 0x21a   : > { %2788 = vst [vmem:[#allocation1 + $0x20] ss:$4 sm:$0xff] %v8702_v7 }
 0x21b   : > { %1449 = vmax.xlane.f32.xlu0 %v1448_v22  ;;  %2790 = vst [vmem:[#allocation1 + $0x21] ss:$4 sm:$0xff] %v8715_v37 }
 0x21c   : > { %2792 = vst [vmem:[#allocation1 + $0x22] ss:$4 sm:$0xff] %v8707_v15 }
 0x21d   : > { %2794 = vst [vmem:[#allocation1 + $0x23] ss:$4 sm:$0xff] %v8690_v59 }
 0x21f   : > { %v8869_v29 = vld.sshfl [vmem:[#allocation1] sm:$0xff pattern:$0x73625140] }
 0x220   : > { %2801 = vst [vmem:[#allocation1] ss:$4 sm:$0xff] %v8624_v55 }
 0x221   : > { %2803 = vst [vmem:[#allocation1 + $0x1] ss:$4 sm:$0xff] %v8628_v56 }
 0x222   : > { %2805 = vst [vmem:[#allocation1 + $0x2] ss:$4 sm:$0xff] %v8633_v58 }
 0x223   : > { %2807 = vst [vmem:[#allocation1 + $0x3] ss:$4 sm:$0xff] %v8639_v12  ;;  %v728_v10 = vpop.xlane.xlu1 %727 }
 0x224   : > { %v8875_v9 = vld.sshfl [vmem:[#allocation1 + $0x20] sm:$0xff pattern:$0x73625140]  ;;  %7728 = vrcp.f32 %v728_v10  ;;  %v859_v10 = vpop.xlane.xlu2 %858 }
 0x225   : > { %12050 = vst [vmem:[#allocation46_spill] sm:$0xff] %v8875_v9  ;;  %v863_v9 = vsub.f32 %v8661_v62, %v859_v10 }
 0x226   : > { %2809 = vst [vmem:[#allocation1 + $0x20] ss:$4 sm:$0xff] %v8642_v5 }
 0x227   : > { %2811 = vst [vmem:[#allocation1 + $0x21] ss:$4 sm:$0xff] %v8646_v50 }
 0x228   : > { %2813 = vst [vmem:[#allocation1 + $0x22] ss:$4 sm:$0xff] %v8649_v6 }
 0x229   : > { %2815 = vst [vmem:[#allocation1 + $0x23] ss:$4 sm:$0xff] %v8655_v60 }
 0x22a   : > { %v8881_v22 = vld.sshfl [vmem:[#allocation1] sm:$0xff pattern:$0x73625140]  ;;  %v7729_v8 = vpop.eup %7728 }
 0x22b   : > { %12051 = vst [vmem:[#allocation47_spill] sm:$0xff] %v8881_v22  ;;  %v734_v38 = vmul.f32 %v7729_v8, %v8687_v53  ;;  %v1151_v8 = vsel %vm682_vm0, %v8803_v28, -inf }
 0x22c   : > { %2875 = vst [vmem:[#allocation1] ss:$4 sm:$0xff] %v8659_v13 }
 0x22d   : > { %2877 = vst [vmem:[#allocation1 + $0x1] ss:$4 sm:$0xff] %v8666_v63  ;;  %7250 = vmatmul.msk.f32.vlgmr.msra.gmra.mxu1 %vm682_vm0, %v734_v38 }
 0x22e   : > { %2879 = vst [vmem:[#allocation1 + $0x2] ss:$4 sm:$0xff] %v8669_v20  ;;  %7270 = vmatpush.xpose.msk.msra.mxu1 %vm682_vm0, %v8586_v61  ;;  %v865_v61 = vmul.f32 1.442695, %v863_v9 }
 0x22f   : > { %2881 = vst [vmem:[#allocation1 + $0x3] ss:$4 sm:$0xff] %v8673_v36  ;;  %v862_v22 = vpop.xlane.xlu0 %861 }
 0x230   : > { %v8891_v54 = vld.sshfl [vmem:[#allocation1 + $0x20] sm:$0xff pattern:$0x73625140]  ;;  %v864_v0 = vsub.f32 %v8718_v47, %v862_v22  ;;  %v1445_v47 = vsel %vm682_vm0, %v8838_v3, -inf }
 0x231   : > { %2883 = vst [vmem:[#allocation1 + $0x20] ss:$4 sm:$0xff] %v8683_v52  ;;  %1152 = vmax.xlane.f32.xlu1 %v1151_v8 }
 0x232   : > { %2885 = vst [vmem:[#allocation1 + $0x21] ss:$4 sm:$0xff] %v8699_v57  ;;  %v867_v53 = vmul.f32 1.442695, %v864_v0  ;;  %7271 = vmatpush.xpose.msk.msra.mxu1 %vm682_vm0, %v8605_v39 }
 0x233   : > { %2887 = vst [vmem:[#allocation1 + $0x22] ss:$4 sm:$0xff] %v8710_v41 }
 0x234   : > { %2889 = vst [vmem:[#allocation1 + $0x23] ss:$4 sm:$0xff] %v8720_v43  ;;  %7730 = vpow2.f32 %v867_v53 }
 0x235   : > { %7732 = vpow2.f32 %v865_v61 }
 0x236   : > { %v8903_v62 = vld.sshfl [vmem:[#allocation1] sm:$0xff pattern:$0x73625140] }
 0x237   : > { %2927 = vst [vmem:[#allocation1] ss:$4 sm:$0xff] %v8676_v44 }
 0x238   : > { %2929 = vst [vmem:[#allocation1 + $0x1] ss:$4 sm:$0xff] %v8697_v42 }
 0x239   : > { %2931 = vst [vmem:[#allocation1 + $0x2] ss:$4 sm:$0xff] %v8679_v45  ;;  %1446 = vmax.xlane.f32.xlu1 %v1445_v47 }
 0x23a   : > { %2933 = vst [vmem:[#allocation1 + $0x3] ss:$4 sm:$0xff] %v8681_v46  ;;  %v8911_v0 = vpop.eup %7730 }
 0x23b   : > { %v8913_v39 = vld.sshfl [vmem:[#allocation1 + $0x20] sm:$0xff pattern:$0x73625140]  ;;  %v872_v9 = vsel %vm682_vm0, %v8911_v0, 0.0  ;;  %v8919_v38 = vpop.eup %7732 }
 0x23c   : > { %2935 = vst [vmem:[#allocation1 + $0x20] ss:$4 sm:$0xff] %v8702_v7  ;;  %873 = vadd.xlane.f32.xlu2 %v872_v9  ;;  %v869_v10 = vsel %vm682_vm0, %v8919_v38, 0.0 }
 0x23d   : > { %2937 = vst [vmem:[#allocation1 + $0x21] ss:$4 sm:$0xff] %v8715_v37 }
 0x23e   : > { %2939 = vst [vmem:[#allocation1 + $0x22] ss:$4 sm:$0xff] %v8707_v15 }
 0x23f   : > { %2941 = vst [vmem:[#allocation1 + $0x23] ss:$4 sm:$0xff] %v8690_v59 }
 0x241   : > { %v8923_v22 = vld.sshfl [vmem:[#allocation1] sm:$0xff pattern:$0x73625140]  ;;  %870 = vadd.xlane.f32.xlu1 %v869_v10 }
 0x242   : > { %2948 = vst [vmem:[#allocation1] ss:$4 sm:$0xff] %v8624_v55 }
 0x243   : > { %2950 = vst [vmem:[#allocation1 + $0x1] ss:$4 sm:$0xff] %v8628_v56 }
 0x244   : > { %2952 = vst [vmem:[#allocation1 + $0x2] ss:$4 sm:$0xff] %v8633_v58 }
 0x245   : > { %2954 = vst [vmem:[#allocation1 + $0x3] ss:$4 sm:$0xff] %v8639_v12 }
 0x246   : > { %v8931_v8 = vld.sshfl [vmem:[#allocation1 + $0x20] sm:$0xff pattern:$0x73625140] }
 0x247   : > { %2956 = vst [vmem:[#allocation1 + $0x20] ss:$4 sm:$0xff] %v8642_v5 }
 0x248   : > { %2958 = vst [vmem:[#allocation1 + $0x21] ss:$4 sm:$0xff] %v8646_v50 }
 0x249   : > { %2960 = vst [vmem:[#allocation1 + $0x22] ss:$4 sm:$0xff] %v8649_v6 }
 0x24a   : > { %2962 = vst [vmem:[#allocation1 + $0x23] ss:$4 sm:$0xff] %v8655_v60 }
 0x24c   : > { %v8937_v53 = vld.sshfl [vmem:[#allocation1] sm:$0xff pattern:$0x73625140] }
 0x24d   : > { %3022 = vst [vmem:[#allocation1] ss:$4 sm:$0xff] %v8659_v13 }
 0x24e   : > { %3024 = vst [vmem:[#allocation1 + $0x1] ss:$4 sm:$0xff] %v8666_v63 }
 0x24f   : > { %3026 = vst [vmem:[#allocation1 + $0x2] ss:$4 sm:$0xff] %v8669_v20 }
 0x250   : > { %3028 = vst [vmem:[#allocation1 + $0x3] ss:$4 sm:$0xff] %v8673_v36 }
 0x251   : > { %v8943_v61 = vld.sshfl [vmem:[#allocation1 + $0x20] sm:$0xff pattern:$0x73625140] }
 0x252   : > { %3030 = vst [vmem:[#allocation1 + $0x20] ss:$4 sm:$0xff] %v8683_v52 }
 0x253   : > { %3032 = vst [vmem:[#allocation1 + $0x21] ss:$4 sm:$0xff] %v8699_v57 }
 0x254   : > { %3034 = vst [vmem:[#allocation1 + $0x22] ss:$4 sm:$0xff] %v8710_v41 }
 0x255   : > { %3036 = vst [vmem:[#allocation1 + $0x23] ss:$4 sm:$0xff] %v8720_v43 }
 0x257   : > { %v8949_v47 = vld.sshfl [vmem:[#allocation1] sm:$0xff pattern:$0x73625140] }
 0x258   : > { %12052 = vst [vmem:[#allocation48_spill] sm:$0xff] %v8949_v47  ;;  %v2506_v47 = vpop.permute.xlu2 %2505 }
 0x259   : > { %3074 = vst [vmem:[#allocation1] ss:$4 sm:$0xff] %v8676_v44 }
 0x25a   : > { %3076 = vst [vmem:[#allocation1 + $0x1] ss:$4 sm:$0xff] %v8697_v42 }
 0x25b   : > { %3078 = vst [vmem:[#allocation1 + $0x2] ss:$4 sm:$0xff] %v8679_v45 }
 0x25c   : > { %3080 = vst [vmem:[#allocation1 + $0x3] ss:$4 sm:$0xff] %v8681_v46  ;;  %v8955_v9 = vld.sshfl [vmem:[#allocation1 + $0x20] sm:$0xff pattern:$0x73625140] }
 0x25d   : > { %3082 = vst [vmem:[#allocation1 + $0x20] ss:$4 sm:$0xff] %v8702_v7 }
 0x25e   : > { %3084 = vst [vmem:[#allocation1 + $0x21] ss:$4 sm:$0xff] %v8715_v37 }
 0x25f   : > { %3086 = vst [vmem:[#allocation1 + $0x22] ss:$4 sm:$0xff] %v8707_v15 }
 0x260   : > { %3088 = vst [vmem:[#allocation1 + $0x23] ss:$4 sm:$0xff] %v8690_v59 }
 0x261   : > { %v731_v42 = vpop.xlane.xlu1 %730 }
 0x262   : > { %7734 = vrcp.f32 %v731_v42  ;;  %v2525_v42 = vpop.permute.xlu0 %2524 }
 0x263   : > { %v8961_v10 = vld.sshfl [vmem:[#allocation1] sm:$0xff pattern:$0x73625140] }
 0x264   : > { %3095 = vst [vmem:[#allocation1] ss:$4 sm:$0xff] %v8624_v55  ;;  %v2527_v55 = vpop.permute.xlu2 %2526 }
 0x265   : > { %3097 = vst [vmem:[#allocation1 + $0x1] ss:$4 sm:$0xff] %v8628_v56  ;;  %7308 = vmatpush.xpose.msk.msra.mxu0 %vm682_vm0, %v2527_v55 }
 0x266   : > { %3099 = vst [vmem:[#allocation1 + $0x2] ss:$4 sm:$0xff] %v8633_v58 }
 0x267   : > { %3101 = vst [vmem:[#allocation1 + $0x3] ss:$4 sm:$0xff] %v8639_v12  ;;  %v8967_v7 = vld.sshfl [vmem:[#allocation1 + $0x20] sm:$0xff pattern:$0x73625140] }
 0x268   : > { %3103 = vst [vmem:[#allocation1 + $0x20] ss:$4 sm:$0xff] %v8642_v5  ;;  %v7735_v15 = vpop.eup %7734 }
 0x269   : > { %3105 = vst [vmem:[#allocation1 + $0x21] ss:$4 sm:$0xff] %v8646_v50  ;;  %v735_v59 = vmul.f32 %v7735_v15, %v8782_v26  ;;  %7309 = vmatpush.xpose.msk.msra.mxu0 %vm682_vm0, %v2525_v42 }
 0x26a   : > { %3107 = vst [vmem:[#allocation1 + $0x22] ss:$4 sm:$0xff] %v8649_v6 }
 0x26b   : > { %3109 = vst [vmem:[#allocation1 + $0x23] ss:$4 sm:$0xff] %v8655_v60  ;;  %7251 = vmatmul.msk.f32.gmra.mxu1 %vm682_vm0, %v735_v59 }
 0x273   : > { %7260 = vmatmul.msk.f32.vlgmr.msrb.gmra.mxu1 %vm682_vm0, %v8525_v48 }
 0x274   : > { %7282 = vmatpush.xpose.msk.msrb.mxu1 %vm682_vm0, %v8777_v27 }
 0x278   : > { %7283 = vmatpush.xpose.msk.msrb.mxu1 %vm682_vm0, %v8797_v35 }
 0x279   : > { %v2504_v15 = vpop.permute.xlu1 %2503 }
 0x27a   : > { %7310 = vmatmul.msk.f32.vlgmr.msra.gmra.mxu0 %vm682_vm0, %v2504_v15 }
 0x27b   : > { %7261 = vmatmul.msk.f32.gmra.mxu1 %vm682_vm0, %v8574_v14 }
 0x282   : > { %7311 = vmatmul.msk.f32.gmra.mxu0 %vm682_vm0, %v2506_v47 }
 0x283   : > { %7272 = vmatmul.msk.f32.vlgmr.msra.gmra.mxu1 %vm682_vm0, %v8570_v4 }
 0x284   : > { %7302 = vmatpush.xpose.msk.msra.mxu1 %vm682_vm0, %v8743_v34 }
 0x285   : > { %v8991_v55 = vpop.f32.mrf.mxu0 }
 0x286   : > { %v1156_v48 = vpop.xlane.xlu0 %1155  ;;  %v1739_v27 = vsel %vm682_vm0, %v8991_v55, -inf }
 0x287   : > { %v1158_v59 = vsub.f32 %v8819_v24, %v1156_v48  ;;  %1740 = vmax.xlane.f32.xlu0 %v1739_v27 }
 0x288   : > { %7303 = vmatpush.xpose.msk.msra.mxu1 %vm682_vm0, %v8737_v30 }
 0x289   : > { %v1161_v14 = vmul.f32 1.442695, %v1158_v59 }
 0x28b   : > { %7273 = vmatmul.msk.f32.gmra.mxu1 %vm682_vm0, %v8789_v19  ;;  %7736 = vpow2.f32 %v1161_v14 }
 0x28d   : > { %v1736_v26 = vpop.f32.mrf.mxu0 }
 0x28e   : > { %v1450_v4 = vpop.xlane.xlu0 %1449  ;;  %v1742_v35 = vsel %vm682_vm0, %v1736_v26, -inf }
 0x28f   : > { %v1452_v34 = vsub.f32 %v8854_v1, %v1450_v4  ;;  %1743 = vmax.xlane.f32.xlu1 %v1742_v35  ;;  %v7566_v35 = vunpack.i.h.bf16 %v8806_v18 }
 0x291   : > { %v1455_v24 = vmul.f32 1.442695, %v1452_v34  ;;  %v9002_v47 = vpop.eup %7736 }
 0x292   : > { %v1166_v30 = vsel %vm682_vm0, %v9002_v47, 0.0 }
 0x293   : > { %7284 = vmatmul.msk.f32.vlgmr.msrb.gmra.mxu1 %vm682_vm0, %v8759_v51  ;;  %7738 = vpow2.f32 %v1455_v24  ;;  %v7565_v24 = vunpack.i.l.bf16 %v8806_v18 }
 0x297   : > { %1167 = vadd.xlane.f32.xlu1 %v1166_v30 }
 0x299   : > { %v9008_v19 = vpop.eup %7738 }
 0x29a   : > { %v1460_v1 = vsel %vm682_vm0, %v9008_v19, 0.0 }
 0x29b   : > { %7285 = vmatmul.msk.f32.gmra.mxu1 %vm682_vm0, %v8824_v23 }
 0x29f   : > { %1461 = vadd.xlane.f32.xlu1 %v1460_v1 }
 0x2a3   : > { %7304 = vmatmul.msk.f32.vlgmr.msra.gmra.mxu1 %vm682_vm0, %v8725_v25 }
 0x2a4   : > { %v1153_v42 = vpop.xlane.xlu1 %1152 }
 0x2a5   : > { %v1157_v51 = vsub.f32 %v8803_v28, %v1153_v42 }
 0x2a7   : > { %v1159_v15 = vmul.f32 1.442695, %v1157_v51 }
 0x2a9   : > { %7740 = vpow2.f32 %v1159_v15 }
 0x2aa   : > { %v9034_v42 = vpop.f32.mrf.mxu1 }
 0x2ab   : > { %7305 = vmatmul.msk.f32.gmra.mxu1 %vm682_vm0, %v8731_v49  ;;  %12053 = vst [vmem:[#allocation49_spill] sm:$0xff] %v9034_v42 }
 0x2ac   : > { %v1447_v48 = vpop.xlane.xlu1 %1446 }
 0x2ad   : > { %v1451_v59 = vsub.f32 %v8838_v3, %v1447_v48 }
 0x2af   : > { %v9020_v27 = vpop.eup %7740  ;;  %v1453_v23 = vmul.f32 1.442695, %v1451_v59  ;;  %v874_v28 = vpop.xlane.xlu2 %873 }
 0x2b0   : > { %v1163_v14 = vsel %vm682_vm0, %v9020_v27, 0.0 }
 0x2b1   : > { %7742 = vpow2.f32 %v1453_v23  ;;  %1164 = vadd.xlane.f32.xlu2 %v1163_v14 }
 0x2b4   : > { %v871_v25 = vpop.xlane.xlu1 %870 }
 0x2b5   : > { %7744 = vrcp.f32 %v871_v25 }
 0x2b6   : > { %7746 = vrcp.f32 %v874_v28 }
 0x2b7   : > { %v9024_v4 = vpop.eup %7742 }
 0x2b8   : > { %v1457_v34 = vsel %vm682_vm0, %v9024_v4, 0.0 }
 0x2b9   : > { %1458 = vadd.xlane.f32.xlu2 %v1457_v34 }
 0x2bb   : > { %v7745_v49 = vpop.eup %7744 }
 0x2bc   : > { %v877_v3 = vmul.f32 %v7745_v49, %v8919_v38  ;;  %v7747_v30 = vpop.eup %7746 }
 0x2bd   : > { %v878_v1 = vmul.f32 %v7747_v30, %v8911_v0 }
 0x2be   : > { %7256 = vmatmul.msk.f32.vlgmr.msra.gmra.mxu3 %vm682_vm0, %v877_v3 }
 0x2bf   : > { %1363 = vmatpush.msra.mxu3 %v7566_v35 }
 0x2c1   : > { %1364 = vmatpush.msra.mxu3 %v7565_v24 }
 0x2c6   : > { %7257 = vmatmul.msk.f32.gmra.mxu3 %vm682_vm0, %v878_v1 }
 0x2e8   : > { %v9036_v51 = vpop.f32.mrf.mxu1 }
 0x2e9   : > { %12054 = vst [vmem:[#allocation50_spill] sm:$0xff] %v9036_v51 }
 0x2f0   : > { %v9038_v15 = vpop.f32.mrf.mxu1 }
 0x2f1   : > { %v1004_v38 = vsel %vm682_vm0, %v9038_v15, -inf }
 0x2f2   : > { %1005 = vmax.xlane.f32.xlu0 %v1004_v38 }
 0x2f8   : > { %v9042_v48 = vpop.f32.mrf.mxu1 }
 0x2f9   : > { %v1007_v18 = vsel %vm682_vm0, %v9042_v48, -inf }
 0x2fa   : > { %1008 = vmax.xlane.f32.xlu2 %v1007_v18  ;;  %v1741_v59 = vpop.xlane.xlu0 %1740 }
 0x2fb   : > { %v1745_v0 = vsub.f32 %v8991_v55, %v1741_v59  ;;  %v9057_v55 = vpop.f32.mrf.mxu0 }
 0x2fc   : > { %v2559_v18 = vsel %vm682_vm0, %v9057_v55, -inf }
 0x2fd   : > { %v1747_v23 = vmul.f32 1.442695, %v1745_v0 }
 0x2ff   : > { %7748 = vpow2.f32 %v1747_v23 }
 0x300   : > { %v9047_v14 = vpop.f32.mrf.mxu1 }
 0x301   : > { %v1298_v25 = vsel %vm682_vm0, %v9047_v14, -inf }
 0x302   : > { %1299 = vmax.xlane.f32.xlu0 %v1298_v25  ;;  %v1744_v28 = vpop.xlane.xlu1 %1743 }
 0x303   : > { %v1746_v34 = vsub.f32 %v1736_v26, %v1744_v28  ;;  %v9069_v59 = vpop.f32.mrf.mxu0 }
 0x304   : > { %v2562_v0 = vsel %vm682_vm0, %v9069_v59, -inf }
 0x305   : > { %v9051_v49 = vpop.eup %7748  ;;  %v1749_v3 = vmul.f32 1.442695, %v1746_v34 }
 0x306   : > { %v1751_v35 = vsel %vm682_vm0, %v9051_v49, 0.0 }
 0x307   : > { %7750 = vpow2.f32 %v1749_v3  ;;  %1752 = vadd.xlane.f32.xlu2 %v1751_v35 }
 0x308   : > { %v9055_v24 = vpop.f32.mrf.mxu1 }
 0x309   : > { %v1301_v30 = vsel %vm682_vm0, %v9055_v24, -inf }
 0x30a   : > { %1302 = vmax.xlane.f32.xlu1 %v1301_v30  ;;  %v1168_v30 = vpop.xlane.xlu1 %1167 }
 0x30d   : > { %v9061_v1 = vpop.eup %7750 }
 0x30e   : > { %v1754_v26 = vsel %vm682_vm0, %v9061_v1, 0.0 }
 0x30f   : > { %1755 = vadd.xlane.f32.xlu0 %v1754_v26 }
 0x310   : > { %v9065_v38 = vpop.f32.mrf.mxu1 }
 0x311   : > { %v1592_v25 = vsel %vm682_vm0, %v9065_v38, -inf }
 0x312   : > { %2560 = vmax.xlane.f32.xlu1 %v2559_v18 }
 0x317   : > { %2563 = vmax.xlane.f32.xlu0 %v2562_v0  ;;  %v7581_v0 = vunpack.i.h.bf16 %v8863_v11 }
 0x318   : > { %v9073_v23 = vpop.f32.mrf.mxu1 }
 0x319   : > { %v1595_v28 = vsel %vm682_vm0, %v9073_v23, -inf }
 0x31a   : > { %1593 = vmax.xlane.f32.xlu1 %v1592_v25 }
 0x31f   : > { %1596 = vmax.xlane.f32.xlu0 %v1595_v28  ;;  %2650 = vrot.lane.b32.xlu2 %v8814_v16, %s8093_s23  ;;  %v7580_v16 = vunpack.i.l.bf16 %v8863_v11 }
 0x320   : > { %v9081_v34 = vpop.f32.mrf.mxu1 }
 0x321   : > { %v2416_v35 = vsel %vm682_vm0, %v9081_v34, -inf }
 0x324   : > { %v1165_v3 = vpop.xlane.xlu2 %1164 }
 0x325   : > { %7752 = vrcp.f32 %v1165_v3  ;;  %v1462_v3 = vpop.xlane.xlu1 %1461 }
 0x326   : > { %7754 = vrcp.f32 %v1168_v30 }
 0x327   : > { %2417 = vmax.xlane.f32.xlu0 %v2416_v35  ;;  %2673 = vrot.lane.b32.xlu2 %v8842_v2, %s8093_s23 }
 0x32b   : > { %v7753_v26 = vpop.eup %7752 }
 0x32c   : > { %v1171_v18 = vmul.f32 %v7753_v26, %v9020_v27  ;;  %v1459_v25 = vpop.xlane.xlu2 %1458  ;;  %v7755_v28 = vpop.eup %7754  ;;  %v7582_v27 = vpack.i.bf16 %v8801_v40, %v8793_v33 }
 0x32d   : > { %7756 = vrcp.f32 %v1459_v25  ;;  %v1172_v2 = vmul.f32 %v7755_v28, %v9002_v47  ;;  %v9105_v33 = vpop.f32.mrf.mxu1 }
 0x32e   : > { %7268 = vmatmul.msk.f32.vlgmr.msrb.gmra.mxu2 %vm682_vm0, %v1171_v18  ;;  %7758 = vrcp.f32 %v1462_v3  ;;  %v2419_v40 = vsel %vm682_vm0, %v9105_v33, -inf }
 0x32f   : > { %1804 = vmatpush.msrb.mxu2 %v7581_v0 }
 0x331   : > { %1805 = vmatpush.msrb.mxu2 %v7580_v16 }
 0x333   : > { %2652 = vrot.lane.b32.xlu1 %v8822_v32, %s8093_s23  ;;  %v7757_v35 = vpop.eup %7756 }
 0x334   : > { %v1465_v11 = vmul.f32 %v7757_v35, %v9024_v4  ;;  %v7759_v30 = vpop.eup %7758 }
 0x335   : > { %v1466_v32 = vmul.f32 %v7759_v30, %v9008_v19 }
 0x336   : > { %7269 = vmatmul.msk.f32.gmra.mxu2 %vm682_vm0, %v1172_v2 }
 0x33b   : > { %7583 = vrot.lane.b32.xlu0 %v7582_v27, %s8092_s22 }
 0x33e   : > { %7280 = vmatmul.msk.f32.vlgmr.msra.gmra.mxu2 %vm682_vm0, %v1465_v11 }
 0x341   : > { %v925_v26 = vpop.f32.mrf.mxu3 }
 0x342   : > { %1815 = vrot.lane.b32.xlu2 %v925_v26, %s8098_s30 }
 0x343   : > { %2671 = vrot.lane.b32.xlu0 %v8833_v21, %s8093_s23 }
 0x346   : > { %7281 = vmatmul.msk.f32.gmra.mxu2 %vm682_vm0, %v1466_v32 }
 0x35d   : > { %2420 = vmax.xlane.f32.xlu1 %v2419_v40 }
 0x365   : > { %v1006_v47 = vpop.xlane.xlu0 %1005 }
 0x366   : > { %v1010_v4 = vsub.f32 %v9038_v15, %v1006_v47 }
 0x368   : > { %v1012_v18 = vmul.f32 1.442695, %v1010_v4 }
 0x36a   : > { %7760 = vpow2.f32 %v1012_v18 }
 0x36d   : > { %v9114_v16 = vpop.xlane.xlu2 %1008 }
 0x370   : > { %v9110_v0 = vpop.eup %7760 }
 0x371   : > { %v1016_v21 = vsel %vm682_vm0, %v9110_v0, 0.0 }
 0x372   : > { %1017 = vadd.xlane.f32.xlu1 %v1016_v21 }
 0x375   : > { %v1300_v19 = vpop.xlane.xlu0 %1299 }
 0x376   : > { %v1304_v25 = vsub.f32 %v9047_v14, %v1300_v19 }
 0x378   : > { %v1306_v28 = vmul.f32 1.442695, %v1304_v25 }
 0x37a   : > { %7762 = vpow2.f32 %v1306_v28  ;;  %v1753_v2 = vpop.xlane.xlu2 %1752 }
 0x37b   : > { %7764 = vrcp.f32 %v1753_v2 }
 0x37d   : > { %v9117_v27 = vpop.xlane.xlu1 %1302 }
 0x380   : > { %v9119_v15 = vpop.eup %7762 }
 0x381   : > { %v7765_v3 = vpop.eup %7764  ;;  %v1310_v35 = vsel %vm682_vm0, %v9119_v15, 0.0 }
 0x382   : > { %v1759_v11 = vmul.f32 %v7765_v3, %v9051_v49  ;;  %1311 = vadd.xlane.f32.xlu2 %v1310_v35  ;;  %v1756_v30 = vpop.xlane.xlu0 %1755  ;;  %v2651_v26 = vpop.permute.xlu2 %2650 }
 0x383   : > { %7766 = vrcp.f32 %v1756_v30 }
 0x384   : > { %7292 = vmatmul.msk.f32.vlgmr.msrb.gmra.mxu2 %vm682_vm0, %v1759_v11 }
 0x385   : > { %v2561_v14 = vpop.xlane.xlu1 %2560 }
 0x386   : > { %v2565_v32 = vsub.f32 %v9057_v55, %v2561_v14 }
 0x388   : > { %v2567_v40 = vmul.f32 1.442695, %v2565_v32 }
 0x389   : > { %v7767_v47 = vpop.eup %7766 }
 0x38a   : > { %7768 = vpow2.f32 %v2567_v40  ;;  %v1760_v4 = vmul.f32 %v7767_v47, %v9061_v1  ;;  %v2674_v18 = vpop.permute.xlu2 %2673  ;;  %v2564_v28 = vpop.xlane.xlu0 %2563 }
 0x38b   : > { %7314 = vmatpush.xpose.msk.msrb.mxu1 %vm682_vm0, %v2674_v18 }
 0x38c   : > { %7293 = vmatmul.msk.f32.gmra.mxu2 %vm682_vm0, %v1760_v4 }
 0x38d   : > { %v1594_v49 = vpop.xlane.xlu1 %1593 }
 0x38e   : > { %v1598_v21 = vsub.f32 %v9065_v38, %v1594_v49 }
 0x390   : > { %v7769_v19 = vpop.eup %7768  ;;  %v1600_v25 = vmul.f32 1.442695, %v1598_v21 }
 0x391   : > { %v2571_v2 = vsel %vm682_vm0, %v7769_v19, 0.0 }
 0x392   : > { %7770 = vpow2.f32 %v1600_v25  ;;  %2572 = vadd.xlane.f32.xlu2 %v2571_v2  ;;  %v1597_v3 = vpop.xlane.xlu0 %1596  ;;  %v7576_v2 = vunpack.i.h.bf16 %v8812_v17 }
 0x398   : > { %v9131_v55 = vpop.eup %7770 }
 0x399   : > { %v1604_v1 = vsel %vm682_vm0, %v9131_v55, 0.0 }
 0x39a   : > { %1605 = vadd.xlane.f32.xlu2 %v1604_v1  ;;  %v2418_v35 = vpop.xlane.xlu0 %2417 }
 0x39b   : > { %v2422_v47 = vsub.f32 %v9081_v34, %v2418_v35  ;;  %v7575_v34 = vunpack.i.l.bf16 %v8812_v17 }
 0x39c   : > { %v9152_v1 = vpop.permute.xlu2 %1815 }
 0x39d   : > { %v2424_v4 = vmul.f32 1.442695, %v2422_v47  ;;  %12055 = vst [vmem:[#allocation51_spill] sm:$0xff] %v9152_v1 }
 0x39f   : > { %7772 = vpow2.f32 %v2424_v4 }
 0x3a5   : > { %v2653_v40 = vpop.permute.xlu1 %2652  ;;  %v9144_v49 = vpop.eup %7772 }
 0x3ad   : > { %v7584_v11 = vpop.permute.xlu0 %7583 }
 0x3ae   : > { %v7586_v30 = vunpack.i.h.bf16 %v7584_v11  ;;  %v7585_v14 = vunpack.i.l.bf16 %v7584_v11 }
 0x3b0   : > { %2624 = vmatpush.msra.mxu2 %v7586_v30 }
 0x3b1   : > { %v1219_v32 = vpop.f32.mrf.mxu2 }
 0x3b2   : > { %2797 = vrot.lane.b32.xlu2 %v8869_v29, %s8094_s26  ;;  %2625 = vmatpush.msra.mxu2 %v7585_v14  ;;  %v2428_v29 = vsel %vm682_vm0, %v9144_v49, 0.0 }
 0x3b5   : > { %v2672_v38 = vpop.permute.xlu0 %2671 }
 0x3b6   : > { %7315 = vmatpush.xpose.msk.msrb.mxu1 %vm682_vm0, %v2672_v38 }
 0x3b9   : > { %7316 = vmatmul.msk.f32.vlgmr.msrb.gmra.mxu1 %vm682_vm0, %v2651_v26 }
 0x3ba   : > { %1831 = vrot.lane.b32.xlu2 %v1219_v32, %s8096_s19  ;;  %v2566_v32 = vsub.f32 %v9069_v59, %v2564_v28 }
 0x3bc   : > { %v2569_v47 = vmul.f32 1.442695, %v2566_v32 }
 0x3c1   : > { %7317 = vmatmul.msk.f32.gmra.mxu1 %vm682_vm0, %v2653_v40 }
 0x3d0   : > { %v9142_v18 = vpop.xlane.xlu1 %2420 }
 0x3e3   : > { %2429 = vadd.xlane.f32.xlu2 %v2428_v29  ;;  %v1599_v29 = vsub.f32 %v9073_v23, %v1597_v3  ;;  %v928_v3 = vpop.f32.mrf.mxu3 }
 0x3e5   : > { %v1018_v21 = vpop.xlane.xlu1 %1017 }
 0x3e6   : > { %7774 = vrcp.f32 %v1018_v21 }
 0x3ec   : > { %v7775_v26 = vpop.eup %7774 }
 0x3ed   : > { %v1024_v25 = vmul.f32 %v7775_v26, %v9110_v0  ;;  %v1011_v0 = vsub.f32 %v9042_v48, %v9114_v16  ;;  %v1602_v16 = vmul.f32 1.442695, %v1599_v29  ;;  %v2423_v29 = vsub.f32 %v9105_v33, %v9142_v18 }
 0x3ef   : > { %7262 = vmatmul.msk.f32.vlgmr.msrb.gmra.mxu3 %vm682_vm0, %v1024_v25  ;;  %v1014_v38 = vmul.f32 1.442695, %v1011_v0  ;;  %v1222_v25 = vpop.f32.mrf.mxu2  ;;  %v12057_v0 = vld [vmem:[#allocation47_spill] sm:$0xff] }
 0x3f0   : > { %1657 = vmatpush.msrb.mxu3 %v7576_v2  ;;  %v12056_v2 = vld [vmem:[#allocation45_spill] sm:$0xff] }
 0x3f2   : > { %1658 = vmatpush.msrb.mxu3 %v7575_v34  ;;  %v7587_v34 = vpack.i.bf16 %v12056_v2, %v8851_v31  ;;  %v12058_v31 = vld [vmem:[#allocation46_spill] sm:$0xff] }
 0x3f5   : > { %v1312_v35 = vpop.xlane.xlu2 %1311 }
 0x405   : > { %v2573_v11 = vpop.xlane.xlu2 %2572 }
 0x406   : > { %7776 = vrcp.f32 %v2573_v11  ;;  %v1305_v11 = vsub.f32 %v9055_v24, %v9117_v27 }
 0x407   : > { %7778 = vpow2.f32 %v1014_v38 }
 0x408   : > { %7780 = vpow2.f32 %v2569_v47 }
 0x409   : > { %7782 = vpow2.f32 %v1602_v16  ;;  %v2426_v16 = vmul.f32 1.442695, %v2423_v29 }
 0x40c   : > { %v7777_v30 = vpop.eup %7776 }
 0x40d   : > { %v2579_v14 = vmul.f32 %v7777_v30, %v7769_v19  ;;  %v7779_v4 = vpop.eup %7778  ;;  %v9176_v30 = vpop.f32.mrf.mxu2 }
 0x40e   : > { %v1019_v19 = vsel %vm682_vm0, %v7779_v4, 0.0  ;;  %v7781_v59 = vpop.eup %7780 }
 0x40f   : > { %7312 = vmatmul.msk.f32.vlgmr.msra.gmra.mxu2 %vm682_vm0, %v2579_v14  ;;  %v2574_v28 = vsel %vm682_vm0, %v7781_v59, 0.0  ;;  %v9166_v26 = vpop.eup %7782  ;;  %v1308_v14 = vmul.f32 1.442695, %v1305_v11 }
 0x410   : > { %v1607_v23 = vsel %vm682_vm0, %v9166_v26, 0.0 }
 0x411   : > { %7784 = vpow2.f32 %v1308_v14 }
 0x415   : > { %v1516_v38 = vpop.f32.mrf.mxu2 }
 0x417   : > { %v7785_v32 = vpop.eup %7784 }
 0x436   : > { %v2700_v40 = vpop.f32.mrf.mxu1 }
 0x437   : > { %v2706_v17 = vsel %vm682_vm0, %v2700_v40, -inf }
 0x438   : > { %2707 = vmax.xlane.f32.xlu0 %v2706_v17  ;;  %v1313_v17 = vsel %vm682_vm0, %v7785_v32, 0.0 }
 0x43e   : > { %v9160_v21 = vpop.f32.mrf.mxu1 }
 0x43f   : > { %v2709_v48 = vsel %vm682_vm0, %v9160_v21, -inf }
 0x440   : > { %1020 = vadd.xlane.f32.xlu0 %v1019_v19  ;;  %2710 = vmax.xlane.f32.xlu1 %v2709_v48 }
 0x448   : > { %2575 = vadd.xlane.f32.xlu1 %v2574_v28 }
 0x450   : > { %1608 = vadd.xlane.f32.xlu1 %v1607_v23 }
 0x454   : > { %1817 = vrot.lane.b32.xlu0 %v928_v3, %s8098_s30 }
 0x469   : > { %7588 = vrot.lane.b32.xlu1 %v7587_v34, %s8093_s23 }
 0x471   : > { %2818 = vrot.lane.b32.xlu1 %v12057_v0, %s8094_s26  ;;  %v12059_v0 = vld [vmem:[#allocation44_spill] sm:$0xff] }
 0x479   : > { %1849 = vrot.lane.b32.xlu1 %v1516_v38, %s8094_s26 }
 0x47e   : > { %1314 = vadd.xlane.f32.xlu0 %v1313_v17 }
 0x492   : > { %2799 = vrot.lane.b32.xlu0 %v12058_v31, %s8094_s26 }
 0x49a   : > { %1833 = vrot.lane.b32.xlu0 %v1222_v25, %s8096_s19 }
 0x4ab   : > { %v2708_v24 = vpop.xlane.xlu0 %2707 }
 0x4ac   : > { %v2712_v27 = vsub.f32 %v2700_v40, %v2708_v24 }
 0x4ae   : > { %v2714_v47 = vmul.f32 1.442695, %v2712_v27 }
 0x4b0   : > { %7786 = vpow2.f32 %v2714_v47 }
 0x4b3   : > { %v1021_v19 = vpop.xlane.xlu0 %1020  ;;  %v2711_v48 = vpop.xlane.xlu1 %2710 }
 0x4b4   : > { %7788 = vrcp.f32 %v1021_v19 }
 0x4b5   : > { %7790 = vpow2.f32 %v2426_v16 }
 0x4b6   : > { %v9187_v28 = vpop.eup %7786  ;;  %7792 = vrcp.f32 %v1312_v35  ;;  %v12060_v35 = vld [vmem:[#allocation43_spill] sm:$0xff] }
 0x4b7   : > { %v2718_v23 = vsel %vm682_vm0, %v9187_v28, 0.0 }
 0x4b8   : > { %2719 = vadd.xlane.f32.xlu2 %v2718_v23 }
 0x4ba   : > { %v7789_v3 = vpop.eup %7788 }
 0x4bb   : > { %v2576_v25 = vpop.xlane.xlu1 %2575  ;;  %v1025_v40 = vmul.f32 %v7789_v3, %v7779_v4  ;;  %v7791_v2 = vpop.eup %7790 }
 0x4bc   : > { %7794 = vrcp.f32 %v2576_v25  ;;  %v7793_v33 = vpop.eup %7792  ;;  %v2431_v11 = vsel %vm682_vm0, %v7791_v2, 0.0  ;;  %v1606_v4 = vpop.xlane.xlu2 %1605 }
 0x4bd   : > { %7263 = vmatmul.msk.f32.gmra.mxu3 %vm682_vm0, %v1025_v40  ;;  %v1318_v34 = vmul.f32 %v7793_v33, %v9119_v15  ;;  %v2713_v15 = vsub.f32 %v9160_v21, %v2711_v48 }
 0x4bf   : > { %v2716_v31 = vmul.f32 1.442695, %v2713_v15 }
 0x4c2   : > { %v7795_v18 = vpop.eup %7794 }
 0x4c3   : > { %v2580_v14 = vmul.f32 %v7795_v18, %v7781_v59  ;;  %v1609_v24 = vpop.xlane.xlu1 %1608 }
 0x4c4   : > { %2432 = vadd.xlane.f32.xlu0 %v2431_v11  ;;  %v2798_v59 = vpop.permute.xlu2 %2797 }
 0x4c5   : > { %7274 = vmatmul.msk.f32.vlgmr.msra.gmra.mxu3 %vm682_vm0, %v1318_v34  ;;  %7313 = vmatmul.msk.f32.gmra.mxu2 %vm682_vm0, %v2580_v14 }
 0x4c6   : > { %2477 = vmatpush.msra.mxu3 %v12059_v0  ;;  %v9200_v38 = vpop.permute.xlu0 %1817 }
 0x4c7   : > { %12061 = vst [vmem:[#allocation45_spill] sm:$0xff] %v9200_v38 }
 0x4c8   : > { %2478 = vmatpush.msra.mxu3 %v12060_v35 }
 0x4cc   : > { %v9204_v19 = vpop.permute.xlu2 %1831 }
 0x4cd   : > { %12062 = vst [vmem:[#allocation47_spill] sm:$0xff] %v9204_v19 }
 0x4d4   : > { %v2430_v25 = vpop.xlane.xlu2 %2429 }
 0x4d8   : > { %2820 = vrot.lane.b32.xlu0 %v8891_v54, %s8094_s26 }
 0x4db   : > { %v7589_v16 = vpop.permute.xlu1 %7588 }
 0x4dc   : > { %v7591_v23 = vunpack.i.h.bf16 %v7589_v16  ;;  %v7590_v3 = vunpack.i.l.bf16 %v7589_v16 }
 0x4f1   : > { %v1315_v17 = vpop.xlane.xlu0 %1314 }
 0x4f2   : > { %7796 = vrcp.f32 %v1315_v17 }
 0x4f3   : > { %7798 = vrcp.f32 %v1606_v4 }
 0x4f4   : > { %7800 = vpow2.f32 %v2716_v31 }
 0x4f5   : > { %7802 = vrcp.f32 %v1609_v24 }
 0x4f6   : > { %7804 = vrcp.f32 %v2430_v25 }
 0x4f8   : > { %v7797_v27 = vpop.eup %7796 }
 0x4f9   : > { %v1319_v47 = vmul.f32 %v7797_v27, %v7785_v32  ;;  %v7799_v29 = vpop.eup %7798 }
 0x4fa   : > { %v7801_v54 = vpop.eup %7800  ;;  %v1612_v21 = vmul.f32 %v7799_v29, %v9131_v55 }
 0x4fb   : > { %7275 = vmatmul.msk.f32.gmra.mxu3 %vm682_vm0, %v1319_v47  ;;  %v2721_v48 = vsel %vm682_vm0, %v7801_v54, 0.0  ;;  %v7803_v32 = vpop.eup %7802  ;;  %v7592_v47 = vpack.i.bf16 %v8913_v39, %v8903_v62 }
 0x4fc   : > { %v1613_v40 = vmul.f32 %v7803_v32, %v9166_v26  ;;  %v7805_v33 = vpop.eup %7804 }
 0x4fd   : > { %v2436_v18 = vmul.f32 %v7805_v33, %v9144_v49 }
 0x502   : > { %2722 = vadd.xlane.f32.xlu0 %v2721_v48 }
 0x503   : > { %7286 = vmatmul.msk.f32.vlgmr.msrb.gmra.mxu3 %vm682_vm0, %v1612_v21 }
 0x504   : > { %2771 = vmatpush.msrb.mxu3 %v7591_v23  ;;  %v2800_v55 = vpop.permute.xlu0 %2799 }
 0x506   : > { %2772 = vmatpush.msrb.mxu3 %v7590_v3 }
 0x50b   : > { %7287 = vmatmul.msk.f32.gmra.mxu3 %vm682_vm0, %v1613_v40 }
 0x50c   : > { %v9215_v34 = vpop.permute.xlu0 %1833 }
 0x50d   : > { %12063 = vst [vmem:[#allocation46_spill] sm:$0xff] %v9215_v34 }
 0x513   : > { %7306 = vmatmul.msk.f32.vlgmr.msra.gmra.mxu3 %vm682_vm0, %v2436_v18 }
 0x516   : > { %1847 = vrot.lane.b32.xlu0 %v9176_v30, %s8094_s26  ;;  %v2819_v30 = vpop.permute.xlu1 %2818 }
 0x51e   : > { %v9233_v29 = vpop.permute.xlu1 %1849 }
 0x51f   : > { %12064 = vst [vmem:[#allocation44_spill] sm:$0xff] %v9233_v29  ;;  %v12102_v29 = vld [vmem:[#allocation32_spill] sm:$0xff] }
 0x52b   : > { %v2720_v14 = vpop.xlane.xlu2 %2719 }
 0x537   : > { %v2433_v11 = vpop.xlane.xlu0 %2432 }
 0x538   : > { %7806 = vrcp.f32 %v2433_v11 }
 0x539   : > { %7808 = vrcp.f32 %v2720_v14 }
 0x53e   : > { %v7807_v0 = vpop.eup %7806 }
 0x53f   : > { %v2437_v35 = vmul.f32 %v7807_v0, %v7791_v2  ;;  %v7809_v26 = vpop.eup %7808 }
 0x540   : > { %v2726_v4 = vmul.f32 %v7809_v26, %v9187_v28 }
 0x541   : > { %7307 = vmatmul.msk.f32.gmra.mxu3 %vm682_vm0, %v2437_v35 }
 0x549   : > { %7318 = vmatmul.msk.f32.vlgmr.msrb.gmra.mxu3 %vm682_vm0, %v2726_v4 }
 0x54a   : > { %v2821_v49 = vpop.permute.xlu0 %2820 }
 0x54b   : > { %7320 = vmatpush.xpose.msk.msrb.mxu0 %vm682_vm0, %v2821_v49 }
 0x54f   : > { %7321 = vmatpush.xpose.msk.msrb.mxu0 %vm682_vm0, %v2819_v30 }
 0x552   : > { %7322 = vmatmul.msk.f32.vlgmr.msrb.gmra.mxu0 %vm682_vm0, %v2798_v59  ;;  %v1807_v59 = vpop.f32.mrf.mxu2 }
 0x55a   : > { %7323 = vmatmul.msk.f32.gmra.mxu0 %vm682_vm0, %v2800_v55  ;;  %v1810_v18 = vpop.f32.mrf.mxu2 }
 0x575   : > { %v2723_v15 = vpop.xlane.xlu0 %2722 }
 0x576   : > { %7810 = vrcp.f32 %v2723_v15  ;;  %v3110_v15 = vld.sshfl [vmem:[#allocation1] sm:$0xff pattern:$0x73625140] }
 0x577   : > { %3169 = vst [vmem:[#allocation1] ss:$4 sm:$0xff] %v8659_v13 }
 0x578   : > { %3171 = vst [vmem:[#allocation1 + $0x1] ss:$4 sm:$0xff] %v8666_v63 }
 0x579   : > { %3173 = vst [vmem:[#allocation1 + $0x2] ss:$4 sm:$0xff] %v8669_v20 }
 0x57a   : > { %3175 = vst [vmem:[#allocation1 + $0x3] ss:$4 sm:$0xff] %v8673_v36 }
 0x57c   : > { %v7811_v2 = vpop.eup %7810 }
 0x57d   : > { %v2727_v17 = vmul.f32 %v7811_v2, %v7801_v54 }
 0x57f   : > { %7319 = vmatmul.msk.f32.gmra.mxu3 %vm682_vm0, %v2727_v17 }
 0x588   : > { %v9247_v14 = vpop.permute.xlu0 %1847 }
 0x589   : > { %12066 = vst [vmem:[#allocation52_spill] sm:$0xff] %v9247_v14 }
 0x5cf   : > { %v2847_v31 = vpop.f32.mrf.mxu0 }
 0x5d0   : > { %v2853_v28 = vsel %vm682_vm0, %v2847_v31, -inf }
 0x5d1   : > { %2854 = vmax.xlane.f32.xlu2 %v2853_v28 }
 0x5d7   : > { %v2850_v24 = vpop.f32.mrf.mxu0 }
 0x5d8   : > { %v2856_v27 = vsel %vm682_vm0, %v2850_v24, -inf }
 0x5d9   : > { %2857 = vmax.xlane.f32.xlu1 %v2856_v27  ;;  %v12067_v27 = vld [vmem:[#allocation48_spill] sm:$0xff] }
 0x5f2   : > { %7593 = vrot.lane.b32.xlu1 %v7592_v47, %s8094_s26  ;;  %v7597_v47 = vpack.i.bf16 %v8955_v9, %v12067_v27  ;;  %v12069_v27 = vld [vmem:[#allocation40_spill] sm:$0xff] }
 0x5fa   : > { %1863 = vrot.lane.b32.xlu1 %v1807_v59, %s8092_s22  ;;  %v1072_v59 = vpop.f32.mrf.mxu3 }
 0x602   : > { %2967 = vrot.lane.b32.xlu1 %v8943_v61, %s8095_s7 }
 0x644   : > { %v2855_v54 = vpop.xlane.xlu2 %2854 }
 0x645   : > { %v2859_v16 = vsub.f32 %v2847_v31, %v2855_v54  ;;  %v3111_v31 = vld.sshfl [vmem:[#allocation1 + $0x20] sm:$0xff pattern:$0x73625140] }
 0x646   : > { %3177 = vst [vmem:[#allocation1 + $0x20] ss:$4 sm:$0xff] %v8683_v52 }
 0x647   : > { %v2861_v23 = vmul.f32 1.442695, %v2859_v16  ;;  %3179 = vst [vmem:[#allocation1 + $0x21] ss:$4 sm:$0xff] %v8699_v57 }
 0x648   : > { %3181 = vst [vmem:[#allocation1 + $0x22] ss:$4 sm:$0xff] %v8710_v41 }
 0x649   : > { %7812 = vpow2.f32 %v2861_v23  ;;  %3183 = vst [vmem:[#allocation1 + $0x23] ss:$4 sm:$0xff] %v8720_v43 }
 0x64c   : > { %v2858_v21 = vpop.xlane.xlu1 %2857 }
 0x64d   : > { %v2860_v48 = vsub.f32 %v2850_v24, %v2858_v21 }
 0x64f   : > { %v7813_v3 = vpop.eup %7812  ;;  %v2863_v25 = vmul.f32 1.442695, %v2860_v48 }
 0x650   : > { %v2865_v62 = vsel %vm682_vm0, %v7813_v3, 0.0 }
 0x651   : > { %7814 = vpow2.f32 %v2863_v25  ;;  %2866 = vadd.xlane.f32.xlu0 %v2865_v62 }
 0x657   : > { %v7815_v39 = vpop.eup %7814 }
 0x658   : > { %v2868_v32 = vsel %vm682_vm0, %v7815_v39, 0.0 }
 0x659   : > { %2869 = vadd.xlane.f32.xlu2 %v2868_v32 }
 0x664   : > { %v7594_v40 = vpop.permute.xlu1 %7593 }
 0x665   : > { %v7596_v61 = vunpack.i.h.bf16 %v7594_v40  ;;  %v7595_v33 = vunpack.i.l.bf16 %v7594_v40  ;;  %2944 = vrot.lane.b32.xlu0 %v8923_v22, %s8095_s7 }
 0x667   : > { %2918 = vmatpush.msrb.mxu2 %v7596_v61 }
 0x669   : > { %2919 = vmatpush.msrb.mxu2 %v7595_v33 }
 0x66c   : > { %v9244_v55 = vpop.permute.xlu1 %1863 }
 0x66d   : > { %2965 = vrot.lane.b32.xlu0 %v8937_v53, %s8095_s7  ;;  %12065 = vst [vmem:[#allocation43_spill] sm:$0xff] %v9244_v55 }
 0x671   : > { %2946 = vrot.lane.b32.xlu2 %v8931_v8, %s8095_s7 }
 0x674   : > { %v2968_v11 = vpop.permute.xlu1 %2967 }
 0x675   : > { %7326 = vmatpush.xpose.msk.msra.mxu1 %vm682_vm0, %v2968_v11  ;;  %v1075_v11 = vpop.f32.mrf.mxu3 }
 0x679   : > { %1865 = vrot.lane.b32.xlu2 %v1810_v18, %s8092_s22 }
 0x6c4   : > { %v2867_v0 = vpop.xlane.xlu0 %2866 }
 0x6c5   : > { %7816 = vrcp.f32 %v2867_v0 }
 0x6cb   : > { %v7817_v22 = vpop.eup %7816 }
 0x6cc   : > { %v2873_v35 = vmul.f32 %v7817_v22, %v7813_v3  ;;  %v2870_v26 = vpop.xlane.xlu2 %2869  ;;  %v1366_v22 = vpop.f32.mrf.mxu3 }
 0x6cd   : > { %7818 = vrcp.f32 %v2870_v26 }
 0x6ce   : > { %7324 = vmatmul.msk.f32.vlgmr.msrb.gmra.mxu2 %vm682_vm0, %v2873_v35 }
 0x6d3   : > { %v7819_v53 = vpop.eup %7818 }
 0x6d4   : > { %v2874_v8 = vmul.f32 %v7819_v53, %v7815_v39  ;;  %v2947_v30 = vpop.permute.xlu2 %2946 }
 0x6d6   : > { %7325 = vmatmul.msk.f32.gmra.mxu2 %vm682_vm0, %v2874_v8 }
 0x6d7   : > { %v2945_v4 = vpop.permute.xlu0 %2944 }
 0x6dc   : > { %v9270_v54 = vpop.permute.xlu2 %1865 }
 0x6dd   : > { %12068 = vst [vmem:[#allocation48_spill] sm:$0xff] %v9270_v54 }
 0x6df   : > { %v2966_v49 = vpop.permute.xlu0 %2965 }
 0x6e0   : > { %7327 = vmatpush.xpose.msk.msra.mxu1 %vm682_vm0, %v2966_v49 }
 0x6e3   : > { %7328 = vmatmul.msk.f32.vlgmr.msra.gmra.mxu1 %vm682_vm0, %v2945_v4 }
 0x6eb   : > { %7329 = vmatmul.msk.f32.gmra.mxu1 %vm682_vm0, %v2947_v30 }
 0x760   : > { %v2994_v2 = vpop.f32.mrf.mxu1 }
 0x761   : > { %v3000_v17 = vsel %vm682_vm0, %v2994_v2, -inf }
 0x762   : > { %3001 = vmax.xlane.f32.xlu2 %v3000_v17 }
 0x768   : > { %v2997_v28 = vpop.f32.mrf.mxu1 }
 0x769   : > { %v3003_v24 = vsel %vm682_vm0, %v2997_v28, -inf }
 0x76a   : > { %3004 = vmax.xlane.f32.xlu0 %v3003_v24 }
 0x77e   : > { %7598 = vrot.lane.b32.xlu0 %v7597_v47, %s8095_s7  ;;  %v12070_v47 = vld [vmem:[#allocation41_spill] sm:$0xff] }
 0x786   : > { %3112 = vrot.lane.b32.xlu0 %v3110_v15, %s8096_s19 }
 0x78e   : > { %3114 = vrot.lane.b32.xlu0 %v3111_v31, %s8096_s19  ;;  %v3184_v31 = vld.sshfl [vmem:[#allocation1] sm:$0xff pattern:$0x73625140] }
 0x78f   : > { %3221 = vst [vmem:[#allocation1] ss:$4 sm:$0xff] %v8676_v44 }
 0x790   : > { %3223 = vst [vmem:[#allocation1 + $0x1] ss:$4 sm:$0xff] %v12069_v27 }
 0x791   : > { %3225 = vst [vmem:[#allocation1 + $0x2] ss:$4 sm:$0xff] %v8679_v45 }
 0x792   : > { %3227 = vst [vmem:[#allocation1 + $0x3] ss:$4 sm:$0xff] %v8681_v46 }
 0x796   : > { %1823 = vrot.lane.b32.xlu0 %v1072_v59, %s8097_s29  ;;  %v12071_v59 = vld [vmem:[#allocation42_spill] sm:$0xff] }
 0x7d5   : > { %v3002_v16 = vpop.xlane.xlu2 %3001 }
 0x7d6   : > { %v3006_v23 = vsub.f32 %v2994_v2, %v3002_v16  ;;  %v12072_v16 = vld [vmem:[#allocation39_spill] sm:$0xff] }
 0x7d8   : > { %v3008_v21 = vmul.f32 1.442695, %v3006_v23 }
 0x7da   : > { %7820 = vpow2.f32 %v3008_v21 }
 0x7dd   : > { %v3005_v48 = vpop.xlane.xlu0 %3004 }
 0x7de   : > { %v3007_v3 = vsub.f32 %v2997_v28, %v3005_v48  ;;  %v3185_v28 = vld.sshfl [vmem:[#allocation1 + $0x20] sm:$0xff pattern:$0x73625140] }
 0x7df   : > { %v7602_v24 = vpack.i.bf16 %v3185_v28, %v3184_v31  ;;  %3229 = vst [vmem:[#allocation1 + $0x20] ss:$4 sm:$0xff] %v12070_v47 }
 0x7e0   : > { %v7821_v25 = vpop.eup %7820  ;;  %v3010_v62 = vmul.f32 1.442695, %v3007_v3  ;;  %3231 = vst [vmem:[#allocation1 + $0x21] ss:$4 sm:$0xff] %v8715_v37 }
 0x7e1   : > { %v3012_v9 = vsel %vm682_vm0, %v7821_v25, 0.0  ;;  %3233 = vst [vmem:[#allocation1 + $0x22] ss:$4 sm:$0xff] %v12071_v59 }
 0x7e2   : > { %7822 = vpow2.f32 %v3010_v62  ;;  %3013 = vadd.xlane.f32.xlu1 %v3012_v9  ;;  %3235 = vst [vmem:[#allocation1 + $0x23] ss:$4 sm:$0xff] %v12072_v16 }
 0x7e8   : > { %v7823_v39 = vpop.eup %7822 }
 0x7e9   : > { %v3015_v32 = vsel %vm682_vm0, %v7823_v39, 0.0 }
 0x7ea   : > { %3016 = vadd.xlane.f32.xlu2 %v3015_v32 }
 0x7f0   : > { %v7599_v40 = vpop.permute.xlu0 %7598 }
 0x7f1   : > { %v7601_v61 = vunpack.i.h.bf16 %v7599_v40  ;;  %v7600_v33 = vunpack.i.l.bf16 %v7599_v40 }
 0x7f3   : > { %3065 = vmatpush.msra.mxu3 %v7601_v61  ;;  %v1369_v61 = vpop.f32.mrf.mxu3 }
 0x7f5   : > { %3066 = vmatpush.msra.mxu3 %v7600_v33 }
 0x7f8   : > { %v3113_v18 = vpop.permute.xlu0 %3112 }
 0x7fb   : > { %3091 = vrot.lane.b32.xlu1 %v8961_v10, %s8096_s19 }
 0x800   : > { %v3115_v0 = vpop.permute.xlu0 %3114 }
 0x801   : > { %7332 = vmatpush.xpose.msk.msra.mxu0 %vm682_vm0, %v3115_v0  ;;  %v12075_v0 = vld [vmem:[#allocation38_spill] sm:$0xff] }
 0x802   : > { %3093 = vrot.lane.b32.xlu2 %v8967_v7, %s8096_s19 }
 0x803   : > { %1825 = vrot.lane.b32.xlu1 %v1075_v11, %s8097_s29  ;;  %v3236_v11 = vld.sshfl [vmem:[#allocation1] sm:$0xff pattern:$0x73625140] }
 0x804   : > { %3242 = vst [vmem:[#allocation1] ss:$4 sm:$0xff] %v12075_v0 }
 0x805   : > { %7333 = vmatpush.xpose.msk.msra.mxu0 %vm682_vm0, %v3113_v18  ;;  %3244 = vst [vmem:[#allocation1 + $0x1] ss:$4 sm:$0xff] %v8628_v56 }
 0x806   : > { %3246 = vst [vmem:[#allocation1 + $0x2] ss:$4 sm:$0xff] %v8633_v58 }
 0x807   : > { %3248 = vst [vmem:[#allocation1 + $0x3] ss:$4 sm:$0xff] %v8639_v12 }
 0x80b   : > { %1839 = vrot.lane.b32.xlu1 %v1366_v22, %s8095_s7 }
 0x855   : > { %v3014_v35 = vpop.xlane.xlu1 %3013 }
 0x856   : > { %7824 = vrcp.f32 %v3014_v35 }
 0x85c   : > { %v7825_v26 = vpop.eup %7824 }
 0x85d   : > { %v3020_v53 = vmul.f32 %v7825_v26, %v7821_v25  ;;  %v3017_v8 = vpop.xlane.xlu2 %3016  ;;  %v3237_v25 = vld.sshfl [vmem:[#allocation1 + $0x20] sm:$0xff pattern:$0x73625140]  ;;  %v1660_v26 = vpop.f32.mrf.mxu3 }
 0x85e   : > { %7826 = vrcp.f32 %v3017_v8  ;;  %3250 = vst [vmem:[#allocation1 + $0x20] ss:$4 sm:$0xff] %v8642_v5 }
 0x85f   : > { %7330 = vmatmul.msk.f32.vlgmr.msra.gmra.mxu3 %vm682_vm0, %v3020_v53  ;;  %3252 = vst [vmem:[#allocation1 + $0x21] ss:$4 sm:$0xff] %v8646_v50  ;;  %v3257_v53 = vld.sshfl [vmem:[#allocation1] sm:$0xff pattern:$0x73625140] }
 0x860   : > { %3254 = vst [vmem:[#allocation1 + $0x22] ss:$4 sm:$0xff] %v8649_v6 }
 0x861   : > { %3256 = vst [vmem:[#allocation1 + $0x23] ss:$4 sm:$0xff] %v8655_v60 }
 0x862   : > { %3316 = vst [vmem:[#allocation1] ss:$4 sm:$0xff] %v8659_v13 }
 0x863   : > { %3318 = vst [vmem:[#allocation1 + $0x1] ss:$4 sm:$0xff] %v8666_v63 }
 0x864   : > { %v7827_v10 = vpop.eup %7826  ;;  %3320 = vst [vmem:[#allocation1 + $0x2] ss:$4 sm:$0xff] %v8669_v20 }
 0x865   : > { %v3021_v4 = vmul.f32 %v7827_v10, %v7823_v39  ;;  %v3094_v49 = vpop.permute.xlu2 %3093  ;;  %v1663_v8 = vpop.f32.mrf.mxu3  ;;  %3322 = vst [vmem:[#allocation1 + $0x3] ss:$4 sm:$0xff] %v8673_v36 }
 0x867   : > { %7331 = vmatmul.msk.f32.gmra.mxu3 %vm682_vm0, %v3021_v4 }
 0x868   : > { %v3258_v18 = vld.sshfl [vmem:[#allocation1 + $0x20] sm:$0xff pattern:$0x73625140] }
 0x869   : > { %3324 = vst [vmem:[#allocation1 + $0x20] ss:$4 sm:$0xff] %v8683_v52 }
 0x86a   : > { %3326 = vst [vmem:[#allocation1 + $0x21] ss:$4 sm:$0xff] %v8699_v57 }
 0x86b   : > { %3328 = vst [vmem:[#allocation1 + $0x22] ss:$4 sm:$0xff] %v8710_v41 }
 0x86c   : > { %3330 = vst [vmem:[#allocation1 + $0x23] ss:$4 sm:$0xff] %v8720_v43 }
 0x86d   : > { %v3092_v7 = vpop.permute.xlu1 %3091 }
 0x86e   : > { %7334 = vmatmul.msk.f32.vlgmr.msra.gmra.mxu0 %vm682_vm0, %v3092_v7 }
 0x875   : > { %v9297_v23 = vpop.permute.xlu1 %1825 }
 0x876   : > { %7335 = vmatmul.msk.f32.gmra.mxu0 %vm682_vm0, %v3094_v49  ;;  %12073 = vst [vmem:[#allocation40_spill] sm:$0xff] %v9297_v23  ;;  %v9326_v49 = vpop.permute.xlu0 %1823  ;;  %v12103_v23 = vld [vmem:[#allocation33_spill] sm:$0xff] }
 0x877   : > { %12076 = vst [vmem:[#allocation42_spill] sm:$0xff] %v9326_v49 }
 0x87d   : > { %v9299_v21 = vpop.permute.xlu1 %1839 }
 0x87e   : > { %12074 = vst [vmem:[#allocation41_spill] sm:$0xff] %v9299_v21 }
 0x8eb   : > { %v3141_v30 = vpop.f32.mrf.mxu0 }
 0x8ec   : > { %v3147_v15 = vsel %vm682_vm0, %v3141_v30, -inf }
 0x8ed   : > { %3148 = vmax.xlane.f32.xlu2 %v3147_v15 }
 0x8f3   : > { %v3144_v2 = vpop.f32.mrf.mxu0 }
 0x8f4   : > { %v3150_v17 = vsel %vm682_vm0, %v3144_v2, -inf }
 0x8f5   : > { %3151 = vmax.xlane.f32.xlu1 %v3150_v17 }
 0x90e   : > { %7603 = vrot.lane.b32.xlu1 %v7602_v24, %s8096_s19 }
 0x916   : > { %3259 = vrot.lane.b32.xlu1 %v3257_v53, %s8097_s29 }
 0x960   : > { %v3149_v48 = vpop.xlane.xlu2 %3148 }
 0x961   : > { %v3153_v3 = vsub.f32 %v3141_v30, %v3149_v48 }
 0x963   : > { %v3155_v62 = vmul.f32 1.442695, %v3153_v3 }
 0x965   : > { %7828 = vpow2.f32 %v3155_v62 }
 0x968   : > { %v3152_v9 = vpop.xlane.xlu1 %3151 }
 0x969   : > { %v3154_v39 = vsub.f32 %v3144_v2, %v3152_v9 }
 0x96b   : > { %v7829_v32 = vpop.eup %7828  ;;  %v3157_v40 = vmul.f32 1.442695, %v3154_v39 }
 0x96c   : > { %v3159_v33 = vsel %vm682_vm0, %v7829_v32, 0.0 }
 0x96d   : > { %7830 = vpow2.f32 %v3157_v40  ;;  %3160 = vadd.xlane.f32.xlu0 %v3159_v33 }
 0x973   : > { %v7831_v22 = vpop.eup %7830 }
 0x974   : > { %v3162_v35 = vsel %vm682_vm0, %v7831_v22, 0.0 }
 0x975   : > { %3163 = vadd.xlane.f32.xlu2 %v3162_v35 }
 0x980   : > { %v7604_v10 = vpop.permute.xlu1 %7603 }
 0x981   : > { %1857 = vrot.lane.b32.xlu0 %v1663_v8, %s8093_s23  ;;  %v7606_v4 = vunpack.i.h.bf16 %v7604_v10  ;;  %v7605_v7 = vunpack.i.l.bf16 %v7604_v10  ;;  %v12080_v10 = vld [vmem:[#allocation18_spill] sm:$0xff] }
 0x983   : > { %3212 = vmatpush.msra.mxu2 %v7606_v4 }
 0x985   : > { %3213 = vmatpush.msra.mxu2 %v7605_v7  ;;  %v12081_v7 = vld [vmem:[#allocation19_spill] sm:$0xff] }
 0x988   : > { %v3260_v9 = vpop.permute.xlu1 %3259 }
 0x989   : > { %3240 = vrot.lane.b32.xlu0 %v3237_v25, %s8097_s29 }
 0x98d   : > { %1841 = vrot.lane.b32.xlu2 %v1369_v61, %s8095_s7 }
 0x991   : > { %3261 = vrot.lane.b32.xlu0 %v3258_v18, %s8097_s29  ;;  %v3331_v18 = vld.sshfl [vmem:[#allocation1] sm:$0xff pattern:$0x73625140] }
 0x992   : > { %3368 = vst [vmem:[#allocation1] ss:$4 sm:$0xff] %v8676_v44 }
 0x993   : > { %3370 = vst [vmem:[#allocation1 + $0x1] ss:$4 sm:$0xff] %v12069_v27 }
 0x994   : > { %3372 = vst [vmem:[#allocation1 + $0x2] ss:$4 sm:$0xff] %v8679_v45 }
 0x995   : > { %1855 = vrot.lane.b32.xlu2 %v1660_v26, %s8093_s23  ;;  %3374 = vst [vmem:[#allocation1 + $0x3] ss:$4 sm:$0xff] %v8681_v46 }
 0x99c   : > { %v3383_v35 = vld.sshfl [vmem:[#allocation1] sm:$0xff pattern:$0x73625140] }
 0x99d   : > { %3238 = vrot.lane.b32.xlu2 %v3236_v11, %s8097_s29  ;;  %v3332_v11 = vld.sshfl [vmem:[#allocation1 + $0x20] sm:$0xff pattern:$0x73625140]  ;;  %3389 = vst [vmem:[#allocation1] ss:$4 sm:$0xff] %v12075_v0 }
 0x99e   : > { %3376 = vst [vmem:[#allocation1 + $0x20] ss:$4 sm:$0xff] %v12070_v47 }
 0x99f   : > { %3378 = vst [vmem:[#allocation1 + $0x21] ss:$4 sm:$0xff] %v8715_v37 }
 0x9a0   : > { %3380 = vst [vmem:[#allocation1 + $0x22] ss:$4 sm:$0xff] %v12071_v59 }
 0x9a1   : > { %3382 = vst [vmem:[#allocation1 + $0x23] ss:$4 sm:$0xff] %v12072_v16 }
 0x9a2   : > { %3391 = vst [vmem:[#allocation1 + $0x1] ss:$4 sm:$0xff] %v8628_v56 }
 0x9a3   : > { %3393 = vst [vmem:[#allocation1 + $0x2] ss:$4 sm:$0xff] %v8633_v58 }
 0x9a4   : > { %3395 = vst [vmem:[#allocation1 + $0x3] ss:$4 sm:$0xff] %v8639_v12 }
 0x9a8   : > { %v3384_v46 = vld.sshfl [vmem:[#allocation1 + $0x20] sm:$0xff pattern:$0x73625140] }
 0x9a9   : > { %3397 = vst [vmem:[#allocation1 + $0x20] ss:$4 sm:$0xff] %v8642_v5 }
 0x9aa   : > { %3399 = vst [vmem:[#allocation1 + $0x21] ss:$4 sm:$0xff] %v8646_v50 }
 0x9ab   : > { %3401 = vst [vmem:[#allocation1 + $0x22] ss:$4 sm:$0xff] %v8649_v6  ;;  %v3404_v37 = vld.sshfl [vmem:[#allocation1] sm:$0xff pattern:$0x73625140] }
 0x9ac   : > { %3403 = vst [vmem:[#allocation1 + $0x23] ss:$4 sm:$0xff] %v8655_v60 }
 0x9ad   : > { %3463 = vst [vmem:[#allocation1] ss:$4 sm:$0xff] %v8659_v13 }
 0x9ae   : > { %3465 = vst [vmem:[#allocation1 + $0x1] ss:$4 sm:$0xff] %v8666_v63 }
 0x9af   : > { %3467 = vst [vmem:[#allocation1 + $0x2] ss:$4 sm:$0xff] %v8669_v20 }
 0x9b0   : > { %3469 = vst [vmem:[#allocation1 + $0x3] ss:$4 sm:$0xff] %v8673_v36 }
 0x9b3   : > { %v3405_v47 = vld.sshfl [vmem:[#allocation1 + $0x20] sm:$0xff pattern:$0x73625140] }
 0x9b4   : > { %3471 = vst [vmem:[#allocation1 + $0x20] ss:$4 sm:$0xff] %v8683_v52 }
 0x9b5   : > { %3473 = vst [vmem:[#allocation1 + $0x21] ss:$4 sm:$0xff] %v8699_v57 }
 0x9b6   : > { %3475 = vst [vmem:[#allocation1 + $0x22] ss:$4 sm:$0xff] %v8710_v41 }
 0x9b7   : > { %3477 = vst [vmem:[#allocation1 + $0x23] ss:$4 sm:$0xff] %v8720_v43  ;;  %v9379_v8 = vld.sshfl [vmem:[#allocation1] sm:$0xff pattern:$0x73625140] }
 0x9b8   : > { %3961 = vst.sshfl [vmem:[#allocation1] sm:$0xff pattern:$0x73625140] %v12080_v10 }
 0x9be   : > { %v9382_v4 = vld.sshfl [vmem:[#allocation1 + $0x20] sm:$0xff pattern:$0x73625140] }
 0x9bf   : > { %3964 = vst.sshfl [vmem:[#allocation1 + $0x20] sm:$0xff pattern:$0x73625140] %v12081_v7 }
 0x9e0   : > { %v3161_v30 = vpop.xlane.xlu0 %3160 }
 0x9e1   : > { %7832 = vrcp.f32 %v3161_v30  ;;  %v3963_v30 = vld [vmem:[#allocation1 + $0x2] ss:$4 sm:$0xff] }
 0x9e7   : > { %v7833_v15 = vpop.eup %7832 }
 0x9e8   : > { %v3167_v2 = vmul.f32 %v7833_v15, %v7829_v32  ;;  %v3164_v17 = vpop.xlane.xlu2 %3163  ;;  %v12082_v15 = vld [vmem:[#allocation20_spill] sm:$0xff] }
 0x9e9   : > { %7834 = vrcp.f32 %v3164_v17  ;;  %3967 = vst.sshfl [vmem:[#allocation1] sm:$0xff pattern:$0x73625140] %v12082_v15  ;;  %v12083_v17 = vld [vmem:[#allocation21_spill] sm:$0xff] }
 0x9ea   : > { %7336 = vmatmul.msk.f32.vlgmr.msra.gmra.mxu2 %vm682_vm0, %v3167_v2  ;;  %v3966_v2 = vld [vmem:[#allocation1 + $0x22] ss:$4 sm:$0xff] }
 0x9eb   : > { %3969 = vst.sshfl [vmem:[#allocation1 + $0x20] sm:$0xff pattern:$0x73625140] %v12083_v17  ;;  %v9441_v54 = vmul.f32 0.25, %v3966_v2 }
 0x9ef   : > { %v7835_v31 = vpop.eup %7834 }
 0x9f0   : > { %v3168_v28 = vmul.f32 %v7835_v31, %v7831_v22  ;;  %v9332_v48 = vpop.permute.xlu2 %1841  ;;  %v7607_v22 = vpack.i.bf16 %v3332_v11, %v3331_v18  ;;  %v3968_v31 = vld [vmem:[#allocation1 + $0x2] ss:$4 sm:$0xff] }
 0x9f1   : > { %12078 = vst [vmem:[#allocation38_spill] sm:$0xff] %v9332_v48  ;;  %v12089_v11 = vld [vmem:[#allocation27_spill] sm:$0xff]  ;;  %v9459_v55 = vmul.f32 0.25, %v3968_v31  ;;  %v9474_v31 = vpop.f32.mrf.mxu3 }
 0x9f2   : > { %7337 = vmatmul.msk.f32.gmra.mxu2 %vm682_vm0, %v3168_v28  ;;  %v12084_v28 = vld [vmem:[#allocation14_spill] sm:$0xff]  ;;  %12104 = vst [vmem:[#allocation18_spill] sm:$0xff] %v9474_v31 }
 0x9f3   : > { %v9330_v24 = vpop.permute.xlu0 %1857  ;;  %3971 = vst.sshfl [vmem:[#allocation1] sm:$0xff pattern:$0x73625140] %v12084_v28 }
 0x9f4   : > { %12077 = vst [vmem:[#allocation39_spill] sm:$0xff] %v9330_v24 }
 0x9f8   : > { %v9334_v25 = vpop.permute.xlu2 %1855 }
 0x9f9   : > { %12079 = vst [vmem:[#allocation53_spill] sm:$0xff] %v9334_v25  ;;  %v9481_v38 = vpop.f32.mrf.mxu3 }
 0x9fa   : > { %12105 = vst [vmem:[#allocation19_spill] sm:$0xff] %v9481_v38 }
 0x9fb   : > { %v3241_v3 = vpop.permute.xlu0 %3240 }
 0xa00   : > { %v3239_v39 = vpop.permute.xlu2 %3238 }
 0xa01   : > { %v2774_v21 = vpop.f32.mrf.mxu3 }
 0xa03   : > { %v3262_v62 = vpop.permute.xlu0 %3261 }
 0xa04   : > { %7338 = vmatpush.xpose.msk.msrb.mxu1 %vm682_vm0, %v3262_v62  ;;  %v12085_v62 = vld [vmem:[#allocation15_spill] sm:$0xff] }
 0xa08   : > { %7339 = vmatpush.xpose.msk.msrb.mxu1 %vm682_vm0, %v3260_v9  ;;  %v3972_v9 = vld [vmem:[#allocation1 + $0x2] ss:$4 sm:$0xff] }
 0xa09   : > { %v2777_v49 = vpop.f32.mrf.mxu3 }
 0xa0b   : > { %7340 = vmatmul.msk.f32.vlgmr.msrb.gmra.mxu1 %vm682_vm0, %v3239_v39  ;;  %v12086_v39 = vld [vmem:[#allocation16_spill] sm:$0xff] }
 0xa0c   : > { %3975 = vst.sshfl [vmem:[#allocation1] sm:$0xff pattern:$0x73625140] %v12086_v39 }
 0xa13   : > { %7341 = vmatmul.msk.f32.gmra.mxu1 %vm682_vm0, %v3241_v3  ;;  %v3970_v3 = vld [vmem:[#allocation1 + $0x22] ss:$4 sm:$0xff] }
 0xa14   : > { %3973 = vst.sshfl [vmem:[#allocation1 + $0x20] sm:$0xff pattern:$0x73625140] %v12085_v62  ;;  %v9446_v48 = vmul.f32 0.25, %v3970_v3 }
 0xa88   : > { %v3288_v32 = vpop.f32.mrf.mxu1 }
 0xa89   : > { %v3294_v40 = vsel %vm682_vm0, %v3288_v32, -inf }
 0xa8a   : > { %3295 = vmax.xlane.f32.xlu2 %v3294_v40  ;;  %v12087_v40 = vld [vmem:[#allocation17_spill] sm:$0xff] }
 0xa90   : > { %v3291_v61 = vpop.f32.mrf.mxu1 }
 0xa91   : > { %v3297_v33 = vsel %vm682_vm0, %v3291_v61, -inf }
 0xa92   : > { %3298 = vmax.xlane.f32.xlu1 %v3297_v33  ;;  %v12088_v33 = vld [vmem:[#allocation26_spill] sm:$0xff] }
 0xaab   : > { %7608 = vrot.lane.b32.xlu1 %v7607_v22, %s8097_s29 }
 0xab3   : > { %3408 = vrot.lane.b32.xlu1 %v3405_v47, %s8098_s30 }
 0xafd   : > { %v3296_v44 = vpop.xlane.xlu2 %3295 }
 0xafe   : > { %v3300_v45 = vsub.f32 %v3288_v32, %v3296_v44  ;;  %v3974_v32 = vld [vmem:[#allocation1 + $0x22] ss:$4 sm:$0xff] }
 0xaff   : > { %3977 = vst.sshfl [vmem:[#allocation1 + $0x20] sm:$0xff pattern:$0x73625140] %v12087_v40  ;;  %v9453_v34 = vmul.f32 0.25, %v3974_v32 }
 0xb00   : > { %v3302_v27 = vmul.f32 1.442695, %v3300_v45  ;;  %v12091_v45 = vld [vmem:[#allocation29_spill] sm:$0xff] }
 0xb02   : > { %7836 = vpow2.f32 %v3302_v27  ;;  %v12092_v27 = vld [vmem:[#allocation22_spill] sm:$0xff] }
 0xb05   : > { %v3299_v56 = vpop.xlane.xlu1 %3298 }
 0xb06   : > { %v3301_v58 = vsub.f32 %v3291_v61, %v3299_v56  ;;  %v3976_v61 = vld [vmem:[#allocation1 + $0x2] ss:$4 sm:$0xff] }
 0xb07   : > { %3995 = vst.sshfl [vmem:[#allocation1] sm:$0xff pattern:$0x73625140] %v12088_v33  ;;  %v3978_v18 = vld [vmem:[#allocation1 + $0x22] ss:$4 sm:$0xff] }
 0xb08   : > { %v7837_v12 = vpop.eup %7836  ;;  %v3304_v5 = vmul.f32 1.442695, %v3301_v58  ;;  %3998 = vst.sshfl [vmem:[#allocation1 + $0x20] sm:$0xff pattern:$0x73625140] %v12089_v11  ;;  %v12093_v56 = vld [vmem:[#allocation23_spill] sm:$0xff] }
 0xb09   : > { %v3306_v50 = vsel %vm682_vm0, %v7837_v12, 0.0  ;;  %v9456_v2 = vmul.f32 0.25, %v3978_v18 }
 0xb0a   : > { %7838 = vpow2.f32 %v3304_v5  ;;  %3307 = vadd.xlane.f32.xlu0 %v3306_v50  ;;  %v12095_v50 = vld [vmem:[#allocation25_spill] sm:$0xff] }
 0xb0e   : > { %v9393_v22 = vld [vmem:[#allocation1 + $0x2] ss:$4 sm:$0xff] }
 0xb0f   : > { %v9396_v44 = vld [vmem:[#allocation1 + $0x22] ss:$4 sm:$0xff] }
 0xb10   : > { %v7839_v6 = vpop.eup %7838  ;;  %4003 = vst.sshfl [vmem:[#allocation1 + $0x20] sm:$0xff pattern:$0x73625140] %v12091_v45 }
 0xb11   : > { %v3309_v60 = vsel %vm682_vm0, %v7839_v6, 0.0 }
 0xb12   : > { %3310 = vadd.xlane.f32.xlu2 %v3309_v60  ;;  %v7612_v60 = vpack.i.bf16 %v9382_v4, %v9379_v8 }
 0xb1d   : > { %v7609_v13 = vpop.permute.xlu1 %7608 }
 0xb1e   : > { %3385 = vrot.lane.b32.xlu0 %v3383_v35, %s8098_s30  ;;  %v7611_v63 = vunpack.i.h.bf16 %v7609_v13  ;;  %v7610_v20 = vunpack.i.l.bf16 %v7609_v13  ;;  %v12090_v35 = vld [vmem:[#allocation28_spill] sm:$0xff] }
 0xb1f   : > { %4001 = vst.sshfl [vmem:[#allocation1] sm:$0xff pattern:$0x73625140] %v12090_v35 }
 0xb20   : > { %3359 = vmatpush.msrb.mxu3 %v7611_v63  ;;  %v12097_v63 = vld [vmem:[#allocation35_spill] sm:$0xff] }
 0xb22   : > { %3360 = vmatpush.msrb.mxu3 %v7610_v20 }
 0xb25   : > { %v3409_v36 = vpop.permute.xlu1 %3408 }
 0xb26   : > { %3406 = vrot.lane.b32.xlu0 %v3404_v37, %s8098_s30  ;;  %7344 = vmatpush.xpose.msk.msrb.mxu0 %vm682_vm0, %v3409_v36  ;;  %v9402_v37 = vld [vmem:[#allocation1 + $0x22] ss:$4 sm:$0xff] }
 0xb27   : > { %4007 = vst.sshfl [vmem:[#allocation1 + $0x20] sm:$0xff pattern:$0x73625140] %v12093_v56  ;;  %v12098_v36 = vld [vmem:[#allocation36_spill] sm:$0xff] }
 0xb2a   : > { %3387 = vrot.lane.b32.xlu2 %v3384_v46, %s8098_s30  ;;  %v9399_v46 = vld [vmem:[#allocation1 + $0x2] ss:$4 sm:$0xff] }
 0xb2b   : > { %4005 = vst.sshfl [vmem:[#allocation1] sm:$0xff pattern:$0x73625140] %v12092_v27 }
 0xb2e   : > { %v9408_v5 = vld [vmem:[#allocation1 + $0x22] ss:$4 sm:$0xff] }
 0xb2f   : > { %4011 = vst.sshfl [vmem:[#allocation1 + $0x20] sm:$0xff pattern:$0x73625140] %v12095_v50 }
 0xb32   : > { %v9405_v58 = vld [vmem:[#allocation1 + $0x2] ss:$4 sm:$0xff] }
 0xb36   : > { %v9416_v13 = vld [vmem:[#allocation1 + $0x22] ss:$4 sm:$0xff] }
 0xb37   : > { %4016 = vst.sshfl [vmem:[#allocation1 + $0x20] sm:$0xff pattern:$0x73625140] %v12097_v63 }
 0xb7d   : > { %v3308_v52 = vpop.xlane.xlu0 %3307 }
 0xb7e   : > { %7840 = vrcp.f32 %v3308_v52  ;;  %v9422_v52 = vld [vmem:[#allocation1 + $0x22] ss:$4 sm:$0xff] }
 0xb84   : > { %v7841_v57 = vpop.eup %7840 }
 0xb85   : > { %v3314_v41 = vmul.f32 %v7841_v57, %v7837_v12  ;;  %v3311_v43 = vpop.xlane.xlu2 %3310  ;;  %v12094_v12 = vld [vmem:[#allocation24_spill] sm:$0xff]  ;;  %v12099_v57 = vld [vmem:[#allocation37_spill] sm:$0xff] }
 0xb86   : > { %7842 = vrcp.f32 %v3311_v43  ;;  %4009 = vst.sshfl [vmem:[#allocation1] sm:$0xff pattern:$0x73625140] %v12094_v12 }
 0xb87   : > { %7342 = vmatmul.msk.f32.vlgmr.msrb.gmra.mxu3 %vm682_vm0, %v3314_v41  ;;  %4021 = vst.sshfl [vmem:[#allocation1 + $0x20] sm:$0xff pattern:$0x73625140] %v12099_v57 }
 0xb8c   : > { %v7843_v59 = vpop.eup %7842 }
 0xb8d   : > { %v3315_v16 = vmul.f32 %v7843_v59, %v7839_v6  ;;  %v3388_v53 = vpop.permute.xlu2 %3387  ;;  %v9411_v47 = vld [vmem:[#allocation1 + $0x2] ss:$4 sm:$0xff] }
 0xb8e   : > { %v12096_v6 = vld [vmem:[#allocation34_spill] sm:$0xff] }
 0xb8f   : > { %7343 = vmatmul.msk.f32.gmra.mxu3 %vm682_vm0, %v3315_v16  ;;  %4013 = vst.sshfl [vmem:[#allocation1] sm:$0xff pattern:$0x73625140] %v12096_v6  ;;  %v12100_v16 = vld [vmem:[#allocation30_spill] sm:$0xff] }
 0xb90   : > { %v3386_v0 = vpop.permute.xlu0 %3385 }
 0xb96   : > { %v9419_v20 = vld [vmem:[#allocation1 + $0x2] ss:$4 sm:$0xff] }
 0xb97   : > { %4019 = vst.sshfl [vmem:[#allocation1] sm:$0xff pattern:$0x73625140] %v12098_v36 }
 0xb98   : > { %v3407_v26 = vpop.permute.xlu0 %3406 }
 0xb99   : > { %7345 = vmatpush.xpose.msk.msrb.mxu0 %vm682_vm0, %v3407_v26  ;;  %v12101_v26 = vld [vmem:[#allocation31_spill] sm:$0xff] }
 0xb9c   : > { %7346 = vmatmul.msk.f32.vlgmr.msrb.gmra.mxu0 %vm682_vm0, %v3386_v0  ;;  %v9432_v0 = vld [vmem:[#allocation1 + $0x22] ss:$4 sm:$0xff] }
 0xb9d   : > { %4025 = vst.sshfl [vmem:[#allocation1 + $0x20] sm:$0xff pattern:$0x73625140] %v12101_v26 }
 0xb9e   : > { %v9427_v43 = vld [vmem:[#allocation1 + $0x2] ss:$4 sm:$0xff] }
 0xb9f   : > { %4023 = vst.sshfl [vmem:[#allocation1] sm:$0xff pattern:$0x73625140] %v12100_v16 }
 0xba4   : > { %7347 = vmatmul.msk.f32.gmra.mxu0 %vm682_vm0, %v3388_v53  ;;  %v9435_v53 = vmul.f32 0.25, %v3963_v30  ;;  %v9451_v30 = vld [vmem:[#allocation1 + $0x22] ss:$4 sm:$0xff] }
 0xba5   : > { %4029 = vst.sshfl [vmem:[#allocation1 + $0x20] sm:$0xff pattern:$0x73625140] %v12103_v23 }
 0xba6   : > { %v9439_v4 = vld [vmem:[#allocation1 + $0x2] ss:$4 sm:$0xff]  ;;  %4049 = vst [vmem:[#allocation1 + $0x21] ss:$4 sm:$0xff] %v9453_v34 }
 0xba7   : > { %4027 = vst.sshfl [vmem:[#allocation1] sm:$0xff pattern:$0x73625140] %v12102_v29 }
 0xba8   : > { %4039 = vst [vmem:[#allocation1] ss:$4 sm:$0xff] %v9435_v53 }
 0xba9   : > { %4041 = vst [vmem:[#allocation1 + $0x1] ss:$4 sm:$0xff] %v9441_v54 }
 0xbaa   : > { %4045 = vst [vmem:[#allocation1 + $0x3] ss:$4 sm:$0xff] %v9446_v48 }
 0xbab   : > { %4053 = vst [vmem:[#allocation1 + $0x23] ss:$4 sm:$0xff] %v9456_v2 }
 0xbac   : > { %v9472_v32 = vld [vmem:[#allocation1 + $0x22] ss:$4 sm:$0xff] }
 0xbae   : > { %v9466_v3 = vld [vmem:[#allocation1 + $0x2] ss:$4 sm:$0xff] }
 0xbaf   : > { %4043 = vst [vmem:[#allocation1 + $0x2] ss:$4 sm:$0xff] %v9459_v55 }
 0xbb6   : > { %v4054_v18 = vld.sshfl [vmem:[#allocation1] sm:$0xff pattern:$0x73625140] }
 0xbb7   : > { %4056 = vst [vmem:[#allocation1] ss:$4 sm:$0xff] %v9393_v22 }
 0xbb8   : > { %4058 = vst [vmem:[#allocation1 + $0x1] ss:$4 sm:$0xff] %v9396_v44 }
 0xbb9   : > { %4060 = vst [vmem:[#allocation1 + $0x2] ss:$4 sm:$0xff] %v9399_v46 }
 0xbba   : > { %4062 = vst [vmem:[#allocation1 + $0x3] ss:$4 sm:$0xff] %v9402_v37 }
 0xbc1   : > { %v4071_v14 = vld.sshfl [vmem:[#allocation1] sm:$0xff pattern:$0x73625140] }
 0xbc2   : > { %4126 = vst [vmem:[#allocation1] ss:$4 sm:$0xff] %v9419_v20 }
 0xbc3   : > { %4128 = vst [vmem:[#allocation1 + $0x1] ss:$4 sm:$0xff] %v9422_v52 }
 0xbc4   : > { %4130 = vst [vmem:[#allocation1 + $0x2] ss:$4 sm:$0xff] %v9427_v43 }
 0xbc5   : > { %4132 = vst [vmem:[#allocation1 + $0x3] ss:$4 sm:$0xff] %v9432_v0 }
 0xbcc   : > { %v4141_v42 = vld.sshfl [vmem:[#allocation1] sm:$0xff pattern:$0x73625140] }
 0xbcd   : > { %4174 = vst [vmem:[#allocation1] ss:$4 sm:$0xff] %v9435_v53 }
 0xbce   : > { %4176 = vst [vmem:[#allocation1 + $0x1] ss:$4 sm:$0xff] %v9441_v54 }
 0xbcf   : > { %4178 = vst [vmem:[#allocation1 + $0x2] ss:$4 sm:$0xff] %v9459_v55 }
 0xbd0   : > { %4180 = vst [vmem:[#allocation1 + $0x3] ss:$4 sm:$0xff] %v9446_v48 }
 0xc19   : > { %v9425_v41 = vpop.f32.mrf.mxu0 }
 0xc1a   : > { %v3441_v59 = vsel %vm682_vm0, %v9425_v41, -inf }
 0xc1b   : > { %3442 = vmax.xlane.f32.xlu2 %v3441_v59  ;;  %v9448_v59 = vmul.f32 0.25, %v3972_v9  ;;  %v9469_v9 = vpop.f32.mrf.mxu2 }
 0xc1d   : > { %4047 = vst [vmem:[#allocation1 + $0x20] ss:$4 sm:$0xff] %v9448_v59 }
 0xc21   : > { %v9437_v8 = vpop.f32.mrf.mxu0 }
 0xc22   : > { %v3444_v24 = vsel %vm682_vm0, %v9437_v8, -inf }
 0xc23   : > { %3445 = vmax.xlane.f32.xlu0 %v3444_v24  ;;  %v9463_v24 = vmul.f32 0.25, %v3976_v61  ;;  %v9477_v51 = vpop.f32.mrf.mxu2 }
 0xc25   : > { %4051 = vst [vmem:[#allocation1 + $0x22] ss:$4 sm:$0xff] %v9463_v24 }
 0xc2b   : > { %v9490_v25 = vpop.f32.mrf.mxu2 }
 0xc2c   : > { %v4055_v61 = vld.sshfl [vmem:[#allocation1 + $0x20] sm:$0xff pattern:$0x73625140] }
 0xc2d   : > { %4064 = vst [vmem:[#allocation1 + $0x20] ss:$4 sm:$0xff] %v9405_v58 }
 0xc2e   : > { %4066 = vst [vmem:[#allocation1 + $0x21] ss:$4 sm:$0xff] %v9408_v5 }
 0xc2f   : > { %4068 = vst [vmem:[#allocation1 + $0x22] ss:$4 sm:$0xff] %v9411_v47 }
 0xc30   : > { %4070 = vst [vmem:[#allocation1 + $0x23] ss:$4 sm:$0xff] %v9416_v13 }
 0xc37   : > { %7613 = vrot.lane.b32.xlu0 %v7612_v60, %s8098_s30  ;;  %v4072_v19 = vld.sshfl [vmem:[#allocation1 + $0x20] sm:$0xff pattern:$0x73625140]  ;;  %v9501_v60 = vpop.f32.mrf.mxu2 }
 0xc38   : > { %4134 = vst [vmem:[#allocation1 + $0x20] ss:$4 sm:$0xff] %v9439_v4  ;;  %7358 = vmatpush.xpose.msk.msra.mxu1 %vm682_vm0, %v4072_v19 }
 0xc39   : > { %4136 = vst [vmem:[#allocation1 + $0x21] ss:$4 sm:$0xff] %v9451_v30 }
 0xc3a   : > { %4138 = vst [vmem:[#allocation1 + $0x22] ss:$4 sm:$0xff] %v9466_v3 }
 0xc3b   : > { %4140 = vst [vmem:[#allocation1 + $0x23] ss:$4 sm:$0xff] %v9472_v32 }
 0xc3c   : > { %7359 = vmatpush.xpose.msk.msra.mxu1 %vm682_vm0, %v4071_v14  ;;  %v3068_v14 = vpop.f32.mrf.mxu3 }
 0xc3f   : > { %3525 = vrot.lane.b32.xlu0 %v2774_v21, %s8097_s29  ;;  %7360 = vmatmul.msk.f32.vlgmr.msra.gmra.mxu1 %vm682_vm0, %v4054_v18  ;;  %v9511_v21 = vpop.f32.mrf.mxu2 }
 0xc42   : > { %v4142_v19 = vld.sshfl [vmem:[#allocation1 + $0x20] sm:$0xff pattern:$0x73625140] }
 0xc43   : > { %4182 = vst [vmem:[#allocation1 + $0x20] ss:$4 sm:$0xff] %v9448_v59  ;;  %4165 = vmatpush.msra.mxu3 %v4142_v19 }
 0xc44   : > { %4184 = vst [vmem:[#allocation1 + $0x21] ss:$4 sm:$0xff] %v9453_v34 }
 0xc45   : > { %4186 = vst [vmem:[#allocation1 + $0x22] ss:$4 sm:$0xff] %v9463_v24  ;;  %4166 = vmatpush.msra.mxu3 %v4141_v42 }
 0xc46   : > { %4188 = vst [vmem:[#allocation1 + $0x23] ss:$4 sm:$0xff] %v9456_v2 }
 0xc47   : > { %3527 = vrot.lane.b32.xlu0 %v2777_v49, %s8097_s29  ;;  %7361 = vmatmul.msk.f32.gmra.mxu1 %vm682_vm0, %v4055_v61  ;;  %v9519_v49 = vld.sshfl [vmem:[#allocation1] sm:$0xff pattern:$0x73625140]  ;;  %v3218_v18 = vpop.f32.mrf.mxu2 }
 0xc48   : > { %4195 = vst [vmem:[#allocation1] ss:$4 sm:$0xff] %v9393_v22 }
 0xc49   : > { %4197 = vst [vmem:[#allocation1 + $0x1] ss:$4 sm:$0xff] %v9396_v44 }
 0xc4a   : > { %4199 = vst [vmem:[#allocation1 + $0x2] ss:$4 sm:$0xff] %v9399_v46 }
 0xc4b   : > { %4201 = vst [vmem:[#allocation1 + $0x3] ss:$4 sm:$0xff] %v9402_v37 }
 0xc4d   : > { %v9524_v19 = vld.sshfl [vmem:[#allocation1 + $0x20] sm:$0xff pattern:$0x73625140] }
 0xc4e   : > { %4203 = vst [vmem:[#allocation1 + $0x20] ss:$4 sm:$0xff] %v9405_v58 }
 0xc4f   : > { %3541 = vrot.lane.b32.xlu0 %v3068_v14, %s8095_s7  ;;  %4205 = vst [vmem:[#allocation1 + $0x21] ss:$4 sm:$0xff] %v9408_v5 }
 0xc50   : > { %4207 = vst [vmem:[#allocation1 + $0x22] ss:$4 sm:$0xff] %v9411_v47 }
 0xc51   : > { %4209 = vst [vmem:[#allocation1 + $0x23] ss:$4 sm:$0xff] %v9416_v13 }
 0xc52   : > { %v9532_v42 = vld.sshfl [vmem:[#allocation1] sm:$0xff pattern:$0x73625140] }
 0xc53   : > { %12106 = vst [vmem:[#allocation20_spill] sm:$0xff] %v9532_v42 }
 0xc54   : > { %4269 = vst [vmem:[#allocation1] ss:$4 sm:$0xff] %v9419_v20 }
 0xc55   : > { %4271 = vst [vmem:[#allocation1 + $0x1] ss:$4 sm:$0xff] %v9422_v52 }
 0xc56   : > { %4273 = vst [vmem:[#allocation1 + $0x2] ss:$4 sm:$0xff] %v9427_v43 }
 0xc57   : > { %3551 = vrot.lane.b32.xlu0 %v3218_v18, %s8094_s26  ;;  %4275 = vst [vmem:[#allocation1 + $0x3] ss:$4 sm:$0xff] %v9432_v0 }
 0xc58   : > { %v9537_v61 = vld.sshfl [vmem:[#allocation1 + $0x20] sm:$0xff pattern:$0x73625140] }
 0xc59   : > { %4277 = vst [vmem:[#allocation1 + $0x20] ss:$4 sm:$0xff] %v9439_v4 }
 0xc5a   : > { %4279 = vst [vmem:[#allocation1 + $0x21] ss:$4 sm:$0xff] %v9451_v30 }
 0xc5b   : > { %4281 = vst [vmem:[#allocation1 + $0x22] ss:$4 sm:$0xff] %v9466_v3 }
 0xc5c   : > { %4283 = vst [vmem:[#allocation1 + $0x23] ss:$4 sm:$0xff] %v9472_v32 }
 0xc5e   : > { %v9544_v14 = vld.sshfl [vmem:[#allocation1] sm:$0xff pattern:$0x73625140] }
 0xc5f   : > { %12107 = vst [vmem:[#allocation21_spill] sm:$0xff] %v9544_v14 }
 0xc60   : > { %4321 = vst [vmem:[#allocation1] ss:$4 sm:$0xff] %v9435_v53 }
 0xc61   : > { %4323 = vst [vmem:[#allocation1 + $0x1] ss:$4 sm:$0xff] %v9441_v54 }
 0xc62   : > { %4325 = vst [vmem:[#allocation1 + $0x2] ss:$4 sm:$0xff] %v9459_v55 }
 0xc63   : > { %v9549_v18 = vld.sshfl [vmem:[#allocation1 + $0x20] sm:$0xff pattern:$0x73625140]  ;;  %4327 = vst [vmem:[#allocation1 + $0x3] ss:$4 sm:$0xff] %v9446_v48 }
 0xc64   : > { %12108 = vst [vmem:[#allocation14_spill] sm:$0xff] %v9549_v18 }
 0xc65   : > { %4329 = vst [vmem:[#allocation1 + $0x20] ss:$4 sm:$0xff] %v9448_v59 }
 0xc66   : > { %4331 = vst [vmem:[#allocation1 + $0x21] ss:$4 sm:$0xff] %v9453_v34 }
 0xc67   : > { %4333 = vst [vmem:[#allocation1 + $0x22] ss:$4 sm:$0xff] %v9463_v24 }
 0xc68   : > { %4335 = vst [vmem:[#allocation1 + $0x23] ss:$4 sm:$0xff] %v9456_v2 }
 0xc6a   : > { %v9556_v1 = vld.sshfl [vmem:[#allocation1] sm:$0xff pattern:$0x73625140] }
 0xc6b   : > { %12109 = vst [vmem:[#allocation15_spill] sm:$0xff] %v9556_v1 }
 0xc6c   : > { %4342 = vst [vmem:[#allocation1] ss:$4 sm:$0xff] %v9393_v22 }
 0xc6d   : > { %4344 = vst [vmem:[#allocation1 + $0x1] ss:$4 sm:$0xff] %v9396_v44 }
 0xc6e   : > { %4346 = vst [vmem:[#allocation1 + $0x2] ss:$4 sm:$0xff] %v9399_v46 }
 0xc6f   : > { %v9561_v14 = vld.sshfl [vmem:[#allocation1 + $0x20] sm:$0xff pattern:$0x73625140]  ;;  %4348 = vst [vmem:[#allocation1 + $0x3] ss:$4 sm:$0xff] %v9402_v37 }
 0xc70   : > { %12110 = vst [vmem:[#allocation16_spill] sm:$0xff] %v9561_v14 }
 0xc71   : > { %4350 = vst [vmem:[#allocation1 + $0x20] ss:$4 sm:$0xff] %v9405_v58 }
 0xc72   : > { %4352 = vst [vmem:[#allocation1 + $0x21] ss:$4 sm:$0xff] %v9408_v5 }
 0xc73   : > { %4354 = vst [vmem:[#allocation1 + $0x22] ss:$4 sm:$0xff] %v9411_v47 }
 0xc74   : > { %4356 = vst [vmem:[#allocation1 + $0x23] ss:$4 sm:$0xff] %v9416_v13 }
 0xc76   : > { %v9568_v18 = vld.sshfl [vmem:[#allocation1] sm:$0xff pattern:$0x73625140] }
 0xc77   : > { %12111 = vst [vmem:[#allocation17_spill] sm:$0xff] %v9568_v18 }
 0xc78   : > { %4416 = vst [vmem:[#allocation1] ss:$4 sm:$0xff] %v9419_v20 }
 0xc79   : > { %4418 = vst [vmem:[#allocation1 + $0x1] ss:$4 sm:$0xff] %v9422_v52 }
 0xc7a   : > { %4420 = vst [vmem:[#allocation1 + $0x2] ss:$4 sm:$0xff] %v9427_v43 }
 0xc7b   : > { %v9573_v1 = vld.sshfl [vmem:[#allocation1 + $0x20] sm:$0xff pattern:$0x73625140]  ;;  %4422 = vst [vmem:[#allocation1 + $0x3] ss:$4 sm:$0xff] %v9432_v0 }
 0xc7c   : > { %12112 = vst [vmem:[#allocation26_spill] sm:$0xff] %v9573_v1 }
 0xc7d   : > { %4424 = vst [vmem:[#allocation1 + $0x20] ss:$4 sm:$0xff] %v9439_v4 }
 0xc7e   : > { %4426 = vst [vmem:[#allocation1 + $0x21] ss:$4 sm:$0xff] %v9451_v30 }
 0xc7f   : > { %4428 = vst [vmem:[#allocation1 + $0x22] ss:$4 sm:$0xff] %v9466_v3 }
 0xc80   : > { %4430 = vst [vmem:[#allocation1 + $0x23] ss:$4 sm:$0xff] %v9472_v32 }
 0xc82   : > { %v9580_v14 = vld.sshfl [vmem:[#allocation1] sm:$0xff pattern:$0x73625140] }
 0xc83   : > { %12113 = vst [vmem:[#allocation27_spill] sm:$0xff] %v9580_v14 }
 0xc84   : > { %4468 = vst [vmem:[#allocation1] ss:$4 sm:$0xff] %v9435_v53 }
 0xc85   : > { %4470 = vst [vmem:[#allocation1 + $0x1] ss:$4 sm:$0xff] %v9441_v54 }
 0xc86   : > { %4472 = vst [vmem:[#allocation1 + $0x2] ss:$4 sm:$0xff] %v9459_v55 }
 0xc87   : > { %v9585_v18 = vld.sshfl [vmem:[#allocation1 + $0x20] sm:$0xff pattern:$0x73625140]  ;;  %4474 = vst [vmem:[#allocation1 + $0x3] ss:$4 sm:$0xff] %v9446_v48 }
 0xc88   : > { %12114 = vst [vmem:[#allocation28_spill] sm:$0xff] %v9585_v18 }
 0xc89   : > { %4476 = vst [vmem:[#allocation1 + $0x20] ss:$4 sm:$0xff] %v9448_v59 }
 0xc8a   : > { %4478 = vst [vmem:[#allocation1 + $0x21] ss:$4 sm:$0xff] %v9453_v34 }
 0xc8b   : > { %4480 = vst [vmem:[#allocation1 + $0x22] ss:$4 sm:$0xff] %v9463_v24 }
 0xc8c   : > { %4482 = vst [vmem:[#allocation1 + $0x23] ss:$4 sm:$0xff] %v9456_v2 }
 0xc8e   : > { %v9592_v1 = vld.sshfl [vmem:[#allocation1] sm:$0xff pattern:$0x73625140] }
 0xc8f   : > { %12115 = vst [vmem:[#allocation29_spill] sm:$0xff] %v9592_v1 }
 0xc90   : > { %4489 = vst [vmem:[#allocation1] ss:$4 sm:$0xff] %v9393_v22 }
 0xc91   : > { %4491 = vst [vmem:[#allocation1 + $0x1] ss:$4 sm:$0xff] %v9396_v44 }
 0xc92   : > { %4493 = vst [vmem:[#allocation1 + $0x2] ss:$4 sm:$0xff] %v9399_v46 }
 0xc93   : > { %v9597_v14 = vld.sshfl [vmem:[#allocation1 + $0x20] sm:$0xff pattern:$0x73625140]  ;;  %4495 = vst [vmem:[#allocation1 + $0x3] ss:$4 sm:$0xff] %v9402_v37 }
 0xc94   : > { %12116 = vst [vmem:[#allocation22_spill] sm:$0xff] %v9597_v14 }
 0xc95   : > { %4497 = vst [vmem:[#allocation1 + $0x20] ss:$4 sm:$0xff] %v9405_v58 }
 0xc96   : > { %4499 = vst [vmem:[#allocation1 + $0x21] ss:$4 sm:$0xff] %v9408_v5  ;;  %v3446_v31 = vpop.xlane.xlu0 %3445 }
 0xc97   : > { %4501 = vst [vmem:[#allocation1 + $0x22] ss:$4 sm:$0xff] %v9411_v47 }
 0xc98   : > { %4503 = vst [vmem:[#allocation1 + $0x23] ss:$4 sm:$0xff] %v9416_v13 }
 0xc9a   : > { %v9604_v18 = vld.sshfl [vmem:[#allocation1] sm:$0xff pattern:$0x73625140] }
 0xc9b   : > { %12117 = vst [vmem:[#allocation23_spill] sm:$0xff] %v9604_v18 }
 0xc9c   : > { %4563 = vst [vmem:[#allocation1] ss:$4 sm:$0xff] %v9419_v20 }
 0xc9d   : > { %4565 = vst [vmem:[#allocation1 + $0x1] ss:$4 sm:$0xff] %v9422_v52 }
 0xc9e   : > { %4567 = vst [vmem:[#allocation1 + $0x2] ss:$4 sm:$0xff] %v9427_v43 }
 0xc9f   : > { %v9609_v1 = vld.sshfl [vmem:[#allocation1 + $0x20] sm:$0xff pattern:$0x73625140]  ;;  %4569 = vst [vmem:[#allocation1 + $0x3] ss:$4 sm:$0xff] %v9432_v0 }
 0xca0   : > { %12118 = vst [vmem:[#allocation24_spill] sm:$0xff] %v9609_v1 }
 0xca1   : > { %4571 = vst [vmem:[#allocation1 + $0x20] ss:$4 sm:$0xff] %v9439_v4 }
 0xca2   : > { %4573 = vst [vmem:[#allocation1 + $0x21] ss:$4 sm:$0xff] %v9451_v30 }
 0xca3   : > { %4575 = vst [vmem:[#allocation1 + $0x22] ss:$4 sm:$0xff] %v9466_v3 }
 0xca4   : > { %4577 = vst [vmem:[#allocation1 + $0x23] ss:$4 sm:$0xff] %v9472_v32 }
 0xca6   : > { %v9616_v14 = vld.sshfl [vmem:[#allocation1] sm:$0xff pattern:$0x73625140] }
 0xca7   : > { %12119 = vst [vmem:[#allocation25_spill] sm:$0xff] %v9616_v14 }
 0xca8   : > { %4615 = vst [vmem:[#allocation1] ss:$4 sm:$0xff] %v9435_v53 }
 0xca9   : > { %4617 = vst [vmem:[#allocation1 + $0x1] ss:$4 sm:$0xff] %v9441_v54 }
 0xcaa   : > { %4619 = vst [vmem:[#allocation1 + $0x2] ss:$4 sm:$0xff] %v9459_v55 }
 0xcab   : > { %v9621_v18 = vld.sshfl [vmem:[#allocation1 + $0x20] sm:$0xff pattern:$0x73625140]  ;;  %4621 = vst [vmem:[#allocation1 + $0x3] ss:$4 sm:$0xff] %v9446_v48 }
 0xcac   : > { %12120 = vst [vmem:[#allocation54_spill] sm:$0xff] %v9621_v18 }
 0xcad   : > { %4623 = vst [vmem:[#allocation1 + $0x20] ss:$4 sm:$0xff] %v9448_v59 }
 0xcae   : > { %4625 = vst [vmem:[#allocation1 + $0x21] ss:$4 sm:$0xff] %v9453_v34 }
 0xcaf   : > { %4627 = vst [vmem:[#allocation1 + $0x22] ss:$4 sm:$0xff] %v9463_v24 }
 0xcb0   : > { %4629 = vst [vmem:[#allocation1 + $0x23] ss:$4 sm:$0xff] %v9456_v2 }
 0xcb2   : > { %v9628_v1 = vld.sshfl [vmem:[#allocation1] sm:$0xff pattern:$0x73625140] }
 0xcb3   : > { %12121 = vst [vmem:[#allocation55_spill] sm:$0xff] %v9628_v1 }
 0xcb4   : > { %4636 = vst [vmem:[#allocation1] ss:$4 sm:$0xff] %v9393_v22 }
 0xcb5   : > { %4638 = vst [vmem:[#allocation1 + $0x1] ss:$4 sm:$0xff] %v9396_v44 }
 0xcb6   : > { %4640 = vst [vmem:[#allocation1 + $0x2] ss:$4 sm:$0xff] %v9399_v46 }
 0xcb7   : > { %v9633_v14 = vld.sshfl [vmem:[#allocation1 + $0x20] sm:$0xff pattern:$0x73625140]  ;;  %4642 = vst [vmem:[#allocation1 + $0x3] ss:$4 sm:$0xff] %v9402_v37 }
 0xcb8   : > { %12122 = vst [vmem:[#allocation56_spill] sm:$0xff] %v9633_v14 }
 0xcb9   : > { %4644 = vst [vmem:[#allocation1 + $0x20] ss:$4 sm:$0xff] %v9405_v58 }
 0xcba   : > { %4646 = vst [vmem:[#allocation1 + $0x21] ss:$4 sm:$0xff] %v9408_v5 }
 0xcbb   : > { %4648 = vst [vmem:[#allocation1 + $0x22] ss:$4 sm:$0xff] %v9411_v47 }
 0xcbc   : > { %4650 = vst [vmem:[#allocation1 + $0x23] ss:$4 sm:$0xff] %v9416_v13 }
 0xcbe   : > { %v9640_v18 = vld.sshfl [vmem:[#allocation1] sm:$0xff pattern:$0x73625140] }
 0xcbf   : > { %12123 = vst [vmem:[#allocation57_spill] sm:$0xff] %v9640_v18 }
 0xcc0   : > { %4710 = vst [vmem:[#allocation1] ss:$4 sm:$0xff] %v9419_v20 }
 0xcc1   : > { %4712 = vst [vmem:[#allocation1 + $0x1] ss:$4 sm:$0xff] %v9422_v52 }
 0xcc2   : > { %4714 = vst [vmem:[#allocation1 + $0x2] ss:$4 sm:$0xff] %v9427_v43 }
 0xcc3   : > { %v9645_v1 = vld.sshfl [vmem:[#allocation1 + $0x20] sm:$0xff pattern:$0x73625140]  ;;  %4716 = vst [vmem:[#allocation1 + $0x3] ss:$4 sm:$0xff] %v9432_v0 }
 0xcc4   : > { %12124 = vst [vmem:[#allocation58_spill] sm:$0xff] %v9645_v1  ;;  %v3443_v1 = vpop.xlane.xlu2 %3442 }
 0xcc5   : > { %4718 = vst [vmem:[#allocation1 + $0x20] ss:$4 sm:$0xff] %v9439_v4 }
 0xcc6   : > { %4720 = vst [vmem:[#allocation1 + $0x21] ss:$4 sm:$0xff] %v9451_v30 }
 0xcc7   : > { %4722 = vst [vmem:[#allocation1 + $0x22] ss:$4 sm:$0xff] %v9466_v3 }
 0xcc8   : > { %4724 = vst [vmem:[#allocation1 + $0x23] ss:$4 sm:$0xff] %v9472_v32 }
 0xcca   : > { %v9652_v14 = vld.sshfl [vmem:[#allocation1] sm:$0xff pattern:$0x73625140] }
 0xccb   : > { %12125 = vst [vmem:[#allocation59_spill] sm:$0xff] %v9652_v14  ;;  %v3447_v14 = vsub.f32 %v9425_v41, %v3443_v1  ;;  %v3448_v1 = vsub.f32 %v9437_v8, %v3446_v31 }
 0xccc   : > { %4762 = vst [vmem:[#allocation1] ss:$4 sm:$0xff] %v9435_v53 }
 0xccd   : > { %4764 = vst [vmem:[#allocation1 + $0x1] ss:$4 sm:$0xff] %v9441_v54  ;;  %v3449_v38 = vmul.f32 1.442695, %v3447_v14  ;;  %v3451_v14 = vmul.f32 1.442695, %v3448_v1 }
 0xcce   : > { %4766 = vst [vmem:[#allocation1 + $0x2] ss:$4 sm:$0xff] %v9459_v55 }
 0xccf   : > { %v9657_v18 = vld.sshfl [vmem:[#allocation1 + $0x20] sm:$0xff pattern:$0x73625140]  ;;  %4768 = vst [vmem:[#allocation1 + $0x3] ss:$4 sm:$0xff] %v9446_v48  ;;  %7844 = vpow2.f32 %v3449_v38 }
 0xcd0   : > { %12126 = vst [vmem:[#allocation60_spill] sm:$0xff] %v9657_v18  ;;  %7846 = vpow2.f32 %v3451_v14 }
 0xcd1   : > { %4770 = vst [vmem:[#allocation1 + $0x20] ss:$4 sm:$0xff] %v9448_v59 }
 0xcd2   : > { %4772 = vst [vmem:[#allocation1 + $0x21] ss:$4 sm:$0xff] %v9453_v34 }
 0xcd3   : > { %4774 = vst [vmem:[#allocation1 + $0x22] ss:$4 sm:$0xff] %v9463_v24 }
 0xcd4   : > { %4776 = vst [vmem:[#allocation1 + $0x23] ss:$4 sm:$0xff] %v9456_v2 }
 0xcd5   : > { %v9678_v41 = vpop.eup %7844 }
 0xcd6   : > { %v9665_v42 = vld.sshfl [vmem:[#allocation1] sm:$0xff pattern:$0x73625140]  ;;  %v3453_v38 = vsel %vm682_vm0, %v9678_v41, 0.0  ;;  %v9691_v8 = vpop.eup %7846 }
 0xcd7   : > { %12127 = vst [vmem:[#allocation61_spill] sm:$0xff] %v9665_v42  ;;  %3454 = vadd.xlane.f32.xlu1 %v3453_v38  ;;  %v3456_v31 = vsel %vm682_vm0, %v9691_v8, 0.0 }
 0xcd8   : > { %4783 = vst [vmem:[#allocation1] ss:$4 sm:$0xff] %v9393_v22  ;;  %3457 = vadd.xlane.f32.xlu2 %v3456_v31 }
 0xcd9   : > { %4785 = vst [vmem:[#allocation1 + $0x1] ss:$4 sm:$0xff] %v9396_v44 }
 0xcda   : > { %4787 = vst [vmem:[#allocation1 + $0x2] ss:$4 sm:$0xff] %v9399_v46 }
 0xcdb   : > { %v9670_v18 = vld.sshfl [vmem:[#allocation1 + $0x20] sm:$0xff pattern:$0x73625140]  ;;  %4789 = vst [vmem:[#allocation1 + $0x3] ss:$4 sm:$0xff] %v9402_v37 }
 0xcdc   : > { %12128 = vst [vmem:[#allocation62_spill] sm:$0xff] %v9670_v18 }
 0xcdd   : > { %4791 = vst [vmem:[#allocation1 + $0x20] ss:$4 sm:$0xff] %v9405_v58 }
 0xcde   : > { %4793 = vst [vmem:[#allocation1 + $0x21] ss:$4 sm:$0xff] %v9408_v5 }
 0xcdf   : > { %4795 = vst [vmem:[#allocation1 + $0x22] ss:$4 sm:$0xff] %v9411_v47 }
 0xce0   : > { %4797 = vst [vmem:[#allocation1 + $0x23] ss:$4 sm:$0xff] %v9416_v13 }
 0xce2   : > { %v9682_v42 = vld.sshfl [vmem:[#allocation1] sm:$0xff pattern:$0x73625140] }
 0xce3   : > { %12129 = vst [vmem:[#allocation63_spill] sm:$0xff] %v9682_v42 }
 0xce4   : > { %4857 = vst [vmem:[#allocation1] ss:$4 sm:$0xff] %v9419_v20 }
 0xce5   : > { %4859 = vst [vmem:[#allocation1 + $0x1] ss:$4 sm:$0xff] %v9422_v52 }
 0xce6   : > { %4861 = vst [vmem:[#allocation1 + $0x2] ss:$4 sm:$0xff] %v9427_v43 }
 0xce7   : > { %v9687_v18 = vld.sshfl [vmem:[#allocation1 + $0x20] sm:$0xff pattern:$0x73625140]  ;;  %4863 = vst [vmem:[#allocation1 + $0x3] ss:$4 sm:$0xff] %v9432_v0 }
 0xce8   : > { %12130 = vst [vmem:[#allocation64_spill] sm:$0xff] %v9687_v18 }
 0xce9   : > { %4865 = vst [vmem:[#allocation1 + $0x20] ss:$4 sm:$0xff] %v9439_v4 }
 0xcea   : > { %4867 = vst [vmem:[#allocation1 + $0x21] ss:$4 sm:$0xff] %v9451_v30 }
 0xceb   : > { %4869 = vst [vmem:[#allocation1 + $0x22] ss:$4 sm:$0xff] %v9466_v3 }
 0xcec   : > { %4871 = vst [vmem:[#allocation1 + $0x23] ss:$4 sm:$0xff] %v9472_v32 }
 0xcee   : > { %v9698_v1 = vld.sshfl [vmem:[#allocation1] sm:$0xff pattern:$0x73625140] }
 0xcef   : > { %12131 = vst [vmem:[#allocation65_spill] sm:$0xff] %v9698_v1 }
 0xcf0   : > { %4909 = vst [vmem:[#allocation1] ss:$4 sm:$0xff] %v9435_v53  ;;  %3517 = vrot.lane.b32.xlu1 %v9469_v9, %s8098_s30  ;;  %3519 = vrot.lane.b32.xlu2 %v9477_v51, %s8098_s30  ;;  %v3071_v9 = vpop.f32.mrf.mxu3 }
 0xcf1   : > { %4911 = vst [vmem:[#allocation1 + $0x1] ss:$4 sm:$0xff] %v9441_v54 }
 0xcf2   : > { %4913 = vst [vmem:[#allocation1 + $0x2] ss:$4 sm:$0xff] %v9459_v55 }
 0xcf3   : > { %v9703_v14 = vld.sshfl [vmem:[#allocation1 + $0x20] sm:$0xff pattern:$0x73625140]  ;;  %4915 = vst [vmem:[#allocation1 + $0x3] ss:$4 sm:$0xff] %v9446_v48 }
 0xcf4   : > { %12132 = vst [vmem:[#allocation66_spill] sm:$0xff] %v9703_v14 }
 0xcf5   : > { %4917 = vst [vmem:[#allocation1 + $0x20] ss:$4 sm:$0xff] %v9448_v59 }
 0xcf6   : > { %4919 = vst [vmem:[#allocation1 + $0x21] ss:$4 sm:$0xff] %v9453_v34 }
 0xcf7   : > { %4921 = vst [vmem:[#allocation1 + $0x22] ss:$4 sm:$0xff] %v9463_v24 }
 0xcf8   : > { %4923 = vst [vmem:[#allocation1 + $0x23] ss:$4 sm:$0xff] %v9456_v2  ;;  %3533 = vrot.lane.b32.xlu1 %v9490_v25, %s8096_s19  ;;  %3535 = vrot.lane.b32.xlu2 %v9501_v60, %s8096_s19  ;;  %v3362_v25 = vpop.f32.mrf.mxu3 }
 0xcfa   : > { %v9710_v38 = vld.sshfl [vmem:[#allocation1] sm:$0xff pattern:$0x73625140] }
 0xcfb   : > { %12133 = vst [vmem:[#allocation67_spill] sm:$0xff] %v9710_v38 }
 0xcfc   : > { %4930 = vst [vmem:[#allocation1] ss:$4 sm:$0xff] %v9393_v22 }
 0xcfd   : > { %4932 = vst [vmem:[#allocation1 + $0x1] ss:$4 sm:$0xff] %v9396_v44 }
 0xcfe   : > { %4934 = vst [vmem:[#allocation1 + $0x2] ss:$4 sm:$0xff] %v9399_v46 }
 0xcff   : > { %v9717_v31 = vld.sshfl [vmem:[#allocation1 + $0x20] sm:$0xff pattern:$0x73625140]  ;;  %4936 = vst [vmem:[#allocation1 + $0x3] ss:$4 sm:$0xff] %v9402_v37 }
 0xd00   : > { %12134 = vst [vmem:[#allocation68_spill] sm:$0xff] %v9717_v31  ;;  %3543 = vrot.lane.b32.xlu1 %v3071_v9, %s8095_s7  ;;  %3549 = vrot.lane.b32.xlu2 %v9511_v21, %s8094_s26  ;;  %v9859_v21 = vpop.f32.mrf.mxu1 }
 0xd01   : > { %4938 = vst [vmem:[#allocation1 + $0x20] ss:$4 sm:$0xff] %v9405_v58 }
 0xd02   : > { %4940 = vst [vmem:[#allocation1 + $0x21] ss:$4 sm:$0xff] %v9408_v5 }
 0xd03   : > { %4942 = vst [vmem:[#allocation1 + $0x22] ss:$4 sm:$0xff] %v9411_v47 }
 0xd04   : > { %4944 = vst [vmem:[#allocation1 + $0x23] ss:$4 sm:$0xff] %v9416_v13 }
 0xd06   : > { %v9726_v14 = vld.sshfl [vmem:[#allocation1] sm:$0xff pattern:$0x73625140] }
 0xd07   : > { %12135 = vst [vmem:[#allocation69_spill] sm:$0xff] %v9726_v14  ;;  %v8099_v14 = vmov 0.0  }
 0xd08   : > { %5004 = vst [vmem:[#allocation1] ss:$4 sm:$0xff] %v9419_v20  ;;  %3557 = vrot.lane.b32.xlu1 %v3362_v25, %s8093_s23 }
 0xd09   : > { %5006 = vst [vmem:[#allocation1 + $0x1] ss:$4 sm:$0xff] %v9422_v52 }
 0xd0a   : > { %5008 = vst [vmem:[#allocation1 + $0x2] ss:$4 sm:$0xff] %v9427_v43 }
 0xd0b   : > { %v9733_v1 = vld.sshfl [vmem:[#allocation1 + $0x20] sm:$0xff pattern:$0x73625140]  ;;  %5010 = vst [vmem:[#allocation1 + $0x3] ss:$4 sm:$0xff] %v9432_v0 }
 0xd0c   : > { %12136 = vst [vmem:[#allocation70_spill] sm:$0xff] %v9733_v1 }
 0xd0d   : > { %5012 = vst [vmem:[#allocation1 + $0x20] ss:$4 sm:$0xff] %v9439_v4 }
 0xd0e   : > { %5014 = vst [vmem:[#allocation1 + $0x21] ss:$4 sm:$0xff] %v9451_v30 }
 0xd0f   : > { %5016 = vst [vmem:[#allocation1 + $0x22] ss:$4 sm:$0xff] %v9466_v3 }
 0xd10   : > { %5018 = vst [vmem:[#allocation1 + $0x23] ss:$4 sm:$0xff] %v9472_v32 }
 0xd12   : > { %v9743_v51 = vld.sshfl [vmem:[#allocation1] sm:$0xff pattern:$0x73625140] }
 0xd13   : > { %12137 = vst [vmem:[#allocation71_spill] sm:$0xff] %v9743_v51 }
 0xd14   : > { %5056 = vst [vmem:[#allocation1] ss:$4 sm:$0xff] %v9435_v53 }
 0xd15   : > { %5058 = vst [vmem:[#allocation1 + $0x1] ss:$4 sm:$0xff] %v9441_v54  ;;  %v3365_v54 = vpop.f32.mrf.mxu3 }
 0xd16   : > { %5060 = vst [vmem:[#allocation1 + $0x2] ss:$4 sm:$0xff] %v9459_v55  ;;  %3559 = vrot.lane.b32.xlu2 %v3365_v54, %s8093_s23 }
 0xd17   : > { %v9748_v31 = vld.sshfl [vmem:[#allocation1 + $0x20] sm:$0xff pattern:$0x73625140]  ;;  %5062 = vst [vmem:[#allocation1 + $0x3] ss:$4 sm:$0xff] %v9446_v48 }
 0xd18   : > { %12138 = vst [vmem:[#allocation72_spill] sm:$0xff] %v9748_v31 }
 0xd19   : > { %5064 = vst [vmem:[#allocation1 + $0x20] ss:$4 sm:$0xff] %v9448_v59 }
 0xd1a   : > { %5066 = vst [vmem:[#allocation1 + $0x21] ss:$4 sm:$0xff] %v9453_v34 }
 0xd1b   : > { %5068 = vst [vmem:[#allocation1 + $0x22] ss:$4 sm:$0xff] %v9463_v24 }
 0xd1c   : > { %5070 = vst [vmem:[#allocation1 + $0x23] ss:$4 sm:$0xff] %v9456_v2 }
 0xd1e   : > { %v9758_v53 = vld.sshfl [vmem:[#allocation1] sm:$0xff pattern:$0x73625140] }
 0xd1f   : > { %12139 = vst [vmem:[#allocation73_spill] sm:$0xff] %v9758_v53 }
 0xd20   : > { %5077 = vst [vmem:[#allocation1] ss:$4 sm:$0xff] %v9393_v22 }
 0xd21   : > { %5079 = vst [vmem:[#allocation1 + $0x1] ss:$4 sm:$0xff] %v9396_v44 }
 0xd22   : > { %5081 = vst [vmem:[#allocation1 + $0x2] ss:$4 sm:$0xff] %v9399_v46 }
 0xd23   : > { %v9764_v55 = vld.sshfl [vmem:[#allocation1 + $0x20] sm:$0xff pattern:$0x73625140]  ;;  %5083 = vst [vmem:[#allocation1 + $0x3] ss:$4 sm:$0xff] %v9402_v37 }
 0xd24   : > { %12140 = vst [vmem:[#allocation74_spill] sm:$0xff] %v9764_v55  ;;  %v12189_v55 = vld [vmem:[#allocation19_spill] sm:$0xff] }
 0xd25   : > { %5085 = vst [vmem:[#allocation1 + $0x20] ss:$4 sm:$0xff] %v9405_v58 }
 0xd26   : > { %5087 = vst [vmem:[#allocation1 + $0x21] ss:$4 sm:$0xff] %v9408_v5 }
 0xd27   : > { %5089 = vst [vmem:[#allocation1 + $0x22] ss:$4 sm:$0xff] %v9411_v47 }
 0xd28   : > { %5091 = vst [vmem:[#allocation1 + $0x23] ss:$4 sm:$0xff] %v9416_v13 }
 0xd2a   : > { %v9771_v34 = vld.sshfl [vmem:[#allocation1] sm:$0xff pattern:$0x73625140] }
 0xd2b   : > { %12141 = vst [vmem:[#allocation75_spill] sm:$0xff] %v9771_v34 }
 0xd2c   : > { %5151 = vst [vmem:[#allocation1] ss:$4 sm:$0xff] %v9419_v20 }
 0xd2d   : > { %5153 = vst [vmem:[#allocation1 + $0x1] ss:$4 sm:$0xff] %v9422_v52 }
 0xd2e   : > { %5155 = vst [vmem:[#allocation1 + $0x2] ss:$4 sm:$0xff] %v9427_v43 }
 0xd2f   : > { %v9776_v48 = vld.sshfl [vmem:[#allocation1 + $0x20] sm:$0xff pattern:$0x73625140]  ;;  %5157 = vst [vmem:[#allocation1 + $0x3] ss:$4 sm:$0xff] %v9432_v0 }
 0xd30   : > { %12142 = vst [vmem:[#allocation76_spill] sm:$0xff] %v9776_v48 }
 0xd31   : > { %5159 = vst [vmem:[#allocation1 + $0x20] ss:$4 sm:$0xff] %v9439_v4 }
 0xd32   : > { %5161 = vst [vmem:[#allocation1 + $0x21] ss:$4 sm:$0xff] %v9451_v30 }
 0xd33   : > { %5163 = vst [vmem:[#allocation1 + $0x22] ss:$4 sm:$0xff] %v9466_v3 }
 0xd34   : > { %5165 = vst [vmem:[#allocation1 + $0x23] ss:$4 sm:$0xff] %v9472_v32 }
 0xd36   : > { %v9783_v22 = vld.sshfl [vmem:[#allocation1] sm:$0xff pattern:$0x73625140] }
 0xd37   : > { %12143 = vst [vmem:[#allocation77_spill] sm:$0xff] %v9783_v22 }
 0xd38   : > { %5649 = vst.sshfl [vmem:[#allocation1] sm:$0xff pattern:$0x73625140] %v12080_v10 }
 0xd3b   : > { %v9786_v44 = vld.sshfl [vmem:[#allocation1 + $0x20] sm:$0xff pattern:$0x73625140] }
 0xd3c   : > { %12144 = vst [vmem:[#allocation78_spill] sm:$0xff] %v9786_v44 }
 0xd3d   : > { %5652 = vst.sshfl [vmem:[#allocation1 + $0x20] sm:$0xff pattern:$0x73625140] %v12081_v7 }
 0xd3f   : > { %v9789_v46 = vld [vmem:[#allocation1 + $0x3] ss:$4 sm:$0xff] }
 0xd40   : > { %5655 = vst.sshfl [vmem:[#allocation1] sm:$0xff pattern:$0x73625140] %v12082_v15  ;;  %v9870_v25 = vmul.f32 0.25, %v9789_v46 }
 0xd44   : > { %v9792_v37 = vld [vmem:[#allocation1 + $0x23] ss:$4 sm:$0xff] }
 0xd45   : > { %5657 = vst.sshfl [vmem:[#allocation1 + $0x20] sm:$0xff pattern:$0x73625140] %v12083_v17  ;;  %v9873_v54 = vmul.f32 0.25, %v9792_v37 }
 0xd47   : > { %v9795_v58 = vld [vmem:[#allocation1 + $0x3] ss:$4 sm:$0xff] }
 0xd48   : > { %5659 = vst.sshfl [vmem:[#allocation1] sm:$0xff pattern:$0x73625140] %v12084_v28  ;;  %v7614_v28 = vpop.permute.xlu0 %7613 }
 0xd49   : > { %v7615_v20 = vunpack.i.l.bf16 %v7614_v28 }
 0xd4a   : > { %v3455_v17 = vpop.xlane.xlu1 %3454 }
 0xd4b   : > { %7848 = vrcp.f32 %v3455_v17 }
 0xd4c   : > { %v9798_v5 = vld [vmem:[#allocation1 + $0x23] ss:$4 sm:$0xff] }
 0xd4d   : > { %5661 = vst.sshfl [vmem:[#allocation1 + $0x20] sm:$0xff pattern:$0x73625140] %v12085_v62  ;;  %v7616_v62 = vunpack.i.h.bf16 %v7614_v28 }
 0xd4f   : > { %v5660_v10 = vld [vmem:[#allocation1 + $0x3] ss:$4 sm:$0xff]  ;;  %3506 = vmatpush.msrb.mxu2 %v7616_v62 }
 0xd50   : > { %5663 = vst.sshfl [vmem:[#allocation1] sm:$0xff pattern:$0x73625140] %v12086_v39  ;;  %v9848_v24 = vmul.f32 0.25, %v5660_v10  ;;  %v9876_v10 = vmul.f32 0.25, %v9795_v58 }
 0xd51   : > { %v7849_v52 = vpop.eup %7848  ;;  %3507 = vmatpush.msrb.mxu2 %v7615_v20 }
 0xd54   : > { %v5662_v7 = vld [vmem:[#allocation1 + $0x23] ss:$4 sm:$0xff] }
 0xd55   : > { %5665 = vst.sshfl [vmem:[#allocation1 + $0x20] sm:$0xff pattern:$0x73625140] %v12087_v40  ;;  %v3461_v40 = vmul.f32 %v7849_v52, %v9678_v41  ;;  %v9850_v3 = vmul.f32 0.25, %v5662_v7  ;;  %v4104_v41 = vsel %vm682_vm0, %v9859_v21, -inf }
 0xd56   : > { %4105 = vmax.xlane.f32.xlu2 %v4104_v41 }
 0xd57   : > { %v5664_v47 = vld [vmem:[#allocation1 + $0x3] ss:$4 sm:$0xff]  ;;  %7348 = vmatmul.msk.f32.vlgmr.msrb.gmra.mxu2 %vm682_vm0, %v3461_v40 }
 0xd58   : > { %5683 = vst.sshfl [vmem:[#allocation1] sm:$0xff pattern:$0x73625140] %v12088_v33  ;;  %v3458_v33 = vpop.xlane.xlu2 %3457  ;;  %v9852_v32 = vmul.f32 0.25, %v5664_v47  ;;  %v9885_v47 = vmul.f32 0.25, %v9798_v5 }
 0xd59   : > { %7850 = vrcp.f32 %v3458_v33 }
 0xd5c   : > { %v5666_v15 = vld [vmem:[#allocation1 + $0x23] ss:$4 sm:$0xff] }
 0xd5d   : > { %5686 = vst.sshfl [vmem:[#allocation1 + $0x20] sm:$0xff pattern:$0x73625140] %v12089_v11 }
 0xd5f   : > { %v9805_v13 = vld [vmem:[#allocation1 + $0x3] ss:$4 sm:$0xff]  ;;  %v7851_v43 = vpop.eup %7850 }
 0xd60   : > { %5689 = vst.sshfl [vmem:[#allocation1] sm:$0xff pattern:$0x73625140] %v12090_v35  ;;  %v3462_v0 = vmul.f32 %v7851_v43, %v9691_v8  ;;  %v9864_v8 = vmul.f32 0.25, %v5666_v15  ;;  %v9955_v43 = vpop.permute.xlu2 %3519 }
 0xd61   : > { %v3572_v18 = vsel %vm682_vm0, %v12189_v55, %v9955_v43  ;;  %v10212_v43 = vld [vmem:[#allocation5 + $0x5] ss:$0 sm:$0xff] }
 0xd62   : > { %7349 = vmatmul.msk.f32.gmra.mxu2 %vm682_vm0, %v3462_v0 }
 0xd64   : > { %v9808_v39 = vld [vmem:[#allocation1 + $0x23] ss:$4 sm:$0xff] }
 0xd65   : > { %5691 = vst.sshfl [vmem:[#allocation1 + $0x20] sm:$0xff pattern:$0x73625140] %v12091_v45 }
 0xd67   : > { %v9812_v11 = vld [vmem:[#allocation1 + $0x3] ss:$4 sm:$0xff] }
 0xd68   : > { %5693 = vst.sshfl [vmem:[#allocation1] sm:$0xff pattern:$0x73625140] %v12092_v27 }
 0xd6c   : > { %v9816_v35 = vld [vmem:[#allocation1 + $0x23] ss:$4 sm:$0xff] }
 0xd6d   : > { %12145 = vst [vmem:[#allocation79_spill] sm:$0xff] %v9816_v35 }
 0xd6e   : > { %5695 = vst.sshfl [vmem:[#allocation1 + $0x20] sm:$0xff pattern:$0x73625140] %v12093_v56 }
 0xd6f   : > { %v9820_v4 = vld [vmem:[#allocation1 + $0x3] ss:$4 sm:$0xff] }
 0xd70   : > { %5697 = vst.sshfl [vmem:[#allocation1] sm:$0xff pattern:$0x73625140] %v12094_v12 }
 0xd75   : > { %v9824_v45 = vld [vmem:[#allocation1 + $0x23] ss:$4 sm:$0xff] }
 0xd76   : > { %5699 = vst.sshfl [vmem:[#allocation1 + $0x20] sm:$0xff pattern:$0x73625140] %v12095_v50 }
 0xd77   : > { %v9827_v59 = vld [vmem:[#allocation1 + $0x3] ss:$4 sm:$0xff] }
 0xd78   : > { %5701 = vst.sshfl [vmem:[#allocation1] sm:$0xff pattern:$0x73625140] %v12096_v6 }
 0xd7d   : > { %v9830_v27 = vld [vmem:[#allocation1 + $0x23] ss:$4 sm:$0xff] }
 0xd7e   : > { %5704 = vst.sshfl [vmem:[#allocation1 + $0x20] sm:$0xff pattern:$0x73625140] %v12097_v63 }
 0xd7f   : > { %v9833_v56 = vld [vmem:[#allocation1 + $0x3] ss:$4 sm:$0xff] }
 0xd80   : > { %5707 = vst.sshfl [vmem:[#allocation1] sm:$0xff pattern:$0x73625140] %v12098_v36 }
 0xd85   : > { %v9836_v30 = vld [vmem:[#allocation1 + $0x23] ss:$4 sm:$0xff] }
 0xd86   : > { %5709 = vst.sshfl [vmem:[#allocation1 + $0x20] sm:$0xff pattern:$0x73625140] %v12099_v57 }
 0xd87   : > { %v9839_v12 = vld [vmem:[#allocation1 + $0x3] ss:$4 sm:$0xff] }
 0xd88   : > { %12146 = vst [vmem:[#allocation80_spill] sm:$0xff] %v9839_v12 }
 0xd89   : > { %5711 = vst.sshfl [vmem:[#allocation1] sm:$0xff pattern:$0x73625140] %v12100_v16 }
 0xd8d   : > { %v9842_v50 = vld [vmem:[#allocation1 + $0x23] ss:$4 sm:$0xff] }
 0xd8e   : > { %12147 = vst [vmem:[#allocation81_spill] sm:$0xff] %v9842_v50 }
 0xd8f   : > { %5713 = vst.sshfl [vmem:[#allocation1 + $0x20] sm:$0xff pattern:$0x73625140] %v12101_v26 }
 0xd90   : > { %v9845_v2 = vld [vmem:[#allocation1 + $0x3] ss:$4 sm:$0xff] }
 0xd91   : > { %5715 = vst.sshfl [vmem:[#allocation1] sm:$0xff pattern:$0x73625140] %v12102_v29 }
 0xd92   : > { %5727 = vst [vmem:[#allocation1] ss:$4 sm:$0xff] %v9870_v25 }
 0xd93   : > { %5729 = vst [vmem:[#allocation1 + $0x1] ss:$4 sm:$0xff] %v9873_v54 }
 0xd94   : > { %5731 = vst [vmem:[#allocation1 + $0x2] ss:$4 sm:$0xff] %v9876_v10 }
 0xd96   : > { %v9854_v60 = vld [vmem:[#allocation1 + $0x23] ss:$4 sm:$0xff] }
 0xd97   : > { %5717 = vst.sshfl [vmem:[#allocation1 + $0x20] sm:$0xff pattern:$0x73625140] %v12103_v23 }
 0xd98   : > { %5735 = vst [vmem:[#allocation1 + $0x20] ss:$4 sm:$0xff] %v9848_v24  ;;  %v9887_v46 = vld [vmem:[#allocation1 + $0x3] ss:$4 sm:$0xff] }
 0xd99   : > { %5737 = vst [vmem:[#allocation1 + $0x21] ss:$4 sm:$0xff] %v9850_v3 }
 0xd9a   : > { %5739 = vst [vmem:[#allocation1 + $0x22] ss:$4 sm:$0xff] %v9852_v32 }
 0xd9b   : > { %5733 = vst [vmem:[#allocation1 + $0x3] ss:$4 sm:$0xff] %v9885_v47 }
 0xd9e   : > { %v9866_v9 = vld [vmem:[#allocation1 + $0x23] ss:$4 sm:$0xff] }
 0xd9f   : > { %5741 = vst [vmem:[#allocation1 + $0x23] ss:$4 sm:$0xff] %v9864_v8 }
 0xda2   : > { %v9897_v58 = vld.sshfl [vmem:[#allocation1] sm:$0xff pattern:$0x73625140] }
 0xda3   : > { %12150 = vst [vmem:[#allocation84_spill] sm:$0xff] %v9897_v58  ;;  %v10006_v58 = vpop.f32.mrf.mxu1 }
 0xda4   : > { %5744 = vst [vmem:[#allocation1] ss:$4 sm:$0xff] %v9805_v13 }
 0xda5   : > { %5746 = vst [vmem:[#allocation1 + $0x1] ss:$4 sm:$0xff] %v9808_v39 }
 0xda6   : > { %v9880_v7 = vld.sshfl [vmem:[#allocation1 + $0x20] sm:$0xff pattern:$0x73625140]  ;;  %5748 = vst [vmem:[#allocation1 + $0x2] ss:$4 sm:$0xff] %v9812_v11 }
 0xda7   : > { %12148 = vst [vmem:[#allocation82_spill] sm:$0xff] %v9880_v7 }
 0xda8   : > { %5752 = vst [vmem:[#allocation1 + $0x20] ss:$4 sm:$0xff] %v9820_v4 }
 0xda9   : > { %5754 = vst [vmem:[#allocation1 + $0x21] ss:$4 sm:$0xff] %v9824_v45 }
 0xdaa   : > { %5756 = vst [vmem:[#allocation1 + $0x22] ss:$4 sm:$0xff] %v9827_v59 }
 0xdab   : > { %5758 = vst [vmem:[#allocation1 + $0x23] ss:$4 sm:$0xff] %v9830_v27 }
 0xdac   : > { %5750 = vst [vmem:[#allocation1 + $0x3] ss:$4 sm:$0xff] %v9816_v35 }
 0xdb2   : > { %v9893_v37 = vld.sshfl [vmem:[#allocation1 + $0x20] sm:$0xff pattern:$0x73625140] }
 0xdb3   : > { %12149 = vst [vmem:[#allocation83_spill] sm:$0xff] %v9893_v37  ;;  %v9911_v15 = vld.sshfl [vmem:[#allocation1] sm:$0xff pattern:$0x73625140]  ;;  %v4107_v37 = vsel %vm682_vm0, %v10006_v58, -inf }
 0xdb4   : > { %5822 = vst [vmem:[#allocation1 + $0x20] ss:$4 sm:$0xff] %v9845_v2 }
 0xdb5   : > { %5824 = vst [vmem:[#allocation1 + $0x21] ss:$4 sm:$0xff] %v9854_v60 }
 0xdb6   : > { %5826 = vst [vmem:[#allocation1 + $0x22] ss:$4 sm:$0xff] %v9887_v46 }
 0xdb7   : > { %5828 = vst [vmem:[#allocation1 + $0x23] ss:$4 sm:$0xff] %v9866_v9 }
 0xdb8   : > { %12152 = vst [vmem:[#allocation86_spill] sm:$0xff] %v9911_v15 }
 0xdb9   : > { %5814 = vst [vmem:[#allocation1] ss:$4 sm:$0xff] %v9833_v56 }
 0xdba   : > { %5816 = vst [vmem:[#allocation1 + $0x1] ss:$4 sm:$0xff] %v9836_v30 }
 0xdbb   : > { %5818 = vst [vmem:[#allocation1 + $0x2] ss:$4 sm:$0xff] %v9839_v12 }
 0xdbc   : > { %5820 = vst [vmem:[#allocation1 + $0x3] ss:$4 sm:$0xff] %v9842_v50 }
 0xdbe   : > { %v9905_v5 = vld.sshfl [vmem:[#allocation1 + $0x20] sm:$0xff pattern:$0x73625140] }
 0xdbf   : > { %12151 = vst [vmem:[#allocation85_spill] sm:$0xff] %v9905_v5 }
 0xdc0   : > { %5870 = vst [vmem:[#allocation1 + $0x20] ss:$4 sm:$0xff] %v9848_v24 }
 0xdc1   : > { %5872 = vst [vmem:[#allocation1 + $0x21] ss:$4 sm:$0xff] %v9850_v3 }
 0xdc2   : > { %5874 = vst [vmem:[#allocation1 + $0x22] ss:$4 sm:$0xff] %v9852_v32 }
 0xdc3   : > { %5876 = vst [vmem:[#allocation1 + $0x23] ss:$4 sm:$0xff] %v9864_v8  ;;  %v9923_v28 = vld.sshfl [vmem:[#allocation1] sm:$0xff pattern:$0x73625140] }
 0xdc4   : > { %12154 = vst [vmem:[#allocation88_spill] sm:$0xff] %v9923_v28 }
 0xdc5   : > { %5862 = vst [vmem:[#allocation1] ss:$4 sm:$0xff] %v9870_v25 }
 0xdc6   : > { %5864 = vst [vmem:[#allocation1 + $0x1] ss:$4 sm:$0xff] %v9873_v54 }
 0xdc7   : > { %5866 = vst [vmem:[#allocation1 + $0x2] ss:$4 sm:$0xff] %v9876_v10 }
 0xdc8   : > { %5868 = vst [vmem:[#allocation1 + $0x3] ss:$4 sm:$0xff] %v9885_v47 }
 0xdca   : > { %v9917_v17 = vld.sshfl [vmem:[#allocation1 + $0x20] sm:$0xff pattern:$0x73625140] }
 0xdcb   : > { %12153 = vst [vmem:[#allocation87_spill] sm:$0xff] %v9917_v17 }
 0xdcc   : > { %5891 = vst [vmem:[#allocation1 + $0x20] ss:$4 sm:$0xff] %v9820_v4 }
 0xdcd   : > { %5893 = vst [vmem:[#allocation1 + $0x21] ss:$4 sm:$0xff] %v9824_v45 }
 0xdce   : > { %5895 = vst [vmem:[#allocation1 + $0x22] ss:$4 sm:$0xff] %v9827_v59 }
 0xdcf   : > { %5897 = vst [vmem:[#allocation1 + $0x23] ss:$4 sm:$0xff] %v9830_v27  ;;  %v9935_v20 = vld.sshfl [vmem:[#allocation1] sm:$0xff pattern:$0x73625140] }
 0xdd0   : > { %12156 = vst [vmem:[#allocation90_spill] sm:$0xff] %v9935_v20 }
 0xdd1   : > { %5883 = vst [vmem:[#allocation1] ss:$4 sm:$0xff] %v9805_v13 }
 0xdd2   : > { %5885 = vst [vmem:[#allocation1 + $0x1] ss:$4 sm:$0xff] %v9808_v39 }
 0xdd3   : > { %5887 = vst [vmem:[#allocation1 + $0x2] ss:$4 sm:$0xff] %v9812_v11 }
 0xdd4   : > { %5889 = vst [vmem:[#allocation1 + $0x3] ss:$4 sm:$0xff] %v9816_v35 }
 0xdd6   : > { %v9929_v62 = vld.sshfl [vmem:[#allocation1 + $0x20] sm:$0xff pattern:$0x73625140] }
 0xdd7   : > { %12155 = vst [vmem:[#allocation89_spill] sm:$0xff] %v9929_v62  ;;  %v10150_v62 = vld [vmem:[#allocation5] ss:$0 sm:$0xff] }
 0xdd8   : > { %5965 = vst [vmem:[#allocation1 + $0x20] ss:$4 sm:$0xff] %v9845_v2 }
 0xdd9   : > { %5967 = vst [vmem:[#allocation1 + $0x21] ss:$4 sm:$0xff] %v9854_v60 }
 0xdda   : > { %5969 = vst [vmem:[#allocation1 + $0x22] ss:$4 sm:$0xff] %v9887_v46  ;;  %v3509_v41 = vpop.f32.mrf.mxu2 }
 0xddb   : > { %5971 = vst [vmem:[#allocation1 + $0x23] ss:$4 sm:$0xff] %v9866_v9  ;;  %v9947_v40 = vld.sshfl [vmem:[#allocation1] sm:$0xff pattern:$0x73625140]  ;;  %3565 = vrot.lane.b32.xlu0 %v3509_v41, %s8092_s22 }
 0xddc   : > { %12158 = vst [vmem:[#allocation92_spill] sm:$0xff] %v9947_v40 }
 0xddd   : > { %5957 = vst [vmem:[#allocation1] ss:$4 sm:$0xff] %v9833_v56 }
 0xdde   : > { %5959 = vst [vmem:[#allocation1 + $0x1] ss:$4 sm:$0xff] %v9836_v30 }
 0xddf   : > { %5961 = vst [vmem:[#allocation1 + $0x2] ss:$4 sm:$0xff] %v9839_v12 }
 0xde0   : > { %5963 = vst [vmem:[#allocation1 + $0x3] ss:$4 sm:$0xff] %v9842_v50 }
 0xde2   : > { %v9941_v52 = vld.sshfl [vmem:[#allocation1 + $0x20] sm:$0xff pattern:$0x73625140] }
 0xde3   : > { %12157 = vst [vmem:[#allocation91_spill] sm:$0xff] %v9941_v52  ;;  %v9968_v52 = vpop.permute.xlu2 %3535 }
 0xde4   : > { %6017 = vst [vmem:[#allocation1 + $0x20] ss:$4 sm:$0xff] %v9848_v24 }
 0xde5   : > { %6019 = vst [vmem:[#allocation1 + $0x21] ss:$4 sm:$0xff] %v9850_v3 }
 0xde6   : > { %6021 = vst [vmem:[#allocation1 + $0x22] ss:$4 sm:$0xff] %v9852_v32 }
 0xde7   : > { %6023 = vst [vmem:[#allocation1 + $0x23] ss:$4 sm:$0xff] %v9864_v8  ;;  %v9961_v0 = vld.sshfl [vmem:[#allocation1] sm:$0xff pattern:$0x73625140] }
 0xde8   : > { %12160 = vst [vmem:[#allocation94_spill] sm:$0xff] %v9961_v0  ;;  %v3512_v0 = vpop.f32.mrf.mxu2 }
 0xde9   : > { %6009 = vst [vmem:[#allocation1] ss:$4 sm:$0xff] %v9870_v25  ;;  %3567 = vrot.lane.b32.xlu1 %v3512_v0, %s8092_s22 }
 0xdea   : > { %6011 = vst [vmem:[#allocation1 + $0x1] ss:$4 sm:$0xff] %v9873_v54 }
 0xdeb   : > { %6013 = vst [vmem:[#allocation1 + $0x2] ss:$4 sm:$0xff] %v9876_v10  ;;  %v9983_v22 = vpop.permute.xlu2 %3549 }
 0xdec   : > { %6015 = vst [vmem:[#allocation1 + $0x3] ss:$4 sm:$0xff] %v9885_v47 }
 0xdee   : > { %v9953_v33 = vld.sshfl [vmem:[#allocation1 + $0x20] sm:$0xff pattern:$0x73625140] }
 0xdef   : > { %12159 = vst [vmem:[#allocation93_spill] sm:$0xff] %v9953_v33 }
 0xdf0   : > { %6038 = vst [vmem:[#allocation1 + $0x20] ss:$4 sm:$0xff] %v9820_v4 }
 0xdf1   : > { %6040 = vst [vmem:[#allocation1 + $0x21] ss:$4 sm:$0xff] %v9824_v45 }
 0xdf2   : > { %6042 = vst [vmem:[#allocation1 + $0x22] ss:$4 sm:$0xff] %v9827_v59 }
 0xdf3   : > { %6044 = vst [vmem:[#allocation1 + $0x23] ss:$4 sm:$0xff] %v9830_v27  ;;  %v9977_v41 = vld.sshfl [vmem:[#allocation1] sm:$0xff pattern:$0x73625140]  ;;  %v9996_v5 = vpop.permute.xlu2 %3559 }
 0xdf4   : > { %12162 = vst [vmem:[#allocation96_spill] sm:$0xff] %v9977_v41 }
 0xdf5   : > { %6030 = vst [vmem:[#allocation1] ss:$4 sm:$0xff] %v9805_v13 }
 0xdf6   : > { %6032 = vst [vmem:[#allocation1 + $0x1] ss:$4 sm:$0xff] %v9808_v39 }
 0xdf7   : > { %6034 = vst [vmem:[#allocation1 + $0x2] ss:$4 sm:$0xff] %v9812_v11 }
 0xdf8   : > { %6036 = vst [vmem:[#allocation1 + $0x3] ss:$4 sm:$0xff] %v9816_v35 }
 0xdf9   : > { %12165 = vst [vmem:[#allocation99_spill] sm:$0xff] %v9996_v5 }
 0xdfa   : > { %v9970_v44 = vld.sshfl [vmem:[#allocation1 + $0x20] sm:$0xff pattern:$0x73625140] }
 0xdfb   : > { %12161 = vst [vmem:[#allocation95_spill] sm:$0xff] %v9970_v44  ;;  %v4106_v31 = vpop.xlane.xlu2 %4105 }
 0xdfc   : > { %6112 = vst [vmem:[#allocation1 + $0x20] ss:$4 sm:$0xff] %v9845_v2  ;;  %v4110_v51 = vsub.f32 %v9859_v21, %v4106_v31 }
 0xdfd   : > { %6114 = vst [vmem:[#allocation1 + $0x21] ss:$4 sm:$0xff] %v9854_v60 }
 0xdfe   : > { %6116 = vst [vmem:[#allocation1 + $0x22] ss:$4 sm:$0xff] %v9887_v46  ;;  %v4112_v7 = vmul.f32 1.442695, %v4110_v51 }
 0xdff   : > { %6118 = vst [vmem:[#allocation1 + $0x23] ss:$4 sm:$0xff] %v9866_v9  ;;  %v9991_v0 = vld.sshfl [vmem:[#allocation1] sm:$0xff pattern:$0x73625140] }
 0xe00   : > { %12164 = vst [vmem:[#allocation98_spill] sm:$0xff] %v9991_v0  ;;  %7852 = vpow2.f32 %v4112_v7 }
 0xe01   : > { %6104 = vst [vmem:[#allocation1] ss:$4 sm:$0xff] %v9833_v56 }
 0xe02   : > { %6106 = vst [vmem:[#allocation1 + $0x1] ss:$4 sm:$0xff] %v9836_v30 }
 0xe03   : > { %6108 = vst [vmem:[#allocation1 + $0x2] ss:$4 sm:$0xff] %v9839_v12 }
 0xe04   : > { %6110 = vst [vmem:[#allocation1 + $0x3] ss:$4 sm:$0xff] %v9842_v50 }
 0xe05   : > { %4108 = vmax.xlane.f32.xlu0 %v4107_v37 }
 0xe06   : > { %v9985_v28 = vld.sshfl [vmem:[#allocation1 + $0x20] sm:$0xff pattern:$0x73625140]  ;;  %v10021_v31 = vpop.eup %7852 }
 0xe07   : > { %12163 = vst [vmem:[#allocation97_spill] sm:$0xff] %v9985_v28  ;;  %v4116_v21 = vsel %vm682_vm0, %v10021_v31, 0.0 }
 0xe08   : > { %6164 = vst [vmem:[#allocation1 + $0x20] ss:$4 sm:$0xff] %v9848_v24 }
 0xe09   : > { %6166 = vst [vmem:[#allocation1 + $0x21] ss:$4 sm:$0xff] %v9850_v3 }
 0xe0a   : > { %6168 = vst [vmem:[#allocation1 + $0x22] ss:$4 sm:$0xff] %v9852_v32 }
 0xe0b   : > { %6170 = vst [vmem:[#allocation1 + $0x23] ss:$4 sm:$0xff] %v9864_v8  ;;  %v10014_v33 = vld.sshfl [vmem:[#allocation1] sm:$0xff pattern:$0x73625140] }
 0xe0c   : > { %12168 = vst [vmem:[#allocation102_spill] sm:$0xff] %v10014_v33 }
 0xe0d   : > { %6156 = vst [vmem:[#allocation1] ss:$4 sm:$0xff] %v9870_v25 }
 0xe0e   : > { %6158 = vst [vmem:[#allocation1 + $0x1] ss:$4 sm:$0xff] %v9873_v54 }
 0xe0f   : > { %6160 = vst [vmem:[#allocation1 + $0x2] ss:$4 sm:$0xff] %v9876_v10 }
 0xe10   : > { %6162 = vst [vmem:[#allocation1 + $0x3] ss:$4 sm:$0xff] %v9885_v47 }
 0xe12   : > { %v9999_v28 = vld.sshfl [vmem:[#allocation1 + $0x20] sm:$0xff pattern:$0x73625140] }
 0xe13   : > { %12166 = vst [vmem:[#allocation100_spill] sm:$0xff] %v9999_v28  ;;  %4117 = vadd.xlane.f32.xlu1 %v4116_v21  ;;  %v7295_v28 = vrot.slane %v12097_v63, 9  ;;  %v12188_v63 = vld [vmem:[#allocation18_spill] sm:$0xff] }
 0xe14   : > { %6185 = vst [vmem:[#allocation1 + $0x20] ss:$4 sm:$0xff] %v9820_v4 }
 0xe15   : > { %6187 = vst [vmem:[#allocation1 + $0x21] ss:$4 sm:$0xff] %v9824_v45 }
 0xe16   : > { %6189 = vst [vmem:[#allocation1 + $0x22] ss:$4 sm:$0xff] %v9827_v59 }
 0xe17   : > { %6191 = vst [vmem:[#allocation1 + $0x23] ss:$4 sm:$0xff] %v9830_v27  ;;  %v10032_v7 = vld.sshfl [vmem:[#allocation1] sm:$0xff pattern:$0x73625140] }
 0xe18   : > { %12170 = vst [vmem:[#allocation104_spill] sm:$0xff] %v10032_v7 }
 0xe19   : > { %6177 = vst [vmem:[#allocation1] ss:$4 sm:$0xff] %v9805_v13  ;;  %4191 = vrot.lane.b32.xlu0 %v9519_v49, %s8092_s22 }
 0xe1a   : > { %6179 = vst [vmem:[#allocation1 + $0x1] ss:$4 sm:$0xff] %v9808_v39 }
 0xe1b   : > { %6181 = vst [vmem:[#allocation1 + $0x2] ss:$4 sm:$0xff] %v9812_v11 }
 0xe1c   : > { %6183 = vst [vmem:[#allocation1 + $0x3] ss:$4 sm:$0xff] %v9816_v35 }
 0xe1e   : > { %v10008_v15 = vld.sshfl [vmem:[#allocation1 + $0x20] sm:$0xff pattern:$0x73625140] }
 0xe1f   : > { %12167 = vst [vmem:[#allocation101_spill] sm:$0xff] %v10008_v15  ;;  %v269_v15 = vrot.slane %v8099_v14, 7 }
 0xe20   : > { %6259 = vst [vmem:[#allocation1 + $0x20] ss:$4 sm:$0xff] %v9845_v2 }
 0xe21   : > { %6261 = vst [vmem:[#allocation1 + $0x21] ss:$4 sm:$0xff] %v9854_v60  ;;  %4214 = vrot.lane.b32.xlu0 %v9537_v61, %s8092_s22 }
 0xe22   : > { %6263 = vst [vmem:[#allocation1 + $0x22] ss:$4 sm:$0xff] %v9887_v46 }
 0xe23   : > { %6265 = vst [vmem:[#allocation1 + $0x23] ss:$4 sm:$0xff] %v9866_v9  ;;  %v10046_v21 = vld.sshfl [vmem:[#allocation1] sm:$0xff pattern:$0x73625140] }
 0xe24   : > { %12172 = vst [vmem:[#allocation106_spill] sm:$0xff] %v10046_v21  ;;  %v7294_v21 = vrot.slane %v12096_v6, 9 }
 0xe25   : > { %6251 = vst [vmem:[#allocation1] ss:$4 sm:$0xff] %v9833_v56 }
 0xe26   : > { %6253 = vst [vmem:[#allocation1 + $0x1] ss:$4 sm:$0xff] %v9836_v30 }
 0xe27   : > { %6255 = vst [vmem:[#allocation1 + $0x2] ss:$4 sm:$0xff] %v9839_v12 }
 0xe28   : > { %6257 = vst [vmem:[#allocation1 + $0x3] ss:$4 sm:$0xff] %v9842_v50 }
 0xe2a   : > { %v10024_v51 = vld.sshfl [vmem:[#allocation1 + $0x20] sm:$0xff pattern:$0x73625140] }
 0xe2b   : > { %12169 = vst [vmem:[#allocation103_spill] sm:$0xff] %v10024_v51 }
 0xe2c   : > { %6311 = vst [vmem:[#allocation1 + $0x20] ss:$4 sm:$0xff] %v9848_v24  ;;  %4193 = vrot.lane.b32.xlu1 %v9524_v19, %s8092_s22 }
 0xe2d   : > { %6313 = vst [vmem:[#allocation1 + $0x21] ss:$4 sm:$0xff] %v9850_v3 }
 0xe2e   : > { %6315 = vst [vmem:[#allocation1 + $0x22] ss:$4 sm:$0xff] %v9852_v32 }
 0xe2f   : > { %6317 = vst [vmem:[#allocation1 + $0x23] ss:$4 sm:$0xff] %v9864_v8  ;;  %v10056_v49 = vld.sshfl [vmem:[#allocation1] sm:$0xff pattern:$0x73625140] }
 0xe30   : > { %12173 = vst [vmem:[#allocation107_spill] sm:$0xff] %v10056_v49 }
 0xe31   : > { %6303 = vst [vmem:[#allocation1] ss:$4 sm:$0xff] %v9870_v25 }
 0xe32   : > { %6305 = vst [vmem:[#allocation1 + $0x1] ss:$4 sm:$0xff] %v9873_v54 }
 0xe33   : > { %6307 = vst [vmem:[#allocation1 + $0x2] ss:$4 sm:$0xff] %v9876_v10 }
 0xe34   : > { %6309 = vst [vmem:[#allocation1 + $0x3] ss:$4 sm:$0xff] %v9885_v47 }
 0xe36   : > { %v10038_v37 = vld.sshfl [vmem:[#allocation1 + $0x20] sm:$0xff pattern:$0x73625140] }
 0xe37   : > { %12171 = vst [vmem:[#allocation105_spill] sm:$0xff] %v10038_v37  ;;  %v10096_v37 = vpop.permute.xlu0 %3525 }
 0xe38   : > { %6332 = vst [vmem:[#allocation1 + $0x20] ss:$4 sm:$0xff] %v9820_v4 }
 0xe39   : > { %6334 = vst [vmem:[#allocation1 + $0x21] ss:$4 sm:$0xff] %v9824_v45 }
 0xe3a   : > { %6336 = vst [vmem:[#allocation1 + $0x22] ss:$4 sm:$0xff] %v9827_v59 }
 0xe3b   : > { %6338 = vst [vmem:[#allocation1 + $0x23] ss:$4 sm:$0xff] %v9830_v27  ;;  %v10068_v19 = vld.sshfl [vmem:[#allocation1] sm:$0xff pattern:$0x73625140] }
 0xe3c   : > { %12175 = vst [vmem:[#allocation109_spill] sm:$0xff] %v10068_v19 }
 0xe3d   : > { %6324 = vst [vmem:[#allocation1] ss:$4 sm:$0xff] %v9805_v13 }
 0xe3e   : > { %6326 = vst [vmem:[#allocation1 + $0x1] ss:$4 sm:$0xff] %v9808_v39 }
 0xe3f   : > { %6328 = vst [vmem:[#allocation1 + $0x2] ss:$4 sm:$0xff] %v9812_v11 }
 0xe40   : > { %6330 = vst [vmem:[#allocation1 + $0x3] ss:$4 sm:$0xff] %v9816_v35 }
 0xe42   : > { %v10060_v51 = vld.sshfl [vmem:[#allocation1 + $0x20] sm:$0xff pattern:$0x73625140] }
 0xe43   : > { %12174 = vst [vmem:[#allocation108_spill] sm:$0xff] %v10060_v51  ;;  %v10109_v51 = vpop.permute.xlu0 %3527 }
 0xe44   : > { %6406 = vst [vmem:[#allocation1 + $0x20] ss:$4 sm:$0xff] %v9845_v2 }
 0xe45   : > { %6408 = vst [vmem:[#allocation1 + $0x21] ss:$4 sm:$0xff] %v9854_v60 }
 0xe46   : > { %6410 = vst [vmem:[#allocation1 + $0x22] ss:$4 sm:$0xff] %v9887_v46 }
 0xe47   : > { %6412 = vst [vmem:[#allocation1 + $0x23] ss:$4 sm:$0xff] %v9866_v9  ;;  %v10080_v49 = vld.sshfl [vmem:[#allocation1] sm:$0xff pattern:$0x73625140] }
 0xe48   : > { %12177 = vst [vmem:[#allocation111_spill] sm:$0xff] %v10080_v49  ;;  %v7296_v49 = vrot.slane %v12098_v36, 9 }
 0xe49   : > { %6398 = vst [vmem:[#allocation1] ss:$4 sm:$0xff] %v9833_v56 }
 0xe4a   : > { %6400 = vst [vmem:[#allocation1 + $0x1] ss:$4 sm:$0xff] %v9836_v30  ;;  %v1937_v36 = vsel %vm287_vm1, 0.0, %v7296_v49 }
 0xe4b   : > { %6402 = vst [vmem:[#allocation1 + $0x2] ss:$4 sm:$0xff] %v9839_v12  ;;  %v10172_v42 = vsel %vm297_vm2, %v1937_v36, 0.0  ;;  %v10185_v36 = vld [vmem:[#allocation5 + $0x4] ss:$0 sm:$0xff] }
 0xe4c   : > { %6404 = vst [vmem:[#allocation1 + $0x3] ss:$4 sm:$0xff] %v9842_v50 }
 0xe4e   : > { %v10074_v61 = vld.sshfl [vmem:[#allocation1 + $0x20] sm:$0xff pattern:$0x73625140] }
 0xe4f   : > { %12176 = vst [vmem:[#allocation110_spill] sm:$0xff] %v10074_v61 }
 0xe50   : > { %6458 = vst [vmem:[#allocation1 + $0x20] ss:$4 sm:$0xff] %v9848_v24 }
 0xe51   : > { %6460 = vst [vmem:[#allocation1 + $0x21] ss:$4 sm:$0xff] %v9850_v3 }
 0xe52   : > { %6462 = vst [vmem:[#allocation1 + $0x22] ss:$4 sm:$0xff] %v9852_v32 }
 0xe53   : > { %6464 = vst [vmem:[#allocation1 + $0x23] ss:$4 sm:$0xff] %v9864_v8  ;;  %v10092_v61 = vld.sshfl [vmem:[#allocation1] sm:$0xff pattern:$0x73625140] }
 0xe54   : > { %12179 = vst [vmem:[#allocation113_spill] sm:$0xff] %v10092_v61  ;;  %v3518_v61 = vpop.permute.xlu1 %3517 }
 0xe55   : > { %6450 = vst [vmem:[#allocation1] ss:$4 sm:$0xff] %v9870_v25  ;;  %v3571_v1 = vsel %vm682_vm0, %v12188_v63, %v3518_v61  ;;  %v288_v63 = vsel %vm287_vm1, 0.0, %v269_v15  ;;  %v10183_v61 = vld [vmem:[#allocation5 + $0x3] ss:$0 sm:$0xff] }
 0xe56   : > { %6452 = vst [vmem:[#allocation1 + $0x1] ss:$4 sm:$0xff] %v9873_v54 }
 0xe57   : > { %6454 = vst [vmem:[#allocation1 + $0x2] ss:$4 sm:$0xff] %v9876_v10 }
 0xe58   : > { %6456 = vst [vmem:[#allocation1 + $0x3] ss:$4 sm:$0xff] %v9885_v47 }
 0xe5a   : > { %v10086_v33 = vld.sshfl [vmem:[#allocation1 + $0x20] sm:$0xff pattern:$0x73625140] }
 0xe5b   : > { %12178 = vst [vmem:[#allocation112_spill] sm:$0xff] %v10086_v33 }
 0xe5c   : > { %6479 = vst [vmem:[#allocation1 + $0x20] ss:$4 sm:$0xff] %v9820_v4  ;;  %v3534_v7 = vpop.permute.xlu1 %3533 }
 0xe5d   : > { %6481 = vst [vmem:[#allocation1 + $0x21] ss:$4 sm:$0xff] %v9824_v45 }
 0xe5e   : > { %6483 = vst [vmem:[#allocation1 + $0x22] ss:$4 sm:$0xff] %v9827_v59 }
 0xe5f   : > { %6485 = vst [vmem:[#allocation1 + $0x23] ss:$4 sm:$0xff] %v9830_v27  ;;  %v10106_v19 = vld.sshfl [vmem:[#allocation1] sm:$0xff pattern:$0x73625140] }
 0xe60   : > { %12181 = vst [vmem:[#allocation115_spill] sm:$0xff] %v10106_v19  ;;  %v10123_v19 = vpop.permute.xlu0 %3541 }
 0xe61   : > { %6471 = vst [vmem:[#allocation1] ss:$4 sm:$0xff] %v9805_v13 }
 0xe62   : > { %6473 = vst [vmem:[#allocation1 + $0x1] ss:$4 sm:$0xff] %v9808_v39 }
 0xe63   : > { %6475 = vst [vmem:[#allocation1 + $0x2] ss:$4 sm:$0xff] %v9812_v11 }
 0xe64   : > { %6477 = vst [vmem:[#allocation1 + $0x3] ss:$4 sm:$0xff] %v9816_v35  ;;  %v10141_v17 = vpop.permute.xlu1 %3543 }
 0xe66   : > { %v10100_v33 = vld.sshfl [vmem:[#allocation1 + $0x20] sm:$0xff pattern:$0x73625140] }
 0xe67   : > { %12180 = vst [vmem:[#allocation114_spill] sm:$0xff] %v10100_v33 }
 0xe68   : > { %6553 = vst [vmem:[#allocation1 + $0x20] ss:$4 sm:$0xff] %v9845_v2 }
 0xe69   : > { %6555 = vst [vmem:[#allocation1 + $0x21] ss:$4 sm:$0xff] %v9854_v60 }
 0xe6a   : > { %6557 = vst [vmem:[#allocation1 + $0x22] ss:$4 sm:$0xff] %v9887_v46 }
 0xe6b   : > { %6559 = vst [vmem:[#allocation1 + $0x23] ss:$4 sm:$0xff] %v9866_v9  ;;  %v10121_v0 = vld.sshfl [vmem:[#allocation1] sm:$0xff pattern:$0x73625140] }
 0xe6c   : > { %12183 = vst [vmem:[#allocation117_spill] sm:$0xff] %v10121_v0  ;;  %v10138_v0 = vld [vmem:[#allocation5 + $0x1] ss:$0 sm:$0xff] }
 0xe6d   : > { %6545 = vst [vmem:[#allocation1] ss:$4 sm:$0xff] %v9833_v56 }
 0xe6e   : > { %6547 = vst [vmem:[#allocation1 + $0x1] ss:$4 sm:$0xff] %v9836_v30 }
 0xe6f   : > { %6549 = vst [vmem:[#allocation1 + $0x2] ss:$4 sm:$0xff] %v9839_v12 }
 0xe70   : > { %6551 = vst [vmem:[#allocation1 + $0x3] ss:$4 sm:$0xff] %v9842_v50 }
 0xe72   : > { %v10114_v33 = vld.sshfl [vmem:[#allocation1 + $0x20] sm:$0xff pattern:$0x73625140] }
 0xe73   : > { %12182 = vst [vmem:[#allocation116_spill] sm:$0xff] %v10114_v33  ;;  %v1935_v33 = vsel %vm287_vm1, 0.0, %v7294_v21 }
 0xe74   : > { %6605 = vst [vmem:[#allocation1 + $0x20] ss:$4 sm:$0xff] %v9848_v24  ;;  %v10135_v6 = vsel %vm297_vm2, %v1935_v33, 0.0  ;;  %v10152_v33 = vld [vmem:[#allocation5 + $0x2] ss:$0 sm:$0xff] }
 0xe75   : > { %6607 = vst [vmem:[#allocation1 + $0x21] ss:$4 sm:$0xff] %v9850_v3  ;;  %v1972_v21 = vmul.f32 %v10138_v0, %v10135_v6  ;;  %v1954_v53 = vmul.f32 %v10150_v62, %v10135_v6  ;;  %v2014_v34 = vmul.f32 %v10152_v33, %v10135_v6 }
 0xe76   : > { %6609 = vst [vmem:[#allocation1 + $0x22] ss:$4 sm:$0xff] %v9852_v32 }
 0xe77   : > { %6611 = vst [vmem:[#allocation1 + $0x23] ss:$4 sm:$0xff] %v9864_v8  ;;  %v10148_v40 = vld.sshfl [vmem:[#allocation1] sm:$0xff pattern:$0x73625140]  ;;  %v1988_v41 = vrot.slane %v1972_v21, 1 }
 0xe78   : > { %12186 = vst [vmem:[#allocation120_spill] sm:$0xff] %v10148_v40  ;;  %v1936_v21 = vsel %vm287_vm1, 0.0, %v7295_v28  ;;  %v2030_v49 = vrot.slane %v2014_v34, 2  ;;  %v3573_v28 = vsel %vm1871_vm3, %v3571_v1, %v10096_v37 }
 0xe79   : > { %6597 = vst [vmem:[#allocation1] ss:$4 sm:$0xff] %v9870_v25  ;;  %v2004_v20 = vadd.f32 %v1988_v41, %v1954_v53  ;;  %v3575_v53 = vsel %vm1874_vm4, %v3573_v28, %v3534_v7  ;;  %v10189_v34 = vsel %vm297_vm2, %v1936_v21, 0.0  ;;  %v1974_v41 = vmul.f32 %v10138_v0, %v10172_v42 }
 0xe7a   : > { %6599 = vst [vmem:[#allocation1 + $0x1] ss:$4 sm:$0xff] %v9873_v54  ;;  %v2056_v1 = vmul.f32 %v10183_v61, %v10189_v34  ;;  %v2074_v37 = vmul.f32 %v10185_v36, %v10189_v34  ;;  %v10203_v7 = vsel %vm297_vm2, %v288_v63, 0.0  ;;  %v7297_v21 = vrot.slane %v12099_v57, 9 }
 0xe7b   : > { %6601 = vst [vmem:[#allocation1 + $0x2] ss:$4 sm:$0xff] %v9876_v10  ;;  %v2046_v15 = vadd.f32 %v2030_v49, %v2004_v20  ;;  %v7298_v28 = vrot.slane %v12100_v16, 9  ;;  %v3577_v55 = vsel %vm1877_vm5, %v3575_v53, %v10123_v19  ;;  %v1971_v20 = vmul.f32 %v10138_v0, %v10203_v7 }
 0xe7c   : > { %6603 = vst [vmem:[#allocation1 + $0x3] ss:$4 sm:$0xff] %v9885_v47  ;;  %v3574_v49 = vsel %vm1871_vm3, %v3572_v18, %v10109_v51  ;;  %v1956_v63 = vmul.f32 %v10150_v62, %v10172_v42  ;;  %v1990_v16 = vrot.slane %v1974_v41, 1  ;;  %v2016_v57 = vmul.f32 %v10152_v33, %v10172_v42 }
 0xe7d   : > { %v3576_v19 = vsel %vm1874_vm4, %v3574_v49, %v9968_v52  ;;  %v2064_v53 = vadd.f32 %v2056_v1, %v2046_v15  ;;  %v2116_v48 = vmul.f32 %v10212_v43, %v10189_v34  ;;  %v3579_v51 = vsel %vm1880_vm6, %v3577_v55, %v9983_v22 }
 0xe7e   : > { %v10130_v44 = vld.sshfl [vmem:[#allocation1 + $0x20] sm:$0xff pattern:$0x73625140]  ;;  %v1938_v41 = vsel %vm287_vm1, 0.0, %v7297_v21  ;;  %v1939_v5 = vsel %vm287_vm1, 0.0, %v7298_v28  ;;  %v1953_v1 = vmul.f32 %v10150_v62, %v10203_v7  ;;  %v2013_v49 = vmul.f32 %v10152_v33, %v10203_v7 }
 0xe7f   : > { %12184 = vst [vmem:[#allocation118_spill] sm:$0xff] %v10130_v44  ;;  %v10145_v44 = vpop.permute.xlu0 %3551  ;;  %v2006_v21 = vadd.f32 %v1990_v16, %v1956_v63  ;;  %v2015_v28 = vmul.f32 %v10152_v33, %v10189_v34  ;;  %v2032_v55 = vrot.slane %v2016_v57, 2  ;;  %v10257_v16 = vsel %vm297_vm2, %v1938_v41, 0.0 }
 0xe80   : > { %6626 = vst [vmem:[#allocation1 + $0x20] ss:$4 sm:$0xff] %v9820_v4  ;;  %v1955_v57 = vmul.f32 %v10150_v62, %v10189_v34 }
 0xe81   : > { %6628 = vst [vmem:[#allocation1 + $0x21] ss:$4 sm:$0xff] %v9824_v45  ;;  %v2048_v63 = vadd.f32 %v2032_v55, %v2006_v21  ;;  %v7299_v21 = vrot.slane %v12101_v26, 9  ;;  %v2073_v55 = vmul.f32 %v10185_v36, %v10135_v6 }
 0xe82   : > { %6630 = vst [vmem:[#allocation1 + $0x22] ss:$4 sm:$0xff] %v9827_v59 }
 0xe83   : > { %6632 = vst [vmem:[#allocation1 + $0x23] ss:$4 sm:$0xff] %v9830_v27  ;;  %v10200_v38 = vld.sshfl [vmem:[#allocation1] sm:$0xff pattern:$0x73625140] }
 0xe84   : > { %12185 = vst [vmem:[#allocation119_spill] sm:$0xff] %v10145_v44  ;;  %v1973_v44 = vmul.f32 %v10138_v0, %v10189_v34 }
 0xe85   : > { %12190 = vst [vmem:[#allocation18_spill] sm:$0xff] %v10200_v38  ;;  %v2090_v38 = vrot.slane %v2074_v37, 1  ;;  %v1987_v37 = vrot.slane %v1971_v20, 1 }
 0xe86   : > { %6618 = vst [vmem:[#allocation1] ss:$4 sm:$0xff] %v9805_v13 }
 0xe87   : > { %v10177_v14 = vpop.permute.xlu0 %3565  ;;  %6620 = vst [vmem:[#allocation1 + $0x1] ss:$4 sm:$0xff] %v9808_v39  ;;  %v2106_v20 = vadd.f32 %v2090_v38, %v2064_v53  ;;  %v2003_v38 = vadd.f32 %v1987_v37, %v1953_v1  ;;  %v10285_v1 = vmul.f32 %v10183_v61, %v10172_v42 }
 0xe88   : > { %6622 = vst [vmem:[#allocation1 + $0x2] ss:$4 sm:$0xff] %v9812_v11 }
 0xe89   : > { %6624 = vst [vmem:[#allocation1 + $0x3] ss:$4 sm:$0xff] %v9816_v35 }
 0xe8a   : > { %v10164_v40 = vld.sshfl [vmem:[#allocation1 + $0x20] sm:$0xff pattern:$0x73625140] }
 0xe8b   : > { %12187 = vst [vmem:[#allocation121_spill] sm:$0xff] %v10164_v40  ;;  %v10175_v40 = vpop.permute.xlu1 %3557 }
 0xe8c   : > { %6700 = vst [vmem:[#allocation1 + $0x20] ss:$4 sm:$0xff] %v9845_v2 }
 0xe8d   : > { %6702 = vst [vmem:[#allocation1 + $0x21] ss:$4 sm:$0xff] %v9854_v60 }
 0xe8e   : > { %6704 = vst [vmem:[#allocation1 + $0x22] ss:$4 sm:$0xff] %v9887_v46 }
 0xe8f   : > { %6706 = vst [vmem:[#allocation1 + $0x23] ss:$4 sm:$0xff] %v9866_v9  ;;  %v4109_v15 = vpop.xlane.xlu0 %4108 }
 0xe90   : > { %v4111_v22 = vsub.f32 %v10006_v58, %v4109_v15  ;;  %v1989_v58 = vrot.slane %v1973_v44, 1  ;;  %v10272_v41 = vld.sshfl [vmem:[#allocation1] sm:$0xff pattern:$0x73625140]  ;;  %v2058_v44 = vmul.f32 %v10183_v61, %v10257_v16 }
 0xe91   : > { %12193 = vst [vmem:[#allocation123_spill] sm:$0xff] %v10272_v41 }
 0xe92   : > { %v4114_v35 = vmul.f32 1.442695, %v4111_v22  ;;  %6692 = vst [vmem:[#allocation1] ss:$4 sm:$0xff] %v9833_v56  ;;  %v10290_v22 = vld [vmem:[#allocation5 + $0x8] ss:$0 sm:$0xff] }
 0xe93   : > { %v10235_v52 = vpop.permute.xlu1 %3567  ;;  %6694 = vst [vmem:[#allocation1 + $0x1] ss:$4 sm:$0xff] %v9836_v30 }
 0xe94   : > { %12192 = vst [vmem:[#allocation122_spill] sm:$0xff] %v10235_v52  ;;  %v2132_v52 = vrot.slane %v2116_v48, 2  ;;  %v2029_v48 = vrot.slane %v2013_v49, 2  ;;  %7854 = vpow2.f32 %v4114_v35  ;;  %v2005_v35 = vadd.f32 %v1989_v58, %v1955_v57 }
 0xe95   : > { %6696 = vst [vmem:[#allocation1 + $0x2] ss:$4 sm:$0xff] %v9839_v12  ;;  %v7301_v12 = vrot.slane %v12103_v23, 9 }
 0xe96   : > { %v10227_v18 = vld.sshfl [vmem:[#allocation1 + $0x20] sm:$0xff pattern:$0x73625140]  ;;  %6698 = vst [vmem:[#allocation1 + $0x3] ss:$4 sm:$0xff] %v9842_v50 }
 0xe97   : > { %12191 = vst [vmem:[#allocation19_spill] sm:$0xff] %v10227_v18  ;;  %v7300_v18 = vrot.slane %v12102_v29, 9  ;;  %v2118_v29 = vmul.f32 %v10212_v43, %v10257_v16 }
 0xe98   : > { %6752 = vst [vmem:[#allocation1 + $0x20] ss:$4 sm:$0xff] %v9848_v24  ;;  %v10249_v24 = vsel %vm297_vm2, %v1939_v5, 0.0  ;;  %v10265_v5 = vld [vmem:[#allocation5 + $0x6] ss:$0 sm:$0xff] }
 0xe99   : > { %6754 = vst [vmem:[#allocation1 + $0x21] ss:$4 sm:$0xff] %v9850_v3  ;;  %v10254_v3 = vsel %vm1877_vm5, %v3576_v19, %v10141_v17  ;;  %v2031_v17 = vrot.slane %v2015_v28, 2  ;;  %v1941_v19 = vsel %vm287_vm1, 0.0, %v7300_v18  ;;  %v1976_v53 = vmul.f32 %v10138_v0, %v10249_v24 }
 0xe9a   : > { %6756 = vst [vmem:[#allocation1 + $0x22] ss:$4 sm:$0xff] %v9852_v32  ;;  %v10263_v32 = vsel %vm1883_vm7, %v3579_v51, %v10175_v40  ;;  %v2076_v40 = vmul.f32 %v10185_v36, %v10257_v16  ;;  %v2148_v51 = vadd.f32 %v2132_v52, %v2106_v20  ;;  %v2158_v15 = vmul.f32 %v10265_v5, %v10172_v42 }
 0xe9b   : > { %6758 = vst [vmem:[#allocation1 + $0x23] ss:$4 sm:$0xff] %v9864_v8  ;;  %v10267_v8 = vld [vmem:[#allocation5 + $0x7] ss:$0 sm:$0xff]  ;;  %v2055_v18 = vmul.f32 %v10183_v61, %v10135_v6  ;;  %v4118_v49 = vpop.xlane.xlu1 %4117  ;;  %v2045_v52 = vadd.f32 %v2029_v48, %v2003_v38  ;;  %v10294_v28 = vsel %vm297_vm2, %v1941_v19, 0.0  ;;  %v1958_v20 = vmul.f32 %v10150_v62, %v10249_v24  ;;  %v10306_v48 = vpop.eup %7854 }
 0xe9c   : > { %v2176_v37 = vmul.f32 %v10267_v8, %v10172_v42  ;;  %7856 = vrcp.f32 %v4118_v49  ;;  %v1992_v57 = vrot.slane %v1976_v53, 1  ;;  %v2018_v58 = vmul.f32 %v10152_v33, %v10249_v24  ;;  %12195 = vst [vmem:[#allocation125_spill] sm:$0xff] %v10306_v48 }
 0xe9d   : > { %v2066_v19 = vadd.f32 %v2058_v44, %v2048_v63  ;;  %v2092_v49 = vrot.slane %v2076_v40, 1  ;;  %v2166_v26 = vadd.f32 %v2158_v15, %v2148_v51  ;;  %v2218_v53 = vmul.f32 %v10290_v22, %v10172_v42 }
 0xe9e   : > { %v2192_v41 = vrot.slane %v2176_v37, 1  ;;  %v4119_v50 = vsel %vm682_vm0, %v10306_v48, 0.0  ;;  %v2063_v63 = vadd.f32 %v2055_v18, %v2045_v52  ;;  %v1978_v44 = vmul.f32 %v10138_v0, %v10294_v28 }
 0xe9f   : > { %4120 = vadd.xlane.f32.xlu2 %v4119_v50  ;;  %v1940_v40 = vsel %vm287_vm1, 0.0, %v7299_v21  ;;  %v2008_v51 = vadd.f32 %v1992_v57, %v1958_v20  ;;  %v2034_v15 = vrot.slane %v2018_v58, 2  ;;  %v2134_v18 = vrot.slane %v2118_v29, 2  ;;  %v10337_v20 = vld.sshfl [vmem:[#allocation1] sm:$0xff pattern:$0x73625140] }
 0xea0   : > { %v2208_v50 = vadd.f32 %v2192_v41, %v2166_v26  ;;  %v2234_v52 = vrot.slane %v2218_v53, 2  ;;  %v10331_v48 = vsel %vm297_vm2, %v1940_v40, 0.0  ;;  %v1960_v21 = vmul.f32 %v10150_v62, %v10294_v28  ;;  %6744 = vst [vmem:[#allocation1] ss:$4 sm:$0xff] %v9870_v25 }
 0xea1   : > { %v2050_v29 = vadd.f32 %v2034_v15, %v2008_v51  ;;  %v2078_v26 = vmul.f32 %v10185_v36, %v10331_v48  ;;  %v2160_v41 = vmul.f32 %v10265_v5, %v10249_v24  ;;  %v2178_v57 = vmul.f32 %v10267_v8, %v10249_v24  ;;  %6746 = vst [vmem:[#allocation1 + $0x1] ss:$4 sm:$0xff] %v9873_v54  ;;  %v10364_v54 = vld [vmem:[%s11929_s2] ss:$0 sm:$0xff] }
 0xea2   : > { %v10304_v38 = vld.sshfl [vmem:[#allocation1 + $0x20] sm:$0xff pattern:$0x73625140]  ;;  %v7857_v37 = vpop.eup %7856  ;;  %6748 = vst [vmem:[#allocation1 + $0x2] ss:$4 sm:$0xff] %v9876_v10  ;;  %v10369_v51 = vsel %vm1886_vm8, %v10263_v32, %v10177_v14  ;;  %v1957_v32 = vmul.f32 %v10150_v62, %v10257_v16 }
 0xea3   : > { %12194 = vst [vmem:[#allocation124_spill] sm:$0xff] %v10304_v38  ;;  %v2047_v38 = vadd.f32 %v2031_v17, %v2005_v35  ;;  %v2108_v17 = vadd.f32 %v2092_v49, %v2066_v19  ;;  %v2115_v35 = vmul.f32 %v10212_v43, %v10135_v6  ;;  %v4124_v23 = vmul.f32 %v7857_v37, %v10021_v31 }
 0xea4   : > { %6773 = vst [vmem:[#allocation1 + $0x20] ss:$4 sm:$0xff] %v9820_v4  ;;  %v10322_v4 = vmul.f32 %v10185_v36, %v10172_v42  ;;  %v2060_v6 = vmul.f32 %v10183_v61, %v10331_v48  ;;  %v2250_v19 = vadd.f32 %v2234_v52, %v2208_v50  ;;  %v2094_v15 = vrot.slane %v2078_v26, 1 }
 0xea5   : > { %6775 = vst [vmem:[#allocation1 + $0x21] ss:$4 sm:$0xff] %v9824_v45  ;;  %v2089_v45 = vrot.slane %v2073_v55, 1  ;;  %v2020_v55 = vmul.f32 %v10152_v33, %v10294_v28  ;;  %7362 = vmatmul.msk.f32.vlgmr.msra.gmra.mxu3 %vm682_vm0, %v4124_v23  ;;  %v2150_v31 = vadd.f32 %v2134_v18, %v2108_v17  ;;  %v2131_v58 = vrot.slane %v2115_v35, 2 }
 0xea6   : > { %6777 = vst [vmem:[#allocation1 + $0x22] ss:$4 sm:$0xff] %v9827_v59  ;;  %v1942_v59 = vsel %vm287_vm1, 0.0, %v7301_v12  ;;  %v2091_v12 = vrot.slane %v10322_v4, 1  ;;  %v1975_v23 = vmul.f32 %v10138_v0, %v10257_v16  ;;  %v2065_v25 = vadd.f32 %v10285_v1, %v2047_v38 }
 0xea7   : > { %6779 = vst [vmem:[#allocation1 + $0x23] ss:$4 sm:$0xff] %v9830_v27  ;;  %v1994_v27 = vrot.slane %v1978_v44, 1  ;;  %v10352_v49 = vsel %vm297_vm2, %v1942_v59, 0.0  ;;  %v2105_v53 = vadd.f32 %v2089_v45, %v2063_v63  ;;  %v2036_v4 = vrot.slane %v2020_v55, 2 }
 0xea8   : > { %6750 = vst [vmem:[#allocation1 + $0x3] ss:$4 sm:$0xff] %v9885_v47  ;;  %v2068_v10 = vadd.f32 %v2060_v6, %v2050_v29  ;;  %v2120_v1 = vmul.f32 %v10212_v43, %v10331_v48  ;;  %v2117_v47 = vmul.f32 %v10212_v43, %v10172_v42  ;;  %v2168_v38 = vadd.f32 %v2160_v41, %v2150_v31 }
 0xea9   : > { %v2010_v44 = vadd.f32 %v1994_v27, %v1960_v21  ;;  %v2194_v63 = vrot.slane %v2178_v57, 1  ;;  %v2220_v37 = vmul.f32 %v10290_v22, %v10249_v24  ;;  %v2258_v14 = vadd.f32 %v10364_v54, %v2250_v19 }
 0xeaa   : > { %v1991_v45 = vrot.slane %v1975_v23, 1  ;;  %v2017_v17 = vmul.f32 %v10152_v33, %v10257_v16  ;;  %v3587_v42 = vrot.slane %v10369_v51, 2  ;;  %v2062_v35 = vmul.f32 %v10183_v61, %v10352_v49 }
 0xeab   : > { %v2147_v18 = vadd.f32 %v2131_v58, %v2105_v53  ;;  %v2157_v50 = vmul.f32 %v10265_v5, %v10189_v34  ;;  %v2110_v52 = vadd.f32 %v2094_v15, %v2068_v10  ;;  %v2136_v59 = vrot.slane %v2120_v1, 2 }
 0xeac   : > { %v2107_v21 = vadd.f32 %v2091_v12, %v2065_v25  ;;  %v2210_v27 = vadd.f32 %v2194_v63, %v2168_v38  ;;  %v2236_v55 = vrot.slane %v2220_v37, 2  ;;  %v2133_v29 = vrot.slane %v2117_v47, 2  ;;  %v12196_v38 = vld [vmem:[#allocation79_spill] sm:$0xff] }
 0xead   : > { %v1977_v6 = vmul.f32 %v10138_v0, %v10331_v48  ;;  %v2007_v26 = vadd.f32 %v1991_v45, %v1957_v32  ;;  %v2033_v31 = vrot.slane %v2017_v17, 2  ;;  %v2122_v19 = vmul.f32 %v10212_v43, %v10352_v49  ;;  %v12197_v63 = vld [vmem:[#allocation119_spill] sm:$0xff] }
 0xeae   : > { %v10359_v40 = vld.sshfl [vmem:[#allocation1 + $0x20] sm:$0xff pattern:$0x73625140]  ;;  %v2165_v12 = vadd.f32 %v2157_v50, %v2147_v18  ;;  %v2152_v23 = vadd.f32 %v2136_v59, %v2110_v52  ;;  %v2162_v25 = vmul.f32 %v10265_v5, %v10294_v28  ;;  %v2180_v0 = vmul.f32 %v10267_v8, %v10294_v28 }
 0xeaf   : > { %6847 = vst [vmem:[#allocation1 + $0x20] ss:$4 sm:$0xff] %v9845_v2  ;;  %v2052_v2 = vadd.f32 %v2036_v4, %v2010_v44  ;;  %v10397_v41 = vld.sshfl [vmem:[#allocation1] sm:$0xff pattern:$0x73625140]  ;;  %v2217_v44 = vmul.f32 %v10290_v22, %v10189_v34  ;;  %v2252_v4 = vadd.f32 %v2236_v55, %v2210_v27  ;;  %v1959_v10 = vmul.f32 %v10150_v62, %v10331_v48  ;;  %v12198_v27 = vld [vmem:[#allocation20_spill] sm:$0xff] }
 0xeb0   : > { %6849 = vst [vmem:[#allocation1 + $0x21] ss:$4 sm:$0xff] %v9854_v60  ;;  %v2080_v60 = vmul.f32 %v10185_v36, %v10352_v49  ;;  %v2019_v15 = vmul.f32 %v10152_v33, %v10331_v48  ;;  %v2049_v1 = vadd.f32 %v2033_v31, %v2007_v26  ;;  %v2059_v47 = vmul.f32 %v10183_v61, %v10249_v24 }
 0xeb1   : > { %6851 = vst [vmem:[#allocation1 + $0x22] ss:$4 sm:$0xff] %v9887_v46  ;;  %v2175_v46 = vmul.f32 %v10267_v8, %v10189_v34  ;;  %v2070_v57 = vadd.f32 %v2062_v35, %v2052_v2  ;;  %v3580_v34 = vsel %vm1880_vm6, %v10254_v3, %v12197_v63  ;;  %v2077_v62 = vmul.f32 %v10185_v36, %v10249_v24  ;;  %v12203_v63 = vld [vmem:[#allocation81_spill] sm:$0xff] }
 0xeb2   : > { %6853 = vst [vmem:[#allocation1 + $0x23] ss:$4 sm:$0xff] %v9866_v9  ;;  %v3600_v9 = vadd.f32 %v3587_v42, %v2258_v14  ;;  %v2096_v58 = vrot.slane %v2080_v60, 1  ;;  %v2138_v37 = vrot.slane %v2122_v19, 2  ;;  %v2149_v14 = vadd.f32 %v2133_v29, %v2107_v21 }
 0xeb3   : > { %6765 = vst [vmem:[#allocation1] ss:$4 sm:$0xff] %v9805_v13  ;;  %v2191_v53 = vrot.slane %v2175_v46, 1  ;;  %v1993_v13 = vrot.slane %v1977_v6, 1  ;;  %v2170_v33 = vadd.f32 %v2162_v25, %v2152_v23  ;;  %v2196_v32 = vrot.slane %v2180_v0, 1  ;;  %v12199_v25 = vld [vmem:[#allocation99_spill] sm:$0xff] }
 0xeb4   : > { %6767 = vst [vmem:[#allocation1 + $0x1] ss:$4 sm:$0xff] %v9808_v39  ;;  %v2222_v45 = vmul.f32 %v10290_v22, %v10294_v28  ;;  %v2159_v17 = vmul.f32 %v10265_v5, %v10257_v16  ;;  %v2177_v42 = vmul.f32 %v10267_v8, %v10257_v16  ;;  %v2233_v3 = vrot.slane %v2217_v44, 2 }
 0xeb5   : > { %6769 = vst [vmem:[#allocation1 + $0x2] ss:$4 sm:$0xff] %v9812_v11  ;;  %v2112_v11 = vadd.f32 %v2096_v58, %v2070_v57  ;;  %v2207_v2 = vadd.f32 %v2191_v53, %v2165_v12  ;;  %v2260_v35 = vadd.f32 %v10364_v54, %v2252_v4  ;;  %v2009_v60 = vadd.f32 %v1993_v13, %v1959_v10 }
 0xeb6   : > { %6771 = vst [vmem:[#allocation1 + $0x3] ss:$4 sm:$0xff] %v12196_v38  ;;  %v2035_v18 = vrot.slane %v2019_v15, 2  ;;  %v2067_v50 = vadd.f32 %v2059_v47, %v2049_v1  ;;  %v2093_v52 = vrot.slane %v2077_v62, 1  ;;  %v2119_v59 = vmul.f32 %v10212_v43, %v10249_v24  ;;  %v12201_v1 = vld [vmem:[#allocation80_spill] sm:$0xff]  ;;  %v12202_v47 = vld [vmem:[#allocation122_spill] sm:$0xff] }
 0xeb7   : > { %v2154_v21 = vadd.f32 %v2138_v37, %v2112_v11  ;;  %v2164_v46 = vmul.f32 %v10265_v5, %v10203_v7  ;;  %4212 = vrot.lane.b32.xlu2 %v12198_v27, %s8092_s22  ;;  %v3589_v55 = vrot.slane %v10369_v51, 6  ;;  %v2182_v29 = vmul.f32 %v10267_v8, %v10203_v7 }
 0xeb8   : > { %v2212_v6 = vadd.f32 %v2196_v32, %v2170_v33  ;;  %v2238_v26 = vrot.slane %v2222_v45, 2  ;;  %v2167_v31 = vadd.f32 %v2159_v17, %v2149_v14  ;;  %v2249_v57 = vadd.f32 %v2233_v3, %v2207_v2 }
 0xeb9   : > { %v10417_v39 = vld.sshfl [vmem:[#allocation1 + $0x20] sm:$0xff pattern:$0x73625140]  ;;  %v2219_v24 = vmul.f32 %v10290_v22, %v10257_v16  ;;  %v2051_v19 = vadd.f32 %v2035_v18, %v2009_v60  ;;  %v2061_v12 = vmul.f32 %v10183_v61, %v10294_v28  ;;  %v2079_v23 = vmul.f32 %v10185_v36, %v10294_v28 }
 0xeba   : > { %6995 = vst [vmem:[#allocation1 + $0x21] ss:$4 sm:$0xff] %v3600_v9  ;;  %v2193_v9 = vrot.slane %v2177_v42, 1  ;;  %v3582_v0 = vsel %vm1883_vm7, %v3580_v34, %v12199_v25  ;;  %v2109_v53 = vadd.f32 %v2093_v52, %v2067_v50  ;;  %v2135_v44 = vrot.slane %v2119_v59, 2 }
 0xebb   : > { %v2172_v4 = vadd.f32 %v2164_v46, %v2154_v21  ;;  %v3602_v16 = vadd.f32 %v3589_v55, %v2260_v35  ;;  %v2198_v13 = vrot.slane %v2182_v29, 1  ;;  %v2224_v61 = vmul.f32 %v10290_v22, %v10203_v7 }
 0xebc   : > { %v2254_v15 = vadd.f32 %v2238_v26, %v2212_v6  ;;  %v2209_v36 = vadd.f32 %v2193_v9, %v2167_v31  ;;  %v3584_v38 = vsel %vm1886_vm8, %v3582_v0, %v12202_v47  ;;  %v2235_v34 = vrot.slane %v2219_v24, 2 }
 0xebd   : > { %v10440_v58 = vld.sshfl [vmem:[#allocation1] sm:$0xff pattern:$0x73625140]  ;;  %v2095_v62 = vrot.slane %v2079_v23, 1  ;;  %v2121_v11 = vmul.f32 %v10212_v43, %v10294_v28  ;;  %v2151_v37 = vadd.f32 %v2135_v44, %v2109_v53  ;;  %v2161_v14 = vmul.f32 %v10265_v5, %v10331_v48 }
 0xebe   : > { %6839 = vst [vmem:[#allocation1] ss:$4 sm:$0xff] %v9833_v56  ;;  %v2257_v56 = vadd.f32 %v10364_v54, %v2249_v57  ;;  %v2179_v33 = vmul.f32 %v10267_v8, %v10331_v48  ;;  %v2214_v32 = vadd.f32 %v2198_v13, %v2172_v4  ;;  %v2240_v45 = vrot.slane %v2224_v61, 2 }
 0xebf   : > { %6841 = vst [vmem:[#allocation1 + $0x1] ss:$4 sm:$0xff] %v9836_v30  ;;  %v2069_v30 = vadd.f32 %v2061_v12, %v2051_v19  ;;  %v2262_v17 = vadd.f32 %v10364_v54, %v2254_v15  ;;  %v3590_v42 = vrot.slane %v3584_v38, 2  ;;  %v2251_v3 = vadd.f32 %v2235_v34, %v2209_v36  ;;  %v4192_v15 = vpop.permute.xlu0 %4191 }
 0xec0   : > { %6843 = vst [vmem:[#allocation1 + $0x2] ss:$4 sm:$0xff] %v12201_v1  ;;  %v3599_v2 = vadd.f32 %v10369_v51, %v2257_v56  ;;  %v2137_v60 = vrot.slane %v2121_v11, 2  ;;  %v2169_v18 = vadd.f32 %v2161_v14, %v2151_v37  ;;  %v2195_v43 = vrot.slane %v2179_v33, 1  ;;  %v12210_v37 = vld [vmem:[#allocation21_spill] sm:$0xff]  ;;  %v12211_v14 = vld [vmem:[#allocation14_spill] sm:$0xff] }
 0xec1   : > { %v10452_v10 = vld.sshfl [vmem:[#allocation1 + $0x20] sm:$0xff pattern:$0x73625140]  ;;  %6845 = vst [vmem:[#allocation1 + $0x3] ss:$4 sm:$0xff] %v12203_v63  ;;  %v2111_v35 = vadd.f32 %v2095_v62, %v2069_v30  ;;  %v2221_v28 = vmul.f32 %v10290_v22, %v10331_v48  ;;  %v2256_v50 = vadd.f32 %v2240_v45, %v2214_v32  ;;  %v3604_v52 = vadd.f32 %v3590_v42, %v2262_v17  ;;  %v12209_v63 = vld [vmem:[#allocation125_spill] sm:$0xff] }
 0xec2   : > { %12200 = vst [vmem:[#allocation79_spill] sm:$0xff] %v10452_v10  ;;  %v2259_v46 = vadd.f32 %v10364_v54, %v2251_v3  ;;  %v2163_v55 = vmul.f32 %v10265_v5, %v10352_v49  ;;  %v3588_v29 = vrot.slane %v10369_v51, 4  ;;  %v2181_v6 = vmul.f32 %v10267_v8, %v10352_v49  ;;  %v12212_v32 = vld [vmem:[#allocation26_spill] sm:$0xff] }
 0xec3   : > { %6999 = vst [vmem:[#allocation1 + $0x21] ss:$4 sm:$0xff] %v3602_v16  ;;  %v2153_v27 = vadd.f32 %v2137_v60, %v2111_v35  ;;  %v2211_v48 = vadd.f32 %v2195_v43, %v2169_v18  ;;  %v2237_v26 = vrot.slane %v2221_v28, 2  ;;  %v2264_v31 = vadd.f32 %v10364_v54, %v2256_v50  ;;  %v12213_v50 = vld [vmem:[#allocation15_spill] sm:$0xff] }
 0xec4   : > { %v3592_v9 = vrot.slane %v3584_v38, 6  ;;  %v3601_v24 = vadd.f32 %v3588_v29, %v2259_v46  ;;  %v2197_v19 = vrot.slane %v2181_v6, 1  ;;  %v2223_v12 = vmul.f32 %v10290_v22, %v10352_v49  ;;  %v12215_v46 = vld [vmem:[#allocation16_spill] sm:$0xff] }
 0xec5   : > { %v2171_v57 = vadd.f32 %v2163_v55, %v2153_v27  ;;  %v2253_v23 = vadd.f32 %v2237_v26, %v2211_v48  ;;  %v3591_v22 = vrot.slane %v3584_v38, 4  ;;  %v7617_v33 = vpack.i.bf16 %v12211_v14, %v12210_v37 }
 0xec6   : > { %v3606_v25 = vadd.f32 %v3592_v9, %v2264_v31  ;;  %v2239_v0 = vrot.slane %v2223_v12, 2 }
 0xec7   : > { %v2213_v8 = vadd.f32 %v2197_v19, %v2171_v57  ;;  %v2261_v53 = vadd.f32 %v10364_v54, %v2253_v23  ;;  %v4215_v1 = vpop.permute.xlu0 %4214 }
 0xec8   : > { %v10471_v59 = vld.sshfl [vmem:[#allocation1] sm:$0xff pattern:$0x73625140]  ;;  %7364 = vmatpush.xpose.msk.msra.mxu0 %vm682_vm0, %v4215_v1 }
 0xec9   : > { %6992 = vst [vmem:[#allocation1 + $0x1] ss:$4 sm:$0xff] %v3599_v2  ;;  %v2255_v44 = vadd.f32 %v2239_v0, %v2213_v8  ;;  %v3603_v4 = vadd.f32 %v3584_v38, %v2261_v53 }
 0xeca   : > { %v10473_v21 = vld.sshfl [vmem:[#allocation1 + $0x20] sm:$0xff pattern:$0x73625140] }
 0xecb   : > { %12204 = vst [vmem:[#allocation119_spill] sm:$0xff] %v10473_v21  ;;  %v2263_v13 = vadd.f32 %v10364_v54, %v2255_v44  ;;  %v4194_v54 = vpop.permute.xlu1 %4193  ;;  %v12216_v44 = vld [vmem:[#allocation27_spill] sm:$0xff] }
 0xecc   : > { %7003 = vst [vmem:[#allocation1 + $0x21] ss:$4 sm:$0xff] %v3604_v52  ;;  %v12214_v52 = vld [vmem:[#allocation17_spill] sm:$0xff] }
 0xecd   : > { %v3605_v49 = vadd.f32 %v3591_v22, %v2263_v13  ;;  %v12218_v22 = vld [vmem:[#allocation23_spill] sm:$0xff] }
 0xed0   : > { %v10484_v5 = vld.sshfl [vmem:[#allocation1] sm:$0xff pattern:$0x73625140] }
 0xed1   : > { %12205 = vst [vmem:[#allocation20_spill] sm:$0xff] %v10484_v5 }
 0xed2   : > { %6997 = vst [vmem:[#allocation1 + $0x1] ss:$4 sm:$0xff] %v3601_v24 }
 0xed3   : > { %v10486_v51 = vld.sshfl [vmem:[#allocation1 + $0x20] sm:$0xff pattern:$0x73625140] }
 0xed4   : > { %12206 = vst [vmem:[#allocation99_spill] sm:$0xff] %v10486_v51 }
 0xed5   : > { %7007 = vst [vmem:[#allocation1 + $0x21] ss:$4 sm:$0xff] %v3606_v25 }
 0xed9   : > { %v10489_v16 = vld.sshfl [vmem:[#allocation1] sm:$0xff pattern:$0x73625140] }
 0xeda   : > { %12207 = vst [vmem:[#allocation80_spill] sm:$0xff] %v10489_v16 }
 0xedb   : > { %7001 = vst [vmem:[#allocation1 + $0x1] ss:$4 sm:$0xff] %v3603_v4  ;;  %v12217_v4 = vld [vmem:[#allocation28_spill] sm:$0xff] }
 0xedc   : > { %v7622_v13 = vpack.i.bf16 %v12217_v4, %v12216_v44 }
 0xee2   : > { %v10492_v61 = vld.sshfl [vmem:[#allocation1] sm:$0xff pattern:$0x73625140] }
 0xee3   : > { %12208 = vst [vmem:[#allocation122_spill] sm:$0xff] %v10492_v61 }
 0xee4   : > { %7005 = vst [vmem:[#allocation1 + $0x1] ss:$4 sm:$0xff] %v3605_v49 }
 0xf12   : > { %v4121_v36 = vpop.xlane.xlu2 %4120 }
 0xf13   : > { %7858 = vrcp.f32 %v4121_v36 }
 0xf19   : > { %v7859_v56 = vpop.eup %7858 }
 0xf1a   : > { %v4213_v47 = vpop.permute.xlu2 %4212  ;;  %v4125_v34 = vmul.f32 %v7859_v56, %v12209_v63 }
 0xf1b   : > { %7365 = vmatpush.xpose.msk.msra.mxu0 %vm682_vm0, %v4213_v47 }
 0xf1c   : > { %7363 = vmatmul.msk.f32.gmra.mxu3 %vm682_vm0, %v4125_v34 }
 0xf1e   : > { %7366 = vmatmul.msk.f32.vlgmr.msra.gmra.mxu0 %vm682_vm0, %v4192_v15 }
 0xf26   : > { %7367 = vmatmul.msk.f32.gmra.mxu0 %vm682_vm0, %v4194_v54 }
 0xf9b   : > { %v4241_v38 = vpop.f32.mrf.mxu0 }
 0xf9c   : > { %v4247_v30 = vsel %vm682_vm0, %v4241_v38, -inf }
 0xf9d   : > { %4248 = vmax.xlane.f32.xlu2 %v4247_v30  ;;  %v12219_v30 = vld [vmem:[#allocation29_spill] sm:$0xff] }
 0xfa3   : > { %v4244_v62 = vpop.f32.mrf.mxu0 }
 0xfa4   : > { %v4250_v11 = vsel %vm682_vm0, %v4244_v62, -inf }
 0xfa5   : > { %4251 = vmax.xlane.f32.xlu1 %v4250_v11  ;;  %v12221_v11 = vld [vmem:[#allocation24_spill] sm:$0xff] }
 0xfbe   : > { %7618 = vrot.lane.b32.xlu1 %v7617_v33, %s8092_s22 }
 0xfc6   : > { %4361 = vrot.lane.b32.xlu1 %v12212_v32, %s8093_s23 }
0x1010   : > { %v4249_v45 = vpop.xlane.xlu2 %4248 }
0x1011   : > { %v4253_v17 = vsub.f32 %v4241_v38, %v4249_v45 }
0x1013   : > { %v4255_v42 = vmul.f32 1.442695, %v4253_v17 }
0x1015   : > { %7860 = vpow2.f32 %v4255_v42 }
0x1018   : > { %v4252_v2 = vpop.xlane.xlu1 %4251 }
0x1019   : > { %v4254_v3 = vsub.f32 %v4244_v62, %v4252_v2  ;;  %v12220_v62 = vld [vmem:[#allocation22_spill] sm:$0xff] }
0x101b   : > { %v7861_v35 = vpop.eup %7860  ;;  %v4257_v60 = vmul.f32 1.442695, %v4254_v3 }
0x101c   : > { %v4259_v18 = vsel %vm682_vm0, %v7861_v35, 0.0 }
0x101d   : > { %7862 = vpow2.f32 %v4257_v60  ;;  %4260 = vadd.xlane.f32.xlu0 %v4259_v18 }
0x1023   : > { %v7863_v43 = vpop.eup %7862 }
0x1024   : > { %v4262_v28 = vsel %vm682_vm0, %v7863_v43, 0.0 }
0x1025   : > { %4263 = vadd.xlane.f32.xlu2 %v4262_v28 }
0x1030   : > { %v7619_v27 = vpop.permute.xlu1 %7618 }
0x1031   : > { %4338 = vrot.lane.b32.xlu0 %v12213_v50, %s8093_s23  ;;  %v7621_v55 = vunpack.i.h.bf16 %v7619_v27  ;;  %v7620_v29 = vunpack.i.l.bf16 %v7619_v27 }
0x1033   : > { %4312 = vmatpush.msra.mxu2 %v7621_v55 }
0x1035   : > { %4313 = vmatpush.msra.mxu2 %v7620_v29 }
0x1038   : > { %v4362_v6 = vpop.permute.xlu1 %4361 }
0x1039   : > { %4359 = vrot.lane.b32.xlu0 %v12214_v52, %s8093_s23  ;;  %7370 = vmatpush.xpose.msk.msrb.mxu1 %vm682_vm0, %v4362_v6 }
0x103d   : > { %4340 = vrot.lane.b32.xlu2 %v12215_v46, %s8093_s23 }
0x1090   : > { %v4261_v48 = vpop.xlane.xlu0 %4260 }
0x1091   : > { %7864 = vrcp.f32 %v4261_v48 }
0x1097   : > { %v7865_v26 = vpop.eup %7864 }
0x1098   : > { %v4267_v31 = vmul.f32 %v7865_v26, %v7861_v35  ;;  %v4264_v9 = vpop.xlane.xlu2 %4263  ;;  %v12222_v26 = vld [vmem:[#allocation25_spill] sm:$0xff] }
0x1099   : > { %7866 = vrcp.f32 %v4264_v9 }
0x109a   : > { %7368 = vmatmul.msk.f32.vlgmr.msra.gmra.mxu2 %vm682_vm0, %v4267_v31  ;;  %v12223_v31 = vld [vmem:[#allocation54_spill] sm:$0xff] }
0x109b   : > { %v7627_v9 = vpack.i.bf16 %v12223_v31, %v12222_v26  ;;  %v12239_v26 = vld [vmem:[#allocation101_spill] sm:$0xff] }
0x109c   : > { %v12240_v31 = vld [vmem:[#allocation69_spill] sm:$0xff] }
0x109f   : > { %v7867_v57 = vpop.eup %7866 }
0x10a0   : > { %v4268_v24 = vmul.f32 %v7867_v57, %v7863_v43  ;;  %v4341_v23 = vpop.permute.xlu2 %4340 }
0x10a2   : > { %7369 = vmatmul.msk.f32.gmra.mxu2 %vm682_vm0, %v4268_v24 }
0x10a3   : > { %v4339_v19 = vpop.permute.xlu0 %4338 }
0x10ab   : > { %v4360_v12 = vpop.permute.xlu0 %4359 }
0x10ac   : > { %7371 = vmatpush.xpose.msk.msrb.mxu1 %vm682_vm0, %v4360_v12 }
0x10af   : > { %7372 = vmatmul.msk.f32.vlgmr.msrb.gmra.mxu1 %vm682_vm0, %v4339_v19 }
0x10b7   : > { %7373 = vmatmul.msk.f32.gmra.mxu1 %vm682_vm0, %v4341_v23  ;;  %v12224_v23 = vld [vmem:[#allocation57_spill] sm:$0xff] }
0x112c   : > { %v4388_v25 = vpop.f32.mrf.mxu1 }
0x112d   : > { %v4394_v8 = vsel %vm682_vm0, %v4388_v25, -inf }
0x112e   : > { %4395 = vmax.xlane.f32.xlu2 %v4394_v8  ;;  %v12225_v8 = vld [vmem:[#allocation55_spill] sm:$0xff] }
0x1134   : > { %v4391_v0 = vpop.f32.mrf.mxu1 }
0x1135   : > { %v4397_v53 = vsel %vm682_vm0, %v4391_v0, -inf }
0x1136   : > { %4398 = vmax.xlane.f32.xlu0 %v4397_v53  ;;  %v12227_v53 = vld [vmem:[#allocation58_spill] sm:$0xff] }
0x114a   : > { %7623 = vrot.lane.b32.xlu0 %v7622_v13, %s8093_s23 }
0x1152   : > { %4506 = vrot.lane.b32.xlu0 %v12218_v22, %s8094_s26 }
0x11a1   : > { %v4396_v49 = vpop.xlane.xlu2 %4395 }
0x11a2   : > { %v4400_v15 = vsub.f32 %v4388_v25, %v4396_v49 }
0x11a4   : > { %v4402_v1 = vmul.f32 1.442695, %v4400_v15 }
0x11a6   : > { %7868 = vpow2.f32 %v4402_v1 }
0x11a9   : > { %v4399_v36 = vpop.xlane.xlu0 %4398 }
0x11aa   : > { %v4401_v56 = vsub.f32 %v4391_v0, %v4399_v36  ;;  %v12226_v0 = vld [vmem:[#allocation56_spill] sm:$0xff] }
0x11ac   : > { %v7869_v47 = vpop.eup %7868  ;;  %v4404_v63 = vmul.f32 1.442695, %v4401_v56 }
0x11ad   : > { %v4406_v34 = vsel %vm682_vm0, %v7869_v47, 0.0 }
0x11ae   : > { %7870 = vpow2.f32 %v4404_v63  ;;  %4407 = vadd.xlane.f32.xlu1 %v4406_v34 }
0x11b4   : > { %v7871_v54 = vpop.eup %7870 }
0x11b5   : > { %v4409_v38 = vsel %vm682_vm0, %v7871_v54, 0.0 }
0x11b6   : > { %4410 = vadd.xlane.f32.xlu2 %v4409_v38 }
0x11bc   : > { %v7624_v37 = vpop.permute.xlu0 %7623 }
0x11bd   : > { %v7626_v14 = vunpack.i.h.bf16 %v7624_v37  ;;  %v7625_v33 = vunpack.i.l.bf16 %v7624_v37 }
0x11bf   : > { %4459 = vmatpush.msrb.mxu3 %v7626_v14 }
0x11c1   : > { %4460 = vmatpush.msrb.mxu3 %v7625_v33  ;;  %v12228_v33 = vld [vmem:[#allocation59_spill] sm:$0xff] }
0x11c4   : > { %v4507_v18 = vpop.permute.xlu0 %4506 }
0x11c7   : > { %4485 = vrot.lane.b32.xlu1 %v12219_v30, %s8094_s26 }
0x11ce   : > { %4487 = vrot.lane.b32.xlu2 %v12220_v62, %s8094_s26 }
0x11cf   : > { %4508 = vrot.lane.b32.xlu1 %v12221_v11, %s8094_s26 }
0x1221   : > { %v4408_v32 = vpop.xlane.xlu1 %4407 }
0x1222   : > { %7872 = vrcp.f32 %v4408_v32  ;;  %v12229_v32 = vld [vmem:[#allocation60_spill] sm:$0xff] }
0x1228   : > { %v7873_v45 = vpop.eup %7872 }
0x1229   : > { %v4414_v17 = vmul.f32 %v7873_v45, %v7869_v47  ;;  %v4411_v42 = vpop.xlane.xlu2 %4410  ;;  %v7632_v45 = vpack.i.bf16 %v12229_v32, %v12228_v33 }
0x122a   : > { %7874 = vrcp.f32 %v4411_v42 }
0x122b   : > { %7374 = vmatmul.msk.f32.vlgmr.msrb.gmra.mxu3 %vm682_vm0, %v4414_v17 }
0x1230   : > { %v7875_v2 = vpop.eup %7874 }
0x1231   : > { %v4415_v3 = vmul.f32 %v7875_v2, %v7871_v54  ;;  %v4488_v43 = vpop.permute.xlu2 %4487 }
0x1233   : > { %7375 = vmatmul.msk.f32.gmra.mxu3 %vm682_vm0, %v4415_v3 }
0x1239   : > { %v4486_v35 = vpop.permute.xlu1 %4485 }
0x1241   : > { %v4509_v60 = vpop.permute.xlu1 %4508 }
0x1242   : > { %7376 = vmatpush.xpose.msk.msrb.mxu0 %vm682_vm0, %v4509_v60  ;;  %v12230_v60 = vld [vmem:[#allocation62_spill] sm:$0xff] }
0x1246   : > { %7377 = vmatpush.xpose.msk.msrb.mxu0 %vm682_vm0, %v4507_v18 }
0x1249   : > { %7378 = vmatmul.msk.f32.vlgmr.msrb.gmra.mxu0 %vm682_vm0, %v4486_v35 }
0x1251   : > { %7379 = vmatmul.msk.f32.gmra.mxu0 %vm682_vm0, %v4488_v43 }
0x12c6   : > { %v4535_v28 = vpop.f32.mrf.mxu0 }
0x12c7   : > { %v4541_v50 = vsel %vm682_vm0, %v4535_v28, -inf }
0x12c8   : > { %4542 = vmax.xlane.f32.xlu0 %v4541_v50 }
0x12ce   : > { %v4538_v52 = vpop.f32.mrf.mxu0 }
0x12cf   : > { %v4544_v46 = vsel %vm682_vm0, %v4538_v52, -inf }
0x12d0   : > { %4545 = vmax.xlane.f32.xlu2 %v4544_v46  ;;  %v12233_v46 = vld [vmem:[#allocation64_spill] sm:$0xff] }
0x12e8   : > { %7628 = vrot.lane.b32.xlu2 %v7627_v9, %s8094_s26  ;;  %v12241_v9 = vld [vmem:[#allocation75_spill] sm:$0xff] }
0x12f0   : > { %4653 = vrot.lane.b32.xlu2 %v12224_v23, %s8095_s7  ;;  %v12246_v23 = vld [vmem:[#allocation89_spill] sm:$0xff] }
0x133b   : > { %v4543_v27 = vpop.xlane.xlu0 %4542 }
0x133c   : > { %v4547_v55 = vsub.f32 %v4535_v28, %v4543_v27  ;;  %v12231_v28 = vld [vmem:[#allocation76_spill] sm:$0xff]  ;;  %v12234_v27 = vld [vmem:[#allocation74_spill] sm:$0xff] }
0x133e   : > { %v4549_v29 = vmul.f32 1.442695, %v4547_v55  ;;  %v12235_v55 = vld [vmem:[#allocation61_spill] sm:$0xff] }
0x1340   : > { %7876 = vpow2.f32 %v4549_v29  ;;  %v12236_v29 = vld [vmem:[#allocation90_spill] sm:$0xff] }
0x1343   : > { %v4546_v6 = vpop.xlane.xlu2 %4545 }
0x1344   : > { %v4548_v48 = vsub.f32 %v4538_v52, %v4546_v6  ;;  %v12232_v52 = vld [vmem:[#allocation67_spill] sm:$0xff] }
0x1345   : > { %v12237_v6 = vld [vmem:[#allocation63_spill] sm:$0xff] }
0x1346   : > { %v7877_v57 = vpop.eup %7876  ;;  %v4551_v24 = vmul.f32 1.442695, %v4548_v48  ;;  %v12238_v48 = vld [vmem:[#allocation70_spill] sm:$0xff] }
0x1347   : > { %v4553_v19 = vsel %vm682_vm0, %v7877_v57, 0.0 }
0x1348   : > { %7878 = vpow2.f32 %v4551_v24  ;;  %4554 = vadd.xlane.f32.xlu1 %v4553_v19  ;;  %v12243_v24 = vld [vmem:[#allocation73_spill] sm:$0xff]  ;;  %v12244_v19 = vld [vmem:[#allocation68_spill] sm:$0xff] }
0x134b   : > { %v7629_v44 = vpop.permute.xlu2 %7628 }
0x134c   : > { %v7631_v4 = vunpack.i.h.bf16 %v7629_v44  ;;  %v7630_v13 = vunpack.i.l.bf16 %v7629_v44  ;;  %v12251_v44 = vld [vmem:[#allocation115_spill] sm:$0xff] }
0x134e   : > { %v7879_v12 = vpop.eup %7878  ;;  %4606 = vmatpush.msrb.mxu2 %v7631_v4  ;;  %v12252_v4 = vld [vmem:[#allocation98_spill] sm:$0xff] }
0x134f   : > { %v4556_v25 = vsel %vm682_vm0, %v7879_v12, 0.0 }
0x1350   : > { %4557 = vadd.xlane.f32.xlu0 %v4556_v25  ;;  %4607 = vmatpush.msrb.mxu2 %v7630_v13  ;;  %v12247_v25 = vld [vmem:[#allocation92_spill] sm:$0xff]  ;;  %v12253_v13 = vld [vmem:[#allocation106_spill] sm:$0xff] }
0x1353   : > { %v4654_v34 = vpop.permute.xlu2 %4653 }
0x1361   : > { %4632 = vrot.lane.b32.xlu1 %v12225_v8, %s8095_s7  ;;  %v12248_v8 = vld [vmem:[#allocation111_spill] sm:$0xff] }
0x1364   : > { %4634 = vrot.lane.b32.xlu0 %v12226_v0, %s8095_s7  ;;  %v12249_v0 = vld [vmem:[#allocation87_spill] sm:$0xff] }
0x136c   : > { %4655 = vrot.lane.b32.xlu0 %v12227_v53, %s8095_s7  ;;  %v12250_v53 = vld [vmem:[#allocation95_spill] sm:$0xff] }
0x13bb   : > { %v4555_v22 = vpop.xlane.xlu1 %4554 }
0x13bc   : > { %7880 = vrcp.f32 %v4555_v22  ;;  %v12254_v22 = vld [vmem:[#allocation121_spill] sm:$0xff] }
0x13c2   : > { %v7881_v49 = vpop.eup %7880 }
0x13c3   : > { %v4561_v15 = vmul.f32 %v7881_v49, %v7877_v57  ;;  %v4558_v1 = vpop.xlane.xlu0 %4557  ;;  %v12242_v57 = vld [vmem:[#allocation96_spill] sm:$0xff] }
0x13c4   : > { %7882 = vrcp.f32 %v4558_v1  ;;  %v12255_v49 = vld [vmem:[#allocation104_spill] sm:$0xff] }
0x13c5   : > { %7380 = vmatmul.msk.f32.vlgmr.msrb.gmra.mxu2 %vm682_vm0, %v4561_v15  ;;  %v12256_v15 = vld [vmem:[#allocation93_spill] sm:$0xff]  ;;  %v12257_v1 = vld [vmem:[#allocation108_spill] sm:$0xff] }
0x13ca   : > { %v7883_v36 = vpop.eup %7882 }
0x13cb   : > { %v4562_v56 = vmul.f32 %v7883_v36, %v7879_v12  ;;  %v12245_v12 = vld [vmem:[#allocation100_spill] sm:$0xff] }
0x13cd   : > { %7381 = vmatmul.msk.f32.gmra.mxu2 %vm682_vm0, %v4562_v56 }
0x13d3   : > { %v4633_v54 = vpop.permute.xlu1 %4632 }
0x13d6   : > { %v4635_v47 = vpop.permute.xlu0 %4634 }
0x13de   : > { %v4656_v63 = vpop.permute.xlu0 %4655 }
0x13df   : > { %7382 = vmatpush.xpose.msk.msra.mxu1 %vm682_vm0, %v4656_v63  ;;  %v12258_v63 = vld [vmem:[#allocation114_spill] sm:$0xff] }
0x13e3   : > { %7383 = vmatpush.xpose.msk.msra.mxu1 %vm682_vm0, %v4654_v34  ;;  %v12259_v34 = vld [vmem:[#allocation118_spill] sm:$0xff] }
0x13e6   : > { %7384 = vmatmul.msk.f32.vlgmr.msra.gmra.mxu1 %vm682_vm0, %v4633_v54  ;;  %v12260_v54 = vld [vmem:[#allocation117_spill] sm:$0xff] }
0x13ee   : > { %7385 = vmatmul.msk.f32.gmra.mxu1 %vm682_vm0, %v4635_v47 }
0x1463   : > { %v4682_v38 = vpop.f32.mrf.mxu1 }
0x1464   : > { %v4688_v30 = vsel %vm682_vm0, %v4682_v38, -inf }
0x1465   : > { %4689 = vmax.xlane.f32.xlu1 %v4688_v30  ;;  %v12263_v30 = vld [vmem:[#allocation112_spill] sm:$0xff] }
0x146b   : > { %v4685_v62 = vpop.f32.mrf.mxu1 }
0x146c   : > { %v4691_v11 = vsel %vm682_vm0, %v4685_v62, -inf }
0x146d   : > { %4692 = vmax.xlane.f32.xlu2 %v4691_v11  ;;  %v12264_v11 = vld [vmem:[#allocation123_spill] sm:$0xff] }
0x1485   : > { %7633 = vrot.lane.b32.xlu2 %v7632_v45, %s8095_s7 }
0x148d   : > { %4781 = vrot.lane.b32.xlu2 %v12230_v60, %s8096_s19 }
0x1495   : > { %5096 = vrot.lane.b32.xlu2 %v12231_v28, %s8098_s30 }
0x149d   : > { %4926 = vrot.lane.b32.xlu2 %v12232_v52, %s8097_s29 }
0x14a5   : > { %5075 = vrot.lane.b32.xlu2 %v12234_v27, %s8098_s30 }
0x14ad   : > { %5879 = vrot.lane.b32.xlu2 %v12236_v29, %s8092_s22 }
0x14b5   : > { %6196 = vrot.lane.b32.xlu2 %v12239_v26, %s8094_s26  ;;  %v12269_v26 = vld [vmem:[#allocation84_spill] sm:$0xff] }
0x14bd   : > { %6026 = vrot.lane.b32.xlu2 %v12242_v57, %s8093_s23 }
0x14c5   : > { %6175 = vrot.lane.b32.xlu2 %v12245_v12, %s8094_s26 }
0x14cd   : > { %6341 = vrot.lane.b32.xlu2 %v12248_v8, %s8095_s7 }
0x14d5   : > { %6467 = vrot.lane.b32.xlu2 %v12251_v44, %s8096_s19 }
0x14d8   : > { %v4690_v37 = vpop.xlane.xlu1 %4689 }
0x14d9   : > { %v4694_v14 = vsub.f32 %v4682_v38, %v4690_v37  ;;  %v12261_v38 = vld [vmem:[#allocation109_spill] sm:$0xff]  ;;  %v12265_v37 = vld [vmem:[#allocation18_spill] sm:$0xff] }
0x14db   : > { %v4696_v17 = vmul.f32 1.442695, %v4694_v14 }
0x14dd   : > { %7884 = vpow2.f32 %v4696_v17  ;;  %6637 = vrot.lane.b32.xlu2 %v12254_v22, %s8097_s29 }
0x14e0   : > { %v4693_v42 = vpop.xlane.xlu2 %4692 }
0x14e1   : > { %v4695_v2 = vsub.f32 %v4685_v62, %v4693_v42 }
0x14e3   : > { %v7885_v3 = vpop.eup %7884  ;;  %v4698_v35 = vmul.f32 1.442695, %v4695_v2 }
0x14e4   : > { %v4700_v18 = vsel %vm682_vm0, %v7885_v3, 0.0 }
0x14e5   : > { %7886 = vpow2.f32 %v4698_v35  ;;  %4701 = vadd.xlane.f32.xlu0 %v4700_v18  ;;  %6782 = vrot.lane.b32.xlu2 %v10440_v58, %s8098_s30  ;;  %v12262_v58 = vld [vmem:[#allocation105_spill] sm:$0xff] }
0x14e8   : > { %v7634_v36 = vpop.permute.xlu2 %7633 }
0x14e9   : > { %v7636_v56 = vunpack.i.h.bf16 %v7634_v36  ;;  %v7635_v47 = vunpack.i.l.bf16 %v7634_v36 }
0x14eb   : > { %v7887_v43 = vpop.eup %7886  ;;  %4753 = vmatpush.msra.mxu3 %v7636_v56 }
0x14ec   : > { %v4703_v50 = vsel %vm682_vm0, %v7887_v43, 0.0 }
0x14ed   : > { %4704 = vadd.xlane.f32.xlu1 %v4703_v50  ;;  %6616 = vrot.lane.b32.xlu2 %v12259_v34, %s8097_s29  ;;  %v12267_v50 = vld [vmem:[#allocation83_spill] sm:$0xff] }
0x14ee   : > { %4754 = vmatpush.msra.mxu3 %v7635_v47  ;;  %v12271_v47 = vld [vmem:[#allocation65_spill] sm:$0xff] }
0x14f0   : > { %v4782_v45 = vpop.permute.xlu2 %4781 }
0x14f8   : > { %v5097_v35 = vpop.permute.xlu2 %5096 }
0x14f9   : > { %4802 = vrot.lane.b32.xlu0 %v12233_v46, %s8096_s19  ;;  %v12268_v46 = vld [vmem:[#allocation86_spill] sm:$0xff] }
0x1500   : > { %v4927_v60 = vpop.permute.xlu2 %4926 }
0x1501   : > { %4779 = vrot.lane.b32.xlu0 %v12235_v55, %s8096_s19 }
0x1506   : > { %4800 = vrot.lane.b32.xlu1 %v12237_v6, %s8096_s19 }
0x1509   : > { %4949 = vrot.lane.b32.xlu0 %v12238_v48, %s8097_s29 }
0x150e   : > { %4947 = vrot.lane.b32.xlu1 %v12240_v31, %s8097_s29 }
0x1511   : > { %5094 = vrot.lane.b32.xlu0 %v12241_v9, %s8098_s30 }
0x1516   : > { %5073 = vrot.lane.b32.xlu1 %v12243_v24, %s8098_s30  ;;  %v12270_v24 = vld [vmem:[#allocation82_spill] sm:$0xff] }
0x1519   : > { %4928 = vrot.lane.b32.xlu0 %v12244_v19, %s8097_s29 }
0x151e   : > { %5902 = vrot.lane.b32.xlu1 %v12246_v23, %s8092_s22 }
0x1521   : > { %5900 = vrot.lane.b32.xlu0 %v12247_v25, %s8092_s22 }
0x1526   : > { %5881 = vrot.lane.b32.xlu1 %v12249_v0, %s8092_s22 }
0x1529   : > { %6049 = vrot.lane.b32.xlu0 %v12250_v53, %s8093_s23 }
0x152e   : > { %6047 = vrot.lane.b32.xlu1 %v12252_v4, %s8093_s23 }
0x1531   : > { %6194 = vrot.lane.b32.xlu0 %v12253_v13, %s8094_s26 }
0x1536   : > { %6173 = vrot.lane.b32.xlu1 %v12255_v49, %s8094_s26 }
0x1539   : > { %6028 = vrot.lane.b32.xlu0 %v12256_v15, %s8093_s23 }
0x153e   : > { %6343 = vrot.lane.b32.xlu1 %v12257_v1, %s8095_s7 }
0x1541   : > { %6490 = vrot.lane.b32.xlu0 %v12258_v63, %s8096_s19  ;;  %v12272_v63 = vld [vmem:[#allocation66_spill] sm:$0xff] }
0x1542   : > { %v7637_v34 = vpack.i.bf16 %v12272_v63, %v12271_v47  ;;  %v12273_v63 = vld [vmem:[#allocation71_spill] sm:$0xff] }
0x1546   : > { %6488 = vrot.lane.b32.xlu1 %v12260_v54, %s8096_s19 }
0x1549   : > { %6320 = vrot.lane.b32.xlu0 %v12261_v38, %s8095_s7 }
0x154e   : > { %6322 = vrot.lane.b32.xlu1 %v12262_v58, %s8095_s7 }
0x1551   : > { %6469 = vrot.lane.b32.xlu0 %v12263_v30, %s8096_s19 }
0x1556   : > { %6784 = vrot.lane.b32.xlu1 %v10359_v40, %s8098_s30  ;;  %v12266_v40 = vld [vmem:[#allocation124_spill] sm:$0xff] }
0x1558   : > { %v4702_v62 = vpop.xlane.xlu0 %4701 }
0x1559   : > { %7888 = vrcp.f32 %v4702_v62  ;;  %6635 = vrot.lane.b32.xlu0 %v12264_v11, %s8097_s29 }
0x155e   : > { %6614 = vrot.lane.b32.xlu1 %v12265_v37, %s8097_s29 }
0x155f   : > { %v7889_v14 = vpop.eup %7888 }
0x1560   : > { %v4708_v33 = vmul.f32 %v7889_v14, %v7885_v3  ;;  %v4705_v32 = vpop.xlane.xlu1 %4704 }
0x1561   : > { %7890 = vrcp.f32 %v4705_v32  ;;  %6761 = vrot.lane.b32.xlu0 %v10397_v41, %s8098_s30 }
0x1562   : > { %7386 = vmatmul.msk.f32.vlgmr.msra.gmra.mxu3 %vm682_vm0, %v4708_v33 }
0x1566   : > { %6763 = vrot.lane.b32.xlu1 %v12266_v40, %s8098_s30 }
0x1567   : > { %v7891_v17 = vpop.eup %7890 }
0x1568   : > { %v4709_v42 = vmul.f32 %v7891_v17, %v7887_v43  ;;  %v5076_v43 = vpop.permute.xlu2 %5075 }
0x156a   : > { %7387 = vmatmul.msk.f32.gmra.mxu3 %vm682_vm0, %v4709_v42 }
0x156b   : > { %v4803_v2 = vpop.permute.xlu0 %4802 }
0x156c   : > { %7388 = vmatpush.xpose.msk.msra.mxu0 %vm682_vm0, %v4803_v2 }
0x1570   : > { %v5880_v29 = vpop.permute.xlu2 %5879 }
0x1573   : > { %v4780_v3 = vpop.permute.xlu0 %4779 }
0x1578   : > { %v4801_v18 = vpop.permute.xlu1 %4800  ;;  %v6197_v31 = vpop.permute.xlu2 %6196 }
0x1579   : > { %7389 = vmatpush.xpose.msk.msra.mxu0 %vm682_vm0, %v4801_v18 }
0x157b   : > { %v4950_v41 = vpop.permute.xlu0 %4949 }
0x157c   : > { %7390 = vmatmul.msk.f32.vlgmr.msra.gmra.mxu0 %vm682_vm0, %v4780_v3  ;;  %7394 = vmatpush.xpose.msk.msrb.mxu1 %vm682_vm0, %v4950_v41 }
0x157d   : > { %7400 = vmatpush.xpose.msk.msrb.mxu0 %vm682_vm0, %v5097_v35 }
0x1580   : > { %v4948_v28 = vpop.permute.xlu1 %4947  ;;  %v6027_v12 = vpop.permute.xlu2 %6026 }
0x1581   : > { %7395 = vmatpush.xpose.msk.msrb.mxu1 %vm682_vm0, %v4948_v28 }
0x1583   : > { %v5095_v52 = vpop.permute.xlu0 %5094 }
0x1584   : > { %7391 = vmatmul.msk.f32.gmra.mxu0 %vm682_vm0, %v4782_v45  ;;  %7396 = vmatmul.msk.f32.vlgmr.msrb.gmra.mxu1 %vm682_vm0, %v4927_v60 }
0x1585   : > { %7414 = vmatpush.xpose.msk.msra.mxu1 %vm682_vm0, %v12267_v50  ;;  %7401 = vmatpush.xpose.msk.msrb.mxu0 %vm682_vm0, %v5095_v52 }
0x1588   : > { %v5074_v27 = vpop.permute.xlu1 %5073  ;;  %v6176_v8 = vpop.permute.xlu2 %6175 }
0x1589   : > { %7415 = vmatpush.xpose.msk.msra.mxu1 %vm682_vm0, %v12268_v46 }
0x158b   : > { %v4929_v55 = vpop.permute.xlu0 %4928 }
0x158c   : > { %7397 = vmatmul.msk.f32.gmra.mxu1 %vm682_vm0, %v4929_v55  ;;  %7402 = vmatmul.msk.f32.vlgmr.msrb.gmra.mxu0 %vm682_vm0, %v5074_v27 }
0x1590   : > { %v5903_v6 = vpop.permute.xlu1 %5902  ;;  %v6342_v13 = vpop.permute.xlu2 %6341 }
0x1591   : > { %7420 = vmatpush.xpose.msk.msra.mxu0 %vm682_vm0, %v5903_v6 }
0x1593   : > { %v5901_v48 = vpop.permute.xlu0 %5900 }
0x1594   : > { %7416 = vmatmul.msk.f32.vlgmr.msra.gmra.mxu1 %vm682_vm0, %v12269_v26  ;;  %7403 = vmatmul.msk.f32.gmra.mxu0 %vm682_vm0, %v5076_v43 }
0x1595   : > { %7421 = vmatpush.xpose.msk.msra.mxu0 %vm682_vm0, %v5901_v48 }
0x1598   : > { %v5882_v9 = vpop.permute.xlu1 %5881  ;;  %v6468_v36 = vpop.permute.xlu2 %6467 }
0x1599   : > { %7432 = vmatpush.xpose.msk.msrb.mxu0 %vm682_vm0, %v6197_v31 }
0x159b   : > { %v6050_v57 = vpop.permute.xlu0 %6049 }
0x159c   : > { %7417 = vmatmul.msk.f32.gmra.mxu1 %vm682_vm0, %v12270_v24  ;;  %7422 = vmatmul.msk.f32.vlgmr.msra.gmra.mxu0 %vm682_vm0, %v5880_v29 }
0x159d   : > { %7426 = vmatpush.xpose.msk.msrb.mxu1 %vm682_vm0, %v6050_v57 }
0x15a0   : > { %v6048_v19 = vpop.permute.xlu1 %6047  ;;  %v6638_v30 = vpop.permute.xlu2 %6637 }
0x15a1   : > { %7427 = vmatpush.xpose.msk.msrb.mxu1 %vm682_vm0, %v6048_v19 }
0x15a3   : > { %v6195_v23 = vpop.permute.xlu0 %6194 }
0x15a4   : > { %7428 = vmatmul.msk.f32.vlgmr.msrb.gmra.mxu1 %vm682_vm0, %v6027_v12  ;;  %7423 = vmatmul.msk.f32.gmra.mxu0 %vm682_vm0, %v5882_v9 }
0x15a5   : > { %7433 = vmatpush.xpose.msk.msrb.mxu0 %vm682_vm0, %v6195_v23 }
0x15a8   : > { %v6174_v25 = vpop.permute.xlu1 %6173  ;;  %v6783_v14 = vpop.permute.xlu2 %6782 }
0x15ab   : > { %v6029_v0 = vpop.permute.xlu0 %6028 }
0x15ac   : > { %7434 = vmatmul.msk.f32.vlgmr.msrb.gmra.mxu0 %vm682_vm0, %v6174_v25  ;;  %7429 = vmatmul.msk.f32.gmra.mxu1 %vm682_vm0, %v6029_v0 }
0x15b0   : > { %v6344_v53 = vpop.permute.xlu1 %6343  ;;  %v6617_v40 = vpop.permute.xlu2 %6616 }
0x15b1   : > { %7438 = vmatpush.xpose.msk.msra.mxu1 %vm682_vm0, %v6344_v53 }
0x15b3   : > { %v6491_v22 = vpop.permute.xlu0 %6490 }
0x15b4   : > { %7435 = vmatmul.msk.f32.gmra.mxu0 %vm682_vm0, %v6176_v8 }
0x15b5   : > { %7439 = vmatpush.xpose.msk.msra.mxu1 %vm682_vm0, %v6342_v13  ;;  %7444 = vmatpush.xpose.msk.msra.mxu0 %vm682_vm0, %v6491_v22 }
0x15b8   : > { %v6489_v15 = vpop.permute.xlu1 %6488 }
0x15b9   : > { %7445 = vmatpush.xpose.msk.msra.mxu0 %vm682_vm0, %v6489_v15  ;;  %7450 = vmatpush.xpose.msk.msrb.mxu1 %vm682_vm0, %v6638_v30 }
0x15bb   : > { %v6321_v56 = vpop.permute.xlu0 %6320 }
0x15bc   : > { %7446 = vmatmul.msk.f32.vlgmr.msra.gmra.mxu0 %vm682_vm0, %v6468_v36  ;;  %7440 = vmatmul.msk.f32.vlgmr.msra.gmra.mxu1 %vm682_vm0, %v6321_v56 }
0x15c0   : > { %v6323_v58 = vpop.permute.xlu1 %6322 }
0x15c3   : > { %v6470_v38 = vpop.permute.xlu0 %6469 }
0x15c4   : > { %7447 = vmatmul.msk.f32.gmra.mxu0 %vm682_vm0, %v6470_v38  ;;  %7441 = vmatmul.msk.f32.gmra.mxu1 %vm682_vm0, %v6323_v58 }
0x15c8   : > { %v6785_v37 = vpop.permute.xlu1 %6784 }
0x15c9   : > { %7456 = vmatpush.xpose.msk.msrb.mxu0 %vm682_vm0, %v6785_v37 }
0x15cb   : > { %v6636_v11 = vpop.permute.xlu0 %6635 }
0x15cc   : > { %7451 = vmatpush.xpose.msk.msrb.mxu1 %vm682_vm0, %v6636_v11 }
0x15cd   : > { %7457 = vmatpush.xpose.msk.msrb.mxu0 %vm682_vm0, %v6783_v14 }
0x15d0   : > { %v6615_v45 = vpop.permute.xlu1 %6614 }
0x15d1   : > { %7452 = vmatmul.msk.f32.vlgmr.msrb.gmra.mxu1 %vm682_vm0, %v6615_v45 }
0x15d3   : > { %v6762_v32 = vpop.permute.xlu0 %6761 }
0x15d4   : > { %7458 = vmatmul.msk.f32.vlgmr.msrb.gmra.mxu0 %vm682_vm0, %v6762_v32 }
0x15d8   : > { %v6764_v9 = vpop.permute.xlu1 %6763 }
0x15d9   : > { %7453 = vmatmul.msk.f32.gmra.mxu1 %vm682_vm0, %v6617_v40 }
0x15dc   : > { %7459 = vmatmul.msk.f32.gmra.mxu0 %vm682_vm0, %v6764_v9 }
0x15f9   : > { %v4829_v44 = vpop.f32.mrf.mxu0 }
0x15fa   : > { %v4835_v4 = vsel %vm682_vm0, %v4829_v44, -inf }
0x15fb   : > { %4836 = vmax.xlane.f32.xlu0 %v4835_v4 }
0x1601   : > { %v4832_v49 = vpop.f32.mrf.mxu0  ;;  %v4976_v54 = vpop.f32.mrf.mxu1 }
0x1602   : > { %v4838_v1 = vsel %vm682_vm0, %v4832_v49, -inf  ;;  %v4982_v27 = vsel %vm682_vm0, %v4976_v54, -inf }
0x1603   : > { %4839 = vmax.xlane.f32.xlu2 %v4838_v1 }
0x1609   : > { %v10698_v62 = vpop.f32.mrf.mxu1  ;;  %v10709_v42 = vpop.f32.mrf.mxu0 }
0x160a   : > { %v5129_v2 = vsel %vm682_vm0, %v10709_v42, -inf  ;;  %v4985_v31 = vsel %vm682_vm0, %v10698_v62, -inf }
0x160f   : > { %7638 = vrot.lane.b32.xlu0 %v7637_v34, %s8096_s19  ;;  %v12274_v34 = vld [vmem:[#allocation72_spill] sm:$0xff] }
0x1611   : > { %v10702_v33 = vpop.f32.mrf.mxu1  ;;  %v5126_v36 = vpop.f32.mrf.mxu0 }
0x1612   : > { %v5132_v56 = vsel %vm682_vm0, %v5126_v36, -inf  ;;  %v5792_v47 = vsel %vm682_vm0, %v10702_v33, -inf }
0x1619   : > { %v10707_v17 = vpop.f32.mrf.mxu1  ;;  %v10741_v38 = vpop.f32.mrf.mxu0 }
0x1621   : > { %v10714_v35 = vpop.f32.mrf.mxu1  ;;  %v10746_v37 = vpop.f32.mrf.mxu0 }
0x1622   : > { %v6082_v3 = vsel %vm682_vm0, %v10714_v35, -inf  ;;  %v5938_v14 = vsel %vm682_vm0, %v10746_v37, -inf }
0x1629   : > { %v10754_v40 = vpop.f32.mrf.mxu0 }
0x1639   : > { %5130 = vmax.xlane.f32.xlu0 %v5129_v2  ;;  %v10758_v2 = vpop.f32.mrf.mxu0 }
0x1641   : > { %6083 = vmax.xlane.f32.xlu0 %v6082_v3  ;;  %v10760_v3 = vpop.f32.mrf.mxu1 }
0x166e   : > { %v4837_v60 = vpop.xlane.xlu0 %4836 }
0x166f   : > { %v4841_v18 = vsub.f32 %v4829_v44, %v4837_v60  ;;  %v6085_v60 = vsel %vm682_vm0, %v10760_v3, -inf }
0x1671   : > { %v4843_v41 = vmul.f32 1.442695, %v4841_v18  ;;  %v5795_v18 = vsel %vm682_vm0, %v10707_v17, -inf }
0x1673   : > { %7892 = vpow2.f32 %v4843_v41  ;;  %v10766_v41 = vpop.f32.mrf.mxu1 }
0x1676   : > { %v4840_v28 = vpop.xlane.xlu2 %4839 }
0x1677   : > { %v4842_v43 = vsub.f32 %v4832_v49, %v4840_v28  ;;  %v10768_v28 = vpop.f32.mrf.mxu0 }
0x1679   : > { %v7893_v50 = vpop.eup %7892  ;;  %v4845_v52 = vmul.f32 1.442695, %v4842_v43  ;;  %v6376_v43 = vsel %vm682_vm0, %v10766_v41, -inf }
0x167a   : > { %v4847_v46 = vsel %vm682_vm0, %v7893_v50, 0.0 }
0x167b   : > { %7894 = vpow2.f32 %v4845_v52  ;;  %4848 = vadd.xlane.f32.xlu1 %v4847_v46  ;;  %v10774_v52 = vpop.f32.mrf.mxu1 }
0x167f   : > { %v10776_v46 = vpop.f32.mrf.mxu0 }
0x1681   : > { %v7895_v55 = vpop.eup %7894  ;;  %v7639_v29 = vpop.permute.xlu0 %7638 }
0x1682   : > { %v4850_v6 = vsel %vm682_vm0, %v7895_v55, 0.0  ;;  %v7641_v48 = vunpack.i.h.bf16 %v7639_v29  ;;  %v7640_v26 = vunpack.i.l.bf16 %v7639_v29 }
0x1683   : > { %4983 = vmax.xlane.f32.xlu1 %v4982_v27  ;;  %4851 = vadd.xlane.f32.xlu2 %v4850_v6  ;;  %v6379_v27 = vsel %vm682_vm0, %v10774_v52, -inf  ;;  %v10782_v29 = vpop.f32.mrf.mxu1 }
0x1684   : > { %4900 = vmatpush.msra.mxu2 %v7641_v48  ;;  %v6670_v48 = vsel %vm682_vm0, %v10782_v29, -inf }
0x1686   : > { %4901 = vmatpush.msra.mxu2 %v7640_v26 }
0x1687   : > { %v10784_v6 = vpop.f32.mrf.mxu0 }
0x1688   : > { %v6817_v26 = vsel %vm682_vm0, %v10784_v6, -inf }
0x168b   : > { %4986 = vmax.xlane.f32.xlu2 %v4985_v31 }
0x16ac   : > { %v5131_v58 = vpop.xlane.xlu0 %5130 }
0x16ad   : > { %v5135_v30 = vsub.f32 %v10709_v42, %v5131_v58  ;;  %v6229_v42 = vsel %vm682_vm0, %v10754_v40, -inf  ;;  %v12277_v58 = vld [vmem:[#allocation77_spill] sm:$0xff] }
0x16af   : > { %v5137_v11 = vmul.f32 1.442695, %v5135_v30  ;;  %v12278_v30 = vld [vmem:[#allocation78_spill] sm:$0xff] }
0x16ee   : > { %v4849_v57 = vpop.xlane.xlu1 %4848 }
0x16ef   : > { %7896 = vrcp.f32 %v4849_v57 }
0x16f5   : > { %v7897_v24 = vpop.eup %7896 }
0x16f6   : > { %v4855_v19 = vmul.f32 %v7897_v24, %v7893_v50  ;;  %v4984_v12 = vpop.xlane.xlu1 %4983  ;;  %v4852_v23 = vpop.xlane.xlu2 %4851  ;;  %v6523_v50 = vsel %vm682_vm0, %v10768_v28, -inf }
0x16f7   : > { %v4988_v25 = vsub.f32 %v4976_v54, %v4984_v12  ;;  %7898 = vrcp.f32 %v4852_v23  ;;  %v7642_v54 = vpack.i.bf16 %v12274_v34, %v12273_v63 }
0x16f8   : > { %7392 = vmatmul.msk.f32.vlgmr.msra.gmra.mxu2 %vm682_vm0, %v4855_v19 }
0x16f9   : > { %v4990_v8 = vmul.f32 1.442695, %v4988_v25 }
0x16fb   : > { %7900 = vpow2.f32 %v4990_v8 }
0x16fd   : > { %v7899_v0 = vpop.eup %7898 }
0x16fe   : > { %v4987_v53 = vpop.xlane.xlu2 %4986  ;;  %v4856_v44 = vmul.f32 %v7899_v0, %v7895_v55  ;;  %v6526_v55 = vsel %vm682_vm0, %v10776_v46, -inf }
0x16ff   : > { %v4989_v4 = vsub.f32 %v10698_v62, %v4987_v53  ;;  %v5935_v62 = vsel %vm682_vm0, %v10741_v38, -inf }
0x1700   : > { %7393 = vmatmul.msk.f32.gmra.mxu2 %vm682_vm0, %v4856_v44 }
0x1701   : > { %v10727_v13 = vpop.eup %7900  ;;  %v4992_v22 = vmul.f32 1.442695, %v4989_v4 }
0x1702   : > { %v4994_v49 = vsel %vm682_vm0, %v10727_v13, 0.0 }
0x1703   : > { %7902 = vpow2.f32 %v4992_v22  ;;  %4995 = vadd.xlane.f32.xlu1 %v4994_v49 }
0x1704   : > { %7904 = vpow2.f32 %v5137_v11  ;;  %v12279_v11 = vld [vmem:[#allocation91_spill] sm:$0xff] }
0x1709   : > { %v10731_v15 = vpop.eup %7902 }
0x170a   : > { %v4997_v1 = vsel %vm682_vm0, %v10731_v15, 0.0  ;;  %v10750_v32 = vpop.eup %7904 }
0x170b   : > { %4998 = vadd.xlane.f32.xlu2 %v4997_v1  ;;  %v5141_v45 = vsel %vm682_vm0, %v10750_v32, 0.0  ;;  %v12275_v1 = vld [vmem:[#allocation85_spill] sm:$0xff] }
0x1713   : > { %5133 = vmax.xlane.f32.xlu2 %v5132_v56 }
0x171b   : > { %5793 = vmax.xlane.f32.xlu2 %v5792_v47  ;;  %v6232_v47 = vsel %vm682_vm0, %v10758_v2, -inf }
0x171c   : > { %7643 = vrot.lane.b32.xlu1 %v7642_v54, %s8097_s29 }
0x1723   : > { %5936 = vmax.xlane.f32.xlu2 %v5935_v62  ;;  %v7647_v62 = vpack.i.bf16 %v12278_v30, %v12277_v58 }
0x172b   : > { %5939 = vmax.xlane.f32.xlu2 %v5938_v14  ;;  %v12280_v14 = vld [vmem:[#allocation94_spill] sm:$0xff] }
0x1733   : > { %5142 = vadd.xlane.f32.xlu2 %v5141_v45  ;;  %v7652_v45 = vpack.i.bf16 %v12280_v14, %v12279_v11  ;;  %v12284_v11 = vld [vmem:[#allocation113_spill] sm:$0xff] }
0x173b   : > { %6230 = vmax.xlane.f32.xlu2 %v6229_v42 }
0x1743   : > { %6086 = vmax.xlane.f32.xlu2 %v6085_v60 }
0x1746   : > { %5796 = vmax.xlane.f32.xlu1 %v5795_v18 }
0x174b   : > { %6377 = vmax.xlane.f32.xlu2 %v6376_v43 }
0x174e   : > { %6524 = vmax.xlane.f32.xlu1 %v6523_v50 }
0x1753   : > { %6380 = vmax.xlane.f32.xlu2 %v6379_v27 }
0x1756   : > { %6527 = vmax.xlane.f32.xlu1 %v6526_v55 }
0x175b   : > { %6671 = vmax.xlane.f32.xlu2 %v6670_v48 }
0x175e   : > { %6818 = vmax.xlane.f32.xlu1 %v6817_v26 }
0x1776   : > { %v4996_v9 = vpop.xlane.xlu1 %4995 }
0x1777   : > { %7906 = vrcp.f32 %v4996_v9 }
0x177d   : > { %v7907_v25 = vpop.eup %7906 }
0x177e   : > { %v4999_v31 = vpop.xlane.xlu2 %4998  ;;  %v5002_v22 = vmul.f32 %v7907_v25, %v10727_v13 }
0x1786   : > { %v5134_v57 = vpop.xlane.xlu2 %5133 }
0x1787   : > { %v5136_v24 = vsub.f32 %v5126_v36, %v5134_v57 }
0x1789   : > { %v5139_v19 = vmul.f32 1.442695, %v5136_v24 }
0x178b   : > { %7908 = vpow2.f32 %v5139_v19 }
0x178c   : > { %7910 = vrcp.f32 %v4999_v31  ;;  %v6084_v31 = vpop.xlane.xlu0 %6083 }
0x178e   : > { %v7644_v12 = vpop.permute.xlu1 %7643  ;;  %v5794_v23 = vpop.xlane.xlu2 %5793 }
0x178f   : > { %v7646_v8 = vunpack.i.h.bf16 %v7644_v12  ;;  %v5798_v0 = vsub.f32 %v10702_v33, %v5794_v23  ;;  %v7645_v44 = vunpack.i.l.bf16 %v7644_v12  ;;  %v12276_v33 = vld [vmem:[#allocation88_spill] sm:$0xff]  ;;  %v10827_v23 = vpop.f32.mrf.mxu1 }
0x1791   : > { %v10791_v53 = vpop.eup %7908  ;;  %v5800_v4 = vmul.f32 1.442695, %v5798_v0  ;;  %5047 = vmatpush.msrb.mxu3 %v7646_v8 }
0x1792   : > { %v5144_v49 = vsel %vm682_vm0, %v10791_v53, 0.0  ;;  %v7911_v36 = vpop.eup %7910 }
0x1793   : > { %7912 = vpow2.f32 %v5800_v4  ;;  %5145 = vadd.xlane.f32.xlu0 %v5144_v49  ;;  %5048 = vmatpush.msrb.mxu3 %v7645_v44  ;;  %v5003_v63 = vmul.f32 %v7911_v36, %v10731_v15  ;;  %v10839_v49 = vpop.f32.mrf.mxu0 }
0x1794   : > { %7398 = vmatmul.msk.f32.vlgmr.msrb.gmra.mxu3 %vm682_vm0, %v5002_v22 }
0x1795   : > { %5853 = vmatpush.msra.mxu3 %v12275_v1  ;;  %v6820_v1 = vsel %vm682_vm0, %v10839_v49, -inf }
0x1796   : > { %v5937_v34 = vpop.xlane.xlu2 %5936 }
0x1797   : > { %5854 = vmatpush.msra.mxu3 %v12276_v33  ;;  %v5941_v9 = vsub.f32 %v10741_v38, %v5937_v34  ;;  %v12282_v34 = vld [vmem:[#allocation102_spill] sm:$0xff] }
0x1799   : > { %v10799_v56 = vpop.eup %7912  ;;  %v5943_v24 = vmul.f32 1.442695, %v5941_v9 }
0x179a   : > { %v5804_v13 = vsel %vm682_vm0, %v10799_v56, 0.0 }
0x179b   : > { %6233 = vmax.xlane.f32.xlu0 %v6232_v47  ;;  %5805 = vadd.xlane.f32.xlu2 %v5804_v13 }
0x179c   : > { %7399 = vmatmul.msk.f32.gmra.mxu3 %vm682_vm0, %v5003_v63 }
0x179e   : > { %v5940_v54 = vpop.xlane.xlu2 %5939 }
0x179f   : > { %v5942_v43 = vsub.f32 %v10746_v37, %v5940_v54 }
0x17a1   : > { %v5945_v27 = vmul.f32 1.442695, %v5942_v43 }
0x17a6   : > { %v10812_v42 = vpop.xlane.xlu2 %5142 }
0x17ae   : > { %v6231_v18 = vpop.xlane.xlu2 %6230 }
0x17af   : > { %7648 = vrot.lane.b32.xlu0 %v7647_v62, %s8098_s30  ;;  %v6235_v8 = vsub.f32 %v10754_v40, %v6231_v18  ;;  %v12283_v62 = vld [vmem:[#allocation110_spill] sm:$0xff] }
0x17b0   : > { %v7667_v14 = vpack.i.bf16 %v12284_v11, %v12283_v62 }
0x17b1   : > { %v6237_v4 = vmul.f32 1.442695, %v6235_v8 }
0x17b3   : > { %7653 = vrot.lane.b32.xlu2 %v7652_v45, %s8092_s22 }
0x17b6   : > { %v6087_v48 = vpop.xlane.xlu2 %6086 }
0x17b9   : > { %v5797_v60 = vpop.xlane.xlu1 %5796 }
0x17ba   : > { %v5799_v15 = vsub.f32 %v10707_v17, %v5797_v60  ;;  %v6088_v17 = vsub.f32 %v10714_v35, %v6084_v31  ;;  %v6673_v35 = vsel %vm682_vm0, %v10827_v23, -inf  ;;  %v12285_v60 = vld [vmem:[#allocation103_spill] sm:$0xff] }
0x17bc   : > { %v5802_v50 = vmul.f32 1.442695, %v5799_v15  ;;  %v6090_v19 = vmul.f32 1.442695, %v6088_v17  ;;  %v12286_v15 = vld [vmem:[#allocation107_spill] sm:$0xff] }
0x17bd   : > { %v7662_v18 = vpack.i.bf16 %v12286_v15, %v12285_v60  ;;  %v4315_v15 = vpop.f32.mrf.mxu2 }
0x17be   : > { %7914 = vpow2.f32 %v5802_v50  ;;  %v6378_v12 = vpop.xlane.xlu2 %6377 }
0x17bf   : > { %7916 = vpow2.f32 %v5945_v27  ;;  %v6382_v25 = vsub.f32 %v10766_v41, %v6378_v12  ;;  %v6089_v41 = vsub.f32 %v10760_v3, %v6087_v48  ;;  %v12281_v3 = vld [vmem:[#allocation97_spill] sm:$0xff] }
0x17c0   : > { %7918 = vpow2.f32 %v5943_v24  ;;  %v7657_v54 = vpack.i.bf16 %v12282_v34, %v12281_v3  ;;  %v12287_v3 = vld [vmem:[#allocation116_spill] sm:$0xff] }
0x17c1   : > { %7920 = vpow2.f32 %v6090_v19  ;;  %v6384_v0 = vmul.f32 1.442695, %v6382_v25  ;;  %v6092_v33 = vmul.f32 1.442695, %v6089_v41  ;;  %v6525_v19 = vpop.xlane.xlu1 %6524  ;;  %v12288_v34 = vld [vmem:[#allocation120_spill] sm:$0xff] }
0x17c3   : > { %7922 = vpow2.f32 %v6384_v0 }
0x17c4   : > { %v10817_v55 = vpop.eup %7914  ;;  %7924 = vpow2.f32 %v6237_v4 }
0x17c5   : > { %v5807_v26 = vsel %vm682_vm0, %v10817_v55, 0.0  ;;  %v10822_v57 = vpop.eup %7916  ;;  %7926 = vpow2.f32 %v6092_v33 }
0x17c6   : > { %5808 = vadd.xlane.f32.xlu1 %v5807_v26  ;;  %v5950_v37 = vsel %vm682_vm0, %v10822_v57, 0.0  ;;  %v10831_v38 = vpop.eup %7918  ;;  %v6381_v45 = vpop.xlane.xlu2 %6380 }
0x17c7   : > { %v10835_v44 = vpop.eup %7920  ;;  %v5947_v22 = vsel %vm682_vm0, %v10831_v38, 0.0  ;;  %v6383_v9 = vsub.f32 %v10774_v52, %v6381_v45 }
0x17c8   : > { %v6094_v40 = vsel %vm682_vm0, %v10835_v44, 0.0 }
0x17c9   : > { %v10846_v36 = vpop.eup %7922 }
0x17ca   : > { %v10848_v47 = vpop.eup %7924  ;;  %v6388_v13 = vsel %vm682_vm0, %v10846_v36, 0.0 }
0x17cb   : > { %v6241_v63 = vsel %vm682_vm0, %v10848_v47, 0.0  ;;  %v10856_v58 = vpop.eup %7926 }
0x17cc   : > { %v6097_v30 = vsel %vm682_vm0, %v10856_v58, 0.0 }
0x17ce   : > { %5951 = vadd.xlane.f32.xlu1 %v5950_v37  ;;  %v10866_v43 = vpop.xlane.xlu2 %6671  ;;  %v6386_v37 = vmul.f32 1.442695, %v6383_v9 }
0x17d6   : > { %6674 = vmax.xlane.f32.xlu1 %v6673_v35 }
0x17d9   : > { %5948 = vadd.xlane.f32.xlu0 %v5947_v22 }
0x17dc   : > { %6095 = vadd.xlane.f32.xlu2 %v6094_v40 }
0x17de   : > { %6821 = vmax.xlane.f32.xlu1 %v6820_v1 }
0x17e4   : > { %6389 = vadd.xlane.f32.xlu2 %v6388_v13 }
0x17e6   : > { %6242 = vadd.xlane.f32.xlu1 %v6241_v63 }
0x17ed   : > { %7658 = vrot.lane.b32.xlu0 %v7657_v54, %s8093_s23  ;;  %v7672_v54 = vpack.i.bf16 %v12288_v34, %v12287_v3 }
0x17ee   : > { %6098 = vadd.xlane.f32.xlu1 %v6097_v30 }
0x17fc   : > { %7668 = vrot.lane.b32.xlu2 %v7667_v14, %s8095_s7  ;;  %v10896_v14 = vpop.f32.mrf.mxu3 }
0x1806   : > { %v5146_v50 = vpop.xlane.xlu0 %5145 }
0x1807   : > { %7663 = vrot.lane.b32.xlu1 %v7662_v18, %s8094_s26 }
0x180e   : > { %v6234_v27 = vpop.xlane.xlu0 %6233  ;;  %v5806_v48 = vpop.xlane.xlu2 %5805 }
0x180f   : > { %v6236_v26 = vsub.f32 %v10758_v2, %v6234_v27  ;;  %7928 = vrcp.f32 %v5806_v48  ;;  %v6529_v2 = vsub.f32 %v10768_v28, %v6525_v19 }
0x1811   : > { %v6239_v31 = vmul.f32 1.442695, %v6236_v26  ;;  %v6531_v22 = vmul.f32 1.442695, %v6529_v2 }
0x1813   : > { %7930 = vpow2.f32 %v6239_v31 }
0x1814   : > { %7932 = vpow2.f32 %v6386_v37 }
0x1815   : > { %v7929_v17 = vpop.eup %7928  ;;  %7934 = vrcp.f32 %v10812_v42 }
0x1816   : > { %v5812_v24 = vmul.f32 %v7929_v17, %v10799_v56  ;;  %v6528_v56 = vpop.xlane.xlu1 %6527  ;;  %7936 = vrcp.f32 %v5146_v50  ;;  %v7654_v1 = vpop.permute.xlu2 %7653 }
0x1817   : > { %v7656_v42 = vunpack.i.h.bf16 %v7654_v1  ;;  %v7655_v28 = vunpack.i.l.bf16 %v7654_v1  ;;  %7938 = vpow2.f32 %v6531_v22  ;;  %v6530_v33 = vsub.f32 %v10776_v46, %v6528_v56  ;;  %v10904_v50 = vpop.f32.mrf.mxu3  ;;  %v10912_v17 = vpop.f32.mrf.mxu2 }
0x1818   : > { %7418 = vmatmul.msk.f32.vlgmr.msra.gmra.mxu3 %vm682_vm0, %v5812_v24 }
0x1819   : > { %v10873_v12 = vpop.eup %7930  ;;  %v6533_v63 = vmul.f32 1.442695, %v6530_v33 }
0x181a   : > { %v6244_v25 = vsel %vm682_vm0, %v10873_v12, 0.0  ;;  %v10879_v52 = vpop.eup %7932 }
0x181b   : > { %6245 = vadd.xlane.f32.xlu0 %v6244_v25  ;;  %v7935_v35 = vpop.eup %7934  ;;  %v6391_v40 = vsel %vm682_vm0, %v10879_v52, 0.0  ;;  %7940 = vpow2.f32 %v6533_v63 }
0x181c   : > { %v5149_v41 = vmul.f32 %v7935_v35, %v10750_v32  ;;  %v7937_v13 = vpop.eup %7936 }
0x181d   : > { %v10888_v62 = vpop.eup %7938  ;;  %v5150_v32 = vmul.f32 %v7937_v13, %v10791_v53 }
0x181e   : > { %v6819_v30 = vpop.xlane.xlu1 %6818  ;;  %v6535_v46 = vsel %vm682_vm0, %v10888_v62, 0.0 }
0x181f   : > { %v6823_v11 = vsub.f32 %v10784_v6, %v6819_v30  ;;  %v7682_v6 = vpack.i.bf16 %v10471_v59, %v10417_v39  ;;  %v10914_v24 = vpop.f32.mrf.mxu3  ;;  %v6676_v39 = vsub.f32 %v10782_v29, %v10866_v43  ;;  %v4609_v37 = vpop.f32.mrf.mxu2 }
0x1821   : > { %v7649_v8 = vpop.permute.xlu0 %7648  ;;  %v6825_v45 = vmul.f32 1.442695, %v6823_v11  ;;  %v10898_v60 = vpop.eup %7940  ;;  %v6678_v19 = vmul.f32 1.442695, %v6676_v39 }
0x1822   : > { %v7651_v0 = vunpack.i.h.bf16 %v7649_v8  ;;  %v7650_v4 = vunpack.i.l.bf16 %v7649_v8  ;;  %v6538_v53 = vsel %vm682_vm0, %v10898_v60, 0.0 }
0x1823   : > { %7942 = vpow2.f32 %v6825_v45 }
0x1824   : > { %5194 = vmatpush.msrb.mxu2 %v7651_v0 }
0x1825   : > { %6392 = vadd.xlane.f32.xlu2 %v6391_v40  ;;  %v12289_v40 = vld [vmem:[#allocation19_spill] sm:$0xff] }
0x1826   : > { %5195 = vmatpush.msrb.mxu2 %v7650_v4 }
0x1827   : > { %7404 = vmatmul.msk.f32.vlgmr.msrb.gmra.mxu2 %vm682_vm0, %v5149_v41  ;;  %v10920_v25 = vpop.f32.mrf.mxu3  ;;  %v10924_v0 = vpop.f32.mrf.mxu2  ;;  %v7677_v41 = vpack.i.bf16 %v10337_v20, %v12289_v40 }
0x1828   : > { %6000 = vmatpush.msra.mxu2 %v7655_v28 }
0x1829   : > { %v10906_v27 = vpop.eup %7942 }
0x182a   : > { %6001 = vmatpush.msra.mxu2 %v7656_v42  ;;  %v6829_v26 = vsel %vm682_vm0, %v10906_v27, 0.0 }
0x182f   : > { %7673 = vrot.lane.b32.xlu0 %v7672_v54, %s8096_s19  ;;  %7405 = vmatmul.msk.f32.gmra.mxu2 %vm682_vm0, %v5150_v32  ;;  %v4756_v4 = vpop.f32.mrf.mxu3 }
0x1831   : > { %6536 = vadd.xlane.f32.xlu1 %v6535_v46 }
0x1839   : > { %v5809_v18 = vpop.xlane.xlu1 %5808  ;;  %6539 = vadd.xlane.f32.xlu1 %v6538_v53 }
0x183a   : > { %7944 = vrcp.f32 %v5809_v18 }
0x183d   : > { %7683 = vrot.lane.b32.xlu2 %v7682_v6, %s8098_s30 }
0x1840   : > { %v7945_v48 = vpop.eup %7944 }
0x1841   : > { %v5952_v31 = vpop.xlane.xlu1 %5951  ;;  %6830 = vadd.xlane.f32.xlu1 %v6829_v26  ;;  %v5813_v9 = vmul.f32 %v7945_v48, %v10817_v55  ;;  %v4759_v48 = vpop.f32.mrf.mxu3 }
0x1843   : > { %7419 = vmatmul.msk.f32.gmra.mxu3 %vm682_vm0, %v5813_v9 }
0x1845   : > { %5205 = vrot.lane.b32.xlu2 %v4315_v15, %s8098_s30 }
0x1849   : > { %v6675_v59 = vpop.xlane.xlu1 %6674 }
0x184a   : > { %v6677_v18 = vsub.f32 %v10827_v23, %v6675_v59 }
0x184c   : > { %v5949_v2 = vpop.xlane.xlu0 %5948 }
0x184d   : > { %7946 = vrcp.f32 %v5949_v2  ;;  %5221 = vrot.lane.b32.xlu2 %v4609_v37, %s8096_s19 }
0x184e   : > { %7948 = vpow2.f32 %v6678_v19 }
0x184f   : > { %v6096_v55 = vpop.xlane.xlu2 %6095  ;;  %7950 = vrcp.f32 %v5952_v31 }
0x1851   : > { %v6822_v8 = vpop.xlane.xlu1 %6821 }
0x1852   : > { %v6824_v35 = vsub.f32 %v10839_v49, %v6822_v8 }
0x1853   : > { %v7947_v56 = vpop.eup %7946 }
0x1854   : > { %v5955_v29 = vmul.f32 %v7947_v56, %v10831_v38  ;;  %v6827_v43 = vmul.f32 1.442695, %v6824_v35  ;;  %v10927_v22 = vpop.eup %7948  ;;  %v4903_v38 = vpop.f32.mrf.mxu2 }
0x1855   : > { %5229 = vrot.lane.b32.xlu2 %v4756_v4, %s8095_s7  ;;  %v6682_v49 = vsel %vm682_vm0, %v10927_v22, 0.0  ;;  %v7951_v42 = vpop.eup %7950 }
0x1856   : > { %7424 = vmatmul.msk.f32.vlgmr.msra.gmra.mxu2 %vm682_vm0, %v5955_v29  ;;  %7952 = vpow2.f32 %v6827_v43  ;;  %v5956_v33 = vmul.f32 %v7951_v42, %v10822_v57 }
0x1857   : > { %v6390_v1 = vpop.xlane.xlu2 %6389  ;;  %7954 = vrcp.f32 %v6096_v55 }
0x1859   : > { %v6243_v28 = vpop.xlane.xlu1 %6242  ;;  %6683 = vadd.xlane.f32.xlu0 %v6682_v49 }
0x185a   : > { %7678 = vrot.lane.b32.xlu1 %v7677_v41, %s8097_s29 }
0x185c   : > { %v10937_v13 = vpop.eup %7952  ;;  %v4906_v35 = vpop.f32.mrf.mxu2 }
0x185d   : > { %5237 = vrot.lane.b32.xlu2 %v4903_v38, %s8094_s26  ;;  %v7955_v3 = vpop.eup %7954  ;;  %v6832_v30 = vsel %vm682_vm0, %v10937_v13, 0.0 }
0x185e   : > { %7425 = vmatmul.msk.f32.gmra.mxu2 %vm682_vm0, %v5956_v33  ;;  %v6102_v57 = vmul.f32 %v7955_v3, %v10835_v44  ;;  %v6680_v44 = vmul.f32 1.442695, %v6677_v18  ;;  %v12292_v18 = vld [vmem:[#allocation35_spill] sm:$0xff] }
0x185f   : > { %v7659_v20 = vpop.permute.xlu0 %7658  ;;  %v7669_v63 = vpop.permute.xlu2 %7668 }
0x1860   : > { %v7661_v34 = vunpack.i.h.bf16 %v7659_v20  ;;  %v7660_v54 = vunpack.i.l.bf16 %v7659_v20  ;;  %v7670_v11 = vunpack.i.l.bf16 %v7669_v63  ;;  %v7671_v46 = vunpack.i.h.bf16 %v7669_v63 }
0x1861   : > { %v6099_v32 = vpop.xlane.xlu1 %6098  ;;  %6833 = vadd.xlane.f32.xlu0 %v6832_v30 }
0x1862   : > { %7956 = vrcp.f32 %v6099_v32  ;;  %6147 = vmatpush.msrb.mxu3 %v7660_v54 }
0x1863   : > { %7958 = vrcp.f32 %v6390_v1 }
0x1864   : > { %6148 = vmatpush.msrb.mxu3 %v7661_v34  ;;  %7960 = vrcp.f32 %v6243_v28 }
0x1865   : > { %7430 = vmatmul.msk.f32.vlgmr.msrb.gmra.mxu3 %vm682_vm0, %v6102_v57  ;;  %7962 = vpow2.f32 %v6680_v44 }
0x1866   : > { %6441 = vmatpush.msra.mxu3 %v7670_v11 }
0x1868   : > { %v7957_v45 = vpop.eup %7956  ;;  %6442 = vmatpush.msra.mxu3 %v7671_v46 }
0x1869   : > { %v6103_v15 = vmul.f32 %v7957_v45, %v10856_v58  ;;  %v7959_v53 = vpop.eup %7958  ;;  %v5050_v58 = vpop.f32.mrf.mxu3 }
0x186a   : > { %v6396_v6 = vmul.f32 %v7959_v53, %v10846_v36  ;;  %v7961_v31 = vpop.eup %7960  ;;  %v12291_v53 = vld [vmem:[#allocation34_spill] sm:$0xff] }
0x186b   : > { %v6249_v37 = vmul.f32 %v7961_v31, %v10848_v47  ;;  %v10955_v23 = vpop.eup %7962 }
0x186c   : > { %v6685_v36 = vsel %vm682_vm0, %v10955_v23, 0.0 }
0x186d   : > { %7431 = vmatmul.msk.f32.gmra.mxu3 %vm682_vm0, %v6103_v15 }
0x1871   : > { %v5053_v59 = vpop.f32.mrf.mxu3 }
0x1875   : > { %7442 = vmatmul.msk.f32.vlgmr.msra.gmra.mxu3 %vm682_vm0, %v6396_v6  ;;  %5213 = vrot.lane.b32.xlu0 %v10914_v24, %s8097_s29  ;;  %v7351_v6 = vrot.slane %v12292_v18, 11 }
0x1879   : > { %v7664_v26 = vpop.permute.xlu1 %7663 }
0x187a   : > { %v7665_v9 = vunpack.i.l.bf16 %v7664_v26  ;;  %v7666_v39 = vunpack.i.h.bf16 %v7664_v26  ;;  %v12294_v26 = vld [vmem:[#allocation37_spill] sm:$0xff] }
0x187b   : > { %v7353_v31 = vrot.slane %v12294_v26, 11 }
0x187c   : > { %6294 = vmatpush.msrb.mxu2 %v7665_v9  ;;  %v10993_v9 = vld [vmem:[#allocation5] ss:$0 sm:$0xff] }
0x187d   : > { %5245 = vrot.lane.b32.xlu0 %v5050_v58, %s8093_s23 }
0x187e   : > { %6295 = vmatpush.msrb.mxu2 %v7666_v39  ;;  %v12295_v39 = vld [vmem:[#allocation30_spill] sm:$0xff] }
0x187f   : > { %7436 = vmatmul.msk.f32.vlgmr.msrb.gmra.mxu2 %vm682_vm0, %v6249_v37  ;;  %v10998_v37 = vld [vmem:[#allocation5 + $0x1] ss:$0 sm:$0xff] }
0x1884   : > { %6686 = vadd.xlane.f32.xlu1 %v6685_v36 }
0x1885   : > { %5215 = vrot.lane.b32.xlu0 %v10920_v25, %s8097_s29 }
0x188d   : > { %5231 = vrot.lane.b32.xlu0 %v4759_v48, %s8095_s7  ;;  %v12293_v48 = vld [vmem:[#allocation36_spill] sm:$0xff] }
0x188e   : > { %v6246_v24 = vpop.xlane.xlu0 %6245  ;;  %v7352_v44 = vrot.slane %v12293_v48, 11 }
0x188f   : > { %7964 = vrcp.f32 %v6246_v24  ;;  %v3632_v24 = vsel %vm287_vm1, 0.0, %v7351_v6  ;;  %v11048_v6 = vld [vmem:[#allocation5 + $0x4] ss:$0 sm:$0xff] }
0x1895   : > { %v7965_v47 = vpop.eup %7964  ;;  %5247 = vrot.lane.b32.xlu0 %v5053_v59, %s8093_s23  ;;  %v3633_v59 = vsel %vm287_vm1, 0.0, %v7352_v44 }
0x1896   : > { %v6250_v19 = vmul.f32 %v7965_v47, %v10873_v12  ;;  %v3634_v47 = vsel %vm287_vm1, 0.0, %v7353_v31 }
0x1898   : > { %v6393_v2 = vpop.xlane.xlu2 %6392  ;;  %7437 = vmatmul.msk.f32.gmra.mxu2 %vm682_vm0, %v6250_v19 }
0x1899   : > { %7966 = vrcp.f32 %v6393_v2 }
0x189d   : > { %5207 = vrot.lane.b32.xlu1 %v10912_v17, %s8098_s30 }
0x189f   : > { %v7967_v55 = vpop.eup %7966 }
0x18a0   : > { %v6397_v25 = vmul.f32 %v7967_v55, %v10879_v52  ;;  %v7684_v56 = vpop.permute.xlu2 %7683  ;;  %v11007_v55 = vsel %vm297_vm2, %v3632_v24, 0.0 }
0x18a1   : > { %v7674_v8 = vpop.permute.xlu0 %7673  ;;  %v7685_v43 = vunpack.i.l.bf16 %v7684_v56  ;;  %v7686_v12 = vunpack.i.h.bf16 %v7684_v56 }
0x18a2   : > { %7443 = vmatmul.msk.f32.gmra.mxu3 %vm682_vm0, %v6397_v25  ;;  %v7676_v4 = vunpack.i.h.bf16 %v7674_v8  ;;  %v7675_v29 = vunpack.i.l.bf16 %v7674_v8  ;;  %v11012_v25 = vld [vmem:[#allocation5 + $0x2] ss:$0 sm:$0xff] }
0x18a4   : > { %v6537_v40 = vpop.xlane.xlu1 %6536  ;;  %6588 = vmatpush.msra.mxu2 %v7675_v29 }
0x18a5   : > { %7968 = vrcp.f32 %v6537_v40 }
0x18a6   : > { %6589 = vmatpush.msra.mxu2 %v7676_v4  ;;  %v3649_v4 = vmul.f32 %v10993_v9, %v10203_v7 }
0x18a8   : > { %6882 = vmatpush.msrb.mxu2 %v7685_v43  ;;  %v5206_v20 = vpop.permute.xlu2 %5205 }
0x18a9   : > { %v5259_v58 = vsel %vm682_vm0, %v10896_v14, %v5206_v20  ;;  %v11010_v14 = vsel %vm297_vm2, %v3633_v59, 0.0 }
0x18aa   : > { %6883 = vmatpush.msrb.mxu2 %v7686_v12  ;;  %v5197_v41 = vpop.f32.mrf.mxu2  ;;  %v3651_v12 = vmul.f32 %v10993_v9, %v11007_v55 }
0x18ab   : > { %v7969_v17 = vpop.eup %7968  ;;  %5253 = vrot.lane.b32.xlu2 %v5197_v41, %s8092_s22  ;;  %v3652_v41 = vmul.f32 %v10993_v9, %v11010_v14 }
0x18ac   : > { %v6543_v52 = vmul.f32 %v7969_v17, %v10888_v62  ;;  %v6540_v1 = vpop.xlane.xlu1 %6539  ;;  %v3667_v17 = vmul.f32 %v10998_v37, %v10203_v7 }
0x18ad   : > { %7970 = vrcp.f32 %v6540_v1 }
0x18ae   : > { %7448 = vmatmul.msk.f32.vlgmr.msra.gmra.mxu2 %vm682_vm0, %v6543_v52 }
0x18b0   : > { %v5222_v32 = vpop.permute.xlu2 %5221 }
0x18b2   : > { %v5200_v62 = vpop.f32.mrf.mxu2 }
0x18b3   : > { %v7971_v49 = vpop.eup %7970  ;;  %5223 = vrot.lane.b32.xlu2 %v10924_v0, %s8096_s19 }
0x18b4   : > { %v6831_v42 = vpop.xlane.xlu1 %6830  ;;  %v6544_v28 = vmul.f32 %v7971_v49, %v10898_v60  ;;  %v3669_v49 = vmul.f32 %v10998_v37, %v11007_v55 }
0x18b5   : > { %7972 = vrcp.f32 %v6831_v42  ;;  %v3670_v42 = vmul.f32 %v10998_v37, %v11010_v14 }
0x18b6   : > { %7449 = vmatmul.msk.f32.gmra.mxu2 %vm682_vm0, %v6544_v28 }
0x18b8   : > { %v5230_v45 = vpop.permute.xlu2 %5229 }
0x18bb   : > { %v7973_v38 = vpop.eup %7972  ;;  %5239 = vrot.lane.b32.xlu2 %v4906_v35, %s8094_s26  ;;  %v11015_v35 = vsel %vm297_vm2, %v3634_v47, 0.0 }
0x18bc   : > { %v6837_v33 = vmul.f32 %v7973_v38, %v10906_v27  ;;  %v10982_v27 = vpop.f32.mrf.mxu3 }
0x18be   : > { %7460 = vmatmul.msk.f32.vlgmr.msrb.gmra.mxu2 %vm682_vm0, %v6837_v33  ;;  %v3683_v33 = vrot.slane %v3667_v17, 1 }
0x18c0   : > { %v5238_v28 = vpop.permute.xlu2 %5237 }
0x18c3   : > { %5255 = vrot.lane.b32.xlu2 %v5200_v62, %s8092_s22  ;;  %v3709_v62 = vmul.f32 %v11012_v25, %v10203_v7 }
0x18c6   : > { %v10987_v15 = vpop.f32.mrf.mxu3 }
0x18c7   : > { %12290 = vst [vmem:[#allocation81_spill] sm:$0xff] %v10987_v15 }
0x18cc   : > { %v6684_v63 = vpop.xlane.xlu0 %6683  ;;  %v7679_v3 = vpop.permute.xlu1 %7678 }
0x18cd   : > { %7974 = vrcp.f32 %v6684_v63  ;;  %v7680_v0 = vunpack.i.l.bf16 %v7679_v3  ;;  %v7681_v34 = vunpack.i.h.bf16 %v7679_v3  ;;  %v11041_v63 = vld [vmem:[#allocation5 + $0x3] ss:$0 sm:$0xff] }
0x18ce   : > { %v3752_v47 = vmul.f32 %v11041_v63, %v11007_v55 }
0x18cf   : > { %6735 = vmatpush.msrb.mxu3 %v7680_v0 }
0x18d1   : > { %6736 = vmatpush.msrb.mxu3 %v7681_v34  ;;  %v3685_v34 = vrot.slane %v3669_v49, 1 }
0x18d3   : > { %v7975_v60 = vpop.eup %7974 }
0x18d4   : > { %v6690_v54 = vmul.f32 %v7975_v60, %v10927_v22  ;;  %v6834_v30 = vpop.xlane.xlu0 %6833  ;;  %v7350_v22 = vrot.slane %v12291_v53, 11  ;;  %v3686_v60 = vrot.slane %v3670_v42, 1 }
0x18d5   : > { %7976 = vrcp.f32 %v6834_v30  ;;  %v3711_v30 = vmul.f32 %v11012_v25, %v11007_v55 }
0x18d6   : > { %7454 = vmatmul.msk.f32.vlgmr.msrb.gmra.mxu3 %vm682_vm0, %v6690_v54  ;;  %v3631_v36 = vsel %vm287_vm1, 0.0, %v7350_v22  ;;  %v3699_v54 = vadd.f32 %v3683_v33, %v3649_v4  ;;  %v11072_v33 = vld [vmem:[#allocation5 + $0x6] ss:$0 sm:$0xff] }
0x18d7   : > { %v3639_v2 = vsel %vm297_vm2, %v3631_v36, 0.0  ;;  %v3727_v44 = vrot.slane %v3711_v30, 2  ;;  %v11051_v36 = vld [vmem:[#allocation5 + $0x5] ss:$0 sm:$0xff] }
0x18d8   : > { %v3650_v29 = vmul.f32 %v10993_v9, %v3639_v2  ;;  %v3668_v1 = vmul.f32 %v10998_v37, %v3639_v2  ;;  %v3710_v20 = vmul.f32 %v11012_v25, %v3639_v2  ;;  %v3769_v17 = vmul.f32 %v11048_v6, %v3639_v2 }
0x18d9   : > { %v6003_v11 = vpop.f32.mrf.mxu2 }
0x18da   : > { %6893 = vrot.lane.b32.xlu1 %v6003_v11, %s8098_s30  ;;  %v3684_v0 = vrot.slane %v3668_v1, 1  ;;  %v3725_v11 = vrot.slane %v3709_v62, 2  ;;  %v3726_v22 = vrot.slane %v3710_v20, 2  ;;  %v3771_v1 = vmul.f32 %v11048_v6, %v11010_v14 }
0x18db   : > { %v7977_v57 = vpop.eup %7976  ;;  %v3785_v62 = vrot.slane %v3769_v17, 1 }
0x18dc   : > { %v6838_v46 = vmul.f32 %v7977_v57, %v10937_v13  ;;  %v7354_v13 = vrot.slane %v12295_v39, 11  ;;  %v3700_v57 = vadd.f32 %v3684_v0, %v3650_v29  ;;  %v3812_v0 = vmul.f32 %v11051_v36, %v11007_v55 }
0x18de   : > { %7461 = vmatmul.msk.f32.gmra.mxu2 %vm682_vm0, %v6838_v46  ;;  %v3635_v19 = vsel %vm287_vm1, 0.0, %v7354_v13  ;;  %v3701_v46 = vadd.f32 %v3685_v34, %v3651_v12  ;;  %v3751_v13 = vmul.f32 %v11041_v63, %v3639_v2  ;;  %v3742_v59 = vadd.f32 %v3726_v22, %v3700_v57 }
0x18df   : > { %v11018_v56 = vsel %vm297_vm2, %v3635_v19, 0.0  ;;  %v3753_v19 = vmul.f32 %v11041_v63, %v11010_v14 }
0x18e7   : > { %v5214_v8 = vpop.permute.xlu0 %5213 }
0x18e8   : > { %v5261_v43 = vsel %vm1871_vm3, %v5259_v58, %v5214_v8  ;;  %v6150_v40 = vpop.f32.mrf.mxu3  ;;  %v3741_v58 = vadd.f32 %v3725_v11, %v3699_v54  ;;  %v3754_v8 = vmul.f32 %v11041_v63, %v11015_v35  ;;  %v3814_v54 = vmul.f32 %v11051_v36, %v11015_v35 }
0x18e9   : > { %v5263_v52 = vsel %vm1874_vm4, %v5261_v43, %v5222_v32  ;;  %6901 = vrot.lane.b32.xlu0 %v6150_v40, %s8097_s29  ;;  %v3712_v32 = vmul.f32 %v11012_v25, %v11010_v14  ;;  %v3743_v43 = vadd.f32 %v3727_v44, %v3701_v46  ;;  %v11080_v46 = vld [vmem:[#allocation5 + $0x7] ss:$0 sm:$0xff] }
0x18ea   : > { %v5265_v38 = vsel %vm1877_vm5, %v5263_v52, %v5230_v45  ;;  %v3702_v45 = vadd.f32 %v3686_v60, %v3652_v41  ;;  %v3759_v12 = vadd.f32 %v3751_v13, %v3741_v58  ;;  %v3760_v41 = vadd.f32 %v3752_v47, %v3742_v59 }
0x18eb   : > { %v5267_v3 = vsel %vm1880_vm6, %v5265_v38, %v5238_v28  ;;  %v3728_v31 = vrot.slane %v3712_v32, 2  ;;  %v3770_v52 = vmul.f32 %v11048_v6, %v11007_v55  ;;  %v3761_v49 = vadd.f32 %v3753_v19, %v3743_v43  ;;  %v11088_v19 = vld [vmem:[#allocation5 + $0x8] ss:$0 sm:$0xff] }
0x18ec   : > { %v3772_v28 = vmul.f32 %v11048_v6, %v11015_v35  ;;  %v3811_v38 = vmul.f32 %v11051_v36, %v3639_v2  ;;  %v3813_v60 = vmul.f32 %v11051_v36, %v11010_v14  ;;  %v3801_v32 = vadd.f32 %v3785_v62, %v3759_v12 }
0x18ed   : > { %v3744_v40 = vadd.f32 %v3728_v31, %v3702_v45  ;;  %v3786_v20 = vrot.slane %v3770_v52, 1  ;;  %v3828_v2 = vrot.slane %v3812_v0, 2  ;;  %v3830_v44 = vrot.slane %v3814_v54, 2 }
0x18ee   : > { %v3788_v34 = vrot.slane %v3772_v28, 1  ;;  %v3827_v30 = vrot.slane %v3811_v38, 2  ;;  %v3829_v22 = vrot.slane %v3813_v60, 2  ;;  %v3853_v31 = vmul.f32 %v11072_v33, %v11007_v55 }
0x18ef   : > { %v5246_v24 = vpop.permute.xlu0 %5245  ;;  %v3762_v42 = vadd.f32 %v3754_v8, %v3744_v40  ;;  %v3802_v11 = vadd.f32 %v3786_v20, %v3760_v41  ;;  %v3854_v59 = vmul.f32 %v11072_v33, %v11010_v14  ;;  %v3855_v47 = vmul.f32 %v11072_v33, %v11015_v35 }
0x18f0   : > { %v11060_v4 = vsel %vm1883_vm7, %v5267_v3, %v5246_v24  ;;  %v11062_v29 = vpop.f32.mrf.mxu3  ;;  %v3787_v3 = vrot.slane %v3771_v1, 1  ;;  %v3843_v13 = vadd.f32 %v3827_v30, %v3801_v32  ;;  %v3856_v12 = vmul.f32 %v11072_v33, %v11018_v56 }
0x18f1   : > { %v3804_v45 = vadd.f32 %v3788_v34, %v3762_v42  ;;  %v3844_v24 = vadd.f32 %v3828_v2, %v3802_v11  ;;  %v3871_v52 = vmul.f32 %v11080_v46, %v11007_v55  ;;  %v3872_v1 = vmul.f32 %v11080_v46, %v11010_v14 }
0x18f2   : > { %v3803_v57 = vadd.f32 %v3787_v3, %v3761_v49  ;;  %v3861_v41 = vadd.f32 %v3853_v31, %v3843_v13  ;;  %v11097_v49 = vpop.f32.mrf.mxu2  ;;  %v3873_v38 = vmul.f32 %v11080_v46, %v11015_v35  ;;  %v3874_v62 = vmul.f32 %v11080_v46, %v11018_v56 }
0x18f3   : > { %v3846_v40 = vadd.f32 %v3830_v44, %v3804_v45  ;;  %v3862_v17 = vadd.f32 %v3854_v59, %v3844_v24  ;;  %v3887_v20 = vrot.slane %v3871_v52, 1  ;;  %v3888_v3 = vrot.slane %v3872_v1, 1  ;;  %v12296_v59 = vld [vmem:[#allocation31_spill] sm:$0xff]  ;;  %v12298_v52 = vld [vmem:[#allocation33_spill] sm:$0xff] }
0x18f4   : > { %v3845_v43 = vadd.f32 %v3829_v22, %v3803_v57  ;;  %v3913_v0 = vmul.f32 %v11088_v19, %v11007_v55  ;;  %v3914_v34 = vmul.f32 %v11088_v19, %v11010_v14  ;;  %v3889_v60 = vrot.slane %v3873_v38, 1 }
0x18f5   : > { %v3864_v28 = vadd.f32 %v3856_v12, %v3846_v40  ;;  %v3890_v54 = vrot.slane %v3874_v62, 1  ;;  %v3915_v30 = vmul.f32 %v11088_v19, %v11015_v35  ;;  %v3916_v32 = vmul.f32 %v11088_v19, %v11018_v56  ;;  %v12297_v40 = vld [vmem:[#allocation32_spill] sm:$0xff] }
0x18f6   : > { %v3863_v42 = vadd.f32 %v3855_v47, %v3845_v43  ;;  %v3903_v11 = vadd.f32 %v3887_v20, %v3861_v41  ;;  %v3904_v57 = vadd.f32 %v3888_v3, %v3862_v17  ;;  %v3929_v2 = vrot.slane %v3913_v0, 2  ;;  %v11119_v17 = vld [vmem:[%s11929_s2] ss:$0 sm:$0xff] }
0x18f7   : > { %v6687_v58 = vpop.xlane.xlu1 %6686  ;;  %v3930_v45 = vrot.slane %v3914_v34, 2  ;;  %v3906_v31 = vadd.f32 %v3890_v54, %v3864_v28  ;;  %v3932_v55 = vrot.slane %v3916_v32, 2  ;;  %v7355_v47 = vrot.slane %v12296_v59, 11 }
0x18f8   : > { %7978 = vrcp.f32 %v6687_v58  ;;  %v6444_v8 = vpop.f32.mrf.mxu3  ;;  %v3905_v44 = vadd.f32 %v3889_v60, %v3863_v42  ;;  %v3931_v58 = vrot.slane %v3915_v30, 2  ;;  %v3945_v14 = vadd.f32 %v3929_v2, %v3903_v11 }
0x18f9   : > { %6917 = vrot.lane.b32.xlu1 %v6444_v8, %s8095_s7  ;;  %v3946_v24 = vadd.f32 %v3930_v45, %v3904_v57  ;;  %v3948_v43 = vadd.f32 %v3932_v55, %v3906_v31  ;;  %v7356_v12 = vrot.slane %v12297_v40, 11  ;;  %v7357_v41 = vrot.slane %v12298_v52, 11 }
0x18fa   : > { %v3947_v8 = vadd.f32 %v3931_v58, %v3905_v44  ;;  %v3953_v1 = vadd.f32 %v11119_v17, %v3945_v14  ;;  %v3636_v42 = vsel %vm287_vm1, 0.0, %v7355_v47  ;;  %v3653_v28 = vmul.f32 %v10993_v9, %v11015_v35 }
0x18fb   : > { %v3956_v20 = vadd.f32 %v11119_v17, %v3948_v43  ;;  %v3637_v3 = vsel %vm287_vm1, 0.0, %v7356_v12  ;;  %v3638_v0 = vsel %vm287_vm1, 0.0, %v7357_v41  ;;  %v11132_v34 = vsel %vm297_vm2, %v3636_v42, 0.0 }
0x18fc   : > { %v3955_v62 = vadd.f32 %v11119_v17, %v3947_v8  ;;  %v11135_v60 = vsel %vm297_vm2, %v3637_v3, 0.0  ;;  %v11138_v54 = vsel %vm297_vm2, %v3638_v0, 0.0  ;;  %v3654_v30 = vmul.f32 %v10993_v9, %v11018_v56 }
0x18fd   : > { %v3655_v32 = vmul.f32 %v10993_v9, %v11132_v34  ;;  %v3656_v11 = vmul.f32 %v10993_v9, %v11135_v60  ;;  %v3671_v57 = vmul.f32 %v10998_v37, %v11015_v35  ;;  %v3672_v2 = vmul.f32 %v10998_v37, %v11018_v56 }
0x18fe   : > { %v7979_v22 = vpop.eup %7978  ;;  %v3674_v44 = vmul.f32 %v10998_v37, %v11135_v60  ;;  %v3713_v31 = vmul.f32 %v11012_v25, %v11015_v35  ;;  %v3714_v58 = vmul.f32 %v11012_v25, %v11018_v56  ;;  %v3715_v14 = vmul.f32 %v11012_v25, %v11132_v34  ;;  %v11162_v35 = vld.sshfl [vmem:[#allocation1] sm:$0xff pattern:$0x73625140] }
0x18ff   : > { %v6691_v13 = vmul.f32 %v7979_v22, %v10955_v23  ;;  %v3954_v23 = vadd.f32 %v11119_v17, %v3946_v24  ;;  %v3673_v22 = vmul.f32 %v10998_v37, %v11132_v34  ;;  %v3687_v55 = vrot.slane %v3671_v57, 1  ;;  %12299 = vst [vmem:[#allocation125_spill] sm:$0xff] %v11162_v35 }
0x1900   : > { %v3690_v37 = vrot.slane %v3674_v44, 1  ;;  %v3730_v51 = vrot.slane %v3714_v58, 2  ;;  %v3774_v58 = vmul.f32 %v11048_v6, %v11132_v34 }
0x1901   : > { %7455 = vmatmul.msk.f32.gmra.mxu3 %vm682_vm0, %v6691_v13  ;;  %v3688_v13 = vrot.slane %v3672_v2, 1  ;;  %v3689_v12 = vrot.slane %v3673_v22, 1  ;;  %v3703_v41 = vadd.f32 %v3687_v55, %v3653_v28  ;;  %v3731_v22 = vrot.slane %v3715_v14, 2 }
0x1902   : > { %v6297_v38 = vpop.f32.mrf.mxu2  ;;  %v3706_v2 = vadd.f32 %v3690_v37, %v3656_v11 }
0x1903   : > { %6909 = vrot.lane.b32.xlu2 %v6297_v38, %s8096_s19  ;;  %v3704_v42 = vadd.f32 %v3688_v13, %v3654_v30  ;;  %v3705_v57 = vadd.f32 %v3689_v12, %v3655_v32  ;;  %v3755_v30 = vmul.f32 %v11041_v63, %v11018_v56  ;;  %v3758_v32 = vmul.f32 %v11041_v63, %v11138_v54 }
0x1904   : > { %v3775_v13 = vmul.f32 %v11048_v6, %v11135_v60  ;;  %v3815_v12 = vmul.f32 %v11051_v36, %v11018_v56 }
0x1905   : > { %v5254_v45 = vpop.permute.xlu2 %5253  ;;  %v3747_v11 = vadd.f32 %v3731_v22, %v3705_v57  ;;  %v3817_v57 = vmul.f32 %v11051_v36, %v11135_v60 }
0x1906   : > { %v5271_v9 = vsel %vm1886_vm8, %v11060_v4, %v5254_v45  ;;  %v3716_v4 = vmul.f32 %v11012_v25, %v11135_v60  ;;  %v3729_v45 = vrot.slane %v3713_v31, 2  ;;  %v3757_v25 = vmul.f32 %v11041_v63, %v11135_v60 }
0x1907   : > { %v5275_v24 = vrot.slane %v5271_v9, 2  ;;  %v5276_v47 = vrot.slane %v5271_v9, 4  ;;  %v5277_v8 = vrot.slane %v5271_v9, 6  ;;  %v5287_v43 = vadd.f32 %v5271_v9, %v3953_v1  ;;  %v11170_v1 = vld.sshfl [vmem:[#allocation1 + $0x20] sm:$0xff pattern:$0x73625140] }
0x1908   : > { %12300 = vst [vmem:[#allocation21_spill] sm:$0xff] %v11170_v1  ;;  %v3732_v28 = vrot.slane %v3716_v4, 2  ;;  %v3773_v31 = vmul.f32 %v11048_v6, %v11018_v56  ;;  %v3765_v14 = vadd.f32 %v3757_v25, %v3747_v11  ;;  %v3833_v22 = vrot.slane %v3817_v57, 2  ;;  %v11359_v1 = vld [vmem:[#allocation5 + $0x3] ss:$0 sm:$0xff] }
0x1909   : > { %v5288_v38 = vadd.f32 %v5275_v24, %v3954_v23  ;;  %v11164_v3 = vadd.f32 %v5276_v47, %v3955_v62  ;;  %v11166_v0 = vadd.f32 %v5277_v8, %v3956_v20  ;;  %7026 = vst [vmem:[#allocation1 + $0x2] ss:$4 sm:$0xff] %v5287_v43  ;;  %v3756_v23 = vmul.f32 %v11041_v63, %v11132_v34 }
0x190a   : > { %v3745_v62 = vadd.f32 %v3729_v45, %v3703_v41  ;;  %v3746_v20 = vadd.f32 %v3730_v51, %v3704_v42  ;;  %v3748_v44 = vadd.f32 %v3732_v28, %v3706_v2  ;;  %v3776_v51 = vmul.f32 %v11048_v6, %v11138_v54  ;;  %12323 = vst [vmem:[#allocation58_spill] sm:$0xff] %v11359_v1 }
0x190b   : > { %7029 = vst [vmem:[#allocation1 + $0x22] ss:$4 sm:$0xff] %v5288_v38  ;;  %v3789_v47 = vrot.slane %v3773_v31, 1  ;;  %v3790_v63 = vrot.slane %v3774_v58, 1  ;;  %v3791_v8 = vrot.slane %v3775_v13, 1  ;;  %v3816_v42 = vmul.f32 %v11051_v36, %v11132_v34 }
0x190c   : > { %v3763_v9 = vadd.f32 %v3755_v30, %v3745_v62  ;;  %v3764_v55 = vadd.f32 %v3756_v23, %v3746_v20  ;;  %v3766_v24 = vadd.f32 %v3758_v32, %v3748_v44  ;;  %v3792_v43 = vrot.slane %v3776_v51, 1 }
0x190d   : > { %v3807_v38 = vadd.f32 %v3791_v8, %v3765_v14  ;;  %v3818_v6 = vmul.f32 %v11051_v36, %v11138_v54  ;;  %v3831_v2 = vrot.slane %v3815_v12, 2  ;;  %v3832_v45 = vrot.slane %v3816_v42, 2 }
0x190e   : > { %v3805_v37 = vadd.f32 %v3789_v47, %v3763_v9  ;;  %v3806_v41 = vadd.f32 %v3790_v63, %v3764_v55  ;;  %v3808_v4 = vadd.f32 %v3792_v43, %v3766_v24  ;;  %v3857_v28 = vmul.f32 %v11072_v33, %v11132_v34 }
0x190f   : > { %v3858_v56 = vmul.f32 %v11072_v33, %v11135_v60  ;;  %v3859_v30 = vmul.f32 %v11072_v33, %v11138_v54  ;;  %v3834_v23 = vrot.slane %v3818_v6, 2  ;;  %v3860_v25 = vmul.f32 %v11072_v33, %v10203_v7 }
0x1910   : > { %v3847_v62 = vadd.f32 %v3831_v2, %v3805_v37  ;;  %v3848_v20 = vadd.f32 %v3832_v45, %v3806_v41  ;;  %v3849_v32 = vadd.f32 %v3833_v22, %v3807_v38  ;;  %v3875_v36 = vmul.f32 %v11080_v46, %v11132_v34 }
0x1911   : > { %v3876_v11 = vmul.f32 %v11080_v46, %v11135_v60  ;;  %v3850_v44 = vadd.f32 %v3834_v23, %v3808_v4  ;;  %v3877_v9 = vmul.f32 %v11080_v46, %v11138_v54  ;;  %v3878_v13 = vmul.f32 %v11080_v46, %v10203_v7 }
0x1912   : > { %v3865_v31 = vadd.f32 %v3857_v28, %v3847_v62  ;;  %v3866_v58 = vadd.f32 %v3858_v56, %v3848_v20  ;;  %v3867_v55 = vadd.f32 %v3859_v30, %v3849_v32  ;;  %v3891_v51 = vrot.slane %v3875_v36, 1  ;;  %v5224_v56 = vpop.permute.xlu2 %5223  ;;  %v5216_v30 = vpop.permute.xlu0 %5215 }
0x1913   : > { %v3892_v14 = vrot.slane %v3876_v11, 1  ;;  %v3868_v33 = vadd.f32 %v3860_v25, %v3850_v44  ;;  %v3893_v24 = vrot.slane %v3877_v9, 1  ;;  %v3917_v47 = vmul.f32 %v11088_v19, %v11132_v34 }
0x1914   : > { %v3918_v63 = vmul.f32 %v11088_v19, %v11135_v60  ;;  %v3894_v8 = vrot.slane %v3878_v13, 1  ;;  %v3907_v43 = vadd.f32 %v3891_v51, %v3865_v31  ;;  %v3919_v37 = vmul.f32 %v11088_v19, %v11138_v54  ;;  %v5208_v54 = vpop.permute.xlu1 %5207  ;;  %v11238_v51 = vld.sshfl [vmem:[#allocation1 + $0x20] sm:$0xff pattern:$0x73625140] }
0x1915   : > { %v3908_v12 = vadd.f32 %v3892_v14, %v3866_v58  ;;  %v3909_v41 = vadd.f32 %v3893_v24, %v3867_v55  ;;  %v3920_v46 = vmul.f32 %v11088_v19, %v10203_v7  ;;  %v3933_v42 = vrot.slane %v3917_v47, 2  ;;  %v11234_v55 = vld.sshfl [vmem:[#allocation1] sm:$0xff pattern:$0x73625140]  ;;  %12302 = vst [vmem:[#allocation26_spill] sm:$0xff] %v11238_v51 }
0x1916   : > { %v3934_v38 = vrot.slane %v3918_v63, 2  ;;  %v3910_v4 = vadd.f32 %v3894_v8, %v3868_v33  ;;  %v3935_v57 = vrot.slane %v3919_v37, 2  ;;  %v5260_v19 = vsel %vm682_vm0, %v10904_v50, %v5208_v54  ;;  %12301 = vst [vmem:[#allocation14_spill] sm:$0xff] %v11234_v55 }
0x1917   : > { %v3936_v6 = vrot.slane %v3920_v46, 2  ;;  %v3949_v2 = vadd.f32 %v3933_v42, %v3907_v43  ;;  %v5262_v25 = vsel %vm1871_vm3, %v5260_v19, %v5216_v30  ;;  %7031 = vst [vmem:[#allocation1 + $0x2] ss:$4 sm:$0xff] %v11164_v3  ;;  %v275_v30 = vrot.slane %v12296_v59, 7 }
0x1918   : > { %v3950_v34 = vadd.f32 %v3934_v38, %v3908_v12  ;;  %v3951_v45 = vadd.f32 %v3935_v57, %v3909_v41  ;;  %v5264_v11 = vsel %vm1874_vm4, %v5262_v25, %v5224_v56  ;;  %7033 = vst [vmem:[#allocation1 + $0x22] ss:$4 sm:$0xff] %v11166_v0  ;;  %v270_v57 = vrot.slane %v12291_v53, 7 }
0x1919   : > { %v3952_v22 = vadd.f32 %v3936_v6, %v3910_v4  ;;  %v3957_v13 = vadd.f32 %v11119_v17, %v3949_v2  ;;  %v271_v6 = vrot.slane %v12292_v18, 7  ;;  %v12307_v2 = vld [vmem:[#allocation51_spill] sm:$0xff]  ;;  %v274_v56 = vrot.slane %v12295_v39, 7 }
0x191a   : > { %v5240_v62 = vpop.permute.xlu2 %5239  ;;  %v5232_v20 = vpop.permute.xlu0 %5231  ;;  %v3958_v14 = vadd.f32 %v11119_v17, %v3950_v34  ;;  %v3959_v3 = vadd.f32 %v11119_v17, %v3951_v45  ;;  %v12308_v34 = vld [vmem:[#allocation49_spill] sm:$0xff]  ;;  %v276_v54 = vrot.slane %v12297_v40, 7  ;;  %v289_v19 = vsel %vm287_vm1, 0.0, %v270_v57 }
0x191b   : > { %v6300_v60 = vpop.f32.mrf.mxu2  ;;  %v5266_v44 = vsel %vm1877_vm5, %v5264_v11, %v5232_v20  ;;  %v3960_v37 = vadd.f32 %v11119_v17, %v3952_v22  ;;  %v1869_v45 = vsel %vm682_vm0, %v12308_v34, %v12307_v2  ;;  %v12309_v22 = vld [vmem:[#allocation42_spill] sm:$0xff]  ;;  %v12310_v20 = vld [vmem:[#allocation47_spill] sm:$0xff]  ;;  %v12311_v11 = vld [vmem:[#allocation41_spill] sm:$0xff] }
0x191c   : > { %v5268_v31 = vsel %vm1880_vm6, %v5266_v44, %v5240_v62  ;;  %v290_v62 = vsel %vm287_vm1, 0.0, %v271_v6 }
0x191e   : > { %v11242_v63 = vld.sshfl [vmem:[#allocation1] sm:$0xff pattern:$0x73625140] }
0x191f   : > { %12303 = vst [vmem:[#allocation15_spill] sm:$0xff] %v11242_v63  ;;  %v11244_v8 = vld.sshfl [vmem:[#allocation1 + $0x20] sm:$0xff pattern:$0x73625140] }
0x1920   : > { %12304 = vst [vmem:[#allocation17_spill] sm:$0xff] %v11244_v8  ;;  %v11395_v8 = vld [vmem:[#allocation5 + $0x1] ss:$0 sm:$0xff] }
0x1922   : > { %v5248_v58 = vpop.permute.xlu0 %5247 }
0x1923   : > { %v5270_v50 = vsel %vm1883_vm7, %v5268_v31, %v5248_v58  ;;  %v7688_v58 = vld [vmem:[#allocation5 + $0x1] ss:$0 sm:$0xff] }
0x1925   : > { %v6447_v32 = vpop.f32.mrf.mxu3 }
0x1931   : > { %v6591_v28 = vpop.f32.mrf.mxu2 }
0x1932   : > { %6925 = vrot.lane.b32.xlu0 %v6591_v28, %s8094_s26  ;;  %v273_v28 = vrot.slane %v12294_v26, 7 }
0x1934   : > { %v292_v31 = vsel %vm287_vm1, 0.0, %v273_v28 }
0x1939   : > { %v6594_v23 = vpop.f32.mrf.mxu2 }
0x193a   : > { %6895 = vrot.lane.b32.xlu0 %v11097_v49, %s8098_s30  ;;  %v5256_v49 = vpop.permute.xlu2 %5255 }
0x193b   : > { %v5272_v9 = vsel %vm1886_vm8, %v5270_v50, %v5256_v49  ;;  %v293_v49 = vsel %vm287_vm1, 0.0, %v274_v56  ;;  %v294_v50 = vsel %vm287_vm1, 0.0, %v275_v30 }
0x193c   : > { %v5278_v33 = vrot.slane %v5272_v9, 2  ;;  %v5291_v24 = vadd.f32 %v5272_v9, %v3957_v13  ;;  %v5279_v12 = vrot.slane %v5272_v9, 4  ;;  %v5280_v41 = vrot.slane %v5272_v9, 6  ;;  %v7687_v13 = vld [vmem:[#allocation5] ss:$0 sm:$0xff] }
0x193d   : > { %v295_v9 = vsel %vm287_vm1, 0.0, %v276_v54 }
0x193e   : > { %v5292_v47 = vadd.f32 %v5278_v33, %v3958_v14  ;;  %7035 = vst [vmem:[#allocation1 + $0x2] ss:$4 sm:$0xff] %v5291_v24  ;;  %v5293_v46 = vadd.f32 %v5279_v12, %v3959_v3  ;;  %v5294_v38 = vadd.f32 %v5280_v41, %v3960_v37  ;;  %v11283_v14 = vsel %vm297_vm2, %v289_v19, 0.0  ;;  %v12312_v37 = vld [vmem:[#allocation52_spill] sm:$0xff] }
0x193f   : > { %v11286_v33 = vsel %vm297_vm2, %v290_v62, 0.0  ;;  %v11294_v3 = vsel %vm297_vm2, %v292_v31, 0.0  ;;  %v11297_v12 = vsel %vm297_vm2, %v293_v49, 0.0  ;;  %v328_v57 = vmul.f32 %v7688_v58, %v11283_v14 }
0x1940   : > { %7037 = vst [vmem:[#allocation1 + $0x22] ss:$4 sm:$0xff] %v5292_v47  ;;  %v329_v6 = vmul.f32 %v7688_v58, %v11286_v33  ;;  %v11315_v34 = vmul.f32 %v7687_v13, %v11294_v3  ;;  %v11327_v30 = vmul.f32 %v7688_v58, %v11294_v3  ;;  %v11330_v54 = vmul.f32 %v7688_v58, %v11297_v12 }
0x1941   : > { %v6885_v36 = vpop.f32.mrf.mxu2  ;;  %v310_v19 = vmul.f32 %v7687_v13, %v11283_v14  ;;  %v311_v62 = vmul.f32 %v7687_v13, %v11286_v33  ;;  %v411_v15 = vmul.f32 %v11359_v1, %v11283_v14 }
0x1942   : > { %6919 = vrot.lane.b32.xlu0 %v6447_v32, %s8095_s7  ;;  %6941 = vrot.lane.b32.xlu1 %v6885_v36, %s8092_s22  ;;  %12319 = vst [vmem:[#allocation54_spill] sm:$0xff] %v11327_v30  ;;  %s7121_s7 = scalar_lea.sflag [#allocation4], %s8218_s17 }
0x1943   : > { %12320 = vst [vmem:[#allocation57_spill] sm:$0xff] %v11330_v54 }
0x1945   : > { %v11252_v0 = vld.sshfl [vmem:[#allocation1] sm:$0xff pattern:$0x73625140] }
0x1946   : > { %12305 = vst [vmem:[#allocation16_spill] sm:$0xff] %v11252_v0 }
0x1947   : > { %7039 = vst [vmem:[#allocation1 + $0x2] ss:$4 sm:$0xff] %v5293_v46  ;;  %v11254_v4 = vld.sshfl [vmem:[#allocation1 + $0x20] sm:$0xff pattern:$0x73625140]  ;;  %v11304_v46 = vsel %vm297_vm2, %v294_v50, 0.0 }
0x1948   : > { %12306 = vst [vmem:[#allocation27_spill] sm:$0xff] %v11254_v4 }
0x1949   : > { %7041 = vst [vmem:[#allocation1 + $0x22] ss:$4 sm:$0xff] %v5294_v38  ;;  %v7689_v38 = vld [vmem:[#allocation5 + $0x2] ss:$0 sm:$0xff] }
0x194a   : > { %6911 = vrot.lane.b32.xlu1 %v6300_v60, %s8096_s19  ;;  %v1872_v60 = vsel %vm1871_vm3, %v1869_v45, %v12309_v22  ;;  %12314 = vst [vmem:[#allocation23_spill] sm:$0xff] %v11304_v46  ;;  %v11318_v45 = vmul.f32 %v7687_v13, %v11297_v12  ;;  %v11322_v22 = vmul.f32 %v7687_v13, %v11304_v46 }
0x194b   : > { %v1875_v25 = vsel %vm1874_vm4, %v1872_v60, %v12310_v20  ;;  %v309_v60 = vmul.f32 %v7687_v13, %v10203_v7  ;;  %v369_v56 = vmul.f32 %v7689_v38, %v10203_v7 }
0x194c   : > { %v1878_v44 = vsel %vm1877_vm5, %v1875_v25, %v12311_v11  ;;  %12317 = vst [vmem:[#allocation24_spill] sm:$0xff] %v11318_v45  ;;  %v344_v25 = vrot.slane %v328_v57, 1  ;;  %v370_v11 = vmul.f32 %v7689_v38, %v11283_v14  ;;  %v11352_v57 = vmul.f32 %v7689_v38, %v11297_v12 }
0x194d   : > { %v11301_v41 = vsel %vm1880_vm6, %v1878_v44, %v12312_v37  ;;  %12318 = vst [vmem:[#allocation25_spill] sm:$0xff] %v11322_v22  ;;  %v371_v44 = vmul.f32 %v7689_v38, %v11286_v33  ;;  %v11349_v37 = vmul.f32 %v7689_v38, %v11294_v3  ;;  %v11445_v22 = vld [vmem:[#allocation5 + $0x5] ss:$0 sm:$0xff] }
0x194e   : > { %12313 = vst [vmem:[#allocation28_spill] sm:$0xff] %v11301_v41 }
0x194f   : > { %v387_v35 = vrot.slane %v371_v44, 2 }
0x1959   : > { %v6738_v43 = vpop.f32.mrf.mxu3 }
0x195a   : > { %6933 = vrot.lane.b32.xlu2 %v6738_v43, %s8093_s23  ;;  %v327_v43 = vmul.f32 %v7688_v58, %v10203_v7 }
0x195c   : > { %v343_v28 = vrot.slane %v327_v43, 1  ;;  %v386_v43 = vrot.slane %v370_v11, 2  ;;  %v7408_v11 = vrot.slane %v12293_v48, 13 }
0x1961   : > { %v6888_v42 = vpop.f32.mrf.mxu2 }
0x1962   : > { %6903 = vrot.lane.b32.xlu2 %v11062_v29, %s8097_s29  ;;  %6943 = vrot.lane.b32.xlu0 %v6888_v42, %s8092_s22  ;;  %v272_v29 = vrot.slane %v12293_v48, 7  ;;  %v11307_v42 = vsel %vm297_vm2, %v295_v9, 0.0  ;;  %v359_v9 = vadd.f32 %v343_v28, %v309_v60  ;;  %v11361_v28 = vld [vmem:[#allocation5 + $0x4] ss:$0 sm:$0xff]  ;;  %s7132_s22 = scalar_lea.hbm %s11930_s3, %s7468_s28 }
0x1963   : > { %12315 = vst [vmem:[#allocation29_spill] sm:$0xff] %v11307_v42  ;;  %v11342_v49 = vmul.f32 %v7687_v13, %v11307_v42  ;;  %v11345_v50 = vmul.f32 %v7688_v58, %v11307_v42  ;;  %v11364_v0 = vmul.f32 %v7689_v38, %v11307_v42  ;;  %v11435_v42 = vld [vmem:[#allocation5 + $0x4] ss:$0 sm:$0xff] }
0x1964   : > { %v291_v32 = vsel %vm287_vm1, 0.0, %v272_v29  ;;  %12324 = vst [vmem:[#allocation59_spill] sm:$0xff] %v11361_v28 }
0x1965   : > { %v11290_v47 = vsel %vm297_vm2, %v291_v32, 0.0  ;;  %v345_v32 = vrot.slane %v329_v6, 1  ;;  %12322 = vst [vmem:[#allocation56_spill] sm:$0xff] %v11342_v49  ;;  %v11355_v6 = vmul.f32 %v7689_v38, %v11304_v46 }
0x1966   : > { %v330_v29 = vmul.f32 %v7688_v58, %v11290_v47  ;;  %v312_v20 = vmul.f32 %v7687_v13, %v11290_v47  ;;  %v372_v31 = vmul.f32 %v7689_v38, %v11290_v47  ;;  %12325 = vst [vmem:[#allocation60_spill] sm:$0xff] %v11364_v0  ;;  %v412_v13 = vmul.f32 %v11359_v1, %v11286_v33 }
0x1967   : > { %v361_v60 = vadd.f32 %v345_v32, %v311_v62  ;;  %v11374_v62 = vmul.f32 %v11361_v28, %v11283_v14  ;;  %v11382_v38 = vmul.f32 %v11361_v28, %v11290_v47  ;;  %v7406_v32 = vrot.slane %v12291_v53, 13 }
0x1968   : > { %v388_v4 = vrot.slane %v372_v31, 2  ;;  %v5321_v53 = vsel %vm287_vm1, 0.0, %v7408_v11 }
0x1969   : > { %v403_v31 = vadd.f32 %v387_v35, %v361_v60  ;;  %v5319_v51 = vsel %vm287_vm1, 0.0, %v7406_v32  ;;  %v445_v48 = vrot.slane %v11374_v62, 1  ;;  %v7409_v60 = vrot.slane %v12294_v26, 13 }
0x196a   : > { %6927 = vrot.lane.b32.xlu2 %v6594_v23, %s8094_s26  ;;  %v277_v23 = vrot.slane %v12298_v52, 7  ;;  %v5327_v35 = vsel %vm297_vm2, %v5319_v51, 0.0  ;;  %s7135_s26 = sshll.u32 %s7132_s22, 4  ;;  %s7136_s26 = int_to_ptr.hbm [resolvable:$true] %s7135_s26 }
0x196b   : > { %v5356_v51 = vmul.f32 %v11395_v8, %v5327_v35  ;;  %s8026_s19 = sshra.s32 %s7136_s26, 4  ;;  %s8027_s19 = int_to_ptr.hbm [resolvable:$true] %s8026_s19 }
0x196c   : > { %v296_v24 = vsel %vm287_vm1, 0.0, %v277_v23  ;;  %v11333_v23 = vmul.f32 %v7688_v58, %v11304_v46  ;;  %v360_v58 = vadd.f32 %v344_v25, %v310_v19  ;;  %v413_v19 = vmul.f32 %v11359_v1, %v11290_v47  ;;  %s8028_s29 = scalar_lea.hbm %s8027_s19, 64  ;;  %p8033_p6 = scmp.lt.s32.totalorder %s8027_s19, %s11930_s3 }
0x196d   : > { %v11312_v2 = vsel %vm297_vm2, %v296_v24, 0.0  ;;  %v385_v24 = vrot.slane %v369_v56, 2  ;;  %v11386_v25 = vmul.f32 %v11361_v28, %v11294_v3  ;;  %p8029_p3 = scmp.ne.s32.totalorder %s8027_s19, %s8028_s29  ;;  %p8034_p7 = scmp.lt.s32.totalorder %s8032_s5, %s8028_s29 }
0x196e   : > { %12316 = vst [vmem:[#allocation22_spill] sm:$0xff] %v11312_v2  ;;  %v402_v44 = vadd.f32 %v386_v43, %v360_v58  ;;  %v11408_v43 = vsel %vm297_vm2, %v5321_v53, 0.0  ;;  %v11427_v53 = vld [vmem:[#allocation5 + $0x3] ss:$0 sm:$0xff] }
0x196f   : > { %12321 = vst [vmem:[#allocation55_spill] sm:$0xff] %v11333_v23  ;;  %v401_v61 = vadd.f32 %v385_v24, %v359_v9  ;;  %v414_v24 = vmul.f32 %v11359_v1, %v11294_v3  ;;  %p8030_p4 = pnand %p8029_p3, %p8174_p11  ;;  %p8035_p8 = por %p8034_p7, %p8033_p6 }
0x1970   : > { %v11439_v0 = vadd.f32 %v412_v13, %v402_v44  ;;  %v5457_v13 = vmul.f32 %v11435_v42, %v5327_v35 }
0x1971   : > { %v419_v63 = vadd.f32 %v411_v15, %v401_v61  ;;  %v5372_v61 = vrot.slane %v5356_v51, 1  ;;  %v5439_v51 = vmul.f32 %v11427_v53, %v5327_v35  ;;  %p8031_p5 = pneg %p8030_p4 }
0x1973   : > { %p8036_p9 = pnand %p8035_p8, %p8031_p5 }
0x1984   : > { %v6741_v36 = vpop.f32.mrf.mxu3 }
0x1985   : > { %6935 = vrot.lane.b32.xlu1 %v6741_v36, %s8093_s23  ;;  %v346_v36 = vrot.slane %v330_v29, 1  ;;  %v11393_v29 = vld [vmem:[#allocation5] ss:$0 sm:$0xff]  ;;  %s7133_s23 = sshll.u32 %s11819_s20, 4  ;;  %s7134_s23 = int_to_ptr.vmem [resolvable:$true] %s7133_s23 }
0x1986   : > { %v5338_v62 = vmul.f32 %v11393_v29, %v5327_v35  ;;  %v5340_v16 = vmul.f32 %v11393_v29, %v11408_v43 }
0x1987   : > { %v362_v56 = vadd.f32 %v346_v36, %v312_v20  ;;  %v11378_v20 = vmul.f32 %v11361_v28, %v11286_v33  ;;  %v7407_v36 = vrot.slane %v12292_v18, 13  ;;  %v11400_v18 = vld [vmem:[#allocation5 + $0x2] ss:$0 sm:$0xff] }
0x1988   : > { %v5397_v11 = vmul.f32 %v11400_v18, %v10203_v7  ;;  %v5398_v26 = vmul.f32 %v11400_v18, %v5327_v35  ;;  %v5388_v46 = vadd.f32 %v5372_v61, %v5338_v62  ;;  %v5400_v1 = vmul.f32 %v11400_v18, %v11408_v43 }
0x1989   : > { %v404_v9 = vadd.f32 %v388_v4, %v362_v56  ;;  %v5320_v55 = vsel %vm287_vm1, 0.0, %v7407_v36  ;;  %v5337_v56 = vmul.f32 %v11393_v29, %v10203_v7  ;;  %v5358_v36 = vmul.f32 %v11395_v8, %v11408_v43 }
0x198a   : > { %v11405_v4 = vsel %vm297_vm2, %v5320_v55, 0.0  ;;  %v5355_v55 = vmul.f32 %v11395_v8, %v10203_v7  ;;  %v5413_v5 = vrot.slane %v5397_v11, 2  ;;  %v5414_v2 = vrot.slane %v5398_v26, 2 }
0x198b   : > { %v5357_v32 = vmul.f32 %v11395_v8, %v11405_v4  ;;  %v5339_v58 = vmul.f32 %v11393_v29, %v11405_v4  ;;  %v5399_v21 = vmul.f32 %v11400_v18, %v11405_v4  ;;  %v5374_v41 = vrot.slane %v5358_v36, 1 }
0x198c   : > { %v5371_v15 = vrot.slane %v5355_v55, 1  ;;  %v5322_v55 = vsel %vm287_vm1, 0.0, %v7409_v60  ;;  %v5440_v49 = vmul.f32 %v11427_v53, %v11405_v4  ;;  %v5430_v23 = vadd.f32 %v5414_v2, %v5388_v46  ;;  %v11454_v60 = vld [vmem:[#allocation5 + $0x5] ss:$0 sm:$0xff] }
0x198d   : > { %v5373_v10 = vrot.slane %v5357_v32, 1  ;;  %v5415_v11 = vrot.slane %v5399_v21, 2  ;;  %v11449_v61 = vadd.f32 %v414_v24, %v404_v9  ;;  %v5458_v44 = vmul.f32 %v11435_v42, %v11405_v4 }
0x198e   : > { %v5387_v28 = vadd.f32 %v5371_v15, %v5337_v56  ;;  %v11447_v15 = vadd.f32 %v413_v19, %v403_v31  ;;  %v5390_v56 = vadd.f32 %v5374_v41, %v5340_v16  ;;  %v5416_v62 = vrot.slane %v5400_v1, 2 }
0x198f   : > { %v5389_v32 = vadd.f32 %v5373_v10, %v5339_v58  ;;  %v5448_v10 = vadd.f32 %v5440_v49, %v5430_v23  ;;  %v11457_v21 = vsel %vm297_vm2, %v5322_v55, 0.0  ;;  %v5473_v46 = vrot.slane %v5457_v13, 1  ;;  %v6894_v23 = vpop.permute.xlu1 %6893  ;;  %v11474_v58 = vld [vmem:[#allocation5 + $0x7] ss:$0 sm:$0xff] }
0x1990   : > { %v5429_v26 = vadd.f32 %v5413_v5, %v5387_v28  ;;  %v5441_v5 = vmul.f32 %v11427_v53, %v11408_v43  ;;  %v5474_v2 = vrot.slane %v5458_v44, 1  ;;  %v11461_v28 = vld [vmem:[#allocation5 + $0x6] ss:$0 sm:$0xff]  ;;  %v5459_v31 = vmul.f32 %v11435_v42, %v11408_v43 }
0x1991   : > { %v5431_v19 = vadd.f32 %v5415_v11, %v5389_v32  ;;  %v5499_v9 = vmul.f32 %v11445_v22, %v5327_v35  ;;  %v5500_v16 = vmul.f32 %v11445_v22, %v11405_v4  ;;  %v11468_v1 = vadd.f32 %v445_v48, %v419_v63 }
0x1992   : > { %v5447_v36 = vadd.f32 %v5439_v51, %v5429_v26  ;;  %v11472_v41 = vmul.f32 %v11454_v60, %v11283_v14  ;;  %v5490_v24 = vadd.f32 %v5474_v2, %v5448_v10  ;;  %v5432_v55 = vadd.f32 %v5416_v62, %v5390_v56  ;;  %v11489_v62 = vld [vmem:[#allocation5 + $0x8] ss:$0 sm:$0xff] }
0x1993   : > { %v5442_v51 = vmul.f32 %v11427_v53, %v11457_v21  ;;  %v5460_v35 = vmul.f32 %v11435_v42, %v11457_v21  ;;  %v5515_v32 = vrot.slane %v5499_v9, 2  ;;  %v11482_v63 = vmul.f32 %v11454_v60, %v11286_v33 }
0x1994   : > { %v5489_v49 = vadd.f32 %v5473_v46, %v5447_v36  ;;  %v5516_v48 = vrot.slane %v5500_v16, 2  ;;  %v5541_v14 = vmul.f32 %v11461_v28, %v11405_v4  ;;  %v5542_v11 = vmul.f32 %v11461_v28, %v11408_v43  ;;  %v6902_v36 = vpop.permute.xlu0 %6901 }
0x1995   : > { %v7410_v26 = vrot.slane %v12295_v39, 13  ;;  %v5449_v13 = vadd.f32 %v5441_v5, %v5431_v19  ;;  %v5475_v44 = vrot.slane %v5459_v31, 1  ;;  %v5501_v10 = vmul.f32 %v11445_v22, %v11408_v43 }
0x1996   : > { %v5531_v56 = vadd.f32 %v5515_v32, %v5489_v49  ;;  %v5532_v46 = vadd.f32 %v5516_v48, %v5490_v24  ;;  %v5559_v2 = vmul.f32 %v11474_v58, %v11405_v4  ;;  %v5560_v9 = vmul.f32 %v11474_v58, %v11408_v43  ;;  %v6910_v48 = vpop.permute.xlu2 %6909 }
0x1997   : > { %v5450_v16 = vadd.f32 %v5442_v51, %v5432_v55  ;;  %v5476_v54 = vrot.slane %v5460_v35, 1  ;;  %v5502_v39 = vmul.f32 %v11445_v22, %v11457_v21  ;;  %v11501_v19 = vmul.f32 %v11454_v60, %v11290_v47  ;;  %v6918_v35 = vpop.permute.xlu1 %6917 }
0x1998   : > { %v5549_v5 = vadd.f32 %v5541_v14, %v5531_v56  ;;  %v5550_v31 = vadd.f32 %v5542_v11, %v5532_v46  ;;  %v5575_v49 = vrot.slane %v5559_v2, 1  ;;  %v5576_v32 = vrot.slane %v5560_v9, 1 }
0x1999   : > { %v11505_v24 = vmul.f32 %v11454_v60, %v11294_v3  ;;  %v5323_v45 = vsel %vm287_vm1, 0.0, %v7410_v26  ;;  %v5491_v55 = vadd.f32 %v5475_v44, %v5449_v13  ;;  %v5601_v51 = vmul.f32 %v11489_v62, %v11405_v4 }
0x199a   : > { %v5517_v14 = vrot.slane %v5501_v10, 2  ;;  %v5591_v56 = vadd.f32 %v5575_v49, %v5549_v5  ;;  %v5592_v30 = vadd.f32 %v5576_v32, %v5550_v31  ;;  %v5602_v11 = vmul.f32 %v11489_v62, %v11408_v43 }
0x199b   : > { %v12326_v46 = vrot.slane %v11378_v20, 1  ;;  %v6947_v9 = vsel %vm682_vm0, %v10982_v27, %v6894_v23  ;;  %v5492_v26 = vadd.f32 %v5476_v54, %v5450_v16  ;;  %v5518_v13 = vrot.slane %v5502_v39, 2 }
0x199c   : > { %v6949_v44 = vsel %vm1871_vm3, %v6947_v9, %v6902_v36  ;;  %v11521_v4 = vsel %vm297_vm2, %v5323_v45, 0.0  ;;  %v5617_v10 = vrot.slane %v5601_v51, 2  ;;  %v5618_v5 = vrot.slane %v5602_v11, 2 }
0x199d   : > { %v11515_v2 = vadd.f32 %v12326_v46, %v11439_v0  ;;  %v12327_v43 = vrot.slane %v11382_v38, 1  ;;  %v12328_v0 = vrot.slane %v11386_v25, 1  ;;  %v5533_v36 = vadd.f32 %v5517_v14, %v5491_v55 }
0x199e   : > { %v5543_v45 = vmul.f32 %v11461_v28, %v11457_v21  ;;  %v5633_v16 = vadd.f32 %v5617_v10, %v5591_v56  ;;  %v5634_v39 = vadd.f32 %v5618_v5, %v5592_v30  ;;  %v5534_v49 = vadd.f32 %v5518_v13, %v5492_v26 }
0x199f   : > { %v11526_v31 = vadd.f32 %v12327_v43, %v11447_v15  ;;  %v11531_v20 = vadd.f32 %v12328_v0, %v11449_v61  ;;  %v6951_v15 = vsel %vm1874_vm4, %v6949_v44, %v6910_v48  ;;  %v5544_v25 = vmul.f32 %v11461_v28, %v11521_v4 }
0x19a0   : > { %v6953_v32 = vsel %vm1877_vm5, %v6951_v15, %v6918_v35  ;;  %v5561_v55 = vmul.f32 %v11474_v58, %v11457_v21  ;;  %v5641_v51 = vadd.f32 %v11119_v17, %v5633_v16  ;;  %v11549_v56 = vmul.f32 %v11474_v58, %v11521_v4  ;;  %v11576_v16 = vld.sshfl [vmem:[#allocation1] sm:$0xff pattern:$0x73625140] }
0x19a1   : > { %v7411_v48 = vrot.slane %v12296_v59, 13  ;;  %v7412_v11 = vrot.slane %v12297_v40, 13  ;;  %v5551_v9 = vadd.f32 %v5543_v45, %v5533_v36  ;;  %v5642_v35 = vadd.f32 %v11119_v17, %v5634_v39 }
0x19a2   : > { %v7413_v13 = vrot.slane %v12298_v52, 13  ;;  %v11556_v44 = vadd.f32 %v5544_v25, %v5534_v49  ;;  %v5577_v59 = vrot.slane %v5561_v55, 1  ;;  %v5359_v17 = vmul.f32 %v11395_v8, %v11457_v21 }
0x19a3   : > { %v5324_v5 = vsel %vm287_vm1, 0.0, %v7411_v48  ;;  %v5325_v43 = vsel %vm287_vm1, 0.0, %v7412_v11  ;;  %v5360_v45 = vmul.f32 %v11395_v8, %v11521_v4  ;;  %v5341_v49 = vmul.f32 %v11393_v29, %v11457_v21 }
0x19a4   : > { %v6926_v23 = vpop.permute.xlu0 %6925  ;;  %v11569_v52 = vsel %vm297_vm2, %v5324_v5, 0.0  ;;  %v11572_v36 = vsel %vm297_vm2, %v5325_v43, 0.0  ;;  %v5326_v15 = vsel %vm287_vm1, 0.0, %v7413_v13  ;;  %v5342_v25 = vmul.f32 %v11393_v29, %v11521_v4 }
0x19a5   : > { %v6955_v14 = vsel %vm1880_vm6, %v6953_v32, %v6926_v23  ;;  %v5578_v23 = vrot.slane %v11549_v56, 1  ;;  %v5343_v32 = vmul.f32 %v11393_v29, %v11569_v52  ;;  %v5344_v55 = vmul.f32 %v11393_v29, %v11572_v36 }
0x19a6   : > { %v5375_v48 = vrot.slane %v5359_v17, 1  ;;  %v5376_v11 = vrot.slane %v5360_v45, 1  ;;  %v5403_v29 = vmul.f32 %v11400_v18, %v11569_v52  ;;  %v5404_v5 = vmul.f32 %v11400_v18, %v11572_v36 }
0x19a7   : > { %v11604_v17 = vsel %vm297_vm2, %v5326_v15, 0.0 }
0x19a8   : > { %v5391_v43 = vadd.f32 %v5375_v48, %v5341_v49  ;;  %v5463_v48 = vmul.f32 %v11435_v42, %v11572_v36 }
0x19b4   : > { %v6934_v30 = vpop.permute.xlu2 %6933  ;;  %v6942_v26 = vpop.permute.xlu1 %6941 }
0x19b5   : > { %v6957_v46 = vsel %vm1883_vm7, %v6955_v14, %v6934_v30  ;;  %v5362_v14 = vmul.f32 %v11395_v8, %v11572_v36  ;;  %v11591_v30 = vld.sshfl [vmem:[#allocation1 + $0x20] sm:$0xff pattern:$0x73625140] }
0x19b6   : > { %v11559_v10 = vsel %vm1886_vm8, %v6957_v46, %v6942_v26  ;;  %v5401_v46 = vmul.f32 %v11400_v18, %v11457_v21 }
0x19b7   : > { %v6963_v40 = vrot.slane %v11559_v10, 2  ;;  %v6975_v0 = vadd.f32 %v11559_v10, %v5641_v51  ;;  %v5361_v51 = vmul.f32 %v11395_v8, %v11569_v52  ;;  %v5378_v13 = vrot.slane %v5362_v14, 1 }
0x19b8   : > { %v11601_v8 = vadd.f32 %v5577_v59, %v5551_v9  ;;  %v5420_v14 = vrot.slane %v5404_v5, 2  ;;  %v5444_v9 = vmul.f32 %v11427_v53, %v11569_v52  ;;  %v5445_v59 = vmul.f32 %v11427_v53, %v11572_v36 }
0x19b9   : > { %v6976_v39 = vadd.f32 %v6963_v40, %v5642_v35  ;;  %7060 = vst [vmem:[#allocation1 + $0x3] ss:$4 sm:$0xff] %v6975_v0  ;;  %v5402_v35 = vmul.f32 %v11400_v18, %v11521_v4  ;;  %v5377_v26 = vrot.slane %v5361_v51, 1  ;;  %v5392_v40 = vadd.f32 %v5376_v11, %v5342_v25 }
0x19ba   : > { %v5417_v0 = vrot.slane %v5401_v46, 2  ;;  %v5394_v61 = vadd.f32 %v5378_v13, %v5344_v55  ;;  %v5419_v51 = vrot.slane %v5403_v29, 2  ;;  %v5443_v18 = vmul.f32 %v11427_v53, %v11521_v4 }
0x19bb   : > { %7063 = vst [vmem:[#allocation1 + $0x23] ss:$4 sm:$0xff] %v6976_v39  ;;  %v5393_v45 = vadd.f32 %v5377_v26, %v5343_v32  ;;  %v5418_v38 = vrot.slane %v5402_v35, 2  ;;  %v11608_v39 = vmul.f32 %v11489_v62, %v11457_v21  ;;  %v5446_v25 = vmul.f32 %v11427_v53, %v11604_v17 }
0x19bc   : > { %v5433_v54 = vadd.f32 %v5417_v0, %v5391_v43  ;;  %v5436_v49 = vadd.f32 %v5420_v14, %v5394_v61  ;;  %v5461_v21 = vmul.f32 %v11435_v42, %v11521_v4  ;;  %v5464_v35 = vmul.f32 %v11435_v42, %v11604_v17 }
0x19bd   : > { %v5434_v27 = vadd.f32 %v5418_v38, %v5392_v40  ;;  %v5435_v15 = vadd.f32 %v5419_v51, %v5393_v45  ;;  %v5462_v38 = vmul.f32 %v11435_v42, %v11569_v52  ;;  %v5479_v13 = vrot.slane %v5463_v48, 1 }
0x19be   : > { %v5451_v32 = vadd.f32 %v5443_v18, %v5433_v54  ;;  %v5454_v46 = vadd.f32 %v5446_v25, %v5436_v49  ;;  %v5477_v61 = vrot.slane %v5461_v21, 1  ;;  %v5503_v53 = vmul.f32 %v11445_v22, %v11521_v4 }
0x19bf   : > { %v5452_v55 = vadd.f32 %v5444_v9, %v5434_v27  ;;  %v5453_v11 = vadd.f32 %v5445_v59, %v5435_v15  ;;  %v5478_v26 = vrot.slane %v5462_v38, 1  ;;  %v5504_v27 = vmul.f32 %v11445_v22, %v11569_v52 }
0x19c0   : > { %v11632_v54 = vmul.f32 %v11489_v62, %v11521_v4  ;;  %v5480_v29 = vrot.slane %v5464_v35, 1  ;;  %v5493_v5 = vadd.f32 %v5477_v61, %v5451_v32  ;;  %v5505_v43 = vmul.f32 %v11445_v22, %v11572_v36 }
0x19c1   : > { %v5494_v40 = vadd.f32 %v5478_v26, %v5452_v55  ;;  %v5495_v42 = vadd.f32 %v5479_v13, %v5453_v11  ;;  %v5506_v0 = vmul.f32 %v11445_v22, %v11604_v17  ;;  %v5519_v45 = vrot.slane %v5503_v53, 2 }
0x19c2   : > { %v5496_v51 = vadd.f32 %v5480_v29, %v5454_v46  ;;  %v5520_v14 = vrot.slane %v5504_v27, 2  ;;  %v5521_v18 = vrot.slane %v5505_v43, 2  ;;  %v5545_v9 = vmul.f32 %v11461_v28, %v11569_v52 }
0x19c3   : > { %v5522_v59 = vrot.slane %v5506_v0, 2  ;;  %v5535_v4 = vadd.f32 %v5519_v45, %v5493_v5  ;;  %v5546_v15 = vmul.f32 %v11461_v28, %v11572_v36  ;;  %v5547_v49 = vmul.f32 %v11461_v28, %v11604_v17 }
0x19c4   : > { %v5536_v25 = vadd.f32 %v5520_v14, %v5494_v40  ;;  %v5537_v21 = vadd.f32 %v5521_v18, %v5495_v42  ;;  %v5548_v22 = vmul.f32 %v11461_v28, %v10203_v7  ;;  %v5563_v32 = vmul.f32 %v11474_v58, %v11569_v52 }
0x19c5   : > { %v5538_v55 = vadd.f32 %v5522_v59, %v5496_v51  ;;  %v5553_v38 = vadd.f32 %v5545_v9, %v5535_v4  ;;  %v5564_v48 = vmul.f32 %v11474_v58, %v11572_v36  ;;  %v5565_v11 = vmul.f32 %v11474_v58, %v11604_v17 }
0x19c6   : > { %v5554_v46 = vadd.f32 %v5546_v15, %v5536_v25  ;;  %v5555_v35 = vadd.f32 %v5547_v49, %v5537_v21  ;;  %v5566_v61 = vmul.f32 %v11474_v58, %v10203_v7  ;;  %v5579_v26 = vrot.slane %v5563_v32, 1 }
0x19c7   : > { %v5556_v13 = vadd.f32 %v5548_v22, %v5538_v55  ;;  %v5580_v53 = vrot.slane %v5564_v48, 1  ;;  %v5581_v28 = vrot.slane %v5565_v11, 1  ;;  %v5605_v27 = vmul.f32 %v11489_v62, %v11569_v52  ;;  %v11663_v52 = vld [vmem:[#allocation5 + $0x6] ss:$0 sm:$0xff] }
0x19c8   : > { %v5582_v29 = vrot.slane %v5566_v61, 1  ;;  %v5595_v5 = vadd.f32 %v5579_v26, %v5553_v38  ;;  %v5606_v43 = vmul.f32 %v11489_v62, %v11572_v36  ;;  %v5607_v40 = vmul.f32 %v11489_v62, %v11604_v17 }
0x19c9   : > { %v5596_v42 = vadd.f32 %v5580_v53, %v5554_v46  ;;  %v5597_v0 = vadd.f32 %v5581_v28, %v5555_v35  ;;  %v5608_v58 = vmul.f32 %v11489_v62, %v10203_v7  ;;  %v5621_v45 = vrot.slane %v5605_v27, 2  ;;  %v12336_v35 = vld [vmem:[#allocation57_spill] sm:$0xff]  ;;  %v12339_v53 = vld [vmem:[#allocation55_spill] sm:$0xff] }
0x19ca   : > { %v5619_v51 = vrot.slane %v11608_v39, 2  ;;  %v5598_v14 = vadd.f32 %v5582_v29, %v5556_v13  ;;  %v5622_v18 = vrot.slane %v5606_v43, 2  ;;  %v5623_v9 = vrot.slane %v5607_v40, 2  ;;  %v12338_v13 = vld [vmem:[#allocation25_spill] sm:$0xff]  ;;  %v11726_v40 = vld [vmem:[%s11929_s2] ss:$0 sm:$0xff] }
0x19cb   : > { %v5594_v36 = vadd.f32 %v5578_v23, %v11556_v44  ;;  %v5620_v59 = vrot.slane %v11632_v54, 2  ;;  %v5624_v17 = vrot.slane %v5608_v58, 2  ;;  %v11669_v4 = vadd.f32 %v5621_v45, %v5595_v5  ;;  %v11685_v54 = vld [vmem:[#allocation5 + $0x7] ss:$0 sm:$0xff]  ;;  %v11721_v29 = vld [vmem:[#allocation5 + $0x8] ss:$0 sm:$0xff] }
0x19cc   : > { %v350_v15 = vrot.slane %v11345_v50, 1  ;;  %v389_v62 = vrot.slane %v11349_v37, 2  ;;  %v11673_v49 = vadd.f32 %v5622_v18, %v5596_v42  ;;  %v11675_v39 = vadd.f32 %v5623_v9, %v5597_v0 }
0x19cd   : > { %v390_v25 = vrot.slane %v11352_v57, 2  ;;  %v12329_v21 = vrot.slane %v11472_v41, 2  ;;  %v513_v44 = vmul.f32 %v11663_v52, %v11286_v33  ;;  %v11683_v23 = vadd.f32 %v5624_v17, %v5598_v14 }
0x19ce   : > { %v12330_v50 = vrot.slane %v11482_v63, 2  ;;  %v514_v22 = vmul.f32 %v11663_v52, %v11290_v47  ;;  %v515_v57 = vmul.f32 %v11663_v52, %v11294_v3  ;;  %v5635_v41 = vadd.f32 %v5619_v51, %v11601_v8 }
0x19cf   : > { %v503_v56 = vadd.f32 %v12329_v21, %v11468_v1  ;;  %v12331_v1 = vrot.slane %v11501_v19, 2  ;;  %v12332_v55 = vrot.slane %v11505_v24, 2  ;;  %v516_v63 = vmul.f32 %v11663_v52, %v11297_v12 }
0x19d0   : > { %v504_v37 = vadd.f32 %v12330_v50, %v11515_v2  ;;  %v5636_v2 = vadd.f32 %v5620_v59, %v5594_v36  ;;  %v391_v48 = vrot.slane %v11355_v6, 2  ;;  %v531_v11 = vmul.f32 %v11685_v54, %v11286_v33 }
0x19d1   : > { %v505_v32 = vadd.f32 %v12331_v1, %v11526_v31  ;;  %v506_v38 = vadd.f32 %v12332_v55, %v11531_v20  ;;  %v532_v8 = vmul.f32 %v11685_v54, %v11290_v47  ;;  %v533_v19 = vmul.f32 %v11685_v54, %v11294_v3  ;;  %v12333_v31 = vld [vmem:[#allocation54_spill] sm:$0xff]  ;;  %v12335_v20 = vld [vmem:[#allocation24_spill] sm:$0xff] }
0x19d2   : > { %v12334_v46 = vrot.slane %v12333_v31, 1  ;;  %v12337_v61 = vrot.slane %v12336_v35, 1  ;;  %v12340_v6 = vrot.slane %v12339_v53, 1  ;;  %v534_v27 = vmul.f32 %v11685_v54, %v11297_v12  ;;  %v12347_v35 = vld [vmem:[#allocation28_spill] sm:$0xff] }
0x19d3   : > { %v521_v5 = vadd.f32 %v513_v44, %v503_v56  ;;  %v522_v43 = vadd.f32 %v514_v22, %v504_v37  ;;  %v6964_v42 = vrot.slane %v11559_v10, 4  ;;  %v523_v0 = vadd.f32 %v515_v57, %v505_v32  ;;  %v12341_v44 = vld [vmem:[#allocation56_spill] sm:$0xff]  ;;  %v12343_v22 = vld [vmem:[#allocation58_spill] sm:$0xff]  ;;  %v12344_v32 = vld [vmem:[#allocation23_spill] sm:$0xff] }
0x19d4   : > { %v363_v24 = vadd.f32 %v12334_v46, %v11315_v34  ;;  %v364_v26 = vadd.f32 %v12337_v61, %v12335_v20  ;;  %v365_v28 = vadd.f32 %v12340_v6, %v12338_v13  ;;  %v5643_v34 = vadd.f32 %v11726_v40, %v5635_v41  ;;  %v12342_v37 = vld [vmem:[#allocation60_spill] sm:$0xff]  ;;  %v12346_v20 = vld [vmem:[#allocation53_spill] sm:$0xff]  ;;  %v12349_v13 = vld [vmem:[#allocation50_spill] sm:$0xff] }
0x19d5   : > { %v524_v58 = vadd.f32 %v516_v63, %v506_v38  ;;  %v5644_v45 = vadd.f32 %v11726_v40, %v5636_v2  ;;  %v6965_v51 = vrot.slane %v11559_v10, 6  ;;  %v547_v14 = vrot.slane %v531_v11, 1  ;;  %v11746_v38 = vld.sshfl [vmem:[#allocation1] sm:$0xff pattern:$0x73625140] }
0x19d6   : > { %v548_v18 = vrot.slane %v532_v8, 1  ;;  %v549_v9 = vrot.slane %v533_v19, 1  ;;  %v573_v36 = vmul.f32 %v11721_v29, %v11286_v33  ;;  %v550_v59 = vrot.slane %v534_v27, 1  ;;  %v12350_v27 = vld [vmem:[#allocation29_spill] sm:$0xff] }
0x19d7   : > { %v574_v17 = vmul.f32 %v11721_v29, %v11290_v47  ;;  %v575_v21 = vmul.f32 %v11721_v29, %v11294_v3  ;;  %v576_v56 = vmul.f32 %v11721_v29, %v11297_v12  ;;  %v366_v50 = vadd.f32 %v350_v15, %v12341_v44  ;;  %v11748_v3 = vld.sshfl [vmem:[#allocation1 + $0x20] sm:$0xff pattern:$0x73625140] }
0x19d8   : > { %v392_v10 = vrot.slane %v12342_v37, 2  ;;  %v415_v57 = vmul.f32 %v12343_v22, %v11297_v12  ;;  %v6977_v41 = vadd.f32 %v6964_v42, %v5643_v34  ;;  %v405_v1 = vadd.f32 %v389_v62, %v363_v24  ;;  %v12345_v62 = vld [vmem:[#allocation59_spill] sm:$0xff] }
0x19d9   : > { %v406_v33 = vadd.f32 %v390_v25, %v364_v26  ;;  %v416_v55 = vmul.f32 %v12343_v22, %v12344_v32  ;;  %v6978_v47 = vadd.f32 %v6965_v51, %v5644_v45  ;;  %v563_v63 = vadd.f32 %v547_v14, %v521_v5  ;;  %v12348_v26 = vld [vmem:[#allocation45_spill] sm:$0xff] }
0x19da   : > { %v564_v2 = vadd.f32 %v548_v18, %v522_v43  ;;  %v565_v11 = vadd.f32 %v549_v9, %v523_v0  ;;  %v589_v15 = vrot.slane %v573_v36, 2  ;;  %7065 = vst [vmem:[#allocation1 + $0x3] ss:$4 sm:$0xff] %v6977_v41  ;;  %v566_v8 = vadd.f32 %v550_v59, %v524_v58  ;;  %v12351_v43 = vld [vmem:[#allocation22_spill] sm:$0xff]  ;;  %v12352_v9 = vld [vmem:[#allocation43_spill] sm:$0xff] }
0x19db   : > { %v590_v19 = vrot.slane %v574_v17, 2  ;;  %v591_v31 = vrot.slane %v575_v21, 2  ;;  %v592_v46 = vrot.slane %v576_v56, 2  ;;  %7067 = vst [vmem:[#allocation1 + $0x23] ss:$4 sm:$0xff] %v6978_v47  ;;  %v433_v25 = vmul.f32 %v12345_v62, %v11297_v12  ;;  %v12353_v21 = vld [vmem:[#allocation40_spill] sm:$0xff]  ;;  %v6896_v47 = vpop.permute.xlu0 %6895 }
0x19dc   : > { %v434_v24 = vmul.f32 %v12345_v62, %v12344_v32  ;;  %v1884_v61 = vsel %vm1883_vm7, %v12347_v35, %v12346_v20  ;;  %v1870_v53 = vsel %vm682_vm0, %v12349_v13, %v12348_v26  ;;  %v407_v6 = vadd.f32 %v391_v48, %v365_v28  ;;  %v6904_v26 = vpop.permute.xlu2 %6903 }
0x19dd   : > { %v417_v5 = vmul.f32 %v12343_v22, %v12350_v27  ;;  %v418_v34 = vmul.f32 %v12343_v22, %v12351_v43  ;;  %v408_v42 = vadd.f32 %v392_v10, %v366_v50  ;;  %v423_v0 = vadd.f32 %v415_v57, %v405_v1 }
0x19de   : > { %v424_v58 = vadd.f32 %v416_v55, %v406_v33  ;;  %v605_v45 = vadd.f32 %v589_v15, %v563_v63  ;;  %v606_v51 = vadd.f32 %v590_v19, %v564_v2  ;;  %v607_v14 = vadd.f32 %v591_v31, %v565_v11 }
0x19df   : > { %v608_v18 = vadd.f32 %v592_v46, %v566_v8  ;;  %v1887_v36 = vsel %vm1886_vm8, %v1884_v61, %v12352_v9  ;;  %v449_v59 = vrot.slane %v433_v25, 1  ;;  %v450_v17 = vrot.slane %v434_v24, 1 }
0x19e0   : > { %v475_v48 = vmul.f32 %v11454_v60, %v11297_v12  ;;  %v476_v28 = vmul.f32 %v11454_v60, %v12344_v32  ;;  %v11772_v56 = vsel %vm1871_vm3, %v1870_v53, %v12353_v21  ;;  %v425_v44 = vadd.f32 %v417_v5, %v407_v6 }
0x19e1   : > { %v435_v50 = vmul.f32 %v12345_v62, %v12350_v27  ;;  %v436_v37 = vmul.f32 %v12345_v62, %v12351_v43  ;;  %v426_v10 = vadd.f32 %v418_v34, %v408_v42  ;;  %v616_v22 = vadd.f32 %v11726_v40, %v605_v45  ;;  %v7066_v5 = vld.sshfl [vmem:[#allocation1] sm:$0xff pattern:$0x73625140]  ;;  %v12354_v42 = vld [vmem:[#allocation20_spill] sm:$0xff] }
0x19e2   : > { %v1891_v57 = vrot.slane %v1887_v36, 2  ;;  %v1892_v41 = vrot.slane %v1887_v36, 4  ;;  %v617_v12 = vadd.f32 %v11726_v40, %v606_v51  ;;  %v618_v1 = vadd.f32 %v11726_v40, %v607_v14  ;;  %v7068_v34 = vld.sshfl [vmem:[#allocation1 + $0x20] sm:$0xff pattern:$0x73625140]  ;;  %v12356_v51 = vld [vmem:[#allocation80_spill] sm:$0xff] }
0x19e3   : > { %v619_v33 = vadd.f32 %v11726_v40, %v608_v18  ;;  %v1893_v55 = vrot.slane %v1887_v36, 6  ;;  %v465_v63 = vadd.f32 %v449_v59, %v423_v0  ;;  %v466_v2 = vadd.f32 %v450_v17, %v424_v58  ;;  %v12355_v58 = vld [vmem:[#allocation79_spill] sm:$0xff]  ;;  %v12359_v17 = vld [vmem:[#allocation26_spill] sm:$0xff] }
0x19e4   : > { %v491_v11 = vrot.slane %v475_v48, 2  ;;  %v492_v15 = vrot.slane %v476_v28, 2  ;;  %v451_v8 = vrot.slane %v435_v50, 1  ;;  %v452_v19 = vrot.slane %v436_v37, 1  ;;  %v12357_v18 = vld [vmem:[#allocation119_spill] sm:$0xff]  ;;  %v12361_v50 = vld [vmem:[#allocation17_spill] sm:$0xff] }
0x19e5   : > { %v477_v31 = vmul.f32 %v11454_v60, %v12350_v27  ;;  %v478_v46 = vmul.f32 %v11454_v60, %v12351_v43  ;;  %v517_v62 = vmul.f32 %v11663_v52, %v12344_v32  ;;  %v518_v25 = vmul.f32 %v11663_v52, %v12350_v27  ;;  %v12360_v28 = vld [vmem:[#allocation15_spill] sm:$0xff] }
0x19e6   : > { %v1903_v24 = vadd.f32 %v1887_v36, %v616_v22  ;;  %v1904_v20 = vadd.f32 %v1891_v57, %v617_v12  ;;  %v1905_v35 = vadd.f32 %v1892_v41, %v618_v1  ;;  %v1906_v61 = vadd.f32 %v1893_v55, %v619_v33  ;;  %v12358_v36 = vld [vmem:[#allocation14_spill] sm:$0xff]  ;;  %v12362_v33 = vld [vmem:[#allocation81_spill] sm:$0xff] }
0x19e7   : > { %v507_v13 = vadd.f32 %v491_v11, %v465_v63  ;;  %v508_v53 = vadd.f32 %v492_v15, %v466_v2  ;;  %v535_v6 = vmul.f32 %v11685_v54, %v12344_v32  ;;  %v536_v60 = vmul.f32 %v11685_v54, %v12350_v27  ;;  %v6912_v63 = vpop.permute.xlu1 %6911 }
0x19e8   : > { %v7086_v0 = vsel %vm7085_vm9, %v1903_v24, %v12354_v42  ;;  %v7087_v45 = vsel %vm7085_vm9, %v1904_v20, %v12355_v58  ;;  %v7088_v14 = vsel %vm7085_vm9, %v1905_v35, %v12356_v51  ;;  %v7089_v9 = vsel %vm7085_vm9, %v1906_v61, %v12357_v18  ;;  %v12364_v20 = vld [vmem:[#allocation38_spill] sm:$0xff] }
0x19e9   : > { %v7095_v59 = vsel %vm7094_vm10, %v7086_v0, %v12358_v36  ;;  %v7096_v48 = vsel %vm7094_vm10, %v7087_v45, %v12359_v17  ;;  %v7097_v21 = vsel %vm7094_vm10, %v7088_v14, %v12360_v28  ;;  %v7098_v37 = vsel %vm7094_vm10, %v7089_v9, %v12361_v50 }
0x19ea   : > { %v7104_v22 = vsel %vm7103_vm11, %v7095_v59, %v11746_v38  ;;  %v7105_v57 = vsel %vm7103_vm11, %v7096_v48, %v11748_v3  ;;  %v7106_v41 = vsel %vm7103_vm11, %v7097_v21, %v7066_v5  ;;  %v467_v12 = vadd.f32 %v451_v8, %v425_v44  ;;  %v6920_v44 = vpop.permute.xlu0 %6919 }
0x19eb   : > { %v493_v1 = vrot.slane %v477_v31, 2  ;;  %v6948_v55 = vsel %vm682_vm0, %v12362_v33, %v6896_v47  ;;  %v7107_v2 = vsel %vm7103_vm11, %v7098_v37, %v7068_v34  ;;  %7112 = vst [vmem:[%s11819_s20] sm:$0xff] %v7104_v22  ;;  %v525_v38 = vadd.f32 %v517_v62, %v507_v13  ;;  %v12363_v47 = vld [vmem:[#allocation46_spill] sm:$0xff] }
0x19ec   : > { %v551_v11 = vrot.slane %v535_v6, 1  ;;  %v577_v3 = vmul.f32 %v11721_v29, %v12344_v32  ;;  %v6950_v15 = vsel %vm1871_vm3, %v6948_v55, %v6904_v26  ;;  %7113 = vst [vmem:[%s11819_s20 + $0x8] sm:$0xff] %v7105_v57  ;;  %v1876_v8 = vsel %vm1874_vm4, %v11772_v56, %v12363_v47 }
0x19ed   : > { %v468_v31 = vadd.f32 %v452_v19, %v426_v10  ;;  %v494_v24 = vrot.slane %v478_v46, 2  ;;  %7114 = vst [vmem:[%s11819_s20 + $0x10] sm:$0xff] %v7106_v41  ;;  %v1879_v35 = vsel %vm1877_vm5, %v1876_v8, %v12364_v20  ;;  %v526_v61 = vadd.f32 %v518_v25, %v508_v53  ;;  %v6928_v46 = vpop.permute.xlu2 %6927  ;;  %v12365_v53 = vld [vmem:[#allocation44_spill] sm:$0xff] }
0x19ee   : > { %v552_v62 = vrot.slane %v536_v60, 1  ;;  %v578_v13 = vmul.f32 %v11721_v29, %v12350_v27  ;;  %7115 = vst [vmem:[%s11819_s20 + $0x18] sm:$0xff] %v7107_v2  ;;  %v509_v32 = vadd.f32 %v493_v1, %v467_v12  ;;  %v519_v26 = vmul.f32 %v11663_v52, %v12351_v43  ;;  %v12367_v12 = vld [vmem:[#allocation48_spill] sm:$0xff] }
0x19ef   : > { %v537_v6 = vmul.f32 %v11685_v54, %v12351_v43  ;;  %v6952_v56 = vsel %vm1874_vm4, %v6950_v15, %v6912_v63  ;;  %v567_v10 = vadd.f32 %v551_v11, %v525_v38  ;;  %v593_v19 = vrot.slane %v577_v3, 2 }
0x19f0   : > { %v510_v5 = vadd.f32 %v494_v24, %v468_v31  ;;  %v520_v25 = vmul.f32 %v11663_v52, %v10203_v7  ;;  %v538_v27 = vmul.f32 %v11685_v54, %v10203_v7  ;;  %v1882_v60 = vsel %vm1880_vm6, %v1879_v35, %v12365_v53  ;;  %v12366_v54 = vld [vmem:[#allocation39_spill] sm:$0xff]  ;;  %v12368_v24 = vld [vmem:[#allocation122_spill] sm:$0xff] }
0x19f1   : > { %v568_v34 = vadd.f32 %v552_v62, %v526_v61  ;;  %v594_v42 = vrot.slane %v578_v13, 2  ;;  %v6954_v0 = vsel %vm1877_vm5, %v6952_v56, %v6920_v44  ;;  %v5645_v58 = vadd.f32 %v11726_v40, %v11669_v4  ;;  %v12369_v62 = vld [vmem:[#allocation16_spill] sm:$0xff] }
0x19f2   : > { %v527_v45 = vadd.f32 %v519_v26, %v509_v32  ;;  %v553_v51 = vrot.slane %v537_v6, 1  ;;  %v579_v14 = vmul.f32 %v11721_v29, %v12351_v43  ;;  %v6956_v52 = vsel %vm1880_vm6, %v6954_v0, %v6928_v46  ;;  %v6944_v59 = vpop.permute.xlu0 %6943  ;;  %v12373_v0 = vld [vmem:[#allocation21_spill] sm:$0xff] }
0x19f3   : > { %v609_v9 = vadd.f32 %v593_v19, %v567_v10  ;;  %v1885_v36 = vsel %vm1883_vm7, %v1882_v60, %v12366_v54  ;;  %v5646_v17 = vadd.f32 %v11726_v40, %v11673_v49  ;;  %v528_v28 = vadd.f32 %v520_v25, %v510_v5  ;;  %v12371_v10 = vld [vmem:[#allocation27_spill] sm:$0xff]  ;;  %v12372_v60 = vld [vmem:[#allocation125_spill] sm:$0xff] }
0x19f4   : > { %v554_v4 = vrot.slane %v538_v27, 1  ;;  %v580_v21 = vmul.f32 %v11721_v29, %v10203_v7  ;;  %v610_v50 = vadd.f32 %v594_v42, %v568_v34  ;;  %v569_v57 = vadd.f32 %v553_v51, %v527_v45 }
0x19f5   : > { %v595_v41 = vrot.slane %v579_v14, 2  ;;  %v1888_v1 = vsel %vm1886_vm8, %v1885_v36, %v12367_v12  ;;  %v620_v33 = vadd.f32 %v11726_v40, %v609_v9  ;;  %v5647_v29 = vadd.f32 %v11726_v40, %v11675_v39 }
0x19f6   : > { %v570_v55 = vadd.f32 %v554_v4, %v528_v28  ;;  %v596_v63 = vrot.slane %v580_v21, 2  ;;  %v621_v2 = vadd.f32 %v11726_v40, %v610_v50  ;;  %v1894_v7 = vrot.slane %v1888_v1, 2 }
0x19f7   : > { %v6936_v18 = vpop.permute.xlu1 %6935  ;;  %v611_v11 = vadd.f32 %v595_v41, %v569_v57  ;;  %v1907_v3 = vadd.f32 %v1888_v1, %v620_v33  ;;  %v5648_v44 = vadd.f32 %v11726_v40, %v11683_v23  ;;  %v1895_v13 = vrot.slane %v1888_v1, 4  ;;  %v12370_v23 = vld [vmem:[#allocation99_spill] sm:$0xff] }
0x19f8   : > { %v6958_v48 = vsel %vm1883_vm7, %v6956_v52, %v6936_v18  ;;  %v612_v47 = vadd.f32 %v596_v63, %v570_v55  ;;  %v1908_v8 = vadd.f32 %v1894_v7, %v621_v2  ;;  %v1896_v5 = vrot.slane %v1888_v1, 6 }
0x19f9   : > { %v6960_v43 = vsel %vm1886_vm8, %v6958_v48, %v6944_v59  ;;  %v7090_v20 = vsel %vm7085_vm9, %v1907_v3, %v12368_v24  ;;  %v622_v35 = vadd.f32 %v11726_v40, %v611_v11 }
0x19fa   : > { %v6966_v37 = vrot.slane %v6960_v43, 2  ;;  %v6979_v22 = vadd.f32 %v6960_v43, %v5645_v58  ;;  %v6967_v38 = vrot.slane %v6960_v43, 4  ;;  %v6968_v15 = vrot.slane %v6960_v43, 6 }
0x19fb   : > { %v7099_v39 = vsel %vm7094_vm10, %v7090_v20, %v12369_v62  ;;  %v7091_v26 = vsel %vm7085_vm9, %v1908_v8, %v12370_v23  ;;  %v623_v46 = vadd.f32 %v11726_v40, %v612_v47  ;;  %v1909_v27 = vadd.f32 %v1895_v13, %v622_v35 }
0x19fc   : > { %v6980_v49 = vadd.f32 %v6966_v37, %v5646_v17  ;;  %7069 = vst [vmem:[#allocation1 + $0x3] ss:$4 sm:$0xff] %v6979_v22  ;;  %v6981_v31 = vadd.f32 %v6967_v38, %v5647_v29  ;;  %v6982_v32 = vadd.f32 %v6968_v15, %v5648_v44  ;;  %v7100_v19 = vsel %vm7094_vm10, %v7091_v26, %v12371_v10 }
0x19fd   : > { %v1910_v53 = vadd.f32 %v1896_v5, %v623_v46  ;;  %v7092_v34 = vsel %vm7085_vm9, %v1909_v27, %v12372_v60 }
0x19fe   : > { %7071 = vst [vmem:[#allocation1 + $0x23] ss:$4 sm:$0xff] %v6980_v49  ;;  %v7101_v42 = vsel %vm7094_vm10, %v7092_v34, %v11576_v16 }
0x19ff   : > { %v7093_v58 = vsel %vm7085_vm9, %v1910_v53, %v12373_v0 }
0x1a00   : > { %v7102_v14 = vsel %vm7094_vm10, %v7093_v58, %v11591_v30 }
0x1a03   : > { %v7070_v61 = vld.sshfl [vmem:[#allocation1] sm:$0xff pattern:$0x73625140] }
0x1a04   : > { %7073 = vst [vmem:[#allocation1 + $0x3] ss:$4 sm:$0xff] %v6981_v31  ;;  %v7108_v6 = vsel %vm7103_vm11, %v7099_v39, %v7070_v61 }
0x1a05   : > { %v7072_v56 = vld.sshfl [vmem:[#allocation1 + $0x20] sm:$0xff pattern:$0x73625140]  ;;  %7116 = vst [vmem:[%s11819_s20 + $0x20] sm:$0xff] %v7108_v6 }
0x1a06   : > { %7075 = vst [vmem:[#allocation1 + $0x23] ss:$4 sm:$0xff] %v6982_v32  ;;  %v7109_v25 = vsel %vm7103_vm11, %v7100_v19, %v7072_v56 }
0x1a07   : > { %7117 = vst [vmem:[%s11819_s20 + $0x28] sm:$0xff] %v7109_v25 }
0x1a0b   : > { %v7074_v40 = vld.sshfl [vmem:[#allocation1] sm:$0xff pattern:$0x73625140] }
0x1a0c   : > { %v7110_v45 = vsel %vm7103_vm11, %v7101_v42, %v7074_v40 }
0x1a0d   : > { %v7076_v51 = vld.sshfl [vmem:[#allocation1 + $0x20] sm:$0xff pattern:$0x73625140]  ;;  %7118 = vst [vmem:[%s11819_s20 + $0x30] sm:$0xff] %v7110_v45 }
0x1a0e   : > { %v7111_v52 = vsel %vm7103_vm11, %v7102_v14, %v7076_v51 }
0x1a0f   : > { %7119 = vst [vmem:[%s11819_s20 + $0x38] sm:$0xff] %v7111_v52 }
0x1a10   : > { %8039 = shalt.err (!%p8036_p9)
}
0x1a11   : > { %s8100_s17 = smov 128   ;;  %s8101_s9 = smov 8  }
0x1a12   : > { %7484 = dma.vmem_to_hbm [thread:$0]  (%p8174_p11), %s7134_s23, 1024, %s7136_s26, %s7121_s7, %s8100_s17, %s8100_s17, %s8101_s9  }
0x1a13 PF: > { %p7496_p10 = scmp.ge.s32.totalorder %s8082_s15, 2  ;;  %s7150_s10 = sand.u32 1, %s8070_s12  }
0x1a14   : > { %s7151_s11 = scalar_lea.sflag [#allocation4], %s7150_s10 }
0x1a15   : > { %p7491_p13 = pnand %p7496_p10, %p8178_p12 }
0x1a17   : > { %p7492_p1 = pneg %p7491_p13 }
0x1a19   : > { %8065 = dma.done.wait (%p7492_p1), %s7151_s11, 1024  }
0x1a1a   : > { %8067 = vsyncadd (%p7492_p1), %s7151_s11, 4294966272  ;;  %p17_p0 = scmp.ge.s32.totalorder %s8147_s18, 6   ;;  %s12374_s12 = smov %s8074_s13 }
0x1a1b   : > { %s12375_s13 = smov %s8078_s14  ;;  %s12376_s14 = smov %s8159_s21 }
0x1a1c   : > { %s12377_s15 = smov %s8147_s18  ;;  %19 = sbr.rel (!%p17_p0) target bundleno = 6 (0x6), region = 784 }
0x1a21   :  { %7157 = vsyncpa [#allocation3], 1 }
0x1a22   :  { %7159 = vsyncpa [#allocation3 + $0x1], 1 }
0x1a23   :  { %7160 = vsyncpa [#allocation6], 1 }
0x1a24   :  { %7161 = vsyncpa [#allocation4], 1 }
0x1a25   :  { %7163 = vsyncpa [#allocation4 + $0x1], 1 }

</bundles_post_ra>
